<compile_context>
chip_gen: v7x
topology: tpu7x:2x2x1
jax: 0.10.0
libtpu: 0.0.40
codegen_flags: <defaults>
</compile_context>

<pallas_src>
import functools
import numpy as np
import jax
import jax.numpy as jnp
from jax.experimental import pallas as pl
from jax.experimental.pallas import tpu as pltpu

_SQRT_2_OVER_PI = 0.7978845608028654


# ----------------------------- in-kernel math ------------------------------

def _gelu(x):
    # tanh-approx GELU (|err| ~1e-3, well under the bf16-matmul noise and the
    # test tolerance); torch.nn.GELU() default is the exact erf form.
    return 0.5 * x * (1.0 + jnp.tanh(_SQRT_2_OVER_PI * (x + 0.044715 * x * x * x)))


def _conv3x3_cf(h, wstack_ref, st_ref, b_ref, rows):
    """Channel-first 3x3 'same' conv (optionally with bilinear x2 upsample folded
    into the taps) followed by GELU.

    h:          (TB*Cin, HW_in)        f32 activations, rows = (batch, channel)
    wstack_ref: (9*TB*Cout, TB*Cin)    bf16 tap-major row blocks of kron(I_TB, W_k)
    st_ref:     (9, HW_in, HW_out)     bf16 transposed (shift [@ upsample]) taps
    b_ref:      (TB*Cout, 1)           f32 bias column
    rows:       TB*Cout                rows per tap block in the channel matmul result
    """
    hb = h.astype(jnp.bfloat16)
    # One fused channel-mix matmul for all 9 taps (at the *input* resolution).
    g = jnp.dot(wstack_ref[...], hb, preferred_element_type=jnp.float32)   # (9*rows, HW_in)
    acc = None
    for k in range(9):
        gk = g[k * rows:(k + 1) * rows, :].astype(jnp.bfloat16)            # (rows, HW_in)
        part = jnp.dot(gk, st_ref[k], preferred_element_type=jnp.float32)  # (rows, HW_out)
        acc = part if acc is None else acc + part
    return _gelu(acc + b_ref[...])


def decoder_kernel(x_ref,
                   e1_ref, b1_ref, w2_ref, b2_ref,
                   w3_ref, st3_ref, b3_ref,
                   w4_ref, st4_ref, b4_ref,
                   w5_ref, st5_ref, b5_ref,
                   w6_ref, st6_ref, b6_ref,
                   w7_ref, st7_ref, b7_ref,
                   w8_ref, st8_ref, b8_ref,
                   out_ref, *, tb, group):
    c = tb * 16
    for gidx in range(group):                       # static unroll over sub-tiles
        r0 = gidx * tb
        x = x_ref[r0:r0 + tb, :].astype(jnp.bfloat16)          # (tb, 4) rows=batch
        # Conv2d(1,16,k=1)+GELU and Conv2d(16,16,k=1)+GELU (batch folded block-diag)
        h = _gelu(jnp.dot(e1_ref[...], x,
                          preferred_element_type=jnp.float32) + b1_ref[...])
        h = _gelu(jnp.dot(w2_ref[...], h.astype(jnp.bfloat16),
                          preferred_element_type=jnp.float32) + b2_ref[...])
        # Upsample(2->4) folded into conv3; conv3, conv4 @ 4x4
        h = _conv3x3_cf(h, w3_ref, st3_ref, b3_ref, c)
        h = _conv3x3_cf(h, w4_ref, st4_ref, b4_ref, c)
        # Upsample(4->8) folded into conv5; conv5, conv6 @ 8x8
        h = _conv3x3_cf(h, w5_ref, st5_ref, b5_ref, c)
        h = _conv3x3_cf(h, w6_ref, st6_ref, b6_ref, c)
        # Upsample(8->16) folded into conv7; conv7, conv8(16->1) @ 16x16
        h = _conv3x3_cf(h, w7_ref, st7_ref, b7_ref, c)
        h = _conv3x3_cf(h, w8_ref, st8_ref, b8_ref, tb)        # (tb, 256)
        out_ref[r0:r0 + tb, :] = h


# ------------------------------ host-side glue ------------------------------

def shift_mats(H, W):
    """(9, HW, HW) matrices implementing the 9 taps of a zero-padded 3x3 'same' conv."""
    S = np.zeros((9, H * W, H * W), np.float32)
    for dy in range(3):
        for dx in range(3):
            k = dy * 3 + dx
            for h in range(H):
                for w in range(W):
                    hh, ww = h + dy - 1, w + dx - 1
                    if 0 <= hh < H and 0 <= ww < W:
                        S[k, h * W + w, hh * W + ww] = 1.0
    return S


def upsample_mat(n_in):
    """Flattened-spatial bilinear x2 upsampling matrix, align_corners=True
    (matches nn.UpsamplingBilinear2d)."""
    n_out = 2 * n_in
    U = np.zeros((n_out, n_in), np.float64)
    for i in range(n_out):
        src = i * (n_in - 1) / (n_out - 1)
        j0 = int(np.floor(src))
        frac = src - j0
        if j0 + 1 < n_in:
            U[i, j0] += 1.0 - frac
            U[i, j0 + 1] += frac
        else:
            U[i, j0] += 1.0
    return np.kron(U, U).astype(np.float32)       # (H'*W', H*W)


def init_params(key):
    """Raw conv weights in PyTorch layout: tuple of 8 (w, b) pairs."""
    def conv_init(k, cout, cin, kh, kw):
        kw_, kb_ = jax.random.split(k)
        fan_in = cin * kh * kw
        bound = 1.0 / float(np.sqrt(fan_in))
        w = jax.random.uniform(kw_, (cout, cin, kh, kw), jnp.float32, -bound, bound)
        b = jax.random.uniform(kb_, (cout,), jnp.float32, -bound, bound)
        return w, b

    ks = jax.random.split(key, 8)
    shapes = [(16, 1, 1, 1), (16, 16, 1, 1)] + [(16, 16, 3, 3)] * 5 + [(1, 16, 3, 3)]
    return tuple(conv_init(ks[i], *shapes[i]) for i in range(8))


def pack_params(raw, tb):
    """Build kernel constants for batch tile `tb` (keep tb=8: kron K-inflation
    scales with tb).  Channel weights are tap-major ROW-stacked kron(I_tb, W_k)
    (channel-first convs); tap tables are transposed, with the bilinear x2
    upsample pre-folded into the first conv of each resolution."""
    raw_np = [(np.asarray(w, np.float32), np.asarray(b, np.float32)) for (w, b) in raw]
    (w1, b1), (w2, b2), (w3, b3), (w4, b4), (w5, b5), (w6, b6), (w7, b7), (w8, b8) = raw_np

    eye = np.eye(tb, dtype=np.float32)

    def kron_eye(m):                      # (r, c) -> (tb*r, tb*c) block-diagonal
        return np.kron(eye, m)

    def wstack(w):                        # (Cout,Cin,3,3) -> (9*tb*Cout, tb*Cin)
        return np.concatenate(
            [kron_eye(w[:, :, ky, kx]) for ky in range(3) for kx in range(3)], axis=0)

    def bcol(b):                          # (Cout,) -> (tb*Cout, 1)
        return np.tile(b, tb).reshape(-1, 1)

    def stt(s):                           # transpose each tap: (9,HWo,HWi) -> (9,HWi,HWo)
        return np.ascontiguousarray(np.transpose(s, (0, 2, 1)))

    s4, s8, s16 = shift_mats(4, 4), shift_mats(8, 8), shift_mats(16, 16)
    su4 = np.einsum("kpq,qr->kpr", s4, upsample_mat(2))       # (9, 16, 4)
    su8 = np.einsum("kpq,qr->kpr", s8, upsample_mat(4))       # (9, 64, 16)
    su16 = np.einsum("kpq,qr->kpr", s16, upsample_mat(8))     # (9, 256, 64)

    bf, f32 = jnp.bfloat16, jnp.float32
    return (
        jnp.asarray(kron_eye(w1[:, :, 0, 0]), bf), jnp.asarray(bcol(b1), f32),
        jnp.asarray(kron_eye(w2[:, :, 0, 0]), bf), jnp.asarray(bcol(b2), f32),
        jnp.asarray(wstack(w3), bf), jnp.asarray(stt(su4), bf),  jnp.asarray(bcol(b3), f32),
        jnp.asarray(wstack(w4), bf), jnp.asarray(stt(s4), bf),   jnp.asarray(bcol(b4), f32),
        jnp.asarray(wstack(w5), bf), jnp.asarray(stt(su8), bf),  jnp.asarray(bcol(b5), f32),
        jnp.asarray(wstack(w6), bf), jnp.asarray(stt(s8), bf),   jnp.asarray(bcol(b6), f32),
        jnp.asarray(wstack(w7), bf), jnp.asarray(stt(su16), bf), jnp.asarray(bcol(b7), f32),
        jnp.asarray(wstack(w8), bf), jnp.asarray(stt(s16), bf),  jnp.asarray(bcol(b8), f32),
    )


def cnn_decoder_forward(x, packed, *, batch_tile=8, group_size=4):
    """x: (B, 4) float32 -> (B, 1, 16, 16) float32 (NCHW, like the PyTorch module).
    `packed` must come from pack_params(raw, tb=batch_tile).  Keep batch_tile=8 on
    all chips (kron K-inflation grows with it); grid steps are coarsened by
    `group_size` sub-tiles instead, and the batch is padded so the parallel grid
    axis has >= 2 steps (both v7x TensorCores)."""
    B = x.shape[0]
    tb = batch_tile
    n_tiles = max(2, pl.cdiv(B, tb))                  # >= 2 grid steps for v7x megacore
    group = max(1, min(group_size, n_tiles // 2))
    n_tiles = ((n_tiles + group - 1) // group) * group
    pb = n_tiles * tb
    x_pad = jnp.zeros((pb, 4), jnp.float32).at[:B].set(x.astype(jnp.float32))

    def const_spec(a):
        nd = a.ndim
        return pl.BlockSpec(a.shape, lambda i, nd=nd: (0,) * nd)

    in_specs = [pl.BlockSpec((group * tb, 4), lambda i: (i, 0))]
    in_specs += [const_spec(a) for a in packed]

    out = pl.pallas_call(
        functools.partial(decoder_kernel, tb=tb, group=group),
        out_shape=jax.ShapeDtypeStruct((pb, 256), jnp.float32),
        grid_spec=pltpu.PrefetchScalarGridSpec(
            num_scalar_prefetch=0,
            grid=(n_tiles // group,),
            in_specs=in_specs,
            out_specs=pl.BlockSpec((group * tb, 256), lambda i: (i, 0)),
        ),
        compiler_params=pltpu.CompilerParams(
            dimension_semantics=("parallel",),
            vmem_limit_bytes=32 * 1024 * 1024,
        ),
    )(x_pad, *packed)

    return out[:B].reshape(B, 1, 16, 16)


# ------------------------------ pure-JAX reference ------------------------------

def reference_forward(x, raw):
    """Straight f32 reference (exact GELU, no batching / kron / bf16)."""
    (w1, b1), (w2, b2), (w3, b3), (w4, b4), (w5, b5), (w6, b6), (w7, b7), (w8, b8) = raw
    s4, s8, s16 = map(jnp.asarray, (shift_mats(4, 4), shift_mats(8, 8), shift_mats(16, 16)))
    u1, u2, u3 = map(jnp.asarray, (upsample_mat(2), upsample_mat(4), upsample_mat(8)))
    g = lambda v: jax.nn.gelu(v, approximate=False)

    def conv3(h, w, b, s):                 # h: (HW, Cin) -> (HW, Cout)
        acc = jnp.zeros((h.shape[0], w.shape[0]), jnp.float32)
        for ky in range(3):
            for kx in range(3):
                acc = acc + (s[ky * 3 + kx] @ h) @ w[:, :, ky, kx].T
        return acc + b

    def single(xb):
        h = xb.reshape(4, 1)
        h = g(h @ w1[:, :, 0, 0].T + b1)
        h = g(h @ w2[:, :, 0, 0].T + b2)
        h = u1 @ h
        h = g(conv3(h, w3, b3, s4)); h = g(conv3(h, w4, b4, s4))
        h = u2 @ h
        h = g(conv3(h, w5, b5, s8)); h = g(conv3(h, w6, b6, s8))
        h = u3 @ h
        h = g(conv3(h, w7, b7, s16)); h = g(conv3(h, w8, b8, s16))
        return h.reshape(16, 16)

    return jax.vmap(single)(x.astype(jnp.float32))[:, None, :, :]


if __name__ == "__main__":
    key = jax.random.PRNGKey(0)
    kx, kp = jax.random.split(key)
    B = 2
    TB = 8                     # batch tile (keep 8; see pack_params docstring)
    x = jax.random.normal(kx, (B, 4), jnp.float32)
    raw = init_params(kp)
    packed = pack_params(raw, TB)

    y = cnn_decoder_forward(x, packed, batch_tile=TB)
    y = jax.block_until_ready(y)

    assert y.shape == (B, 1, 16, 16), y.shape
    assert bool(jnp.all(jnp.isfinite(y)))

    # sanity check vs exact-GELU f32 reference (kernel: bf16 matmuls + tanh GELU)
    y_ref = jax.block_until_ready(reference_forward(x, raw))
    max_err = float(jnp.max(jnp.abs(y - y_ref)))
    assert max_err < 5e-2, max_err

    print("KERNEL_OK")
</pallas_src>

<mosaic_0001>
module attributes {stable_mosaic.version = 11 : i64} {
  func.func @decoder_kernel(%arg0: i32, %arg1: memref<8x4xf32, #tpu.memory_space<vmem>>, %arg2: memref<128x8xbf16, #tpu.memory_space<vmem>>, %arg3: memref<128x1xf32, #tpu.memory_space<vmem>>, %arg4: memref<128x128xbf16, #tpu.memory_space<vmem>>, %arg5: memref<128x1xf32, #tpu.memory_space<vmem>>, %arg6: memref<1152x128xbf16, #tpu.memory_space<vmem>>, %arg7: memref<9x4x16xbf16, #tpu.memory_space<vmem>>, %arg8: memref<128x1xf32, #tpu.memory_space<vmem>>, %arg9: memref<1152x128xbf16, #tpu.memory_space<vmem>>, %arg10: memref<9x16x16xbf16, #tpu.memory_space<vmem>>, %arg11: memref<128x1xf32, #tpu.memory_space<vmem>>, %arg12: memref<1152x128xbf16, #tpu.memory_space<vmem>>, %arg13: memref<9x16x64xbf16, #tpu.memory_space<vmem>>, %arg14: memref<128x1xf32, #tpu.memory_space<vmem>>, %arg15: memref<1152x128xbf16, #tpu.memory_space<vmem>>, %arg16: memref<9x64x64xbf16, #tpu.memory_space<vmem>>, %arg17: memref<128x1xf32, #tpu.memory_space<vmem>>, %arg18: memref<1152x128xbf16, #tpu.memory_space<vmem>>, %arg19: memref<9x64x256xbf16, #tpu.memory_space<vmem>>, %arg20: memref<128x1xf32, #tpu.memory_space<vmem>>, %arg21: memref<72x128xbf16, #tpu.memory_space<vmem>>, %arg22: memref<9x256x256xbf16, #tpu.memory_space<vmem>>, %arg23: memref<8x1xf32, #tpu.memory_space<vmem>>, %arg24: memref<8x256xf32, #tpu.memory_space<vmem>>) attributes {dimension_semantics = [#tpu.dimension_semantics<parallel>], iteration_bounds = array<i64: 2>, scalar_prefetch = 0 : i64, scratch_operands = 0 : i64, tpu.core_type = #tpu.core_type<tc>, window_params = [{transform_indices = @transform_0, window_bounds = array<i64: 8, 4>}, {pipeline_mode = #tpu.pipeline_mode<synchronous>, transform_indices = @transform_1, window_bounds = array<i64: 128, 8>}, {pipeline_mode = #tpu.pipeline_mode<synchronous>, transform_indices = @transform_2, window_bounds = array<i64: 128, 1>}, {pipeline_mode = #tpu.pipeline_mode<synchronous>, transform_indices = @transform_3, window_bounds = array<i64: 128, 128>}, {pipeline_mode = #tpu.pipeline_mode<synchronous>, transform_indices = @transform_4, window_bounds = array<i64: 128, 1>}, {pipeline_mode = #tpu.pipeline_mode<synchronous>, transform_indices = @transform_5, window_bounds = array<i64: 1152, 128>}, {pipeline_mode = #tpu.pipeline_mode<synchronous>, transform_indices = @transform_6, window_bounds = array<i64: 9, 4, 16>}, {pipeline_mode = #tpu.pipeline_mode<synchronous>, transform_indices = @transform_7, window_bounds = array<i64: 128, 1>}, {pipeline_mode = #tpu.pipeline_mode<synchronous>, transform_indices = @transform_8, window_bounds = array<i64: 1152, 128>}, {pipeline_mode = #tpu.pipeline_mode<synchronous>, transform_indices = @transform_9, window_bounds = array<i64: 9, 16, 16>}, {pipeline_mode = #tpu.pipeline_mode<synchronous>, transform_indices = @transform_10, window_bounds = array<i64: 128, 1>}, {pipeline_mode = #tpu.pipeline_mode<synchronous>, transform_indices = @transform_11, window_bounds = array<i64: 1152, 128>}, {pipeline_mode = #tpu.pipeline_mode<synchronous>, transform_indices = @transform_12, window_bounds = array<i64: 9, 16, 64>}, {pipeline_mode = #tpu.pipeline_mode<synchronous>, transform_indices = @transform_13, window_bounds = array<i64: 128, 1>}, {pipeline_mode = #tpu.pipeline_mode<synchronous>, transform_indices = @transform_14, window_bounds = array<i64: 1152, 128>}, {pipeline_mode = #tpu.pipeline_mode<synchronous>, transform_indices = @transform_15, window_bounds = array<i64: 9, 64, 64>}, {pipeline_mode = #tpu.pipeline_mode<synchronous>, transform_indices = @transform_16, window_bounds = array<i64: 128, 1>}, {pipeline_mode = #tpu.pipeline_mode<synchronous>, transform_indices = @transform_17, window_bounds = array<i64: 1152, 128>}, {pipeline_mode = #tpu.pipeline_mode<synchronous>, transform_indices = @transform_18, window_bounds = array<i64: 9, 64, 256>}, {pipeline_mode = #tpu.pipeline_mode<synchronous>, transform_indices = @transform_19, window_bounds = array<i64: 128, 1>}, {pipeline_mode = #tpu.pipeline_mode<synchronous>, transform_indices = @transform_20, window_bounds = array<i64: 72, 128>}, {pipeline_mode = #tpu.pipeline_mode<synchronous>, transform_indices = @transform_21, window_bounds = array<i64: 9, 256, 256>}, {pipeline_mode = #tpu.pipeline_mode<synchronous>, transform_indices = @transform_22, window_bounds = array<i64: 8, 1>}, {transform_indices = @transform_23, window_bounds = array<i64: 8, 256>}]} {
    %c0 = arith.constant 0 : index
    %c0_0 = arith.constant 0 : index
    %0 = vector.load %arg1[%c0, %c0_0] : memref<8x4xf32, #tpu.memory_space<vmem>>, vector<8x4xf32>
    %1 = arith.truncf %0 : vector<8x4xf32> to vector<8x4xbf16>
    %c0_1 = arith.constant 0 : index
    %c0_2 = arith.constant 0 : index
    %2 = vector.load %arg2[%c0_1, %c0_2] : memref<128x8xbf16, #tpu.memory_space<vmem>>, vector<128x8xbf16>
    %cst = arith.constant dense<0.000000e+00> : vector<128x4xf32>
    %3 = tpu.matmul %2, %1, %cst {dimension_numbers = #tpu.dot_dimension_numbers<[1], [0], [0], [1], [0, 0, 1, 1], [], []>} : vector<128x8xbf16>, vector<8x4xbf16>, vector<128x4xf32> -> vector<128x4xf32>
    %c0_3 = arith.constant 0 : index
    %c0_4 = arith.constant 0 : index
    %4 = vector.load %arg3[%c0_3, %c0_4] : memref<128x1xf32, #tpu.memory_space<vmem>>, vector<128x1xf32>
    %5 = vector.broadcast %4 : vector<128x1xf32> to vector<128x4xf32>
    %6 = arith.addf %3, %5 : vector<128x4xf32>
    %cst_5 = arith.constant 5.000000e-01 : f32
    %7 = vector.broadcast %cst_5 : f32 to vector<128x4xf32>
    %8 = arith.mulf %7, %6 : vector<128x4xf32>
    %cst_6 = arith.constant 4.471500e-02 : f32
    %9 = vector.broadcast %cst_6 : f32 to vector<128x4xf32>
    %10 = arith.mulf %9, %6 : vector<128x4xf32>
    %11 = arith.mulf %10, %6 : vector<128x4xf32>
    %12 = arith.mulf %11, %6 : vector<128x4xf32>
    %13 = arith.addf %6, %12 : vector<128x4xf32>
    %cst_7 = arith.constant 0.797884583 : f32
    %14 = vector.broadcast %cst_7 : f32 to vector<128x4xf32>
    %15 = arith.mulf %14, %13 : vector<128x4xf32>
    %16 = math.tanh %15 : vector<128x4xf32>
    %cst_8 = arith.constant 1.000000e+00 : f32
    %17 = vector.broadcast %cst_8 : f32 to vector<128x4xf32>
    %18 = arith.addf %17, %16 : vector<128x4xf32>
    %19 = arith.mulf %8, %18 : vector<128x4xf32>
    %c0_9 = arith.constant 0 : index
    %c0_10 = arith.constant 0 : index
    %20 = vector.load %arg4[%c0_9, %c0_10] : memref<128x128xbf16, #tpu.memory_space<vmem>>, vector<128x128xbf16>
    %21 = arith.truncf %19 : vector<128x4xf32> to vector<128x4xbf16>
    %cst_11 = arith.constant dense<0.000000e+00> : vector<128x4xf32>
    %22 = tpu.matmul %20, %21, %cst_11 {dimension_numbers = #tpu.dot_dimension_numbers<[1], [0], [0], [1], [0, 0, 1, 1], [], []>} : vector<128x128xbf16>, vector<128x4xbf16>, vector<128x4xf32> -> vector<128x4xf32>
    %c0_12 = arith.constant 0 : index
    %c0_13 = arith.constant 0 : index
    %23 = vector.load %arg5[%c0_12, %c0_13] : memref<128x1xf32, #tpu.memory_space<vmem>>, vector<128x1xf32>
    %24 = vector.broadcast %23 : vector<128x1xf32> to vector<128x4xf32>
    %25 = arith.addf %22, %24 : vector<128x4xf32>
    %cst_14 = arith.constant 5.000000e-01 : f32
    %26 = vector.broadcast %cst_14 : f32 to vector<128x4xf32>
    %27 = arith.mulf %26, %25 : vector<128x4xf32>
    %cst_15 = arith.constant 4.471500e-02 : f32
    %28 = vector.broadcast %cst_15 : f32 to vector<128x4xf32>
    %29 = arith.mulf %28, %25 : vector<128x4xf32>
    %30 = arith.mulf %29, %25 : vector<128x4xf32>
    %31 = arith.mulf %30, %25 : vector<128x4xf32>
    %32 = arith.addf %25, %31 : vector<128x4xf32>
    %cst_16 = arith.constant 0.797884583 : f32
    %33 = vector.broadcast %cst_16 : f32 to vector<128x4xf32>
    %34 = arith.mulf %33, %32 : vector<128x4xf32>
    %35 = math.tanh %34 : vector<128x4xf32>
    %cst_17 = arith.constant 1.000000e+00 : f32
    %36 = vector.broadcast %cst_17 : f32 to vector<128x4xf32>
    %37 = arith.addf %36, %35 : vector<128x4xf32>
    %38 = arith.mulf %27, %37 : vector<128x4xf32>
    %39 = arith.truncf %38 : vector<128x4xf32> to vector<128x4xbf16>
    %c0_18 = arith.constant 0 : index
    %c0_19 = arith.constant 0 : index
    %40 = vector.load %arg6[%c0_18, %c0_19] : memref<1152x128xbf16, #tpu.memory_space<vmem>>, vector<1152x128xbf16>
    %cst_20 = arith.constant dense<0.000000e+00> : vector<1152x4xf32>
    %41 = tpu.matmul %40, %39, %cst_20 {dimension_numbers = #tpu.dot_dimension_numbers<[1], [0], [0], [1], [0, 0, 1, 1], [], []>} : vector<1152x128xbf16>, vector<128x4xbf16>, vector<1152x4xf32> -> vector<1152x4xf32>
    %42 = vector.extract_strided_slice %41 {offsets = [0, 0], sizes = [128, 4], strides = [1, 1]} : vector<1152x4xf32> to vector<128x4xf32>
    %43 = arith.truncf %42 : vector<128x4xf32> to vector<128x4xbf16>
    %c0_21 = arith.constant 0 : index
    %c0_22 = arith.constant 0 : index
    %c0_23 = arith.constant 0 : index
    %44 = vector.load %arg7[%c0_21, %c0_22, %c0_23] : memref<9x4x16xbf16, #tpu.memory_space<vmem>>, vector<1x4x16xbf16>
    %45 = vector.shape_cast %44 : vector<1x4x16xbf16> to vector<4x16xbf16>
    %cst_24 = arith.constant dense<0.000000e+00> : vector<128x16xf32>
    %46 = tpu.matmul %43, %45, %cst_24 {dimension_numbers = #tpu.dot_dimension_numbers<[1], [0], [0], [1], [0, 0, 1, 1], [], []>} : vector<128x4xbf16>, vector<4x16xbf16>, vector<128x16xf32> -> vector<128x16xf32>
    %47 = vector.extract_strided_slice %41 {offsets = [128, 0], sizes = [128, 4], strides = [1, 1]} : vector<1152x4xf32> to vector<128x4xf32>
    %48 = arith.truncf %47 : vector<128x4xf32> to vector<128x4xbf16>
    %c1 = arith.constant 1 : index
    %c0_25 = arith.constant 0 : index
    %c0_26 = arith.constant 0 : index
    %49 = vector.load %arg7[%c1, %c0_25, %c0_26] : memref<9x4x16xbf16, #tpu.memory_space<vmem>>, vector<1x4x16xbf16>
    %50 = vector.shape_cast %49 : vector<1x4x16xbf16> to vector<4x16xbf16>
    %cst_27 = arith.constant dense<0.000000e+00> : vector<128x16xf32>
    %51 = tpu.matmul %48, %50, %cst_27 {dimension_numbers = #tpu.dot_dimension_numbers<[1], [0], [0], [1], [0, 0, 1, 1], [], []>} : vector<128x4xbf16>, vector<4x16xbf16>, vector<128x16xf32> -> vector<128x16xf32>
    %52 = arith.addf %46, %51 : vector<128x16xf32>
    %53 = vector.extract_strided_slice %41 {offsets = [256, 0], sizes = [128, 4], strides = [1, 1]} : vector<1152x4xf32> to vector<128x4xf32>
    %54 = arith.truncf %53 : vector<128x4xf32> to vector<128x4xbf16>
    %c2 = arith.constant 2 : index
    %c0_28 = arith.constant 0 : index
    %c0_29 = arith.constant 0 : index
    %55 = vector.load %arg7[%c2, %c0_28, %c0_29] : memref<9x4x16xbf16, #tpu.memory_space<vmem>>, vector<1x4x16xbf16>
    %56 = vector.shape_cast %55 : vector<1x4x16xbf16> to vector<4x16xbf16>
    %cst_30 = arith.constant dense<0.000000e+00> : vector<128x16xf32>
    %57 = tpu.matmul %54, %56, %cst_30 {dimension_numbers = #tpu.dot_dimension_numbers<[1], [0], [0], [1], [0, 0, 1, 1], [], []>} : vector<128x4xbf16>, vector<4x16xbf16>, vector<128x16xf32> -> vector<128x16xf32>
    %58 = arith.addf %52, %57 : vector<128x16xf32>
    %59 = vector.extract_strided_slice %41 {offsets = [384, 0], sizes = [128, 4], strides = [1, 1]} : vector<1152x4xf32> to vector<128x4xf32>
    %60 = arith.truncf %59 : vector<128x4xf32> to vector<128x4xbf16>
    %c3 = arith.constant 3 : index
    %c0_31 = arith.constant 0 : index
    %c0_32 = arith.constant 0 : index
    %61 = vector.load %arg7[%c3, %c0_31, %c0_32] : memref<9x4x16xbf16, #tpu.memory_space<vmem>>, vector<1x4x16xbf16>
    %62 = vector.shape_cast %61 : vector<1x4x16xbf16> to vector<4x16xbf16>
    %cst_33 = arith.constant dense<0.000000e+00> : vector<128x16xf32>
    %63 = tpu.matmul %60, %62, %cst_33 {dimension_numbers = #tpu.dot_dimension_numbers<[1], [0], [0], [1], [0, 0, 1, 1], [], []>} : vector<128x4xbf16>, vector<4x16xbf16>, vector<128x16xf32> -> vector<128x16xf32>
    %64 = arith.addf %58, %63 : vector<128x16xf32>
    %65 = vector.extract_strided_slice %41 {offsets = [512, 0], sizes = [128, 4], strides = [1, 1]} : vector<1152x4xf32> to vector<128x4xf32>
    %66 = arith.truncf %65 : vector<128x4xf32> to vector<128x4xbf16>
    %c4 = arith.constant 4 : index
    %c0_34 = arith.constant 0 : index
    %c0_35 = arith.constant 0 : index
    %67 = vector.load %arg7[%c4, %c0_34, %c0_35] : memref<9x4x16xbf16, #tpu.memory_space<vmem>>, vector<1x4x16xbf16>
    %68 = vector.shape_cast %67 : vector<1x4x16xbf16> to vector<4x16xbf16>
    %cst_36 = arith.constant dense<0.000000e+00> : vector<128x16xf32>
    %69 = tpu.matmul %66, %68, %cst_36 {dimension_numbers = #tpu.dot_dimension_numbers<[1], [0], [0], [1], [0, 0, 1, 1], [], []>} : vector<128x4xbf16>, vector<4x16xbf16>, vector<128x16xf32> -> vector<128x16xf32>
    %70 = arith.addf %64, %69 : vector<128x16xf32>
    %71 = vector.extract_strided_slice %41 {offsets = [640, 0], sizes = [128, 4], strides = [1, 1]} : vector<1152x4xf32> to vector<128x4xf32>
    %72 = arith.truncf %71 : vector<128x4xf32> to vector<128x4xbf16>
    %c5 = arith.constant 5 : index
    %c0_37 = arith.constant 0 : index
    %c0_38 = arith.constant 0 : index
    %73 = vector.load %arg7[%c5, %c0_37, %c0_38] : memref<9x4x16xbf16, #tpu.memory_space<vmem>>, vector<1x4x16xbf16>
    %74 = vector.shape_cast %73 : vector<1x4x16xbf16> to vector<4x16xbf16>
    %cst_39 = arith.constant dense<0.000000e+00> : vector<128x16xf32>
    %75 = tpu.matmul %72, %74, %cst_39 {dimension_numbers = #tpu.dot_dimension_numbers<[1], [0], [0], [1], [0, 0, 1, 1], [], []>} : vector<128x4xbf16>, vector<4x16xbf16>, vector<128x16xf32> -> vector<128x16xf32>
    %76 = arith.addf %70, %75 : vector<128x16xf32>
    %77 = vector.extract_strided_slice %41 {offsets = [768, 0], sizes = [128, 4], strides = [1, 1]} : vector<1152x4xf32> to vector<128x4xf32>
    %78 = arith.truncf %77 : vector<128x4xf32> to vector<128x4xbf16>
    %c6 = arith.constant 6 : index
    %c0_40 = arith.constant 0 : index
    %c0_41 = arith.constant 0 : index
    %79 = vector.load %arg7[%c6, %c0_40, %c0_41] : memref<9x4x16xbf16, #tpu.memory_space<vmem>>, vector<1x4x16xbf16>
    %80 = vector.shape_cast %79 : vector<1x4x16xbf16> to vector<4x16xbf16>
    %cst_42 = arith.constant dense<0.000000e+00> : vector<128x16xf32>
    %81 = tpu.matmul %78, %80, %cst_42 {dimension_numbers = #tpu.dot_dimension_numbers<[1], [0], [0], [1], [0, 0, 1, 1], [], []>} : vector<128x4xbf16>, vector<4x16xbf16>, vector<128x16xf32> -> vector<128x16xf32>
    %82 = arith.addf %76, %81 : vector<128x16xf32>
    %83 = vector.extract_strided_slice %41 {offsets = [896, 0], sizes = [128, 4], strides = [1, 1]} : vector<1152x4xf32> to vector<128x4xf32>
    %84 = arith.truncf %83 : vector<128x4xf32> to vector<128x4xbf16>
    %c7 = arith.constant 7 : index
    %c0_43 = arith.constant 0 : index
    %c0_44 = arith.constant 0 : index
    %85 = vector.load %arg7[%c7, %c0_43, %c0_44] : memref<9x4x16xbf16, #tpu.memory_space<vmem>>, vector<1x4x16xbf16>
    %86 = vector.shape_cast %85 : vector<1x4x16xbf16> to vector<4x16xbf16>
    %cst_45 = arith.constant dense<0.000000e+00> : vector<128x16xf32>
    %87 = tpu.matmul %84, %86, %cst_45 {dimension_numbers = #tpu.dot_dimension_numbers<[1], [0], [0], [1], [0, 0, 1, 1], [], []>} : vector<128x4xbf16>, vector<4x16xbf16>, vector<128x16xf32> -> vector<128x16xf32>
    %88 = arith.addf %82, %87 : vector<128x16xf32>
    %89 = vector.extract_strided_slice %41 {offsets = [1024, 0], sizes = [128, 4], strides = [1, 1]} : vector<1152x4xf32> to vector<128x4xf32>
    %90 = arith.truncf %89 : vector<128x4xf32> to vector<128x4xbf16>
    %c8 = arith.constant 8 : index
    %c0_46 = arith.constant 0 : index
    %c0_47 = arith.constant 0 : index
    %91 = vector.load %arg7[%c8, %c0_46, %c0_47] : memref<9x4x16xbf16, #tpu.memory_space<vmem>>, vector<1x4x16xbf16>
    %92 = vector.shape_cast %91 : vector<1x4x16xbf16> to vector<4x16xbf16>
    %cst_48 = arith.constant dense<0.000000e+00> : vector<128x16xf32>
    %93 = tpu.matmul %90, %92, %cst_48 {dimension_numbers = #tpu.dot_dimension_numbers<[1], [0], [0], [1], [0, 0, 1, 1], [], []>} : vector<128x4xbf16>, vector<4x16xbf16>, vector<128x16xf32> -> vector<128x16xf32>
    %94 = arith.addf %88, %93 : vector<128x16xf32>
    %c0_49 = arith.constant 0 : index
    %c0_50 = arith.constant 0 : index
    %95 = vector.load %arg8[%c0_49, %c0_50] : memref<128x1xf32, #tpu.memory_space<vmem>>, vector<128x1xf32>
    %96 = vector.broadcast %95 : vector<128x1xf32> to vector<128x16xf32>
    %97 = arith.addf %94, %96 : vector<128x16xf32>
    %cst_51 = arith.constant 5.000000e-01 : f32
    %98 = vector.broadcast %cst_51 : f32 to vector<128x16xf32>
    %99 = arith.mulf %98, %97 : vector<128x16xf32>
    %cst_52 = arith.constant 4.471500e-02 : f32
    %100 = vector.broadcast %cst_52 : f32 to vector<128x16xf32>
    %101 = arith.mulf %100, %97 : vector<128x16xf32>
    %102 = arith.mulf %101, %97 : vector<128x16xf32>
    %103 = arith.mulf %102, %97 : vector<128x16xf32>
    %104 = arith.addf %97, %103 : vector<128x16xf32>
    %cst_53 = arith.constant 0.797884583 : f32
    %105 = vector.broadcast %cst_53 : f32 to vector<128x16xf32>
    %106 = arith.mulf %105, %104 : vector<128x16xf32>
    %107 = math.tanh %106 : vector<128x16xf32>
    %cst_54 = arith.constant 1.000000e+00 : f32
    %108 = vector.broadcast %cst_54 : f32 to vector<128x16xf32>
    %109 = arith.addf %108, %107 : vector<128x16xf32>
    %110 = arith.mulf %99, %109 : vector<128x16xf32>
    %111 = arith.truncf %110 : vector<128x16xf32> to vector<128x16xbf16>
    %c0_55 = arith.constant 0 : index
    %c0_56 = arith.constant 0 : index
    %112 = vector.load %arg9[%c0_55, %c0_56] : memref<1152x128xbf16, #tpu.memory_space<vmem>>, vector<1152x128xbf16>
    %cst_57 = arith.constant dense<0.000000e+00> : vector<1152x16xf32>
    %113 = tpu.matmul %112, %111, %cst_57 {dimension_numbers = #tpu.dot_dimension_numbers<[1], [0], [0], [1], [0, 0, 1, 1], [], []>} : vector<1152x128xbf16>, vector<128x16xbf16>, vector<1152x16xf32> -> vector<1152x16xf32>
    %114 = vector.extract_strided_slice %113 {offsets = [0, 0], sizes = [128, 16], strides = [1, 1]} : vector<1152x16xf32> to vector<128x16xf32>
    %115 = arith.truncf %114 : vector<128x16xf32> to vector<128x16xbf16>
    %c0_58 = arith.constant 0 : index
    %c0_59 = arith.constant 0 : index
    %c0_60 = arith.constant 0 : index
    %116 = vector.load %arg10[%c0_58, %c0_59, %c0_60] : memref<9x16x16xbf16, #tpu.memory_space<vmem>>, vector<1x16x16xbf16>
    %117 = vector.shape_cast %116 : vector<1x16x16xbf16> to vector<16x16xbf16>
    %cst_61 = arith.constant dense<0.000000e+00> : vector<128x16xf32>
    %118 = tpu.matmul %115, %117, %cst_61 {dimension_numbers = #tpu.dot_dimension_numbers<[1], [0], [0], [1], [0, 0, 1, 1], [], []>} : vector<128x16xbf16>, vector<16x16xbf16>, vector<128x16xf32> -> vector<128x16xf32>
    %119 = vector.extract_strided_slice %113 {offsets = [128, 0], sizes = [128, 16], strides = [1, 1]} : vector<1152x16xf32> to vector<128x16xf32>
    %120 = arith.truncf %119 : vector<128x16xf32> to vector<128x16xbf16>
    %c1_62 = arith.constant 1 : index
    %c0_63 = arith.constant 0 : index
    %c0_64 = arith.constant 0 : index
    %121 = vector.load %arg10[%c1_62, %c0_63, %c0_64] : memref<9x16x16xbf16, #tpu.memory_space<vmem>>, vector<1x16x16xbf16>
    %122 = vector.shape_cast %121 : vector<1x16x16xbf16> to vector<16x16xbf16>
    %cst_65 = arith.constant dense<0.000000e+00> : vector<128x16xf32>
    %123 = tpu.matmul %120, %122, %cst_65 {dimension_numbers = #tpu.dot_dimension_numbers<[1], [0], [0], [1], [0, 0, 1, 1], [], []>} : vector<128x16xbf16>, vector<16x16xbf16>, vector<128x16xf32> -> vector<128x16xf32>
    %124 = arith.addf %118, %123 : vector<128x16xf32>
    %125 = vector.extract_strided_slice %113 {offsets = [256, 0], sizes = [128, 16], strides = [1, 1]} : vector<1152x16xf32> to vector<128x16xf32>
    %126 = arith.truncf %125 : vector<128x16xf32> to vector<128x16xbf16>
    %c2_66 = arith.constant 2 : index
    %c0_67 = arith.constant 0 : index
    %c0_68 = arith.constant 0 : index
    %127 = vector.load %arg10[%c2_66, %c0_67, %c0_68] : memref<9x16x16xbf16, #tpu.memory_space<vmem>>, vector<1x16x16xbf16>
    %128 = vector.shape_cast %127 : vector<1x16x16xbf16> to vector<16x16xbf16>
    %cst_69 = arith.constant dense<0.000000e+00> : vector<128x16xf32>
    %129 = tpu.matmul %126, %128, %cst_69 {dimension_numbers = #tpu.dot_dimension_numbers<[1], [0], [0], [1], [0, 0, 1, 1], [], []>} : vector<128x16xbf16>, vector<16x16xbf16>, vector<128x16xf32> -> vector<128x16xf32>
    %130 = arith.addf %124, %129 : vector<128x16xf32>
    %131 = vector.extract_strided_slice %113 {offsets = [384, 0], sizes = [128, 16], strides = [1, 1]} : vector<1152x16xf32> to vector<128x16xf32>
    %132 = arith.truncf %131 : vector<128x16xf32> to vector<128x16xbf16>
    %c3_70 = arith.constant 3 : index
    %c0_71 = arith.constant 0 : index
    %c0_72 = arith.constant 0 : index
    %133 = vector.load %arg10[%c3_70, %c0_71, %c0_72] : memref<9x16x16xbf16, #tpu.memory_space<vmem>>, vector<1x16x16xbf16>
    %134 = vector.shape_cast %133 : vector<1x16x16xbf16> to vector<16x16xbf16>
    %cst_73 = arith.constant dense<0.000000e+00> : vector<128x16xf32>
    %135 = tpu.matmul %132, %134, %cst_73 {dimension_numbers = #tpu.dot_dimension_numbers<[1], [0], [0], [1], [0, 0, 1, 1], [], []>} : vector<128x16xbf16>, vector<16x16xbf16>, vector<128x16xf32> -> vector<128x16xf32>
    %136 = arith.addf %130, %135 : vector<128x16xf32>
    %137 = vector.extract_strided_slice %113 {offsets = [512, 0], sizes = [128, 16], strides = [1, 1]} : vector<1152x16xf32> to vector<128x16xf32>
    %138 = arith.truncf %137 : vector<128x16xf32> to vector<128x16xbf16>
    %c4_74 = arith.constant 4 : index
    %c0_75 = arith.constant 0 : index
    %c0_76 = arith.constant 0 : index
    %139 = vector.load %arg10[%c4_74, %c0_75, %c0_76] : memref<9x16x16xbf16, #tpu.memory_space<vmem>>, vector<1x16x16xbf16>
    %140 = vector.shape_cast %139 : vector<1x16x16xbf16> to vector<16x16xbf16>
    %cst_77 = arith.constant dense<0.000000e+00> : vector<128x16xf32>
    %141 = tpu.matmul %138, %140, %cst_77 {dimension_numbers = #tpu.dot_dimension_numbers<[1], [0], [0], [1], [0, 0, 1, 1], [], []>} : vector<128x16xbf16>, vector<16x16xbf16>, vector<128x16xf32> -> vector<128x16xf32>
    %142 = arith.addf %136, %141 : vector<128x16xf32>
    %143 = vector.extract_strided_slice %113 {offsets = [640, 0], sizes = [128, 16], strides = [1, 1]} : vector<1152x16xf32> to vector<128x16xf32>
    %144 = arith.truncf %143 : vector<128x16xf32> to vector<128x16xbf16>
    %c5_78 = arith.constant 5 : index
    %c0_79 = arith.constant 0 : index
    %c0_80 = arith.constant 0 : index
    %145 = vector.load %arg10[%c5_78, %c0_79, %c0_80] : memref<9x16x16xbf16, #tpu.memory_space<vmem>>, vector<1x16x16xbf16>
    %146 = vector.shape_cast %145 : vector<1x16x16xbf16> to vector<16x16xbf16>
    %cst_81 = arith.constant dense<0.000000e+00> : vector<128x16xf32>
    %147 = tpu.matmul %144, %146, %cst_81 {dimension_numbers = #tpu.dot_dimension_numbers<[1], [0], [0], [1], [0, 0, 1, 1], [], []>} : vector<128x16xbf16>, vector<16x16xbf16>, vector<128x16xf32> -> vector<128x16xf32>
    %148 = arith.addf %142, %147 : vector<128x16xf32>
    %149 = vector.extract_strided_slice %113 {offsets = [768, 0], sizes = [128, 16], strides = [1, 1]} : vector<1152x16xf32> to vector<128x16xf32>
    %150 = arith.truncf %149 : vector<128x16xf32> to vector<128x16xbf16>
    %c6_82 = arith.constant 6 : index
    %c0_83 = arith.constant 0 : index
    %c0_84 = arith.constant 0 : index
    %151 = vector.load %arg10[%c6_82, %c0_83, %c0_84] : memref<9x16x16xbf16, #tpu.memory_space<vmem>>, vector<1x16x16xbf16>
    %152 = vector.shape_cast %151 : vector<1x16x16xbf16> to vector<16x16xbf16>
    %cst_85 = arith.constant dense<0.000000e+00> : vector<128x16xf32>
    %153 = tpu.matmul %150, %152, %cst_85 {dimension_numbers = #tpu.dot_dimension_numbers<[1], [0], [0], [1], [0, 0, 1, 1], [], []>} : vector<128x16xbf16>, vector<16x16xbf16>, vector<128x16xf32> -> vector<128x16xf32>
    %154 = arith.addf %148, %153 : vector<128x16xf32>
    %155 = vector.extract_strided_slice %113 {offsets = [896, 0], sizes = [128, 16], strides = [1, 1]} : vector<1152x16xf32> to vector<128x16xf32>
    %156 = arith.truncf %155 : vector<128x16xf32> to vector<128x16xbf16>
    %c7_86 = arith.constant 7 : index
    %c0_87 = arith.constant 0 : index
    %c0_88 = arith.constant 0 : index
    %157 = vector.load %arg10[%c7_86, %c0_87, %c0_88] : memref<9x16x16xbf16, #tpu.memory_space<vmem>>, vector<1x16x16xbf16>
    %158 = vector.shape_cast %157 : vector<1x16x16xbf16> to vector<16x16xbf16>
    %cst_89 = arith.constant dense<0.000000e+00> : vector<128x16xf32>
    %159 = tpu.matmul %156, %158, %cst_89 {dimension_numbers = #tpu.dot_dimension_numbers<[1], [0], [0], [1], [0, 0, 1, 1], [], []>} : vector<128x16xbf16>, vector<16x16xbf16>, vector<128x16xf32> -> vector<128x16xf32>
    %160 = arith.addf %154, %159 : vector<128x16xf32>
    %161 = vector.extract_strided_slice %113 {offsets = [1024, 0], sizes = [128, 16], strides = [1, 1]} : vector<1152x16xf32> to vector<128x16xf32>
    %162 = arith.truncf %161 : vector<128x16xf32> to vector<128x16xbf16>
    %c8_90 = arith.constant 8 : index
    %c0_91 = arith.constant 0 : index
    %c0_92 = arith.constant 0 : index
    %163 = vector.load %arg10[%c8_90, %c0_91, %c0_92] : memref<9x16x16xbf16, #tpu.memory_space<vmem>>, vector<1x16x16xbf16>
    %164 = vector.shape_cast %163 : vector<1x16x16xbf16> to vector<16x16xbf16>
    %cst_93 = arith.constant dense<0.000000e+00> : vector<128x16xf32>
    %165 = tpu.matmul %162, %164, %cst_93 {dimension_numbers = #tpu.dot_dimension_numbers<[1], [0], [0], [1], [0, 0, 1, 1], [], []>} : vector<128x16xbf16>, vector<16x16xbf16>, vector<128x16xf32> -> vector<128x16xf32>
    %166 = arith.addf %160, %165 : vector<128x16xf32>
    %c0_94 = arith.constant 0 : index
    %c0_95 = arith.constant 0 : index
    %167 = vector.load %arg11[%c0_94, %c0_95] : memref<128x1xf32, #tpu.memory_space<vmem>>, vector<128x1xf32>
    %168 = vector.broadcast %167 : vector<128x1xf32> to vector<128x16xf32>
    %169 = arith.addf %166, %168 : vector<128x16xf32>
    %cst_96 = arith.constant 5.000000e-01 : f32
    %170 = vector.broadcast %cst_96 : f32 to vector<128x16xf32>
    %171 = arith.mulf %170, %169 : vector<128x16xf32>
    %cst_97 = arith.constant 4.471500e-02 : f32
    %172 = vector.broadcast %cst_97 : f32 to vector<128x16xf32>
    %173 = arith.mulf %172, %169 : vector<128x16xf32>
    %174 = arith.mulf %173, %169 : vector<128x16xf32>
    %175 = arith.mulf %174, %169 : vector<128x16xf32>
    %176 = arith.addf %169, %175 : vector<128x16xf32>
    %cst_98 = arith.constant 0.797884583 : f32
    %177 = vector.broadcast %cst_98 : f32 to vector<128x16xf32>
    %178 = arith.mulf %177, %176 : vector<128x16xf32>
    %179 = math.tanh %178 : vector<128x16xf32>
    %cst_99 = arith.constant 1.000000e+00 : f32
    %180 = vector.broadcast %cst_99 : f32 to vector<128x16xf32>
    %181 = arith.addf %180, %179 : vector<128x16xf32>
    %182 = arith.mulf %171, %181 : vector<128x16xf32>
    %183 = arith.truncf %182 : vector<128x16xf32> to vector<128x16xbf16>
    %c0_100 = arith.constant 0 : index
    %c0_101 = arith.constant 0 : index
    %184 = vector.load %arg12[%c0_100, %c0_101] : memref<1152x128xbf16, #tpu.memory_space<vmem>>, vector<1152x128xbf16>
    %cst_102 = arith.constant dense<0.000000e+00> : vector<1152x16xf32>
    %185 = tpu.matmul %184, %183, %cst_102 {dimension_numbers = #tpu.dot_dimension_numbers<[1], [0], [0], [1], [0, 0, 1, 1], [], []>} : vector<1152x128xbf16>, vector<128x16xbf16>, vector<1152x16xf32> -> vector<1152x16xf32>
    %186 = vector.extract_strided_slice %185 {offsets = [0, 0], sizes = [128, 16], strides = [1, 1]} : vector<1152x16xf32> to vector<128x16xf32>
    %187 = arith.truncf %186 : vector<128x16xf32> to vector<128x16xbf16>
    %c0_103 = arith.constant 0 : index
    %c0_104 = arith.constant 0 : index
    %c0_105 = arith.constant 0 : index
    %188 = vector.load %arg13[%c0_103, %c0_104, %c0_105] : memref<9x16x64xbf16, #tpu.memory_space<vmem>>, vector<1x16x64xbf16>
    %189 = vector.shape_cast %188 : vector<1x16x64xbf16> to vector<16x64xbf16>
    %cst_106 = arith.constant dense<0.000000e+00> : vector<128x64xf32>
    %190 = tpu.matmul %187, %189, %cst_106 {dimension_numbers = #tpu.dot_dimension_numbers<[1], [0], [0], [1], [0, 0, 1, 1], [], []>} : vector<128x16xbf16>, vector<16x64xbf16>, vector<128x64xf32> -> vector<128x64xf32>
    %191 = vector.extract_strided_slice %185 {offsets = [128, 0], sizes = [128, 16], strides = [1, 1]} : vector<1152x16xf32> to vector<128x16xf32>
    %192 = arith.truncf %191 : vector<128x16xf32> to vector<128x16xbf16>
    %c1_107 = arith.constant 1 : index
    %c0_108 = arith.constant 0 : index
    %c0_109 = arith.constant 0 : index
    %193 = vector.load %arg13[%c1_107, %c0_108, %c0_109] : memref<9x16x64xbf16, #tpu.memory_space<vmem>>, vector<1x16x64xbf16>
    %194 = vector.shape_cast %193 : vector<1x16x64xbf16> to vector<16x64xbf16>
    %cst_110 = arith.constant dense<0.000000e+00> : vector<128x64xf32>
    %195 = tpu.matmul %192, %194, %cst_110 {dimension_numbers = #tpu.dot_dimension_numbers<[1], [0], [0], [1], [0, 0, 1, 1], [], []>} : vector<128x16xbf16>, vector<16x64xbf16>, vector<128x64xf32> -> vector<128x64xf32>
    %196 = arith.addf %190, %195 : vector<128x64xf32>
    %197 = vector.extract_strided_slice %185 {offsets = [256, 0], sizes = [128, 16], strides = [1, 1]} : vector<1152x16xf32> to vector<128x16xf32>
    %198 = arith.truncf %197 : vector<128x16xf32> to vector<128x16xbf16>
    %c2_111 = arith.constant 2 : index
    %c0_112 = arith.constant 0 : index
    %c0_113 = arith.constant 0 : index
    %199 = vector.load %arg13[%c2_111, %c0_112, %c0_113] : memref<9x16x64xbf16, #tpu.memory_space<vmem>>, vector<1x16x64xbf16>
    %200 = vector.shape_cast %199 : vector<1x16x64xbf16> to vector<16x64xbf16>
    %cst_114 = arith.constant dense<0.000000e+00> : vector<128x64xf32>
    %201 = tpu.matmul %198, %200, %cst_114 {dimension_numbers = #tpu.dot_dimension_numbers<[1], [0], [0], [1], [0, 0, 1, 1], [], []>} : vector<128x16xbf16>, vector<16x64xbf16>, vector<128x64xf32> -> vector<128x64xf32>
    %202 = arith.addf %196, %201 : vector<128x64xf32>
    %203 = vector.extract_strided_slice %185 {offsets = [384, 0], sizes = [128, 16], strides = [1, 1]} : vector<1152x16xf32> to vector<128x16xf32>
    %204 = arith.truncf %203 : vector<128x16xf32> to vector<128x16xbf16>
    %c3_115 = arith.constant 3 : index
    %c0_116 = arith.constant 0 : index
    %c0_117 = arith.constant 0 : index
    %205 = vector.load %arg13[%c3_115, %c0_116, %c0_117] : memref<9x16x64xbf16, #tpu.memory_space<vmem>>, vector<1x16x64xbf16>
    %206 = vector.shape_cast %205 : vector<1x16x64xbf16> to vector<16x64xbf16>
    %cst_118 = arith.constant dense<0.000000e+00> : vector<128x64xf32>
    %207 = tpu.matmul %204, %206, %cst_118 {dimension_numbers = #tpu.dot_dimension_numbers<[1], [0], [0], [1], [0, 0, 1, 1], [], []>} : vector<128x16xbf16>, vector<16x64xbf16>, vector<128x64xf32> -> vector<128x64xf32>
    %208 = arith.addf %202, %207 : vector<128x64xf32>
    %209 = vector.extract_strided_slice %185 {offsets = [512, 0], sizes = [128, 16], strides = [1, 1]} : vector<1152x16xf32> to vector<128x16xf32>
    %210 = arith.truncf %209 : vector<128x16xf32> to vector<128x16xbf16>
    %c4_119 = arith.constant 4 : index
    %c0_120 = arith.constant 0 : index
    %c0_121 = arith.constant 0 : index
    %211 = vector.load %arg13[%c4_119, %c0_120, %c0_121] : memref<9x16x64xbf16, #tpu.memory_space<vmem>>, vector<1x16x64xbf16>
    %212 = vector.shape_cast %211 : vector<1x16x64xbf16> to vector<16x64xbf16>
    %cst_122 = arith.constant dense<0.000000e+00> : vector<128x64xf32>
    %213 = tpu.matmul %210, %212, %cst_122 {dimension_numbers = #tpu.dot_dimension_numbers<[1], [0], [0], [1], [0, 0, 1, 1], [], []>} : vector<128x16xbf16>, vector<16x64xbf16>, vector<128x64xf32> -> vector<128x64xf32>
    %214 = arith.addf %208, %213 : vector<128x64xf32>
    %215 = vector.extract_strided_slice %185 {offsets = [640, 0], sizes = [128, 16], strides = [1, 1]} : vector<1152x16xf32> to vector<128x16xf32>
    %216 = arith.truncf %215 : vector<128x16xf32> to vector<128x16xbf16>
    %c5_123 = arith.constant 5 : index
    %c0_124 = arith.constant 0 : index
    %c0_125 = arith.constant 0 : index
    %217 = vector.load %arg13[%c5_123, %c0_124, %c0_125] : memref<9x16x64xbf16, #tpu.memory_space<vmem>>, vector<1x16x64xbf16>
    %218 = vector.shape_cast %217 : vector<1x16x64xbf16> to vector<16x64xbf16>
    %cst_126 = arith.constant dense<0.000000e+00> : vector<128x64xf32>
    %219 = tpu.matmul %216, %218, %cst_126 {dimension_numbers = #tpu.dot_dimension_numbers<[1], [0], [0], [1], [0, 0, 1, 1], [], []>} : vector<128x16xbf16>, vector<16x64xbf16>, vector<128x64xf32> -> vector<128x64xf32>
    %220 = arith.addf %214, %219 : vector<128x64xf32>
    %221 = vector.extract_strided_slice %185 {offsets = [768, 0], sizes = [128, 16], strides = [1, 1]} : vector<1152x16xf32> to vector<128x16xf32>
    %222 = arith.truncf %221 : vector<128x16xf32> to vector<128x16xbf16>
    %c6_127 = arith.constant 6 : index
    %c0_128 = arith.constant 0 : index
    %c0_129 = arith.constant 0 : index
    %223 = vector.load %arg13[%c6_127, %c0_128, %c0_129] : memref<9x16x64xbf16, #tpu.memory_space<vmem>>, vector<1x16x64xbf16>
    %224 = vector.shape_cast %223 : vector<1x16x64xbf16> to vector<16x64xbf16>
    %cst_130 = arith.constant dense<0.000000e+00> : vector<128x64xf32>
    %225 = tpu.matmul %222, %224, %cst_130 {dimension_numbers = #tpu.dot_dimension_numbers<[1], [0], [0], [1], [0, 0, 1, 1], [], []>} : vector<128x16xbf16>, vector<16x64xbf16>, vector<128x64xf32> -> vector<128x64xf32>
    %226 = arith.addf %220, %225 : vector<128x64xf32>
    %227 = vector.extract_strided_slice %185 {offsets = [896, 0], sizes = [128, 16], strides = [1, 1]} : vector<1152x16xf32> to vector<128x16xf32>
    %228 = arith.truncf %227 : vector<128x16xf32> to vector<128x16xbf16>
    %c7_131 = arith.constant 7 : index
    %c0_132 = arith.constant 0 : index
    %c0_133 = arith.constant 0 : index
    %229 = vector.load %arg13[%c7_131, %c0_132, %c0_133] : memref<9x16x64xbf16, #tpu.memory_space<vmem>>, vector<1x16x64xbf16>
    %230 = vector.shape_cast %229 : vector<1x16x64xbf16> to vector<16x64xbf16>
    %cst_134 = arith.constant dense<0.000000e+00> : vector<128x64xf32>
    %231 = tpu.matmul %228, %230, %cst_134 {dimension_numbers = #tpu.dot_dimension_numbers<[1], [0], [0], [1], [0, 0, 1, 1], [], []>} : vector<128x16xbf16>, vector<16x64xbf16>, vector<128x64xf32> -> vector<128x64xf32>
    %232 = arith.addf %226, %231 : vector<128x64xf32>
    %233 = vector.extract_strided_slice %185 {offsets = [1024, 0], sizes = [128, 16], strides = [1, 1]} : vector<1152x16xf32> to vector<128x16xf32>
    %234 = arith.truncf %233 : vector<128x16xf32> to vector<128x16xbf16>
    %c8_135 = arith.constant 8 : index
    %c0_136 = arith.constant 0 : index
    %c0_137 = arith.constant 0 : index
    %235 = vector.load %arg13[%c8_135, %c0_136, %c0_137] : memref<9x16x64xbf16, #tpu.memory_space<vmem>>, vector<1x16x64xbf16>
    %236 = vector.shape_cast %235 : vector<1x16x64xbf16> to vector<16x64xbf16>
    %cst_138 = arith.constant dense<0.000000e+00> : vector<128x64xf32>
    %237 = tpu.matmul %234, %236, %cst_138 {dimension_numbers = #tpu.dot_dimension_numbers<[1], [0], [0], [1], [0, 0, 1, 1], [], []>} : vector<128x16xbf16>, vector<16x64xbf16>, vector<128x64xf32> -> vector<128x64xf32>
    %238 = arith.addf %232, %237 : vector<128x64xf32>
    %c0_139 = arith.constant 0 : index
    %c0_140 = arith.constant 0 : index
    %239 = vector.load %arg14[%c0_139, %c0_140] : memref<128x1xf32, #tpu.memory_space<vmem>>, vector<128x1xf32>
    %240 = vector.broadcast %239 : vector<128x1xf32> to vector<128x64xf32>
    %241 = arith.addf %238, %240 : vector<128x64xf32>
    %cst_141 = arith.constant 5.000000e-01 : f32
    %242 = vector.broadcast %cst_141 : f32 to vector<128x64xf32>
    %243 = arith.mulf %242, %241 : vector<128x64xf32>
    %cst_142 = arith.constant 4.471500e-02 : f32
    %244 = vector.broadcast %cst_142 : f32 to vector<128x64xf32>
    %245 = arith.mulf %244, %241 : vector<128x64xf32>
    %246 = arith.mulf %245, %241 : vector<128x64xf32>
    %247 = arith.mulf %246, %241 : vector<128x64xf32>
    %248 = arith.addf %241, %247 : vector<128x64xf32>
    %cst_143 = arith.constant 0.797884583 : f32
    %249 = vector.broadcast %cst_143 : f32 to vector<128x64xf32>
    %250 = arith.mulf %249, %248 : vector<128x64xf32>
    %251 = math.tanh %250 : vector<128x64xf32>
    %cst_144 = arith.constant 1.000000e+00 : f32
    %252 = vector.broadcast %cst_144 : f32 to vector<128x64xf32>
    %253 = arith.addf %252, %251 : vector<128x64xf32>
    %254 = arith.mulf %243, %253 : vector<128x64xf32>
    %255 = arith.truncf %254 : vector<128x64xf32> to vector<128x64xbf16>
    %c0_145 = arith.constant 0 : index
    %c0_146 = arith.constant 0 : index
    %256 = vector.load %arg15[%c0_145, %c0_146] : memref<1152x128xbf16, #tpu.memory_space<vmem>>, vector<1152x128xbf16>
    %cst_147 = arith.constant dense<0.000000e+00> : vector<1152x64xf32>
    %257 = tpu.matmul %256, %255, %cst_147 {dimension_numbers = #tpu.dot_dimension_numbers<[1], [0], [0], [1], [0, 0, 1, 1], [], []>} : vector<1152x128xbf16>, vector<128x64xbf16>, vector<1152x64xf32> -> vector<1152x64xf32>
    %258 = vector.extract_strided_slice %257 {offsets = [0, 0], sizes = [128, 64], strides = [1, 1]} : vector<1152x64xf32> to vector<128x64xf32>
    %259 = arith.truncf %258 : vector<128x64xf32> to vector<128x64xbf16>
    %c0_148 = arith.constant 0 : index
    %c0_149 = arith.constant 0 : index
    %c0_150 = arith.constant 0 : index
    %260 = vector.load %arg16[%c0_148, %c0_149, %c0_150] : memref<9x64x64xbf16, #tpu.memory_space<vmem>>, vector<1x64x64xbf16>
    %261 = vector.shape_cast %260 : vector<1x64x64xbf16> to vector<64x64xbf16>
    %cst_151 = arith.constant dense<0.000000e+00> : vector<128x64xf32>
    %262 = tpu.matmul %259, %261, %cst_151 {dimension_numbers = #tpu.dot_dimension_numbers<[1], [0], [0], [1], [0, 0, 1, 1], [], []>} : vector<128x64xbf16>, vector<64x64xbf16>, vector<128x64xf32> -> vector<128x64xf32>
    %263 = vector.extract_strided_slice %257 {offsets = [128, 0], sizes = [128, 64], strides = [1, 1]} : vector<1152x64xf32> to vector<128x64xf32>
    %264 = arith.truncf %263 : vector<128x64xf32> to vector<128x64xbf16>
    %c1_152 = arith.constant 1 : index
    %c0_153 = arith.constant 0 : index
    %c0_154 = arith.constant 0 : index
    %265 = vector.load %arg16[%c1_152, %c0_153, %c0_154] : memref<9x64x64xbf16, #tpu.memory_space<vmem>>, vector<1x64x64xbf16>
    %266 = vector.shape_cast %265 : vector<1x64x64xbf16> to vector<64x64xbf16>
    %cst_155 = arith.constant dense<0.000000e+00> : vector<128x64xf32>
    %267 = tpu.matmul %264, %266, %cst_155 {dimension_numbers = #tpu.dot_dimension_numbers<[1], [0], [0], [1], [0, 0, 1, 1], [], []>} : vector<128x64xbf16>, vector<64x64xbf16>, vector<128x64xf32> -> vector<128x64xf32>
    %268 = arith.addf %262, %267 : vector<128x64xf32>
    %269 = vector.extract_strided_slice %257 {offsets = [256, 0], sizes = [128, 64], strides = [1, 1]} : vector<1152x64xf32> to vector<128x64xf32>
    %270 = arith.truncf %269 : vector<128x64xf32> to vector<128x64xbf16>
    %c2_156 = arith.constant 2 : index
    %c0_157 = arith.constant 0 : index
    %c0_158 = arith.constant 0 : index
    %271 = vector.load %arg16[%c2_156, %c0_157, %c0_158] : memref<9x64x64xbf16, #tpu.memory_space<vmem>>, vector<1x64x64xbf16>
    %272 = vector.shape_cast %271 : vector<1x64x64xbf16> to vector<64x64xbf16>
    %cst_159 = arith.constant dense<0.000000e+00> : vector<128x64xf32>
    %273 = tpu.matmul %270, %272, %cst_159 {dimension_numbers = #tpu.dot_dimension_numbers<[1], [0], [0], [1], [0, 0, 1, 1], [], []>} : vector<128x64xbf16>, vector<64x64xbf16>, vector<128x64xf32> -> vector<128x64xf32>
    %274 = arith.addf %268, %273 : vector<128x64xf32>
    %275 = vector.extract_strided_slice %257 {offsets = [384, 0], sizes = [128, 64], strides = [1, 1]} : vector<1152x64xf32> to vector<128x64xf32>
    %276 = arith.truncf %275 : vector<128x64xf32> to vector<128x64xbf16>
    %c3_160 = arith.constant 3 : index
    %c0_161 = arith.constant 0 : index
    %c0_162 = arith.constant 0 : index
    %277 = vector.load %arg16[%c3_160, %c0_161, %c0_162] : memref<9x64x64xbf16, #tpu.memory_space<vmem>>, vector<1x64x64xbf16>
    %278 = vector.shape_cast %277 : vector<1x64x64xbf16> to vector<64x64xbf16>
    %cst_163 = arith.constant dense<0.000000e+00> : vector<128x64xf32>
    %279 = tpu.matmul %276, %278, %cst_163 {dimension_numbers = #tpu.dot_dimension_numbers<[1], [0], [0], [1], [0, 0, 1, 1], [], []>} : vector<128x64xbf16>, vector<64x64xbf16>, vector<128x64xf32> -> vector<128x64xf32>
    %280 = arith.addf %274, %279 : vector<128x64xf32>
    %281 = vector.extract_strided_slice %257 {offsets = [512, 0], sizes = [128, 64], strides = [1, 1]} : vector<1152x64xf32> to vector<128x64xf32>
    %282 = arith.truncf %281 : vector<128x64xf32> to vector<128x64xbf16>
    %c4_164 = arith.constant 4 : index
    %c0_165 = arith.constant 0 : index
    %c0_166 = arith.constant 0 : index
    %283 = vector.load %arg16[%c4_164, %c0_165, %c0_166] : memref<9x64x64xbf16, #tpu.memory_space<vmem>>, vector<1x64x64xbf16>
    %284 = vector.shape_cast %283 : vector<1x64x64xbf16> to vector<64x64xbf16>
    %cst_167 = arith.constant dense<0.000000e+00> : vector<128x64xf32>
    %285 = tpu.matmul %282, %284, %cst_167 {dimension_numbers = #tpu.dot_dimension_numbers<[1], [0], [0], [1], [0, 0, 1, 1], [], []>} : vector<128x64xbf16>, vector<64x64xbf16>, vector<128x64xf32> -> vector<128x64xf32>
    %286 = arith.addf %280, %285 : vector<128x64xf32>
    %287 = vector.extract_strided_slice %257 {offsets = [640, 0], sizes = [128, 64], strides = [1, 1]} : vector<1152x64xf32> to vector<128x64xf32>
    %288 = arith.truncf %287 : vector<128x64xf32> to vector<128x64xbf16>
    %c5_168 = arith.constant 5 : index
    %c0_169 = arith.constant 0 : index
    %c0_170 = arith.constant 0 : index
    %289 = vector.load %arg16[%c5_168, %c0_169, %c0_170] : memref<9x64x64xbf16, #tpu.memory_space<vmem>>, vector<1x64x64xbf16>
    %290 = vector.shape_cast %289 : vector<1x64x64xbf16> to vector<64x64xbf16>
    %cst_171 = arith.constant dense<0.000000e+00> : vector<128x64xf32>
    %291 = tpu.matmul %288, %290, %cst_171 {dimension_numbers = #tpu.dot_dimension_numbers<[1], [0], [0], [1], [0, 0, 1, 1], [], []>} : vector<128x64xbf16>, vector<64x64xbf16>, vector<128x64xf32> -> vector<128x64xf32>
    %292 = arith.addf %286, %291 : vector<128x64xf32>
    %293 = vector.extract_strided_slice %257 {offsets = [768, 0], sizes = [128, 64], strides = [1, 1]} : vector<1152x64xf32> to vector<128x64xf32>
    %294 = arith.truncf %293 : vector<128x64xf32> to vector<128x64xbf16>
    %c6_172 = arith.constant 6 : index
    %c0_173 = arith.constant 0 : index
    %c0_174 = arith.constant 0 : index
    %295 = vector.load %arg16[%c6_172, %c0_173, %c0_174] : memref<9x64x64xbf16, #tpu.memory_space<vmem>>, vector<1x64x64xbf16>
    %296 = vector.shape_cast %295 : vector<1x64x64xbf16> to vector<64x64xbf16>
    %cst_175 = arith.constant dense<0.000000e+00> : vector<128x64xf32>
    %297 = tpu.matmul %294, %296, %cst_175 {dimension_numbers = #tpu.dot_dimension_numbers<[1], [0], [0], [1], [0, 0, 1, 1], [], []>} : vector<128x64xbf16>, vector<64x64xbf16>, vector<128x64xf32> -> vector<128x64xf32>
    %298 = arith.addf %292, %297 : vector<128x64xf32>
    %299 = vector.extract_strided_slice %257 {offsets = [896, 0], sizes = [128, 64], strides = [1, 1]} : vector<1152x64xf32> to vector<128x64xf32>
    %300 = arith.truncf %299 : vector<128x64xf32> to vector<128x64xbf16>
    %c7_176 = arith.constant 7 : index
    %c0_177 = arith.constant 0 : index
    %c0_178 = arith.constant 0 : index
    %301 = vector.load %arg16[%c7_176, %c0_177, %c0_178] : memref<9x64x64xbf16, #tpu.memory_space<vmem>>, vector<1x64x64xbf16>
    %302 = vector.shape_cast %301 : vector<1x64x64xbf16> to vector<64x64xbf16>
    %cst_179 = arith.constant dense<0.000000e+00> : vector<128x64xf32>
    %303 = tpu.matmul %300, %302, %cst_179 {dimension_numbers = #tpu.dot_dimension_numbers<[1], [0], [0], [1], [0, 0, 1, 1], [], []>} : vector<128x64xbf16>, vector<64x64xbf16>, vector<128x64xf32> -> vector<128x64xf32>
    %304 = arith.addf %298, %303 : vector<128x64xf32>
    %305 = vector.extract_strided_slice %257 {offsets = [1024, 0], sizes = [128, 64], strides = [1, 1]} : vector<1152x64xf32> to vector<128x64xf32>
    %306 = arith.truncf %305 : vector<128x64xf32> to vector<128x64xbf16>
    %c8_180 = arith.constant 8 : index
    %c0_181 = arith.constant 0 : index
    %c0_182 = arith.constant 0 : index
    %307 = vector.load %arg16[%c8_180, %c0_181, %c0_182] : memref<9x64x64xbf16, #tpu.memory_space<vmem>>, vector<1x64x64xbf16>
    %308 = vector.shape_cast %307 : vector<1x64x64xbf16> to vector<64x64xbf16>
    %cst_183 = arith.constant dense<0.000000e+00> : vector<128x64xf32>
    %309 = tpu.matmul %306, %308, %cst_183 {dimension_numbers = #tpu.dot_dimension_numbers<[1], [0], [0], [1], [0, 0, 1, 1], [], []>} : vector<128x64xbf16>, vector<64x64xbf16>, vector<128x64xf32> -> vector<128x64xf32>
    %310 = arith.addf %304, %309 : vector<128x64xf32>
    %c0_184 = arith.constant 0 : index
    %c0_185 = arith.constant 0 : index
    %311 = vector.load %arg17[%c0_184, %c0_185] : memref<128x1xf32, #tpu.memory_space<vmem>>, vector<128x1xf32>
    %312 = vector.broadcast %311 : vector<128x1xf32> to vector<128x64xf32>
    %313 = arith.addf %310, %312 : vector<128x64xf32>
    %cst_186 = arith.constant 5.000000e-01 : f32
    %314 = vector.broadcast %cst_186 : f32 to vector<128x64xf32>
    %315 = arith.mulf %314, %313 : vector<128x64xf32>
    %cst_187 = arith.constant 4.471500e-02 : f32
    %316 = vector.broadcast %cst_187 : f32 to vector<128x64xf32>
    %317 = arith.mulf %316, %313 : vector<128x64xf32>
    %318 = arith.mulf %317, %313 : vector<128x64xf32>
    %319 = arith.mulf %318, %313 : vector<128x64xf32>
    %320 = arith.addf %313, %319 : vector<128x64xf32>
    %cst_188 = arith.constant 0.797884583 : f32
    %321 = vector.broadcast %cst_188 : f32 to vector<128x64xf32>
    %322 = arith.mulf %321, %320 : vector<128x64xf32>
    %323 = math.tanh %322 : vector<128x64xf32>
    %cst_189 = arith.constant 1.000000e+00 : f32
    %324 = vector.broadcast %cst_189 : f32 to vector<128x64xf32>
    %325 = arith.addf %324, %323 : vector<128x64xf32>
    %326 = arith.mulf %315, %325 : vector<128x64xf32>
    %327 = arith.truncf %326 : vector<128x64xf32> to vector<128x64xbf16>
    %c0_190 = arith.constant 0 : index
    %c0_191 = arith.constant 0 : index
    %328 = vector.load %arg18[%c0_190, %c0_191] : memref<1152x128xbf16, #tpu.memory_space<vmem>>, vector<1152x128xbf16>
    %cst_192 = arith.constant dense<0.000000e+00> : vector<1152x64xf32>
    %329 = tpu.matmul %328, %327, %cst_192 {dimension_numbers = #tpu.dot_dimension_numbers<[1], [0], [0], [1], [0, 0, 1, 1], [], []>} : vector<1152x128xbf16>, vector<128x64xbf16>, vector<1152x64xf32> -> vector<1152x64xf32>
    %330 = vector.extract_strided_slice %329 {offsets = [0, 0], sizes = [128, 64], strides = [1, 1]} : vector<1152x64xf32> to vector<128x64xf32>
    %331 = arith.truncf %330 : vector<128x64xf32> to vector<128x64xbf16>
    %c0_193 = arith.constant 0 : index
    %c0_194 = arith.constant 0 : index
    %c0_195 = arith.constant 0 : index
    %332 = vector.load %arg19[%c0_193, %c0_194, %c0_195] : memref<9x64x256xbf16, #tpu.memory_space<vmem>>, vector<1x64x256xbf16>
    %333 = vector.shape_cast %332 : vector<1x64x256xbf16> to vector<64x256xbf16>
    %cst_196 = arith.constant dense<0.000000e+00> : vector<128x256xf32>
    %334 = tpu.matmul %331, %333, %cst_196 {dimension_numbers = #tpu.dot_dimension_numbers<[1], [0], [0], [1], [0, 0, 1, 1], [], []>} : vector<128x64xbf16>, vector<64x256xbf16>, vector<128x256xf32> -> vector<128x256xf32>
    %335 = vector.extract_strided_slice %329 {offsets = [128, 0], sizes = [128, 64], strides = [1, 1]} : vector<1152x64xf32> to vector<128x64xf32>
    %336 = arith.truncf %335 : vector<128x64xf32> to vector<128x64xbf16>
    %c1_197 = arith.constant 1 : index
    %c0_198 = arith.constant 0 : index
    %c0_199 = arith.constant 0 : index
    %337 = vector.load %arg19[%c1_197, %c0_198, %c0_199] : memref<9x64x256xbf16, #tpu.memory_space<vmem>>, vector<1x64x256xbf16>
    %338 = vector.shape_cast %337 : vector<1x64x256xbf16> to vector<64x256xbf16>
    %cst_200 = arith.constant dense<0.000000e+00> : vector<128x256xf32>
    %339 = tpu.matmul %336, %338, %cst_200 {dimension_numbers = #tpu.dot_dimension_numbers<[1], [0], [0], [1], [0, 0, 1, 1], [], []>} : vector<128x64xbf16>, vector<64x256xbf16>, vector<128x256xf32> -> vector<128x256xf32>
    %340 = arith.addf %334, %339 : vector<128x256xf32>
    %341 = vector.extract_strided_slice %329 {offsets = [256, 0], sizes = [128, 64], strides = [1, 1]} : vector<1152x64xf32> to vector<128x64xf32>
    %342 = arith.truncf %341 : vector<128x64xf32> to vector<128x64xbf16>
    %c2_201 = arith.constant 2 : index
    %c0_202 = arith.constant 0 : index
    %c0_203 = arith.constant 0 : index
    %343 = vector.load %arg19[%c2_201, %c0_202, %c0_203] : memref<9x64x256xbf16, #tpu.memory_space<vmem>>, vector<1x64x256xbf16>
    %344 = vector.shape_cast %343 : vector<1x64x256xbf16> to vector<64x256xbf16>
    %cst_204 = arith.constant dense<0.000000e+00> : vector<128x256xf32>
    %345 = tpu.matmul %342, %344, %cst_204 {dimension_numbers = #tpu.dot_dimension_numbers<[1], [0], [0], [1], [0, 0, 1, 1], [], []>} : vector<128x64xbf16>, vector<64x256xbf16>, vector<128x256xf32> -> vector<128x256xf32>
    %346 = arith.addf %340, %345 : vector<128x256xf32>
    %347 = vector.extract_strided_slice %329 {offsets = [384, 0], sizes = [128, 64], strides = [1, 1]} : vector<1152x64xf32> to vector<128x64xf32>
    %348 = arith.truncf %347 : vector<128x64xf32> to vector<128x64xbf16>
    %c3_205 = arith.constant 3 : index
    %c0_206 = arith.constant 0 : index
    %c0_207 = arith.constant 0 : index
    %349 = vector.load %arg19[%c3_205, %c0_206, %c0_207] : memref<9x64x256xbf16, #tpu.memory_space<vmem>>, vector<1x64x256xbf16>
    %350 = vector.shape_cast %349 : vector<1x64x256xbf16> to vector<64x256xbf16>
    %cst_208 = arith.constant dense<0.000000e+00> : vector<128x256xf32>
    %351 = tpu.matmul %348, %350, %cst_208 {dimension_numbers = #tpu.dot_dimension_numbers<[1], [0], [0], [1], [0, 0, 1, 1], [], []>} : vector<128x64xbf16>, vector<64x256xbf16>, vector<128x256xf32> -> vector<128x256xf32>
    %352 = arith.addf %346, %351 : vector<128x256xf32>
    %353 = vector.extract_strided_slice %329 {offsets = [512, 0], sizes = [128, 64], strides = [1, 1]} : vector<1152x64xf32> to vector<128x64xf32>
    %354 = arith.truncf %353 : vector<128x64xf32> to vector<128x64xbf16>
    %c4_209 = arith.constant 4 : index
    %c0_210 = arith.constant 0 : index
    %c0_211 = arith.constant 0 : index
    %355 = vector.load %arg19[%c4_209, %c0_210, %c0_211] : memref<9x64x256xbf16, #tpu.memory_space<vmem>>, vector<1x64x256xbf16>
    %356 = vector.shape_cast %355 : vector<1x64x256xbf16> to vector<64x256xbf16>
    %cst_212 = arith.constant dense<0.000000e+00> : vector<128x256xf32>
    %357 = tpu.matmul %354, %356, %cst_212 {dimension_numbers = #tpu.dot_dimension_numbers<[1], [0], [0], [1], [0, 0, 1, 1], [], []>} : vector<128x64xbf16>, vector<64x256xbf16>, vector<128x256xf32> -> vector<128x256xf32>
    %358 = arith.addf %352, %357 : vector<128x256xf32>
    %359 = vector.extract_strided_slice %329 {offsets = [640, 0], sizes = [128, 64], strides = [1, 1]} : vector<1152x64xf32> to vector<128x64xf32>
    %360 = arith.truncf %359 : vector<128x64xf32> to vector<128x64xbf16>
    %c5_213 = arith.constant 5 : index
    %c0_214 = arith.constant 0 : index
    %c0_215 = arith.constant 0 : index
    %361 = vector.load %arg19[%c5_213, %c0_214, %c0_215] : memref<9x64x256xbf16, #tpu.memory_space<vmem>>, vector<1x64x256xbf16>
    %362 = vector.shape_cast %361 : vector<1x64x256xbf16> to vector<64x256xbf16>
    %cst_216 = arith.constant dense<0.000000e+00> : vector<128x256xf32>
    %363 = tpu.matmul %360, %362, %cst_216 {dimension_numbers = #tpu.dot_dimension_numbers<[1], [0], [0], [1], [0, 0, 1, 1], [], []>} : vector<128x64xbf16>, vector<64x256xbf16>, vector<128x256xf32> -> vector<128x256xf32>
    %364 = arith.addf %358, %363 : vector<128x256xf32>
    %365 = vector.extract_strided_slice %329 {offsets = [768, 0], sizes = [128, 64], strides = [1, 1]} : vector<1152x64xf32> to vector<128x64xf32>
    %366 = arith.truncf %365 : vector<128x64xf32> to vector<128x64xbf16>
    %c6_217 = arith.constant 6 : index
    %c0_218 = arith.constant 0 : index
    %c0_219 = arith.constant 0 : index
    %367 = vector.load %arg19[%c6_217, %c0_218, %c0_219] : memref<9x64x256xbf16, #tpu.memory_space<vmem>>, vector<1x64x256xbf16>
    %368 = vector.shape_cast %367 : vector<1x64x256xbf16> to vector<64x256xbf16>
    %cst_220 = arith.constant dense<0.000000e+00> : vector<128x256xf32>
    %369 = tpu.matmul %366, %368, %cst_220 {dimension_numbers = #tpu.dot_dimension_numbers<[1], [0], [0], [1], [0, 0, 1, 1], [], []>} : vector<128x64xbf16>, vector<64x256xbf16>, vector<128x256xf32> -> vector<128x256xf32>
    %370 = arith.addf %364, %369 : vector<128x256xf32>
    %371 = vector.extract_strided_slice %329 {offsets = [896, 0], sizes = [128, 64], strides = [1, 1]} : vector<1152x64xf32> to vector<128x64xf32>
    %372 = arith.truncf %371 : vector<128x64xf32> to vector<128x64xbf16>
    %c7_221 = arith.constant 7 : index
    %c0_222 = arith.constant 0 : index
    %c0_223 = arith.constant 0 : index
    %373 = vector.load %arg19[%c7_221, %c0_222, %c0_223] : memref<9x64x256xbf16, #tpu.memory_space<vmem>>, vector<1x64x256xbf16>
    %374 = vector.shape_cast %373 : vector<1x64x256xbf16> to vector<64x256xbf16>
    %cst_224 = arith.constant dense<0.000000e+00> : vector<128x256xf32>
    %375 = tpu.matmul %372, %374, %cst_224 {dimension_numbers = #tpu.dot_dimension_numbers<[1], [0], [0], [1], [0, 0, 1, 1], [], []>} : vector<128x64xbf16>, vector<64x256xbf16>, vector<128x256xf32> -> vector<128x256xf32>
    %376 = arith.addf %370, %375 : vector<128x256xf32>
    %377 = vector.extract_strided_slice %329 {offsets = [1024, 0], sizes = [128, 64], strides = [1, 1]} : vector<1152x64xf32> to vector<128x64xf32>
    %378 = arith.truncf %377 : vector<128x64xf32> to vector<128x64xbf16>
    %c8_225 = arith.constant 8 : index
    %c0_226 = arith.constant 0 : index
    %c0_227 = arith.constant 0 : index
    %379 = vector.load %arg19[%c8_225, %c0_226, %c0_227] : memref<9x64x256xbf16, #tpu.memory_space<vmem>>, vector<1x64x256xbf16>
    %380 = vector.shape_cast %379 : vector<1x64x256xbf16> to vector<64x256xbf16>
    %cst_228 = arith.constant dense<0.000000e+00> : vector<128x256xf32>
    %381 = tpu.matmul %378, %380, %cst_228 {dimension_numbers = #tpu.dot_dimension_numbers<[1], [0], [0], [1], [0, 0, 1, 1], [], []>} : vector<128x64xbf16>, vector<64x256xbf16>, vector<128x256xf32> -> vector<128x256xf32>
    %382 = arith.addf %376, %381 : vector<128x256xf32>
    %c0_229 = arith.constant 0 : index
    %c0_230 = arith.constant 0 : index
    %383 = vector.load %arg20[%c0_229, %c0_230] : memref<128x1xf32, #tpu.memory_space<vmem>>, vector<128x1xf32>
    %384 = vector.broadcast %383 : vector<128x1xf32> to vector<128x256xf32>
    %385 = arith.addf %382, %384 : vector<128x256xf32>
    %cst_231 = arith.constant 5.000000e-01 : f32
    %386 = vector.broadcast %cst_231 : f32 to vector<128x256xf32>
    %387 = arith.mulf %386, %385 : vector<128x256xf32>
    %cst_232 = arith.constant 4.471500e-02 : f32
    %388 = vector.broadcast %cst_232 : f32 to vector<128x256xf32>
    %389 = arith.mulf %388, %385 : vector<128x256xf32>
    %390 = arith.mulf %389, %385 : vector<128x256xf32>
    %391 = arith.mulf %390, %385 : vector<128x256xf32>
    %392 = arith.addf %385, %391 : vector<128x256xf32>
    %cst_233 = arith.constant 0.797884583 : f32
    %393 = vector.broadcast %cst_233 : f32 to vector<128x256xf32>
    %394 = arith.mulf %393, %392 : vector<128x256xf32>
    %395 = math.tanh %394 : vector<128x256xf32>
    %cst_234 = arith.constant 1.000000e+00 : f32
    %396 = vector.broadcast %cst_234 : f32 to vector<128x256xf32>
    %397 = arith.addf %396, %395 : vector<128x256xf32>
    %398 = arith.mulf %387, %397 : vector<128x256xf32>
    %399 = arith.truncf %398 : vector<128x256xf32> to vector<128x256xbf16>
    %c0_235 = arith.constant 0 : index
    %c0_236 = arith.constant 0 : index
    %400 = vector.load %arg21[%c0_235, %c0_236] : memref<72x128xbf16, #tpu.memory_space<vmem>>, vector<72x128xbf16>
    %cst_237 = arith.constant dense<0.000000e+00> : vector<72x256xf32>
    %401 = tpu.matmul %400, %399, %cst_237 {dimension_numbers = #tpu.dot_dimension_numbers<[1], [0], [0], [1], [0, 0, 1, 1], [], []>} : vector<72x128xbf16>, vector<128x256xbf16>, vector<72x256xf32> -> vector<72x256xf32>
    %402 = vector.extract_strided_slice %401 {offsets = [0, 0], sizes = [8, 256], strides = [1, 1]} : vector<72x256xf32> to vector<8x256xf32>
    %403 = arith.truncf %402 : vector<8x256xf32> to vector<8x256xbf16>
    %c0_238 = arith.constant 0 : index
    %c0_239 = arith.constant 0 : index
    %c0_240 = arith.constant 0 : index
    %404 = vector.load %arg22[%c0_238, %c0_239, %c0_240] : memref<9x256x256xbf16, #tpu.memory_space<vmem>>, vector<1x256x256xbf16>
    %405 = vector.shape_cast %404 : vector<1x256x256xbf16> to vector<256x256xbf16>
    %cst_241 = arith.constant dense<0.000000e+00> : vector<8x256xf32>
    %406 = tpu.matmul %403, %405, %cst_241 {dimension_numbers = #tpu.dot_dimension_numbers<[1], [0], [0], [1], [0, 0, 1, 1], [], []>} : vector<8x256xbf16>, vector<256x256xbf16>, vector<8x256xf32> -> vector<8x256xf32>
    %407 = vector.extract_strided_slice %401 {offsets = [8, 0], sizes = [8, 256], strides = [1, 1]} : vector<72x256xf32> to vector<8x256xf32>
    %408 = arith.truncf %407 : vector<8x256xf32> to vector<8x256xbf16>
    %c1_242 = arith.constant 1 : index
    %c0_243 = arith.constant 0 : index
    %c0_244 = arith.constant 0 : index
    %409 = vector.load %arg22[%c1_242, %c0_243, %c0_244] : memref<9x256x256xbf16, #tpu.memory_space<vmem>>, vector<1x256x256xbf16>
    %410 = vector.shape_cast %409 : vector<1x256x256xbf16> to vector<256x256xbf16>
    %cst_245 = arith.constant dense<0.000000e+00> : vector<8x256xf32>
    %411 = tpu.matmul %408, %410, %cst_245 {dimension_numbers = #tpu.dot_dimension_numbers<[1], [0], [0], [1], [0, 0, 1, 1], [], []>} : vector<8x256xbf16>, vector<256x256xbf16>, vector<8x256xf32> -> vector<8x256xf32>
    %412 = arith.addf %406, %411 : vector<8x256xf32>
    %413 = vector.extract_strided_slice %401 {offsets = [16, 0], sizes = [8, 256], strides = [1, 1]} : vector<72x256xf32> to vector<8x256xf32>
    %414 = arith.truncf %413 : vector<8x256xf32> to vector<8x256xbf16>
    %c2_246 = arith.constant 2 : index
    %c0_247 = arith.constant 0 : index
    %c0_248 = arith.constant 0 : index
    %415 = vector.load %arg22[%c2_246, %c0_247, %c0_248] : memref<9x256x256xbf16, #tpu.memory_space<vmem>>, vector<1x256x256xbf16>
    %416 = vector.shape_cast %415 : vector<1x256x256xbf16> to vector<256x256xbf16>
    %cst_249 = arith.constant dense<0.000000e+00> : vector<8x256xf32>
    %417 = tpu.matmul %414, %416, %cst_249 {dimension_numbers = #tpu.dot_dimension_numbers<[1], [0], [0], [1], [0, 0, 1, 1], [], []>} : vector<8x256xbf16>, vector<256x256xbf16>, vector<8x256xf32> -> vector<8x256xf32>
    %418 = arith.addf %412, %417 : vector<8x256xf32>
    %419 = vector.extract_strided_slice %401 {offsets = [24, 0], sizes = [8, 256], strides = [1, 1]} : vector<72x256xf32> to vector<8x256xf32>
    %420 = arith.truncf %419 : vector<8x256xf32> to vector<8x256xbf16>
    %c3_250 = arith.constant 3 : index
    %c0_251 = arith.constant 0 : index
    %c0_252 = arith.constant 0 : index
    %421 = vector.load %arg22[%c3_250, %c0_251, %c0_252] : memref<9x256x256xbf16, #tpu.memory_space<vmem>>, vector<1x256x256xbf16>
    %422 = vector.shape_cast %421 : vector<1x256x256xbf16> to vector<256x256xbf16>
    %cst_253 = arith.constant dense<0.000000e+00> : vector<8x256xf32>
    %423 = tpu.matmul %420, %422, %cst_253 {dimension_numbers = #tpu.dot_dimension_numbers<[1], [0], [0], [1], [0, 0, 1, 1], [], []>} : vector<8x256xbf16>, vector<256x256xbf16>, vector<8x256xf32> -> vector<8x256xf32>
    %424 = arith.addf %418, %423 : vector<8x256xf32>
    %425 = vector.extract_strided_slice %401 {offsets = [32, 0], sizes = [8, 256], strides = [1, 1]} : vector<72x256xf32> to vector<8x256xf32>
    %426 = arith.truncf %425 : vector<8x256xf32> to vector<8x256xbf16>
    %c4_254 = arith.constant 4 : index
    %c0_255 = arith.constant 0 : index
    %c0_256 = arith.constant 0 : index
    %427 = vector.load %arg22[%c4_254, %c0_255, %c0_256] : memref<9x256x256xbf16, #tpu.memory_space<vmem>>, vector<1x256x256xbf16>
    %428 = vector.shape_cast %427 : vector<1x256x256xbf16> to vector<256x256xbf16>
    %cst_257 = arith.constant dense<0.000000e+00> : vector<8x256xf32>
    %429 = tpu.matmul %426, %428, %cst_257 {dimension_numbers = #tpu.dot_dimension_numbers<[1], [0], [0], [1], [0, 0, 1, 1], [], []>} : vector<8x256xbf16>, vector<256x256xbf16>, vector<8x256xf32> -> vector<8x256xf32>
    %430 = arith.addf %424, %429 : vector<8x256xf32>
    %431 = vector.extract_strided_slice %401 {offsets = [40, 0], sizes = [8, 256], strides = [1, 1]} : vector<72x256xf32> to vector<8x256xf32>
    %432 = arith.truncf %431 : vector<8x256xf32> to vector<8x256xbf16>
    %c5_258 = arith.constant 5 : index
    %c0_259 = arith.constant 0 : index
    %c0_260 = arith.constant 0 : index
    %433 = vector.load %arg22[%c5_258, %c0_259, %c0_260] : memref<9x256x256xbf16, #tpu.memory_space<vmem>>, vector<1x256x256xbf16>
    %434 = vector.shape_cast %433 : vector<1x256x256xbf16> to vector<256x256xbf16>
    %cst_261 = arith.constant dense<0.000000e+00> : vector<8x256xf32>
    %435 = tpu.matmul %432, %434, %cst_261 {dimension_numbers = #tpu.dot_dimension_numbers<[1], [0], [0], [1], [0, 0, 1, 1], [], []>} : vector<8x256xbf16>, vector<256x256xbf16>, vector<8x256xf32> -> vector<8x256xf32>
    %436 = arith.addf %430, %435 : vector<8x256xf32>
    %437 = vector.extract_strided_slice %401 {offsets = [48, 0], sizes = [8, 256], strides = [1, 1]} : vector<72x256xf32> to vector<8x256xf32>
    %438 = arith.truncf %437 : vector<8x256xf32> to vector<8x256xbf16>
    %c6_262 = arith.constant 6 : index
    %c0_263 = arith.constant 0 : index
    %c0_264 = arith.constant 0 : index
    %439 = vector.load %arg22[%c6_262, %c0_263, %c0_264] : memref<9x256x256xbf16, #tpu.memory_space<vmem>>, vector<1x256x256xbf16>
    %440 = vector.shape_cast %439 : vector<1x256x256xbf16> to vector<256x256xbf16>
    %cst_265 = arith.constant dense<0.000000e+00> : vector<8x256xf32>
    %441 = tpu.matmul %438, %440, %cst_265 {dimension_numbers = #tpu.dot_dimension_numbers<[1], [0], [0], [1], [0, 0, 1, 1], [], []>} : vector<8x256xbf16>, vector<256x256xbf16>, vector<8x256xf32> -> vector<8x256xf32>
    %442 = arith.addf %436, %441 : vector<8x256xf32>
    %443 = vector.extract_strided_slice %401 {offsets = [56, 0], sizes = [8, 256], strides = [1, 1]} : vector<72x256xf32> to vector<8x256xf32>
    %444 = arith.truncf %443 : vector<8x256xf32> to vector<8x256xbf16>
    %c7_266 = arith.constant 7 : index
    %c0_267 = arith.constant 0 : index
    %c0_268 = arith.constant 0 : index
    %445 = vector.load %arg22[%c7_266, %c0_267, %c0_268] : memref<9x256x256xbf16, #tpu.memory_space<vmem>>, vector<1x256x256xbf16>
    %446 = vector.shape_cast %445 : vector<1x256x256xbf16> to vector<256x256xbf16>
    %cst_269 = arith.constant dense<0.000000e+00> : vector<8x256xf32>
    %447 = tpu.matmul %444, %446, %cst_269 {dimension_numbers = #tpu.dot_dimension_numbers<[1], [0], [0], [1], [0, 0, 1, 1], [], []>} : vector<8x256xbf16>, vector<256x256xbf16>, vector<8x256xf32> -> vector<8x256xf32>
    %448 = arith.addf %442, %447 : vector<8x256xf32>
    %449 = vector.extract_strided_slice %401 {offsets = [64, 0], sizes = [8, 256], strides = [1, 1]} : vector<72x256xf32> to vector<8x256xf32>
    %450 = arith.truncf %449 : vector<8x256xf32> to vector<8x256xbf16>
    %c8_270 = arith.constant 8 : index
    %c0_271 = arith.constant 0 : index
    %c0_272 = arith.constant 0 : index
    %451 = vector.load %arg22[%c8_270, %c0_271, %c0_272] : memref<9x256x256xbf16, #tpu.memory_space<vmem>>, vector<1x256x256xbf16>
    %452 = vector.shape_cast %451 : vector<1x256x256xbf16> to vector<256x256xbf16>
    %cst_273 = arith.constant dense<0.000000e+00> : vector<8x256xf32>
    %453 = tpu.matmul %450, %452, %cst_273 {dimension_numbers = #tpu.dot_dimension_numbers<[1], [0], [0], [1], [0, 0, 1, 1], [], []>} : vector<8x256xbf16>, vector<256x256xbf16>, vector<8x256xf32> -> vector<8x256xf32>
    %454 = arith.addf %448, %453 : vector<8x256xf32>
    %c0_274 = arith.constant 0 : index
    %c0_275 = arith.constant 0 : index
    %455 = vector.load %arg23[%c0_274, %c0_275] : memref<8x1xf32, #tpu.memory_space<vmem>>, vector<8x1xf32>
    %456 = vector.broadcast %455 : vector<8x1xf32> to vector<8x256xf32>
    %457 = arith.addf %454, %456 : vector<8x256xf32>
    %cst_276 = arith.constant 5.000000e-01 : f32
    %458 = vector.broadcast %cst_276 : f32 to vector<8x256xf32>
    %459 = arith.mulf %458, %457 : vector<8x256xf32>
    %cst_277 = arith.constant 4.471500e-02 : f32
    %460 = vector.broadcast %cst_277 : f32 to vector<8x256xf32>
    %461 = arith.mulf %460, %457 : vector<8x256xf32>
    %462 = arith.mulf %461, %457 : vector<8x256xf32>
    %463 = arith.mulf %462, %457 : vector<8x256xf32>
    %464 = arith.addf %457, %463 : vector<8x256xf32>
    %cst_278 = arith.constant 0.797884583 : f32
    %465 = vector.broadcast %cst_278 : f32 to vector<8x256xf32>
    %466 = arith.mulf %465, %464 : vector<8x256xf32>
    %467 = math.tanh %466 : vector<8x256xf32>
    %cst_279 = arith.constant 1.000000e+00 : f32
    %468 = vector.broadcast %cst_279 : f32 to vector<8x256xf32>
    %469 = arith.addf %468, %467 : vector<8x256xf32>
    %470 = arith.mulf %459, %469 : vector<8x256xf32>
    %c0_280 = arith.constant 0 : index
    %c0_281 = arith.constant 0 : index
    %471 = vector.load %arg24[%c0_280, %c0_281] : memref<8x256xf32, #tpu.memory_space<vmem>>, vector<8x256xf32>
    tpu.vector_store %arg24[%c0_280, %c0_281], %470 {strides = array<i32>} : memref<8x256xf32, #tpu.memory_space<vmem>>, vector<8x256xf32>,
    return
  }
  func.func @transform_0(%arg0: i32) -> (i32, i32) {
    %c0_i32 = arith.constant 0 : i32
    %c0_i32_0 = arith.constant 0 : i32
    return %arg0, %c0_i32 : i32, i32
  }
  func.func @transform_1(%arg0: i32) -> (i32, i32) {
    %c0_i32 = arith.constant 0 : i32
    %c0_i32_0 = arith.constant 0 : i32
    %c0_i32_1 = arith.constant 0 : i32
    return %c0_i32, %c0_i32_0 : i32, i32
  }
  func.func @transform_2(%arg0: i32) -> (i32, i32) {
    %c0_i32 = arith.constant 0 : i32
    %c0_i32_0 = arith.constant 0 : i32
    %c0_i32_1 = arith.constant 0 : i32
    return %c0_i32, %c0_i32_0 : i32, i32
  }
  func.func @transform_3(%arg0: i32) -> (i32, i32) {
    %c0_i32 = arith.constant 0 : i32
    %c0_i32_0 = arith.constant 0 : i32
    %c0_i32_1 = arith.constant 0 : i32
    return %c0_i32, %c0_i32_0 : i32, i32
  }
  func.func @transform_4(%arg0: i32) -> (i32, i32) {
    %c0_i32 = arith.constant 0 : i32
    %c0_i32_0 = arith.constant 0 : i32
    %c0_i32_1 = arith.constant 0 : i32
    return %c0_i32, %c0_i32_0 : i32, i32
  }
  func.func @transform_5(%arg0: i32) -> (i32, i32) {
    %c0_i32 = arith.constant 0 : i32
    %c0_i32_0 = arith.constant 0 : i32
    %c0_i32_1 = arith.constant 0 : i32
    return %c0_i32, %c0_i32_0 : i32, i32
  }
  func.func @transform_6(%arg0: i32) -> (i32, i32, i32) {
    %c0_i32 = arith.constant 0 : i32
    %c0_i32_0 = arith.constant 0 : i32
    %c0_i32_1 = arith.constant 0 : i32
    %c0_i32_2 = arith.constant 0 : i32
    return %c0_i32, %c0_i32_0, %c0_i32_1 : i32, i32, i32
  }
  func.func @transform_7(%arg0: i32) -> (i32, i32) {
    %c0_i32 = arith.constant 0 : i32
    %c0_i32_0 = arith.constant 0 : i32
    %c0_i32_1 = arith.constant 0 : i32
    return %c0_i32, %c0_i32_0 : i32, i32
  }
  func.func @transform_8(%arg0: i32) -> (i32, i32) {
    %c0_i32 = arith.constant 0 : i32
    %c0_i32_0 = arith.constant 0 : i32
    %c0_i32_1 = arith.constant 0 : i32
    return %c0_i32, %c0_i32_0 : i32, i32
  }
  func.func @transform_9(%arg0: i32) -> (i32, i32, i32) {
    %c0_i32 = arith.constant 0 : i32
    %c0_i32_0 = arith.constant 0 : i32
    %c0_i32_1 = arith.constant 0 : i32
    %c0_i32_2 = arith.constant 0 : i32
    return %c0_i32, %c0_i32_0, %c0_i32_1 : i32, i32, i32
  }
  func.func @transform_10(%arg0: i32) -> (i32, i32) {
    %c0_i32 = arith.constant 0 : i32
    %c0_i32_0 = arith.constant 0 : i32
    %c0_i32_1 = arith.constant 0 : i32
    return %c0_i32, %c0_i32_0 : i32, i32
  }
  func.func @transform_11(%arg0: i32) -> (i32, i32) {
    %c0_i32 = arith.constant 0 : i32
    %c0_i32_0 = arith.constant 0 : i32
    %c0_i32_1 = arith.constant 0 : i32
    return %c0_i32, %c0_i32_0 : i32, i32
  }
  func.func @transform_12(%arg0: i32) -> (i32, i32, i32) {
    %c0_i32 = arith.constant 0 : i32
    %c0_i32_0 = arith.constant 0 : i32
    %c0_i32_1 = arith.constant 0 : i32
    %c0_i32_2 = arith.constant 0 : i32
    return %c0_i32, %c0_i32_0, %c0_i32_1 : i32, i32, i32
  }
  func.func @transform_13(%arg0: i32) -> (i32, i32) {
    %c0_i32 = arith.constant 0 : i32
    %c0_i32_0 = arith.constant 0 : i32
    %c0_i32_1 = arith.constant 0 : i32
    return %c0_i32, %c0_i32_0 : i32, i32
  }
  func.func @transform_14(%arg0: i32) -> (i32, i32) {
    %c0_i32 = arith.constant 0 : i32
    %c0_i32_0 = arith.constant 0 : i32
    %c0_i32_1 = arith.constant 0 : i32
    return %c0_i32, %c0_i32_0 : i32, i32
  }
  func.func @transform_15(%arg0: i32) -> (i32, i32, i32) {
    %c0_i32 = arith.constant 0 : i32
    %c0_i32_0 = arith.constant 0 : i32
    %c0_i32_1 = arith.constant 0 : i32
    %c0_i32_2 = arith.constant 0 : i32
    return %c0_i32, %c0_i32_0, %c0_i32_1 : i32, i32, i32
  }
  func.func @transform_16(%arg0: i32) -> (i32, i32) {
    %c0_i32 = arith.constant 0 : i32
    %c0_i32_0 = arith.constant 0 : i32
    %c0_i32_1 = arith.constant 0 : i32
    return %c0_i32, %c0_i32_0 : i32, i32
  }
  func.func @transform_17(%arg0: i32) -> (i32, i32) {
    %c0_i32 = arith.constant 0 : i32
    %c0_i32_0 = arith.constant 0 : i32
    %c0_i32_1 = arith.constant 0 : i32
    return %c0_i32, %c0_i32_0 : i32, i32
  }
  func.func @transform_18(%arg0: i32) -> (i32, i32, i32) {
    %c0_i32 = arith.constant 0 : i32
    %c0_i32_0 = arith.constant 0 : i32
    %c0_i32_1 = arith.constant 0 : i32
    %c0_i32_2 = arith.constant 0 : i32
    return %c0_i32, %c0_i32_0, %c0_i32_1 : i32, i32, i32
  }
  func.func @transform_19(%arg0: i32) -> (i32, i32) {
    %c0_i32 = arith.constant 0 : i32
    %c0_i32_0 = arith.constant 0 : i32
    %c0_i32_1 = arith.constant 0 : i32
    return %c0_i32, %c0_i32_0 : i32, i32
  }
  func.func @transform_20(%arg0: i32) -> (i32, i32) {
    %c0_i32 = arith.constant 0 : i32
    %c0_i32_0 = arith.constant 0 : i32
    %c0_i32_1 = arith.constant 0 : i32
    return %c0_i32, %c0_i32_0 : i32, i32
  }
  func.func @transform_21(%arg0: i32) -> (i32, i32, i32) {
    %c0_i32 = arith.constant 0 : i32
    %c0_i32_0 = arith.constant 0 : i32
    %c0_i32_1 = arith.constant 0 : i32
    %c0_i32_2 = arith.constant 0 : i32
    return %c0_i32, %c0_i32_0, %c0_i32_1 : i32, i32, i32
  }
  func.func @transform_22(%arg0: i32) -> (i32, i32) {
    %c0_i32 = arith.constant 0 : i32
    %c0_i32_0 = arith.constant 0 : i32
    %c0_i32_1 = arith.constant 0 : i32
    return %c0_i32, %c0_i32_0 : i32, i32
  }
  func.func @transform_23(%arg0: i32) -> (i32, i32) {
    %c0_i32 = arith.constant 0 : i32
    %c0_i32_0 = arith.constant 0 : i32
    return %arg0, %c0_i32 : i32, i32
  }
}

</mosaic_0001>

<bundles_post_ra>
// kernel: tpu_custom_call.1
= control target key start
LH: loop header
LB: loop body
LE: loop exit
PB: predicated region body
PF: predicated region fallthrough
CT: control target
= control target key end

     0   :  { %s28595_s0 = inlined_call_operand.vmem [shape: f32[16,4], index: 0, kind: input, shape index: {}]   ;;  %s28596_s1 = inlined_call_operand.vmem [shape: bf16[128,8], index: 1, kind: input, shape index: {}]   ;;  %s28597_s2 = inlined_call_operand.vmem [shape: f32[128,1], index: 2, kind: input, shape index: {}]   ;;  %s28598_s3 = inlined_call_operand.hbm [shape: bf16[128,128], index: 3, kind: input, shape index: {}]   ;;  %s28599_s4 = inlined_call_operand.vmem [shape: f32[128,1], index: 4, kind: input, shape index: {}]   ;;  %s28600_s5 = inlined_call_operand.hbm [shape: bf16[1152,128], index: 5, kind: input, shape index: {}]   ;;  %s28601_s6 = inlined_call_operand.hbm [shape: bf16[9,4,16], index: 6, kind: input, shape index: {}]   ;;  %s28602_s7 = inlined_call_operand.vmem [shape: f32[128,1], index: 7, kind: input, shape index: {}]   ;;  %s28603_s8 = inlined_call_operand.hbm [shape: bf16[1152,128], index: 8, kind: input, shape index: {}]   ;;  %s28604_s9 = inlined_call_operand.hbm [shape: bf16[9,16,16], index: 9, kind: input, shape index: {}]   ;;  %s28605_s10 = inlined_call_operand.vmem [shape: f32[128,1], index: 10, kind: input, shape index: {}]   ;;  %s28606_s11 = inlined_call_operand.hbm [shape: bf16[1152,128], index: 11, kind: input, shape index: {}]   ;;  %s28607_s12 = inlined_call_operand.hbm [shape: bf16[9,16,64], index: 12, kind: input, shape index: {}]   ;;  %s28608_s13 = inlined_call_operand.vmem [shape: f32[128,1], index: 13, kind: input, shape index: {}]   ;;  %s28609_s14 = inlined_call_operand.hbm [shape: bf16[1152,128], index: 14, kind: input, shape index: {}]   ;;  %s28610_s15 = inlined_call_operand.hbm [shape: bf16[9,64,64], index: 15, kind: input, shape index: {}]   ;;  %s28611_s16 = inlined_call_operand.vmem [shape: f32[128,1], index: 16, kind: input, shape index: {}]   ;;  %s28612_s17 = inlined_call_operand.hbm [shape: bf16[1152,128], index: 17, kind: input, shape index: {}]   ;;  %s28613_s18 = inlined_call_operand.hbm [shape: bf16[9,64,256], index: 18, kind: input, shape index: {}]   ;;  %s28614_s19 = inlined_call_operand.vmem [shape: f32[128,1], index: 19, kind: input, shape index: {}]   ;;  %s28615_s20 = inlined_call_operand.hbm [shape: bf16[72,128], index: 20, kind: input, shape index: {}]   ;;  %s28616_s21 = inlined_call_operand.hbm [shape: bf16[9,256,256], index: 21, kind: input, shape index: {}]   ;;  %s28617_s22 = inlined_call_operand.vmem [shape: f32[8,1], index: 22, kind: input, shape index: {}]   ;;  %s28618_s23 = inlined_call_operand.hbm [shape: f32[16,256], index: 23, kind: output, shape index: {}]  }
   0x1   :  { %28644 = sst [smem:[#allocation40_spill]] %s28595_s0 }
   0x2   :  { %28645 = sst [smem:[#allocation41_spill]] %s28596_s1 }
   0x3   :  { %28646 = sst [smem:[#allocation42_spill]] %s28597_s2 }
   0x4   :  { %28647 = sst [smem:[#allocation43_spill]] %s28598_s3 }
   0x5   :  { %28648 = sst [smem:[#allocation44_spill]] %s28599_s4 }
   0x6   :  { %28649 = sst [smem:[#allocation45_spill]] %s28600_s5 }
   0x7   :  { %28650 = sst [smem:[#allocation46_spill]] %s28601_s6 }
   0x8   :  { %28651 = sst [smem:[#allocation47_spill]] %s28602_s7 }
   0x9   :  { %28652 = sst [smem:[#allocation48_spill]] %s28603_s8 }
   0xa   :  { %28653 = sst [smem:[#allocation49_spill]] %s28606_s11 }
   0xb   :  { %28654 = sst [smem:[#allocation50_spill]] %s28609_s14 }
   0xc   :  { %28655 = sst [smem:[#allocation51_spill]] %s28611_s16 }
   0xd   :  { %28656 = sst [smem:[#allocation52_spill]] %s28614_s19 }
   0xe   :  { %28657 = sst [smem:[#allocation53_spill]] %s28617_s22 }
   0xf   :  { %28658 = sst [smem:[#allocation54_spill]] %s28618_s23 }
  0x10   :  { %28 = vsyncpa [#allocation3], 0 }
  0x11   :  { %29 = vsyncpa [#allocation6], 0 }
  0x12   :  { %30 = vsyncpa [#allocation9], 0 }
  0x13   :  { %31 = vsyncpa [#allocation12], 0 }
  0x14   :  { %32 = vsyncpa [#allocation15], 0 }
  0x15   :  { %33 = vsyncpa [#allocation18], 0 }
  0x16   :  { %34 = vsyncpa [#allocation21], 0 }
  0x17   :  { %35 = vsyncpa [#allocation4], 0 }
  0x18   :  { %37 = vsyncpa [#allocation4 + $0x1], 0  ;;  %s25532_s4 = smov 0   ;;  %s25534_s30 = smov 0  }
  0x19   :  { %s25536_s24 = smov 0   ;;  %s25538_s25 = smov 0  }
  0x1a LB: > { %28659 = sst [smem:[#allocation32_spill]] %s25377_s4  ;;  %s25553_s5 = sadd.s32 4294967295, %s25389_s25   ;;  %s25389_s25 = sphi %s25538_s25, %s28713_s25   ;;  %s25385_s24 = sphi %s25536_s24, %s28716_s24   ;;  %s25381_s30 = sphi %s25534_s30, %s28715_s30   ;;  %s25377_s4 = sphi %s25532_s4, %s28714_s4  }
  0x1b   : > { %28660 = sst [smem:[#allocation33_spill]] %s25381_s30  ;;  %s19198_s1 = sadd.s32 4294967294, %s25389_s25  }
  0x1c   : > { %28661 = sst [smem:[#allocation34_spill]] %s25385_s24  ;;  %s25557_s26 = sadd.s32 1, %s25389_s25  }
  0x1d   : > { %28662 = sst [smem:[#allocation35_spill]] %s25389_s25  ;;  %s538_s2 = sadd.s32 1, %s25385_s24 }
  0x1e   : > { %28663 = sst [smem:[#allocation36_spill]] %s25557_s26  ;;  %s535_s6 = ssub.s32 %s25389_s25, %s25557_s26 }
  0x1f   : > { %p548_p0 = scmp.ne.s32.totalorder %s25385_s24, %s25381_s30  ;;  %p536_p1 = scmp.eq.s32.totalorder %s535_s6, 0 }
  0x20   : > { %p549_p2 = scmp.eq.s32.totalorder %s25553_s5, 1  ;;  %p554_p3 = scmp.ne.s32.totalorder %s25381_s30, %s25377_s4 }
  0x21   : > { %p555_p4 = scmp.eq.s32.totalorder %s19198_s1, 1  ;;  %p19199_p7 = scmp.ge.s32.totalorder %s25389_s25, 1 }
  0x22   : > { %s25568_s27 = scalar_select %p536_p1, %s25385_s24, %s538_s2  }
  0x23   : > { %p25570_p5 = por %p549_p2, %p548_p0  ;;  %p25574_p6 = por %p555_p4, %p554_p3 }
  0x24   : > { %28664 = sst [smem:[#allocation37_spill]] %s25568_s27  ;;  %p562_p8 = scmp.lt.s32.totalorder %s25389_s25, 3 }
  0x25   : > { %s28665_s7 = scalar_select %p25570_p5, 1, 0 }
  0x26   : > { %s28667_s28 = scalar_select %p25574_p6, 1, 0 }
  0x27   : > { %28666 = sst [smem:[#allocation38_spill]] %s28665_s7  ;;  %p28636_p9 = scmp.eq.s32.totalorder %s25553_s5, 0 }
  0x28   : > { %28668 = sst [smem:[#allocation39_spill]] %s28667_s28  ;;  %p25581_p10 = pnand %p19199_p7, %p562_p8 }
  0x29   : > { %s25391_s3 = smov [#allocation5]   ;;  %s25392_s2 = smov [#allocation8]  }
  0x2a   : > { %s28669_s29 = scalar_select %p25581_p10, 1, 0 }
  0x2b   : > { %p23575_p11 = pneg %p25581_p10  ;;  %s596_s0 = sshll.u32 %s25391_s3, 4  ;;  %s25587_s0 = int_to_ptr.vmem [resolvable:$true] %s596_s0 }
  0x2c   : > { %s625_s6 = sshll.u32 %s25392_s2, 4  ;;  %s25393_s27 = smov [#allocation11]   ;;  %s25595_s6 = int_to_ptr.vmem [resolvable:$true] %s625_s6 }
  0x2d   : > { %p25591_p12 = pnand %p28636_p9, %p23575_p11  ;;  %s25597_s24 = sshll.u32 %s25393_s27, 4  ;;  %s655_s24 = int_to_ptr.vmem [resolvable:$true] %s25597_s24 }
  0x2e   : > { %s28671_s4 = sld [smem:[#allocation45_spill]] }
  0x2f   : > { %p25607_p0 = pneg %p25591_p12 }
  0x34   : > { %s28672_s23 = smov %s28671_s4  ;;  %s24935_s25 = scalar_lea.hbm %s28671_s4, 9216 }
  0x35   : > { %p24936_p13 = scmp.ne.s32.totalorder %s28672_s23, %s24935_s25  ;;  %p24942_p3 = scmp.lt.u32.totalorder %s24935_s25, %s28672_s23 }
  0x37   : > { %p24938_p1 = pnand %p25607_p0, %p24936_p13 }
  0x39   : > { %p24939_p2 = pneg %p24938_p1 }
  0x3b   : > { %p24944_p4 = pnand %p24942_p3, %p24939_p2 }
  0x3d   : > { %24947 = shalt.err (!%p24944_p4)
}
  0x3e   : > { %s24948_s4 = scalar_lea.vmem %s25587_s0, 9216  ;;  %p24956_p9 = scmp.lt.s32.totalorder %s25587_s0, %s25587_s0 }
  0x3f   : > { %p24949_p7 = scmp.ne.s32.totalorder %s25587_s0, %s24948_s4  ;;  %p24957_p6 = scmp.lt.s32.totalorder %s24948_s4, %s24948_s4 }
  0x41   : > { %p24951_p8 = pnand %p24949_p7, %p25607_p0  ;;  %p24958_p13 = por %p24957_p6, %p24956_p9 }
  0x43   : > { %p24952_p11 = pneg %p24951_p8 }
  0x45   : > { %p24959_p1 = pnand %p24958_p13, %p24952_p11 }
  0x47   : > { %24962 = shalt.err (!%p24959_p1)
}
  0x48   : > { %s28641_s26 = smov 64   ;;  %s25395_s25 = smov 4  }
  0x49   : > { %23581 = dma.hbm_to_vmem [thread:$0]  (!%p25591_p12), %s28672_s23, 9216, %s25587_s0, [#allocation6], %s28641_s26, %s28641_s26, %s25395_s25  }
  0x4a   : > { %s28674_s8 = sld [smem:[#allocation48_spill]] }
  0x50   : > { %s24963_s27 = scalar_lea.hbm %s28674_s8, 9216 }
  0x51   : > { %p24964_p6 = scmp.ne.s32.totalorder %s28674_s8, %s24963_s27  ;;  %p24970_p3 = scmp.lt.u32.totalorder %s24963_s27, %s28674_s8 }
  0x53   : > { %p24966_p9 = pnand %p24964_p6, %p25607_p0 }
  0x55   : > { %p24967_p2 = pneg %p24966_p9 }
  0x57   : > { %p24972_p4 = pnand %p24970_p3, %p24967_p2 }
  0x59   : > { %24975 = shalt.err (!%p24972_p4)
}
  0x5a   : > { %s24976_s0 = scalar_lea.vmem %s25595_s6, 9216  ;;  %p24984_p13 = scmp.lt.s32.totalorder %s25595_s6, %s25595_s6 }
  0x5b   : > { %p24977_p7 = scmp.ne.s32.totalorder %s25595_s6, %s24976_s0  ;;  %p24985_p1 = scmp.lt.s32.totalorder %s24976_s0, %s24976_s0 }
  0x5d   : > { %p24979_p8 = pnand %p24977_p7, %p25607_p0  ;;  %p24986_p6 = por %p24985_p1, %p24984_p13 }
  0x5f   : > { %p24980_p11 = pneg %p24979_p8 }
  0x61   : > { %p24987_p9 = pnand %p24986_p6, %p24980_p11 }
  0x63   : > { %24990 = shalt.err (!%p24987_p9)
}
  0x64   : > { %23587 = dma.hbm_to_vmem [thread:$0]  (!%p25591_p12), %s28674_s8, 9216, %s25595_s6, [#allocation9], %s28641_s26, %s28641_s26, %s25395_s25  }
  0x65   : > { %s28675_s11 = sld [smem:[#allocation49_spill]] }
  0x6b   : > { %s24991_s28 = scalar_lea.hbm %s28675_s11, 9216 }
  0x6c   : > { %p24992_p2 = scmp.ne.s32.totalorder %s28675_s11, %s24991_s28  ;;  %p24998_p7 = scmp.lt.u32.totalorder %s24991_s28, %s28675_s11 }
  0x6e   : > { %p24994_p3 = pnand %p24992_p2, %p25607_p0 }
  0x70   : > { %p24995_p4 = pneg %p24994_p3 }
  0x72   : > { %p25000_p8 = pnand %p24998_p7, %p24995_p4 }
  0x74   : > { %25003 = shalt.err (!%p25000_p8)
}
  0x75   : > { %s25004_s0 = scalar_lea.vmem %s655_s24, 9216  ;;  %p25012_p6 = scmp.lt.s32.totalorder %s655_s24, %s655_s24 }
  0x76   : > { %p25005_p11 = scmp.ne.s32.totalorder %s655_s24, %s25004_s0  ;;  %p25013_p9 = scmp.lt.s32.totalorder %s25004_s0, %s25004_s0 }
  0x78   : > { %p25007_p13 = pnand %p25005_p11, %p25607_p0  ;;  %p25014_p5 = por %p25013_p9, %p25012_p6 }
  0x7a   : > { %p25008_p1 = pneg %p25007_p13 }
  0x7c   : > { %p25015_p10 = pnand %p25014_p5, %p25008_p1 }
  0x7e   : > { %25018 = shalt.err (!%p25015_p10)
}
  0x7f   : > { %23593 = dma.hbm_to_vmem [thread:$0]  (!%p25591_p12), %s28675_s11, 9216, %s655_s24, [#allocation12], %s28641_s26, %s28641_s26, %s25395_s25  }
  0x80   : > { %s25396_s19 = smov [#allocation14]   ;;  %s25397_s7 = smov [#allocation17]  }
  0x81   : > { %s683_s22 = sshll.u32 %s25396_s19, 4  ;;  %s712_s28 = sshll.u32 %s25397_s7, 4  ;;  %s684_s22 = int_to_ptr.vmem [resolvable:$true] %s683_s22  ;;  %s713_s28 = int_to_ptr.vmem [resolvable:$true] %s712_s28 }
  0x82   : > { %s28676_s14 = sld [smem:[#allocation50_spill]] }
  0x88   : > { %s25019_s27 = scalar_lea.hbm %s28676_s14, 9216 }
  0x89   : > { %p25020_p5 = scmp.ne.s32.totalorder %s28676_s14, %s25019_s27  ;;  %p25026_p3 = scmp.lt.u32.totalorder %s25019_s27, %s28676_s14 }
  0x8b   : > { %p25022_p10 = pnand %p25020_p5, %p25607_p0 }
  0x8d   : > { %p25023_p2 = pneg %p25022_p10 }
  0x8f   : > { %p25028_p4 = pnand %p25026_p3, %p25023_p2 }
  0x91   : > { %25031 = shalt.err (!%p25028_p4)
}
  0x92   : > { %s25032_s24 = scalar_lea.vmem %s684_s22, 9216  ;;  %p25040_p13 = scmp.lt.s32.totalorder %s684_s22, %s684_s22 }
  0x93   : > { %p25033_p7 = scmp.ne.s32.totalorder %s684_s22, %s25032_s24  ;;  %p25041_p1 = scmp.lt.s32.totalorder %s25032_s24, %s25032_s24 }
  0x95   : > { %p25035_p8 = pnand %p25033_p7, %p25607_p0  ;;  %p25042_p6 = por %p25041_p1, %p25040_p13 }
  0x97   : > { %p25036_p11 = pneg %p25035_p8 }
  0x99   : > { %p25043_p9 = pnand %p25042_p6, %p25036_p11 }
  0x9b   : > { %25046 = shalt.err (!%p25043_p9)
}
  0x9c   : > { %23599 = dma.hbm_to_vmem [thread:$0]  (!%p25591_p12), %s28676_s14, 9216, %s684_s22, [#allocation15], %s28641_s26, %s28641_s26, %s25395_s25  }
  0x9d   : > { %s25047_s3 = scalar_lea.hbm %s28612_s17, 9216 }
  0x9e   : > { %p25048_p5 = scmp.ne.s32.totalorder %s28612_s17, %s25047_s3  ;;  %p25054_p3 = scmp.lt.u32.totalorder %s25047_s3, %s28612_s17 }
  0xa0   : > { %p25050_p10 = pnand %p25048_p5, %p25607_p0 }
  0xa2   : > { %p25051_p2 = pneg %p25050_p10 }
  0xa4   : > { %p25056_p4 = pnand %p25054_p3, %p25051_p2 }
  0xa6   : > { %25059 = shalt.err (!%p25056_p4)
}
  0xa7   : > { %s25060_s6 = scalar_lea.vmem %s713_s28, 9216  ;;  %p25068_p13 = scmp.lt.s32.totalorder %s713_s28, %s713_s28 }
  0xa8   : > { %p25061_p7 = scmp.ne.s32.totalorder %s713_s28, %s25060_s6  ;;  %p25069_p1 = scmp.lt.s32.totalorder %s25060_s6, %s25060_s6 }
  0xaa   : > { %p25063_p8 = pnand %p25061_p7, %p25607_p0  ;;  %p25070_p6 = por %p25069_p1, %p25068_p13 }
  0xac   : > { %p25064_p11 = pneg %p25063_p8 }
  0xae   : > { %p25071_p9 = pnand %p25070_p6, %p25064_p11 }
  0xb0   : > { %25074 = shalt.err (!%p25071_p9)
}
  0xb1   : > { %23605 = dma.hbm_to_vmem [thread:$0]  (!%p25591_p12), %s28612_s17, 9216, %s713_s28, [#allocation18], %s28641_s26, %s28641_s26, %s25395_s25  }
  0xb2   : > { %s25398_s8 = smov [#allocation20]   ;;  %s25399_s19 = smov [#allocation2]  }
  0xb3   : > { %s741_s16 = sshll.u32 %s25398_s8, 4  ;;  %s580_s7 = sshll.u32 %s25399_s19, 4  ;;  %s742_s16 = int_to_ptr.vmem [resolvable:$true] %s741_s16  ;;  %s581_s7 = int_to_ptr.vmem [resolvable:$true] %s580_s7 }
  0xb4   : > { %s25075_s27 = scalar_lea.hbm %s28615_s20, 576 }
  0xb5   : > { %p25076_p5 = scmp.ne.s32.totalorder %s28615_s20, %s25075_s27  ;;  %p25082_p3 = scmp.lt.u32.totalorder %s25075_s27, %s28615_s20 }
  0xb7   : > { %p25078_p10 = pnand %p25076_p5, %p25607_p0 }
  0xb9   : > { %p25079_p2 = pneg %p25078_p10 }
  0xbb   : > { %p25084_p4 = pnand %p25082_p3, %p25079_p2 }
  0xbd   : > { %25087 = shalt.err (!%p25084_p4)
}
  0xbe   : > { %s25088_s28 = scalar_lea.vmem %s742_s16, 576  ;;  %p25096_p13 = scmp.lt.s32.totalorder %s742_s16, %s742_s16 }
  0xbf   : > { %p25089_p7 = scmp.ne.s32.totalorder %s742_s16, %s25088_s28  ;;  %p25097_p1 = scmp.lt.s32.totalorder %s25088_s28, %s25088_s28 }
  0xc1   : > { %p25091_p8 = pnand %p25089_p7, %p25607_p0  ;;  %p25098_p6 = por %p25097_p1, %p25096_p13 }
  0xc3   : > { %p25092_p11 = pneg %p25091_p8 }
  0xc5   : > { %p25099_p9 = pnand %p25098_p6, %p25092_p11 }
  0xc7   : > { %25102 = shalt.err (!%p25099_p9)
}
  0xc8   : > { %23611 = dma.hbm_to_vmem [thread:$0]  (!%p25591_p12), %s28615_s20, 576, %s742_s16, [#allocation21], %s28641_s26, %s28641_s26, %s25395_s25  }
  0xc9   : > { %s28677_s2 = sld [smem:[#allocation43_spill]] }
  0xcf   : > { %s25103_s27 = scalar_lea.hbm %s28677_s2, 1024 }
  0xd0   : > { %p25104_p5 = scmp.ne.s32.totalorder %s28677_s2, %s25103_s27  ;;  %p25110_p3 = scmp.lt.u32.totalorder %s25103_s27, %s28677_s2 }
  0xd2   : > { %p25106_p10 = pnand %p25104_p5, %p25607_p0 }
  0xd4   : > { %p25107_p2 = pneg %p25106_p10 }
  0xd6   : > { %p25112_p4 = pnand %p25110_p3, %p25107_p2 }
  0xd8   : > { %25115 = shalt.err (!%p25112_p4)
}
  0xd9   : > { %s25116_s28 = scalar_lea.vmem %s581_s7, 1024  ;;  %p25124_p13 = scmp.lt.s32.totalorder %s581_s7, %s581_s7 }
  0xda   : > { %p25117_p7 = scmp.ne.s32.totalorder %s581_s7, %s25116_s28  ;;  %p25125_p1 = scmp.lt.s32.totalorder %s25116_s28, %s25116_s28 }
  0xdc   : > { %p25119_p8 = pnand %p25117_p7, %p25607_p0  ;;  %p25126_p6 = por %p25125_p1, %p25124_p13 }
  0xde   : > { %p25120_p11 = pneg %p25119_p8 }
  0xe0   : > { %p25127_p9 = pnand %p25126_p6, %p25120_p11 }
  0xe2   : > { %25130 = shalt.err (!%p25127_p9)
}
  0xe3   : > { %23578 = dma.hbm_to_vmem [thread:$0]  (!%p25591_p12), %s28677_s2, 1024, %s581_s7, [#allocation3], %s28641_s26, %s28641_s26, %s25395_s25  }
  0xe4   : > { %s25400_s8 = smov [#allocation7]   ;;  %s28678_s4 = sld [smem:[#allocation46_spill]] }
  0xe5   : > { %s609_s19 = sshll.u32 %s25400_s8, 4  ;;  %s610_s19 = int_to_ptr.vmem [resolvable:$true] %s609_s19 }
  0xea   : > { %s28679_s0 = smov %s28678_s4  ;;  %s25131_s6 = scalar_lea.hbm %s28678_s4, 288 }
  0xeb   : > { %p25132_p5 = scmp.ne.s32.totalorder %s28679_s0, %s25131_s6  ;;  %p25138_p3 = scmp.lt.u32.totalorder %s25131_s6, %s28679_s0 }
  0xed   : > { %p25134_p10 = pnand %p25132_p5, %p25607_p0 }
  0xef   : > { %p25135_p2 = pneg %p25134_p10 }
  0xf1   : > { %p25140_p4 = pnand %p25138_p3, %p25135_p2 }
  0xf3   : > { %25143 = shalt.err (!%p25140_p4)
}
  0xf4   : > { %s25144_s7 = scalar_lea.vmem %s610_s19, 288  ;;  %p25152_p13 = scmp.lt.s32.totalorder %s610_s19, %s610_s19 }
  0xf5   : > { %p25145_p7 = scmp.ne.s32.totalorder %s610_s19, %s25144_s7  ;;  %p25153_p1 = scmp.lt.s32.totalorder %s25144_s7, %s25144_s7 }
  0xf7   : > { %p25147_p8 = pnand %p25145_p7, %p25607_p0  ;;  %p25154_p6 = por %p25153_p1, %p25152_p13 }
  0xf9   : > { %p25148_p11 = pneg %p25147_p8 }
  0xfb   : > { %p25155_p9 = pnand %p25154_p6, %p25148_p11 }
  0xfd   : > { %25158 = shalt.err (!%p25155_p9)
}
  0xfe   : > { %s25401_s16 = smov 32   ;;  %s25402_s24 = smov 2  }
  0xff   : > { %23584 = dma.hbm_to_vmem [thread:$0]  (!%p25591_p12), %s28679_s0, 288, %s610_s19, [#allocation6], %s25401_s16, %s25401_s16, %s25402_s24  }
 0x100   : > { %s25403_s8 = smov [#allocation10]   ;;  %s25404_s27 = smov [#allocation13]  }
 0x101   : > { %s638_s3 = sshll.u32 %s25403_s8, 4  ;;  %s667_s4 = sshll.u32 %s25404_s27, 4  ;;  %s639_s3 = int_to_ptr.vmem [resolvable:$true] %s638_s3  ;;  %s25781_s4 = int_to_ptr.vmem [resolvable:$true] %s667_s4 }
 0x102   : > { %s25159_s28 = scalar_lea.hbm %s28604_s9, 1152 }
 0x103   : > { %p25160_p5 = scmp.ne.s32.totalorder %s28604_s9, %s25159_s28  ;;  %p25166_p3 = scmp.lt.u32.totalorder %s25159_s28, %s28604_s9 }
 0x105   : > { %p25162_p10 = pnand %p25160_p5, %p25607_p0 }
 0x107   : > { %p25163_p2 = pneg %p25162_p10 }
 0x109   : > { %p25168_p4 = pnand %p25166_p3, %p25163_p2 }
 0x10b   : > { %25171 = shalt.err (!%p25168_p4)
}
 0x10c   : > { %s25172_s16 = scalar_lea.vmem %s639_s3, 1152  ;;  %p25180_p13 = scmp.lt.s32.totalorder %s639_s3, %s639_s3 }
 0x10d   : > { %p25173_p7 = scmp.ne.s32.totalorder %s639_s3, %s25172_s16  ;;  %p25181_p1 = scmp.lt.s32.totalorder %s25172_s16, %s25172_s16 }
 0x10f   : > { %p25175_p8 = pnand %p25173_p7, %p25607_p0  ;;  %p25182_p6 = por %p25181_p1, %p25180_p13 }
 0x111   : > { %p25176_p11 = pneg %p25175_p8 }
 0x113   : > { %p25183_p9 = pnand %p25182_p6, %p25176_p11 }
 0x115   : > { %25186 = shalt.err (!%p25183_p9)
}
 0x116   : > { %s28680_s26 = smov 64   ;;  %s25187_s6 = scalar_lea.hbm %s28607_s12, 1152 }
 0x117   : > { %23590 = dma.hbm_to_vmem [thread:$0]  (!%p25591_p12), %s28604_s9, 1152, %s639_s3, [#allocation9], %s28680_s26, %s28680_s26, %s25395_s25  }
 0x118   : > { %p25188_p5 = scmp.ne.s32.totalorder %s28607_s12, %s25187_s6  ;;  %p25194_p3 = scmp.lt.u32.totalorder %s25187_s6, %s28607_s12 }
 0x11a   : > { %p25190_p10 = pnand %p25188_p5, %p25607_p0 }
 0x11c   : > { %p25191_p2 = pneg %p25190_p10 }
 0x11e   : > { %p25196_p4 = pnand %p25194_p3, %p25191_p2 }
 0x120   : > { %25199 = shalt.err (!%p25196_p4)
}
 0x121   : > { %s25200_s3 = scalar_lea.vmem %s25781_s4, 1152  ;;  %p25208_p13 = scmp.lt.s32.totalorder %s25781_s4, %s25781_s4 }
 0x122   : > { %p25201_p7 = scmp.ne.s32.totalorder %s25781_s4, %s25200_s3  ;;  %p25209_p1 = scmp.lt.s32.totalorder %s25200_s3, %s25200_s3 }
 0x124   : > { %p25203_p8 = pnand %p25201_p7, %p25607_p0  ;;  %p25210_p6 = por %p25209_p1, %p25208_p13 }
 0x126   : > { %p25204_p11 = pneg %p25203_p8 }
 0x128   : > { %p25211_p9 = pnand %p25210_p6, %p25204_p11 }
 0x12a   : > { %25214 = shalt.err (!%p25211_p9)
}
 0x12b   : > { %23596 = dma.hbm_to_vmem [thread:$0]  (!%p25591_p12), %s28607_s12, 1152, %s25781_s4, [#allocation12], %s28680_s26, %s28680_s26, %s25395_s25  }
 0x12c   : > { %s25405_s24 = smov [#allocation16]   ;;  %s25406_s8 = smov [#allocation19]  }
 0x12d   : > { %s696_s14 = sshll.u32 %s25405_s24, 4  ;;  %s725_s27 = sshll.u32 %s25406_s8, 4  ;;  %s697_s14 = int_to_ptr.vmem [resolvable:$true] %s696_s14  ;;  %s25830_s27 = int_to_ptr.vmem [resolvable:$true] %s725_s27 }
 0x12e   : > { %s25215_s28 = scalar_lea.hbm %s28610_s15, 4608 }
 0x12f   : > { %p25216_p5 = scmp.ne.s32.totalorder %s28610_s15, %s25215_s28  ;;  %p25222_p3 = scmp.lt.u32.totalorder %s25215_s28, %s28610_s15 }
 0x131   : > { %p25218_p10 = pnand %p25216_p5, %p25607_p0 }
 0x133   : > { %p25219_p2 = pneg %p25218_p10 }
 0x135   : > { %p25224_p4 = pnand %p25222_p3, %p25219_p2 }
 0x137   : > { %25227 = shalt.err (!%p25224_p4)
}
 0x138   : > { %s25228_s19 = scalar_lea.vmem %s697_s14, 4608  ;;  %p25236_p13 = scmp.lt.s32.totalorder %s697_s14, %s697_s14 }
 0x139   : > { %p25229_p7 = scmp.ne.s32.totalorder %s697_s14, %s25228_s19  ;;  %p25237_p1 = scmp.lt.s32.totalorder %s25228_s19, %s25228_s19 }
 0x13b   : > { %p25231_p8 = pnand %p25229_p7, %p25607_p0  ;;  %p25238_p6 = por %p25237_p1, %p25236_p13 }
 0x13d   : > { %p25232_p11 = pneg %p25231_p8 }
 0x13f   : > { %p25239_p9 = pnand %p25238_p6, %p25232_p11 }
 0x141   : > { %25242 = shalt.err (!%p25239_p9)
}
 0x142   : > { %23602 = dma.hbm_to_vmem [thread:$0]  (!%p25591_p12), %s28610_s15, 4608, %s697_s14, [#allocation15], %s28680_s26, %s28680_s26, %s25395_s25  }
 0x143   : > { %s25243_s22 = scalar_lea.hbm %s28613_s18, 9216 }
 0x144   : > { %p25244_p5 = scmp.ne.s32.totalorder %s28613_s18, %s25243_s22  ;;  %p25250_p3 = scmp.lt.u32.totalorder %s25243_s22, %s28613_s18 }
 0x146   : > { %p25246_p10 = pnand %p25244_p5, %p25607_p0 }
 0x148   : > { %p25247_p2 = pneg %p25246_p10 }
 0x14a   : > { %p25252_p4 = pnand %p25250_p3, %p25247_p2 }
 0x14c   : > { %25255 = shalt.err (!%p25252_p4)
}
 0x14d   : > { %s25256_s25 = scalar_lea.vmem %s25830_s27, 9216  ;;  %p25264_p13 = scmp.lt.s32.totalorder %s25830_s27, %s25830_s27 }
 0x14e   : > { %p25257_p7 = scmp.ne.s32.totalorder %s25830_s27, %s25256_s25  ;;  %p25265_p1 = scmp.lt.s32.totalorder %s25256_s25, %s25256_s25 }
 0x150   : > { %p25259_p8 = pnand %p25257_p7, %p25607_p0  ;;  %p25266_p6 = por %p25265_p1, %p25264_p13 }
 0x152   : > { %p25260_p11 = pneg %p25259_p8 }
 0x154   : > { %p25267_p9 = pnand %p25266_p6, %p25260_p11 }
 0x156   : > { %25270 = shalt.err (!%p25267_p9)
}
 0x157   : > { %s25407_s26 = smov 128   ;;  %s25408_s14 = smov 8  }
 0x158   : > { %23608 = dma.hbm_to_vmem [thread:$0]  (!%p25591_p12), %s28613_s18, 9216, %s25830_s27, [#allocation18], %s25407_s26, %s25407_s26, %s25408_s14  }
 0x159   : > { %s25409_s16 = smov [#allocation22]   ;;  %s25271_s22 = scalar_lea.hbm %s28616_s21, 36864 }
 0x15a   : > { %s754_s24 = sshll.u32 %s25409_s16, 4  ;;  %p25272_p5 = scmp.ne.s32.totalorder %s28616_s21, %s25271_s22  ;;  %s755_s24 = int_to_ptr.vmem [resolvable:$true] %s754_s24 }
 0x15b   : > { %p25278_p3 = scmp.lt.u32.totalorder %s25271_s22, %s28616_s21 }
 0x15c   : > { %p25274_p10 = pnand %p25272_p5, %p25607_p0 }
 0x15e   : > { %p25275_p2 = pneg %p25274_p10 }
 0x160   : > { %p25280_p4 = pnand %p25278_p3, %p25275_p2 }
 0x162   : > { %25283 = shalt.err (!%p25280_p4)
}
 0x163   : > { %s25284_s27 = scalar_lea.vmem %s755_s24, 36864  ;;  %p25292_p13 = scmp.lt.s32.totalorder %s755_s24, %s755_s24 }
 0x164   : > { %p25285_p7 = scmp.ne.s32.totalorder %s755_s24, %s25284_s27  ;;  %p25293_p1 = scmp.lt.s32.totalorder %s25284_s27, %s25284_s27 }
 0x166   : > { %p25287_p8 = pnand %p25285_p7, %p25607_p0  ;;  %p25294_p6 = por %p25293_p1, %p25292_p13 }
 0x168   : > { %p25288_p11 = pneg %p25287_p8 }
 0x16a   : > { %p25295_p9 = pnand %p25294_p6, %p25288_p11 }
 0x16c   : > { %25298 = shalt.err (!%p25295_p9)
}
 0x16d   : > { %23614 = dma.hbm_to_vmem [thread:$0]  (!%p25591_p12), %s28616_s21, 36864, %s755_s24, [#allocation21], %s25407_s26, %s25407_s26, %s25408_s14  }
 0x16e   : > { %p28681_p5 = scmp.ne.s32.totalorder %s28669_s29, 0 }
 0x16f   : > { %p28682_p10 = scmp.eq.s32.totalorder (!%p28681_p5), %s25553_s5, 0 }
 0x170   : > { %780 = sbr.rel (%p28681_p5) target bundleno = 5973 (0x1755), region = 112 }
 0x177   : > { %25344 = dma.done.wait (%p28682_p10), [#allocation3], 1024   ;;  %p28683_p0 = pmov %p28682_p10 }
 0x179   : > { %25346 = vsyncadd (%p28683_p0), [#allocation3], 4294966272  ;;  %p28684_p2 = pmov %p28683_p0 }
 0x17a   : > { %p28685_p3 = pmov %p28683_p0 }
 0x17b   : > { %25348 = dma.done.wait (%p28684_p2), [#allocation6], 9504  }
 0x17c   : > { %25350 = vsyncadd (%p28685_p3), [#allocation6], 4294957792  ;;  %p28686_p4 = pmov %p28683_p0 }
 0x17d   : > { %p28687_p12 = pmov %p28683_p0 }
 0x17e   : > { %25352 = dma.done.wait (%p28686_p4), [#allocation9], 10368  }
 0x17f   : > { %25354 = vsyncadd (%p28687_p12), [#allocation9], 4294956928  ;;  %p28688_p7 = pmov %p28683_p0 }
 0x180   : > { %p28689_p8 = pmov %p28683_p0 }
 0x181   : > { %25356 = dma.done.wait (%p28688_p7), [#allocation12], 10368  }
 0x182   : > { %25358 = vsyncadd (%p28689_p8), [#allocation12], 4294956928  ;;  %p28690_p11 = pmov %p28683_p0 }
 0x183   : > { %p28691_p13 = pmov %p28683_p0 }
 0x184   : > { %25360 = dma.done.wait (%p28690_p11), [#allocation15], 13824  }
 0x185   : > { %25362 = vsyncadd (%p28691_p13), [#allocation15], 4294953472  ;;  %p28692_p1 = pmov %p28683_p0 }
 0x186   : > { %p28693_p6 = pmov %p28683_p0 }
 0x187   : > { %25364 = dma.done.wait (%p28692_p1), [#allocation18], 18432  }
 0x188   : > { %25366 = vsyncadd (%p28693_p6), [#allocation18], 4294948864  ;;  %p28694_p9 = pmov %p28683_p0 }
 0x189   : > { %p28695_p5 = pmov %p28683_p0 }
 0x18a   : > { %25368 = dma.done.wait (%p28694_p9), [#allocation21], 37440  }
 0x18b   : > { %25370 = vsyncadd (%p28695_p5), [#allocation21], 4294929856  ;;  %p891_p10 = scmp.lt.s32.totalorder %s25553_s5, 1  ;;  %v25410_v0 = vmov 0   ;;  %s28696_s14 = sld [smem:[#allocation40_spill]]  ;;  %vm1075_vm0 = vcmask 1043456  }
 0x18c   : > { %23699 = vset.pattern.permute.xlu1 %v25410_v0  ;;  %23698 = vset.pattern.permute.xlu0 %v25410_v0  ;;  %s28697_s8 = sld [smem:[#allocation42_spill]]  ;;  %vm1050_vm1 = vcmask 64512   ;;  %s28698_s4 = sld [smem:[#allocation41_spill]]  ;;  %v7045_v60 = vld [vmem:[%s28605_s10 + $0x8] sm:$0xff]  ;;  %v7044_v61 = vld [vmem:[%s28605_s10] sm:$0xff]  ;;  %v7047_v62 = vld [vmem:[%s28605_s10 + $0x18] sm:$0xff] }
 0x18d   : > { %s892_s30 = scalar_select %p891_p10, %s25553_s5, 1  ;;  %v7046_v63 = vld [vmem:[%s28605_s10 + $0x10] sm:$0xff]  ;;  %vm2966_vm2 = vcmask 1041408   ;;  %vm2941_vm3 = vcmask 31744   ;;  %vm5717_vm4 = vcmask 130048   ;;  %vm11352_vm5 = vcmask 523264  }
 0x18e   : > { %s28700_s22 = sld [smem:[#allocation44_spill]]  ;;  %s28701_s11 = sld [smem:[#allocation47_spill]] }
 0x18f   : > { %s19229_s29 = sshll.u32 %s892_s30, 3  ;;  %s28702_s28 = sld [smem:[#allocation51_spill]] }
 0x190   : > { %s28703_s1 = sld [smem:[#allocation52_spill]]  ;;  %s28704_s27 = sld [smem:[#allocation53_spill]] }
 0x191   : > { %s894_s19 = scalar_lea.vmem %s28696_s14, %s19229_s29  ;;  %s28705_s25 = sld [smem:[#allocation33_spill]] }
 0x192   : > { %v916_v1 = vld [vmem:[%s28697_s8 + $0x10] sm:$0xff]  ;;  %v914_v2 = vld [vmem:[%s28697_s8] sm:$0xff]  ;;  %v917_v5 = vld [vmem:[%s28697_s8 + $0x18] sm:$0xff]  ;;  %s28699_s29 = smov %s28698_s4  ;;  %s28706_s26 = sld [smem:[#allocation38_spill]] }
 0x193   : > { %v896_v3 = vld [vmem:[%s894_s19] sm:$0xff]  ;;  %942 = vperm.xlu1 %23699, %v916_v1   ;;  %932 = vperm.xlu0 %23698, %v914_v2   ;;  %v915_v6 = vld [vmem:[%s28697_s8 + $0x8] sm:$0xff]  ;;  %v23702_v11 = vld [vmem:[%s28699_s29 + $0x10] sm:$0xff]   ;;  %s20398_s14 = sshll.u32 %s25553_s5, 8  ;;  %s28707_s7 = sld [smem:[#allocation54_spill]] }
 0x194   : > { %v897_v4 = vpack.c.bf16 %v896_v3, %v896_v3  ;;  %v23700_v7 = vld [vmem:[%s28698_s4] sm:$0xff]   ;;  %v23701_v9 = vld [vmem:[%s28699_s29 + $0x8] sm:$0xff]   ;;  %v921_v13 = vld [vmem:[%s28697_s8 + $0x38] sm:$0xff] }
 0x195   : > { %21177 = vmatprep.mubr.msk.bf16.mxu0 %vm1050_vm1, %v23700_v7  ;;  %v919_v10 = vld [vmem:[%s28697_s8 + $0x28] sm:$0xff]  ;;  %v918_v12 = vld [vmem:[%s28697_s8 + $0x20] sm:$0xff]  ;;  %v920_v14 = vld [vmem:[%s28697_s8 + $0x30] sm:$0xff] }
 0x196   : > { %23511 = vmatprep.subr.msk.bf16.mxu0 %vm1075_vm0, %v897_v4  ;;  %v1077_v8 = vsel %vm1075_vm0, %v897_v4, 0  ;;  %v23703_v15 = vld [vmem:[%s28699_s29 + $0x18] sm:$0xff]   ;;  %v23704_v16 = vld [vmem:[%s28699_s29 + $0x20] sm:$0xff]   ;;  %v923_v17 = vld [vmem:[%s28697_s8 + $0x48] sm:$0xff] }
 0x197   : > { %21176 = vmatpush3.bf16.msra.mxu0 %v1077_v8  ;;  %947 = vperm.xlu1 %23699, %v917_v5   ;;  %v922_v18 = vld [vmem:[%s28697_s8 + $0x40] sm:$0xff]  ;;  %v925_v19 = vld [vmem:[%s28697_s8 + $0x58] sm:$0xff]  ;;  %v924_v20 = vld [vmem:[%s28697_s8 + $0x50] sm:$0xff]  ;;  %s888_s4 = sand.u32 1, %s28705_s25   ;;  %s25411_s25 = smov [#allocation23]  }
 0x198   : > { %937 = vperm.xlu0 %23698, %v915_v6   ;;  %v23705_v21 = vld [vmem:[%s28699_s29 + $0x28] sm:$0xff]   ;;  %v23706_v22 = vld [vmem:[%s28699_s29 + $0x30] sm:$0xff]   ;;  %v926_v24 = vld [vmem:[%s28697_s8 + $0x60] sm:$0xff]  ;;  %s19228_s30 = sshll.u32 %s888_s4, 4  ;;  %p28708_p2 = scmp.ne.s32.totalorder %s28706_s26, 0 }
 0x199   : > { %v927_v23 = vld [vmem:[%s28697_s8 + $0x68] sm:$0xff]  ;;  %v929_v25 = vld [vmem:[%s28697_s8 + $0x78] sm:$0xff]  ;;  %v928_v26 = vld [vmem:[%s28697_s8 + $0x70] sm:$0xff]  ;;  %s890_s19 = scalar_lea.vmem [#allocation23], %s19228_s30  ;;  %s28553_s3 = scalar_lea.hbm %s28707_s7, %s20398_s14 }
 0x19a   : > { %21178 = vmatmul.mubr.msk.bf16.vlgmr.msra.gmra.mrb[0].mxu0 %vm1050_vm1, %v23701_v9  ;;  %v23707_v27 = vld [vmem:[%s28699_s29 + $0x38] sm:$0xff]   ;;  %v1345_v28 = vld [vmem:[%s28700_s22 + $0x8] sm:$0xff]  ;;  %v1344_v29 = vld [vmem:[%s28700_s22] sm:$0xff]  ;;  %s19013_s16 = sshll.u32 %s890_s19, 4  ;;  %s25303_s30 = sshll.u32 %s25411_s25, 4  ;;  %s28555_s16 = int_to_ptr.vmem [resolvable:$true] %s19013_s16  ;;  %s25304_s30 = int_to_ptr.vmem [resolvable:$false] %s25303_s30 }
 0x19b   : > { %21181 = vmatprep.mubr.msk.bf16.mxu0 %vm1050_vm1, %v23702_v11  ;;  %957 = vperm.xlu1 %23699, %v919_v10   ;;  %v1347_v30 = vld [vmem:[%s28700_s22 + $0x18] sm:$0xff]  ;;  %v1346_v31 = vld [vmem:[%s28700_s22 + $0x10] sm:$0xff]  ;;  %v1349_v32 = vld [vmem:[%s28700_s22 + $0x28] sm:$0xff]  ;;  %s25299_s5 = scalar_lea.vmem %s28555_s16, 256  ;;  %s25305_s0 = scalar_lea.vmem %s25304_s30, 512 }
 0x19c   : > { %952 = vperm.xlu0 %23698, %v918_v12   ;;  %v1348_v33 = vld [vmem:[%s28700_s22 + $0x20] sm:$0xff]  ;;  %v1351_v34 = vld [vmem:[%s28700_s22 + $0x38] sm:$0xff]  ;;  %v1350_v35 = vld [vmem:[%s28700_s22 + $0x30] sm:$0xff]  ;;  %p25300_p0 = scmp.ne.s32.totalorder %s28555_s16, %s25299_s5  ;;  %p25306_p12 = scmp.lt.s32.totalorder %s28555_s16, %s25304_s30 }
 0x19d   : > { %v1353_v36 = vld [vmem:[%s28700_s22 + $0x48] sm:$0xff]  ;;  %v1352_v37 = vld [vmem:[%s28700_s22 + $0x40] sm:$0xff]  ;;  %v1355_v38 = vld [vmem:[%s28700_s22 + $0x58] sm:$0xff]  ;;  %p25307_p7 = scmp.lt.s32.totalorder %s25305_s0, %s25299_s5 }
 0x19e   : > { %v1354_v39 = vld [vmem:[%s28700_s22 + $0x50] sm:$0xff]  ;;  %v1357_v40 = vld [vmem:[%s28700_s22 + $0x68] sm:$0xff]  ;;  %v1356_v41 = vld [vmem:[%s28700_s22 + $0x60] sm:$0xff]  ;;  %p25301_p3 = pnand %p25300_p0, %p28708_p2 }
 0x19f   : > { %967 = vperm.xlu1 %23699, %v921_v13   ;;  %v1359_v42 = vld [vmem:[%s28700_s22 + $0x78] sm:$0xff]  ;;  %v1358_v43 = vld [vmem:[%s28700_s22 + $0x70] sm:$0xff]  ;;  %v4242_v44 = vld [vmem:[%s28701_s11 + $0x8] sm:$0xff]  ;;  %p25308_p8 = por %p25307_p7, %p25306_p12 }
 0x1a0   : > { %962 = vperm.xlu0 %23698, %v920_v14   ;;  %v4241_v45 = vld [vmem:[%s28701_s11] sm:$0xff]  ;;  %v4244_v46 = vld [vmem:[%s28701_s11 + $0x18] sm:$0xff]  ;;  %v4243_v47 = vld [vmem:[%s28701_s11 + $0x10] sm:$0xff]  ;;  %p25302_p4 = pneg %p25301_p3 }
 0x1a1   : > { %v4246_v48 = vld [vmem:[%s28701_s11 + $0x28] sm:$0xff]  ;;  %v4245_v49 = vld [vmem:[%s28701_s11 + $0x20] sm:$0xff]  ;;  %v4248_v50 = vld [vmem:[%s28701_s11 + $0x38] sm:$0xff] }
 0x1a2   : > { %21182 = vmatmul.mubr.msk.bf16.gmra.mrb[4].mxu0 %vm1050_vm1, %v23703_v15  ;;  %v4247_v51 = vld [vmem:[%s28701_s11 + $0x30] sm:$0xff]  ;;  %v4250_v52 = vld [vmem:[%s28701_s11 + $0x48] sm:$0xff]  ;;  %v4249_v53 = vld [vmem:[%s28701_s11 + $0x40] sm:$0xff]  ;;  %p25309_p11 = pnand %p25308_p8, %p25302_p4 }
 0x1a3   : > { %21185 = vmatprep.mubr.msk.bf16.mxu0 %vm1050_vm1, %v23704_v16  ;;  %977 = vperm.xlu1 %23699, %v923_v17   ;;  %v4252_v54 = vld [vmem:[%s28701_s11 + $0x58] sm:$0xff]  ;;  %v4251_v55 = vld [vmem:[%s28701_s11 + $0x50] sm:$0xff]  ;;  %v4254_v56 = vld [vmem:[%s28701_s11 + $0x68] sm:$0xff] }
 0x1a4   : > { %972 = vperm.xlu0 %23698, %v922_v18   ;;  %v4253_v57 = vld [vmem:[%s28701_s11 + $0x60] sm:$0xff]  ;;  %v4256_v58 = vld [vmem:[%s28701_s11 + $0x78] sm:$0xff]  ;;  %v4255_v59 = vld [vmem:[%s28701_s11 + $0x70] sm:$0xff] }
 0x1a5   : > { %v7049_v1 = vld [vmem:[%s28605_s10 + $0x28] sm:$0xff]  ;;  %v7048_v2 = vld [vmem:[%s28605_s10 + $0x20] sm:$0xff]  ;;  %v7051_v3 = vld [vmem:[%s28605_s10 + $0x38] sm:$0xff] }
 0x1a6   : > { %v7050_v4 = vld [vmem:[%s28605_s10 + $0x30] sm:$0xff]  ;;  %v7053_v5 = vld [vmem:[%s28605_s10 + $0x48] sm:$0xff]  ;;  %v7052_v6 = vld [vmem:[%s28605_s10 + $0x40] sm:$0xff] }
 0x1a7   : > { %987 = vperm.xlu1 %23699, %v925_v19   ;;  %v7055_v7 = vld [vmem:[%s28605_s10 + $0x58] sm:$0xff]  ;;  %v7054_v8 = vld [vmem:[%s28605_s10 + $0x50] sm:$0xff]  ;;  %v7057_v9 = vld [vmem:[%s28605_s10 + $0x68] sm:$0xff] }
 0x1a8   : > { %982 = vperm.xlu0 %23698, %v924_v20   ;;  %v7056_v10 = vld [vmem:[%s28605_s10 + $0x60] sm:$0xff]  ;;  %v7059_v11 = vld [vmem:[%s28605_s10 + $0x78] sm:$0xff]  ;;  %v7058_v12 = vld [vmem:[%s28605_s10 + $0x70] sm:$0xff] }
 0x1a9   : > { %v9847_v13 = vld [vmem:[%s28608_s13 + $0x8] sm:$0xff]  ;;  %v9846_v14 = vld [vmem:[%s28608_s13] sm:$0xff]  ;;  %v9849_v15 = vld [vmem:[%s28608_s13 + $0x18] sm:$0xff] }
 0x1aa   : > { %21186 = vmatmul.mubr.msk.bf16.gmra.mrb[8].mxu0 %vm1050_vm1, %v23705_v21  ;;  %v9848_v16 = vld [vmem:[%s28608_s13 + $0x10] sm:$0xff]  ;;  %v9851_v17 = vld [vmem:[%s28608_s13 + $0x28] sm:$0xff]  ;;  %v9850_v18 = vld [vmem:[%s28608_s13 + $0x20] sm:$0xff] }
 0x1ab   : > { %21189 = vmatprep.mubr.msk.bf16.mxu0 %vm1050_vm1, %v23706_v22  ;;  %997 = vperm.xlu1 %23699, %v927_v23   ;;  %v9853_v19 = vld [vmem:[%s28608_s13 + $0x38] sm:$0xff]  ;;  %v9852_v20 = vld [vmem:[%s28608_s13 + $0x30] sm:$0xff]  ;;  %v9855_v21 = vld [vmem:[%s28608_s13 + $0x48] sm:$0xff] }
 0x1ac   : > { %992 = vperm.xlu0 %23698, %v926_v24   ;;  %v9854_v22 = vld [vmem:[%s28608_s13 + $0x40] sm:$0xff]  ;;  %v9857_v23 = vld [vmem:[%s28608_s13 + $0x58] sm:$0xff]  ;;  %v9856_v24 = vld [vmem:[%s28608_s13 + $0x50] sm:$0xff] }
 0x1af   : > { %1007 = vperm.xlu1 %23699, %v929_v25   ;;  %v9859_v25 = vld [vmem:[%s28608_s13 + $0x68] sm:$0xff] }
 0x1b0   : > { %1002 = vperm.xlu0 %23698, %v928_v26   ;;  %v9858_v26 = vld [vmem:[%s28608_s13 + $0x60] sm:$0xff] }
 0x1b2   : > { %21190 = vmatmul.mubr.msk.bf16.gmra.mrb[12].mxu0 %vm1050_vm1, %v23707_v27  ;;  %v9861_v27 = vld [vmem:[%s28608_s13 + $0x78] sm:$0xff] }
 0x1b3   : > { %1367 = vperm.xlu1 %23699, %v1345_v28   ;;  %v9860_v28 = vld [vmem:[%s28608_s13 + $0x70] sm:$0xff] }
 0x1b4   : > { %1362 = vperm.xlu0 %23698, %v1344_v29   ;;  %v23708_v29 = vld [vmem:[#allocation2] sm:$0xff]  }
 0x1b5   : > { %21209 = vmatprep.mubr.bf16.mxu0 %v23708_v29 }
 0x1b7   : > { %1377 = vperm.xlu1 %23699, %v1347_v30   ;;  %v12866_v30 = vld [vmem:[%s28702_s28 + $0x8] sm:$0xff] }
 0x1b8   : > { %1372 = vperm.xlu0 %23698, %v1346_v31   ;;  %v12865_v31 = vld [vmem:[%s28702_s28] sm:$0xff] }
 0x1bb   : > { %1387 = vperm.xlu1 %23699, %v1349_v32   ;;  %v12868_v32 = vld [vmem:[%s28702_s28 + $0x18] sm:$0xff] }
 0x1bc   : > { %1382 = vperm.xlu0 %23698, %v1348_v33   ;;  %v12867_v33 = vld [vmem:[%s28702_s28 + $0x10] sm:$0xff] }
 0x1bf   : > { %1397 = vperm.xlu1 %23699, %v1351_v34   ;;  %v12870_v34 = vld [vmem:[%s28702_s28 + $0x28] sm:$0xff] }
 0x1c0   : > { %1392 = vperm.xlu0 %23698, %v1350_v35   ;;  %v12869_v35 = vld [vmem:[%s28702_s28 + $0x20] sm:$0xff] }
 0x1c3   : > { %1407 = vperm.xlu1 %23699, %v1353_v36   ;;  %v12872_v36 = vld [vmem:[%s28702_s28 + $0x38] sm:$0xff] }
 0x1c4   : > { %1402 = vperm.xlu0 %23698, %v1352_v37   ;;  %v12871_v37 = vld [vmem:[%s28702_s28 + $0x30] sm:$0xff] }
 0x1c7   : > { %1417 = vperm.xlu1 %23699, %v1355_v38   ;;  %v12874_v38 = vld [vmem:[%s28702_s28 + $0x48] sm:$0xff] }
 0x1c8   : > { %1412 = vperm.xlu0 %23698, %v1354_v39   ;;  %v12873_v39 = vld [vmem:[%s28702_s28 + $0x40] sm:$0xff] }
 0x1cb   : > { %1427 = vperm.xlu1 %23699, %v1357_v40   ;;  %v12876_v40 = vld [vmem:[%s28702_s28 + $0x58] sm:$0xff] }
 0x1cc   : > { %1422 = vperm.xlu0 %23698, %v1356_v41   ;;  %v12875_v41 = vld [vmem:[%s28702_s28 + $0x50] sm:$0xff] }
 0x1cf   : > { %1437 = vperm.xlu1 %23699, %v1359_v42   ;;  %v12878_v42 = vld [vmem:[%s28702_s28 + $0x68] sm:$0xff] }
 0x1d0   : > { %1432 = vperm.xlu0 %23698, %v1358_v43   ;;  %v12877_v43 = vld [vmem:[%s28702_s28 + $0x60] sm:$0xff] }
 0x1d3   : > { %4264 = vperm.xlu1 %23699, %v4242_v44  }
 0x1d4   : > { %4259 = vperm.xlu0 %23698, %v4241_v45   ;;  %v12880_v45 = vld [vmem:[%s28702_s28 + $0x78] sm:$0xff] }
 0x1d7   : > { %4274 = vperm.xlu1 %23699, %v4244_v46   ;;  %v12879_v46 = vld [vmem:[%s28702_s28 + $0x70] sm:$0xff] }
 0x1d8   : > { %4269 = vperm.xlu0 %23698, %v4243_v47  }
 0x1db   : > { %4284 = vperm.xlu1 %23699, %v4246_v48   ;;  %v16284_v48 = vld [vmem:[%s28703_s1 + $0x8] sm:$0xff] }
 0x1dc   : > { %4279 = vperm.xlu0 %23698, %v4245_v49   ;;  %v16283_v49 = vld [vmem:[%s28703_s1] sm:$0xff] }
 0x1df   : > { %4294 = vperm.xlu1 %23699, %v4248_v50  }
 0x1e0   : > { %4289 = vperm.xlu0 %23698, %v4247_v51  }
 0x1e3   : > { %4304 = vperm.xlu1 %23699, %v4250_v52   ;;  %v16286_v52 = vld [vmem:[%s28703_s1 + $0x18] sm:$0xff] }
 0x1e4   : > { %4299 = vperm.xlu0 %23698, %v4249_v53   ;;  %v16285_v53 = vld [vmem:[%s28703_s1 + $0x10] sm:$0xff] }
 0x1e7   : > { %4314 = vperm.xlu1 %23699, %v4252_v54  }
 0x1e8   : > { %4309 = vperm.xlu0 %23698, %v4251_v55   ;;  %v16288_v55 = vld [vmem:[%s28703_s1 + $0x28] sm:$0xff] }
 0x1eb   : > { %4324 = vperm.xlu1 %23699, %v4254_v56   ;;  %v16287_v56 = vld [vmem:[%s28703_s1 + $0x20] sm:$0xff] }
 0x1ec   : > { %4319 = vperm.xlu0 %23698, %v4253_v57  }
 0x1ef   : > { %4334 = vperm.xlu1 %23699, %v4256_v58   ;;  %v16290_v58 = vld [vmem:[%s28703_s1 + $0x38] sm:$0xff] }
 0x1f0   : > { %4329 = vperm.xlu0 %23698, %v4255_v59   ;;  %v16289_v59 = vld [vmem:[%s28703_s1 + $0x30] sm:$0xff] }
 0x1f3   : > { %7067 = vperm.xlu1 %23699, %v7045_v60  }
 0x1f4   : > { %7062 = vperm.xlu0 %23698, %v7044_v61  }
 0x1f7   : > { %7077 = vperm.xlu1 %23699, %v7047_v62   ;;  %v16292_v62 = vld [vmem:[%s28703_s1 + $0x48] sm:$0xff] }
 0x1f8   : > { %7072 = vperm.xlu0 %23698, %v7046_v63   ;;  %v16291_v63 = vld [vmem:[%s28703_s1 + $0x40] sm:$0xff] }
 0x1fb   : > { %7087 = vperm.xlu1 %23699, %v7049_v1  }
 0x1fc   : > { %7082 = vperm.xlu0 %23698, %v7048_v2   ;;  %v16294_v2 = vld [vmem:[%s28703_s1 + $0x58] sm:$0xff] }
 0x1ff   : > { %7097 = vperm.xlu1 %23699, %v7051_v3   ;;  %v16293_v3 = vld [vmem:[%s28703_s1 + $0x50] sm:$0xff] }
 0x200   : > { %7092 = vperm.xlu0 %23698, %v7050_v4  }
 0x203   : > { %7107 = vperm.xlu1 %23699, %v7053_v5   ;;  %v16296_v5 = vld [vmem:[%s28703_s1 + $0x68] sm:$0xff] }
 0x204   : > { %7102 = vperm.xlu0 %23698, %v7052_v6   ;;  %v16295_v6 = vld [vmem:[%s28703_s1 + $0x60] sm:$0xff] }
 0x207   : > { %7117 = vperm.xlu1 %23699, %v7055_v7  }
 0x208   : > { %7112 = vperm.xlu0 %23698, %v7054_v8  }
 0x20b   : > { %7127 = vperm.xlu1 %23699, %v7057_v9   ;;  %v16298_v9 = vld [vmem:[%s28703_s1 + $0x78] sm:$0xff] }
 0x20c   : > { %7122 = vperm.xlu0 %23698, %v7056_v10   ;;  %v16297_v10 = vld [vmem:[%s28703_s1 + $0x70] sm:$0xff] }
 0x20f   : > { %7137 = vperm.xlu1 %23699, %v7059_v11  }
 0x210   : > { %7132 = vperm.xlu0 %23698, %v7058_v12  }
 0x212   : > { %v933_v44 = vpop.permute.xlu0 %932  ;;  %v943_v47 = vpop.permute.xlu1 %942 }
 0x213   : > { %9869 = vperm.xlu1 %23699, %v9847_v13  }
 0x214   : > { %9864 = vperm.xlu0 %23698, %v9846_v14  }
 0x216   : > { %v948_v51 = vpop.permute.xlu1 %947 }
 0x217   : > { %9879 = vperm.xlu1 %23699, %v9849_v15   ;;  %v938_v50 = vpop.permute.xlu0 %937 }
 0x218   : > { %9874 = vperm.xlu0 %23698, %v9848_v16   ;;  %v18970_v16 = vld [vmem:[%s28704_s27] sm:$0xff]  ;;  %s18999_s27 = scalar_lea.sflag [#allocation4], %s888_s4 }
 0x21a   : > { %v26271_v57 = vpop.permute.xlu1 %957 }
 0x21b   : > { %9889 = vperm.xlu1 %23699, %v9851_v17   ;;  %v26263_v54 = vpop.permute.xlu0 %952 }
 0x21c   : > { %9884 = vperm.xlu0 %23698, %v9850_v18  }
 0x21e   : > { %v26279_v61 = vpop.permute.xlu1 %967 }
 0x21f   : > { %9899 = vperm.xlu1 %23699, %v9853_v19   ;;  %v963_v60 = vpop.permute.xlu0 %962 }
 0x220   : > { %9894 = vperm.xlu0 %23698, %v9852_v20  }
 0x222   : > { %v26295_v4 = vpop.permute.xlu1 %977 }
 0x223   : > { %9909 = vperm.xlu1 %23699, %v9855_v21   ;;  %v26287_v1 = vpop.permute.xlu0 %972 }
 0x224   : > { %9904 = vperm.xlu0 %23698, %v9854_v22  }
 0x226   : > { %v26305_v8 = vpop.permute.xlu1 %987 }
 0x227   : > { %9919 = vperm.xlu1 %23699, %v9857_v23   ;;  %v26303_v7 = vpop.permute.xlu0 %982 }
 0x228   : > { %9914 = vperm.xlu0 %23698, %v9856_v24  }
 0x22a   : > { %v26318_v17 = vpop.permute.xlu1 %997 }
 0x22b   : > { %9929 = vperm.xlu1 %23699, %v9859_v25   ;;  %v26313_v12 = vpop.permute.xlu0 %992 }
 0x22c   : > { %9924 = vperm.xlu0 %23698, %v9858_v26  }
 0x22f   : > { %9939 = vperm.xlu1 %23699, %v9861_v27  }
 0x230   : > { %9934 = vperm.xlu0 %23698, %v9860_v28  }
 0x233   : > { %12888 = vperm.xlu1 %23699, %v12866_v30   ;;  %v26326_v30 = vpop.permute.xlu0 %1002 }
 0x234   : > { %12883 = vperm.xlu0 %23698, %v12865_v31  }
 0x237   : > { %12898 = vperm.xlu1 %23699, %v12868_v32  }
 0x238   : > { %12893 = vperm.xlu0 %23698, %v12867_v33  }
 0x23b   : > { %12908 = vperm.xlu1 %23699, %v12870_v34  }
 0x23c   : > { %12903 = vperm.xlu0 %23698, %v12869_v35  }
 0x23f   : > { %12918 = vperm.xlu1 %23699, %v12872_v36  }
 0x240   : > { %12913 = vperm.xlu0 %23698, %v12871_v37  }
 0x243   : > { %12928 = vperm.xlu1 %23699, %v12874_v38  }
 0x244   : > { %12923 = vperm.xlu0 %23698, %v12873_v39  }
 0x247   : > { %12938 = vperm.xlu1 %23699, %v12876_v40  }
 0x248   : > { %12933 = vperm.xlu0 %23698, %v12875_v41  }
 0x24b   : > { %12948 = vperm.xlu1 %23699, %v12878_v42  }
 0x24c   : > { %12943 = vperm.xlu0 %23698, %v12877_v43  }
 0x24f   : > { %12958 = vperm.xlu1 %23699, %v12880_v45  }
 0x250   : > { %12953 = vperm.xlu0 %23698, %v12879_v46  }
 0x253   : > { %16306 = vperm.xlu1 %23699, %v16284_v48  }
 0x254   : > { %16301 = vperm.xlu0 %23698, %v16283_v49  }
 0x257   : > { %16316 = vperm.xlu1 %23699, %v16286_v52  }
 0x258   : > { %16311 = vperm.xlu0 %23698, %v16285_v53  }
 0x25b   : > { %16326 = vperm.xlu1 %23699, %v16288_v55  }
 0x25c   : > { %16321 = vperm.xlu0 %23698, %v16287_v56  }
 0x25f   : > { %16336 = vperm.xlu1 %23699, %v16290_v58  }
 0x260   : > { %16331 = vperm.xlu0 %23698, %v16289_v59  }
 0x263   : > { %16346 = vperm.xlu1 %23699, %v16292_v62  }
 0x264   : > { %16341 = vperm.xlu0 %23698, %v16291_v63  }
 0x267   : > { %16356 = vperm.xlu1 %23699, %v16294_v2  }
 0x268   : > { %16351 = vperm.xlu0 %23698, %v16293_v3  }
 0x26b   : > { %16366 = vperm.xlu1 %23699, %v16296_v5  }
 0x26c   : > { %16361 = vperm.xlu0 %23698, %v16295_v6  }
 0x26d   : > { %v21179_v11 = vpop.f32.mrb[0].mxu0 }
 0x26e   : > { %v1122_v13 = vadd.f32 %v21179_v11, %v943_v47  ;;  %v1113_v14 = vpop.f32.mrb[1].mxu0 }
 0x26f   : > { %v1114_v15 = vadd.f32 %v1113_v14, %v933_v44  ;;  %v21180_v19 = vpop.f32.mrb[2].mxu0  ;;  %16376 = vperm.xlu1 %23699, %v16298_v9  }
 0x270   : > { %v1194_v18 = vmul.f32 0.044715, %v1122_v13  ;;  %16371 = vperm.xlu0 %23698, %v16297_v10   ;;  %v26320_v20 = vmul.f32 0.5, %v1122_v13  ;;  %v1125_v22 = vadd.f32 %v21180_v19, %v948_v51  ;;  %v1116_v23 = vpop.f32.mrb[3].mxu0 }
 0x271   : > { %v1192_v21 = vmul.f32 0.044715, %v1114_v15  ;;  %v26322_v24 = vmul.f32 0.5, %v1114_v15  ;;  %v1117_v25 = vadd.f32 %v1116_v23, %v938_v50 }
 0x272   : > { %v1210_v26 = vmul.f32 %v1194_v18, %v1122_v13  ;;  %v1195_v27 = vmul.f32 0.044715, %v1125_v22  ;;  %v26324_v29 = vmul.f32 0.5, %v1125_v22 }
 0x273   : > { %v1208_v28 = vmul.f32 %v1192_v21, %v1114_v15  ;;  %v1193_v31 = vmul.f32 0.044715, %v1117_v25  ;;  %v26328_v32 = vmul.f32 0.5, %v1117_v25 }
 0x274   : > { %18973 = vperm.xlu0 %23698, %v18970_v16   ;;  %v1226_v33 = vmul.f32 %v1210_v26, %v1122_v13  ;;  %v1211_v36 = vmul.f32 %v1195_v27, %v1125_v22 }
 0x275   : > { %v21183_v34 = vpop.f32.mrb[4].mxu0  ;;  %v1224_v35 = vmul.f32 %v1208_v28, %v1114_v15  ;;  %v1209_v39 = vmul.f32 %v1193_v31, %v1117_v25 }
 0x276   : > { %v1138_v37 = vadd.f32 %v21183_v34, %v963_v60  ;;  %v1129_v38 = vpop.f32.mrb[5].mxu0  ;;  %v1242_v40 = vadd.f32 %v1226_v33, %v1122_v13  ;;  %v1227_v43 = vmul.f32 %v1211_v36, %v1125_v22 }
 0x277   : > { %v1130_v41 = vadd.f32 %v1129_v38, %v26263_v54  ;;  %v1240_v42 = vadd.f32 %v1224_v35, %v1114_v15  ;;  %v21184_v45 = vpop.f32.mrb[6].mxu0  ;;  %v1225_v46 = vmul.f32 %v1209_v39, %v1117_v25 }
 0x278   : > { %v1198_v44 = vmul.f32 0.044715, %v1138_v37  ;;  %v1258_v47 = vmul.f32 0.7978846, %v1242_v40  ;;  %v26331_v48 = vmul.f32 0.5, %v1138_v37  ;;  %v1141_v50 = vadd.f32 %v21184_v45, %v26279_v61  ;;  %v1132_v51 = vpop.f32.mrb[7].mxu0 }
 0x279   : > { %v1196_v49 = vmul.f32 0.044715, %v1130_v41  ;;  %v1256_v52 = vmul.f32 0.7978846, %v1240_v42  ;;  %v1243_v53 = vadd.f32 %v1227_v43, %v1125_v22  ;;  %v1133_v55 = vadd.f32 %v1132_v51, %v26271_v57 }
 0x27a   : > { %v1241_v56 = vadd.f32 %v1225_v46, %v1117_v25  ;;  %24675 = vtanh.f32 %v1258_v47  ;;  %v26335_v58 = vmul.f32 0.5, %v1130_v41  ;;  %v1199_v54 = vmul.f32 0.044715, %v1141_v50 }
 0x27b   : > { %24677 = vtanh.f32 %v1256_v52  ;;  %v1259_v59 = vmul.f32 0.7978846, %v1243_v53  ;;  %v1212_v60 = vmul.f32 %v1196_v49, %v1130_v41  ;;  %v1197_v62 = vmul.f32 0.044715, %v1133_v55 }
 0x27c   : > { %v1257_v63 = vmul.f32 0.7978846, %v1241_v56  ;;  %v26337_v2 = vmul.f32 0.5, %v1133_v55  ;;  %v26339_v3 = vmul.f32 0.5, %v1141_v50  ;;  %v1214_v6 = vmul.f32 %v1198_v44, %v1138_v37  ;;  %v1008_v56 = vpop.permute.xlu1 %1007 }
 0x27d   : > { %v21187_v61 = vpop.f32.mrb[8].mxu0  ;;  %24679 = vtanh.f32 %v1259_v59  ;;  %v1228_v5 = vmul.f32 %v1212_v60, %v1130_v41  ;;  %v1215_v9 = vmul.f32 %v1199_v54, %v1141_v50  ;;  %v1213_v11 = vmul.f32 %v1197_v62, %v1133_v55 }
 0x27e   : > { %v26342_v57 = vadd.f32 %v21187_v61, %v26303_v7  ;;  %v1145_v10 = vpop.f32.mrb[9].mxu0  ;;  %24681 = vtanh.f32 %v1257_v63  ;;  %v1230_v15 = vmul.f32 %v1214_v6, %v1138_v37 }
 0x27f   : > { %v1146_v13 = vadd.f32 %v1145_v10, %v26287_v1  ;;  %v1244_v14 = vadd.f32 %v1228_v5, %v1130_v41  ;;  %v1231_v16 = vmul.f32 %v1215_v9, %v1141_v50  ;;  %v21188_v19 = vpop.f32.mrb[10].mxu0  ;;  %v1229_v21 = vmul.f32 %v1213_v11, %v1133_v55 }
 0x280   : > { %v1202_v18 = vmul.f32 0.044715, %v26342_v57  ;;  %v26347_v22 = vmul.f32 0.5, %v26342_v57  ;;  %v26350_v25 = vadd.f32 %v21188_v19, %v26305_v8  ;;  %v1148_v7 = vpop.f32.mrb[11].mxu0  ;;  %v1246_v27 = vadd.f32 %v1230_v15, %v1138_v37 }
 0x281   : > { %v1200_v23 = vmul.f32 0.044715, %v1146_v13  ;;  %v1260_v26 = vmul.f32 0.7978846, %v1244_v14  ;;  %v1149_v28 = vadd.f32 %v1148_v7, %v26295_v4  ;;  %v1245_v1 = vadd.f32 %v1229_v21, %v1133_v55 }
 0x282   : > { %v1247_v31 = vadd.f32 %v1231_v16, %v1141_v50  ;;  %v26353_v33 = vmul.f32 0.5, %v1146_v13  ;;  %v1203_v34 = vmul.f32 0.044715, %v26350_v25  ;;  %v1262_v35 = vmul.f32 0.7978846, %v1246_v27 }
 0x283   : > { %24683 = vtanh.f32 %v1260_v26  ;;  %v1216_v36 = vmul.f32 %v1200_v23, %v1146_v13  ;;  %v1201_v39 = vmul.f32 0.044715, %v1149_v28  ;;  %v1261_v40 = vmul.f32 0.7978846, %v1245_v1 }
 0x284   : > { %v24676_v38 = vpop.eup %24675  ;;  %v1263_v41 = vmul.f32 0.7978846, %v1247_v31  ;;  %v1218_v8 = vmul.f32 %v1202_v18, %v26342_v57  ;;  %24685 = vtanh.f32 %v1262_v35  ;;  %v26357_v4 = vmul.f32 0.5, %v1149_v28 }
 0x285   : > { %v24678_v42 = vpop.eup %24677  ;;  %v21191_v43 = vpop.f32.mrb[12].mxu0  ;;  %v1290_v37 = vadd.f32 1.0, %v24676_v38  ;;  %v1232_v44 = vmul.f32 %v1216_v36, %v1146_v13  ;;  %24687 = vtanh.f32 %v1261_v40  ;;  %v1217_v49 = vmul.f32 %v1201_v39, %v1149_v28 }
 0x286   : > { %v26360_v45 = vadd.f32 %v21191_v43, %v26326_v30  ;;  %v1161_v46 = vpop.f32.mrb[13].mxu0  ;;  %v1288_v47 = vadd.f32 1.0, %v24678_v42  ;;  %24689 = vtanh.f32 %v1263_v41  ;;  %v26371_v11 = vmul.f32 0.5, %v26350_v25 }
 0x287   : > { %v24680_v50 = vpop.eup %24679  ;;  %v1162_v51 = vadd.f32 %v1161_v46, %v26313_v12  ;;  %v1306_v52 = vmul.f32 %v1290_v37, %v26320_v20  ;;  %v1248_v53 = vadd.f32 %v1232_v44, %v1146_v13  ;;  %v21192_v59 = vpop.f32.mrb[14].mxu0  ;;  %v1233_v62 = vmul.f32 %v1217_v49, %v1149_v28 }
 0x288   : > { %v24682_v55 = vpop.eup %24681  ;;  %v1206_v54 = vmul.f32 0.044715, %v26360_v45  ;;  %v1304_v60 = vmul.f32 %v1288_v47, %v26322_v24  ;;  %v1291_v30 = vadd.f32 1.0, %v24680_v50  ;;  %v26366_v61 = vadd.f32 %v21192_v59, %v1008_v56  ;;  %v1164_v5 = vpop.f32.mrb[15].mxu0 }
 0x289   : > { %v1204_v63 = vmul.f32 0.044715, %v1162_v51  ;;  %v1289_v6 = vadd.f32 1.0, %v24682_v55  ;;  %v1264_v9 = vmul.f32 0.7978846, %v1248_v53  ;;  %v1165_v12 = vadd.f32 %v1164_v5, %v26318_v17 }
 0x28a   : > { %v1307_v20 = vmul.f32 %v1291_v30, %v26324_v29  ;;  %v1249_v10 = vadd.f32 %v1233_v62, %v1149_v28  ;;  %v1207_v13 = vmul.f32 0.044715, %v26366_v61  ;;  %v1219_v14 = vmul.f32 %v1203_v34, %v26350_v25 }
 0x28b   : > { %v1305_v24 = vmul.f32 %v1289_v6, %v26328_v32  ;;  %24691 = vtanh.f32 %v1264_v9  ;;  %v1205_v15 = vmul.f32 0.044715, %v1165_v12  ;;  %v1234_v19 = vmul.f32 %v1218_v8, %v26342_v57 }
 0x28c   : > { %v1337_v16 = vpack.c.bf16 %v1307_v20, %v1306_v52  ;;  %v1265_v18 = vmul.f32 0.7978846, %v1249_v10  ;;  %v1235_v29 = vmul.f32 %v1219_v14, %v26350_v25  ;;  %v26378_v23 = vmul.f32 0.5, %v1162_v51 }
 0x28d   : > { %v24684_v21 = vpop.eup %24683  ;;  %v1336_v17 = vpack.c.bf16 %v1305_v24, %v1304_v60  ;;  %v26380_v7 = vmul.f32 0.5, %v1165_v12  ;;  %v1250_v32 = vadd.f32 %v1234_v19, %v26342_v57  ;;  %v1220_v27 = vmul.f32 %v1204_v63, %v1162_v51 }
 0x28e   : > { %v1292_v26 = vadd.f32 1.0, %v24684_v21  ;;  %24693 = vtanh.f32 %v1265_v18  ;;  %v24686_v28 = vpop.eup %24685  ;;  %v1251_v1 = vadd.f32 %v1235_v29, %v26350_v25  ;;  %v1221_v31 = vmul.f32 %v1205_v15, %v1165_v12 }
 0x28f   : > { %21193 = vmatprep.subr.bf16.mxu0 %v1336_v17  ;;  %v26385_v34 = vmul.f32 0.5, %v26360_v45  ;;  %v26388_v35 = vmul.f32 0.5, %v26366_v61  ;;  %v24688_v36 = vpop.eup %24687  ;;  %v1294_v38 = vadd.f32 1.0, %v24686_v28  ;;  %v1266_v39 = vmul.f32 0.7978846, %v1250_v32  ;;  %v23710_v28 = vld [vmem:[#allocation2 + $0x10] sm:$0xff]  }
 0x290   : > { %21194 = vmatpush3.bf16.msra.mxu0 %v1336_v17  ;;  %v1236_v40 = vmul.f32 %v1220_v27, %v1162_v51  ;;  %v24690_v41 = vpop.eup %24689  ;;  %v1293_v57 = vadd.f32 1.0, %v24688_v36  ;;  %v1267_v8 = vmul.f32 0.7978846, %v1251_v1  ;;  %v1237_v42 = vmul.f32 %v1221_v31, %v1165_v12  ;;  %v23709_v27 = vld [vmem:[#allocation2 + $0x8] sm:$0xff]   ;;  %v23714_v31 = vld [vmem:[#allocation2 + $0x30] sm:$0xff]   ;;  %v23715_v36 = vld [vmem:[#allocation2 + $0x38] sm:$0xff]  }
 0x291   : > { %21195 = vmatprep.subr.bf16.mxu0 %v1337_v16  ;;  %v1222_v43 = vmul.f32 %v1206_v54, %v26360_v45  ;;  %v1308_v25 = vmul.f32 %v1292_v26, %v26335_v58  ;;  %v1295_v37 = vadd.f32 1.0, %v24690_v41  ;;  %24695 = vtanh.f32 %v1266_v39  ;;  %v23713_v1 = vld [vmem:[#allocation2 + $0x28] sm:$0xff]  }
 0x292   : > { %v1252_v44 = vadd.f32 %v1236_v40, %v1162_v51  ;;  %v1309_v46 = vmul.f32 %v1293_v57, %v26337_v2  ;;  %24697 = vtanh.f32 %v1267_v8  ;;  %v1253_v47 = vadd.f32 %v1237_v42, %v1165_v12 }
 0x293   : > { %v1223_v49 = vmul.f32 %v1207_v13, %v26366_v61  ;;  %v1310_v50 = vmul.f32 %v1294_v38, %v26331_v48  ;;  %v1311_v52 = vmul.f32 %v1295_v37, %v26339_v3  ;;  %v1238_v55 = vmul.f32 %v1222_v43, %v26360_v45  ;;  %v1363_v38 = vpop.permute.xlu0 %1362 }
 0x294   : > { %21196 = vmatpush3.bf16.msra.mxu0 %v1337_v16  ;;  %v1268_v53 = vmul.f32 0.7978846, %v1252_v44  ;;  %v1338_v54 = vpack.c.bf16 %v1309_v46, %v1308_v25  ;;  %v1269_v58 = vmul.f32 0.7978846, %v1253_v47 }
 0x295   : > { %v24692_v56 = vpop.eup %24691  ;;  %v1239_v59 = vmul.f32 %v1223_v49, %v26366_v61  ;;  %v1339_v51 = vpack.c.bf16 %v1311_v52, %v1310_v50  ;;  %v1254_v2 = vadd.f32 %v1238_v55, %v26360_v45 }
 0x296   : > { %v1296_v60 = vadd.f32 1.0, %v24692_v56  ;;  %24699 = vtanh.f32 %v1268_v53  ;;  %21197 = vmatprep.subr.bf16.mxu0 %v1338_v54 }
 0x297   : > { %24701 = vtanh.f32 %v1269_v58  ;;  %v1255_v30 = vadd.f32 %v1239_v59, %v26366_v61  ;;  %v1270_v3 = vmul.f32 0.7978846, %v1254_v2  ;;  %v1373_v40 = vpop.permute.xlu0 %1372 }
 0x298   : > { %v24694_v48 = vpop.eup %24693  ;;  %21198 = vmatpush3.bf16.msra.mxu0 %v1338_v54  ;;  %v1312_v5 = vmul.f32 %v1296_v60, %v26353_v33 }
 0x299   : > { %21199 = vmatprep.subr.bf16.mxu0 %v1339_v51  ;;  %v1297_v62 = vadd.f32 1.0, %v24694_v48  ;;  %v1271_v63 = vmul.f32 0.7978846, %v1255_v30  ;;  %24703 = vtanh.f32 %v1270_v3 }
 0x29b   : > { %v1313_v6 = vmul.f32 %v1297_v62, %v26357_v4  ;;  %24705 = vtanh.f32 %v1271_v63  ;;  %v24696_v9 = vpop.eup %24695  ;;  %v1383_v57 = vpop.permute.xlu0 %1382 }
 0x29c   : > { %21200 = vmatpush3.bf16.msra.mxu0 %v1339_v51  ;;  %v24698_v12 = vpop.eup %24697  ;;  %v1298_v20 = vadd.f32 1.0, %v24696_v9 }
 0x29d   : > { %v1340_v45 = vpack.c.bf16 %v1313_v6, %v1312_v5  ;;  %v1299_v10 = vadd.f32 1.0, %v24698_v12 }
 0x29e   : > { %v1314_v13 = vmul.f32 %v1298_v20, %v26347_v22 }
 0x29f   : > { %21201 = vmatprep.subr.bf16.mxu0 %v1340_v45  ;;  %v1315_v24 = vmul.f32 %v1299_v10, %v26371_v11  ;;  %v1393_v37 = vpop.permute.xlu0 %1392 }
 0x2a0   : > { %v24700_v61 = vpop.eup %24699  ;;  %21202 = vmatpush3.bf16.msra.mxu0 %v1340_v45 }
 0x2a1   : > { %v24702_v14 = vpop.eup %24701  ;;  %v1300_v15 = vadd.f32 1.0, %v24700_v61  ;;  %v1341_v16 = vpack.c.bf16 %v1315_v24, %v1314_v13 }
 0x2a2   : > { %v1301_v33 = vadd.f32 1.0, %v24702_v14 }
 0x2a3   : > { %v24704_v18 = vpop.eup %24703  ;;  %21203 = vmatprep.subr.bf16.mxu0 %v1341_v16  ;;  %v1316_v4 = vmul.f32 %v1300_v15, %v26378_v23  ;;  %v23711_v23 = vld [vmem:[#allocation2 + $0x18] sm:$0xff]   ;;  %v1403_v2 = vpop.permute.xlu0 %1402 }
 0x2a4   : > { %v1317_v19 = vmul.f32 %v1301_v33, %v26380_v7  ;;  %21204 = vmatpush3.bf16.msra.mxu0 %v1341_v16  ;;  %v1302_v17 = vadd.f32 1.0, %v24704_v18  ;;  %v23712_v7 = vld [vmem:[#allocation2 + $0x20] sm:$0xff]  }
 0x2a5   : > { %v24706_v21 = vpop.eup %24705 }
 0x2a6   : > { %v1342_v29 = vpack.c.bf16 %v1317_v19, %v1316_v4  ;;  %v1303_v26 = vadd.f32 1.0, %v24706_v21  ;;  %v1318_v22 = vmul.f32 %v1302_v17, %v26385_v34  ;;  %v23716_v34 = vld [vmem:[#allocation5] sm:$0xff]  }
 0x2a7   : > { %v1413_v17 = vpop.permute.xlu0 %1412 }
 0x2a8   : > { %21205 = vmatprep.subr.bf16.mxu0 %v1342_v29  ;;  %v1319_v11 = vmul.f32 %v1303_v26, %v26388_v35  ;;  %v1368_v35 = vpop.permute.xlu1 %1367 }
 0x2a9   : > { %21206 = vmatpush3.bf16.msra.mxu0 %v1342_v29 }
 0x2aa   : > { %v1343_v32 = vpack.c.bf16 %v1319_v11, %v1318_v22 }
 0x2ac   : > { %21207 = vmatprep.subr.bf16.mxu0 %v1343_v32  ;;  %v1378_v39 = vpop.permute.xlu1 %1377 }
 0x2ad   : > { %21208 = vmatpush3.bf16.msra.mxu0 %v1343_v32 }
 0x2b0   : > { %21210 = vmatmul.mubr.bf16.vlgmr.msra.gmra.mrb[16].mxu0 %v23709_v27  ;;  %v1388_v41 = vpop.permute.xlu1 %1387 }
 0x2b1   : > { %21213 = vmatprep.mubr.bf16.mxu0 %v23710_v28 }
 0x2b4   : > { %v1398_v42 = vpop.permute.xlu1 %1397 }
 0x2b8   : > { %21214 = vmatmul.mubr.bf16.gmra.mrb[20].mxu0 %v23711_v23  ;;  %v1408_v59 = vpop.permute.xlu1 %1407 }
 0x2b9   : > { %21217 = vmatprep.mubr.bf16.mxu0 %v23712_v7 }
 0x2bc   : > { %v1418_v4 = vpop.permute.xlu1 %1417 }
 0x2c0   : > { %21218 = vmatmul.mubr.bf16.gmra.mrb[24].mxu0 %v23713_v1 }
 0x2c1   : > { %21221 = vmatprep.mubr.bf16.mxu0 %v23714_v31 }
 0x2c8   : > { %21222 = vmatmul.mubr.bf16.gmra.mrb[28].mxu0 %v23715_v36 }
 0x2c9   : > { %21241 = vmatprep.mubr.bf16.mxu0 %v23716_v34 }
 0x383   : > { %v21211_v8 = vpop.f32.mrb[16].mxu0 }
 0x384   : > { %v26408_v43 = vadd.f32 %v21211_v8, %v1373_v40  ;;  %v1522_v25 = vpop.f32.mrb[17].mxu0 }
 0x385   : > { %v1523_v44 = vadd.f32 %v1522_v25, %v1363_v38  ;;  %v21212_v46 = vpop.f32.mrb[18].mxu0  ;;  %v1423_v25 = vpop.permute.xlu0 %1422 }
 0x386   : > { %v1603_v47 = vmul.f32 0.044715, %v26408_v43  ;;  %v1534_v49 = vadd.f32 %v21212_v46, %v1378_v39  ;;  %v1525_v50 = vpop.f32.mrb[19].mxu0  ;;  %v1428_v39 = vpop.permute.xlu1 %1427 }
 0x387   : > { %v1601_v52 = vmul.f32 0.044715, %v1523_v44  ;;  %v26411_v53 = vadd.f32 %v1525_v50, %v1368_v35 }
 0x388   : > { %v1604_v55 = vmul.f32 0.044715, %v1534_v49  ;;  %v1619_v56 = vmul.f32 %v1603_v47, %v26408_v43  ;;  %v1588_v8 = vmul.f32 0.5, %v1534_v49 }
 0x389   : > { %v1602_v54 = vmul.f32 0.044715, %v26411_v53  ;;  %v1617_v58 = vmul.f32 %v1601_v52, %v1523_v44 }
 0x38a   : > { %v1620_v51 = vmul.f32 %v1604_v55, %v1534_v49  ;;  %v1635_v60 = vmul.f32 %v1619_v56, %v26408_v43 }
 0x38b   : > { %v21215_v30 = vpop.f32.mrb[20].mxu0  ;;  %v1618_v48 = vmul.f32 %v1602_v54, %v26411_v53  ;;  %v1633_v3 = vmul.f32 %v1617_v58, %v1523_v44 }
 0x38c   : > { %v26417_v62 = vadd.f32 %v21215_v30, %v1393_v37  ;;  %v1538_v63 = vpop.f32.mrb[21].mxu0  ;;  %v1636_v5 = vmul.f32 %v1620_v51, %v1534_v49  ;;  %v1651_v6 = vadd.f32 %v1635_v60, %v26408_v43 }
 0x38d   : > { %v1539_v9 = vadd.f32 %v1538_v63, %v1383_v57  ;;  %v21216_v12 = vpop.f32.mrb[22].mxu0  ;;  %v1634_v45 = vmul.f32 %v1618_v48, %v26411_v53  ;;  %v1649_v20 = vadd.f32 %v1633_v3, %v1523_v44  ;;  %v1587_v57 = vmul.f32 0.5, %v26408_v43 }
 0x38e   : > { %v1607_v10 = vmul.f32 0.044715, %v26417_v62  ;;  %v26422_v61 = vadd.f32 %v21216_v12, %v1398_v42  ;;  %v1541_v13 = vpop.f32.mrb[23].mxu0  ;;  %v1652_v24 = vadd.f32 %v1636_v5, %v1534_v49  ;;  %v1667_v14 = vmul.f32 0.7978846, %v1651_v6  ;;  %v1438_v12 = vpop.permute.xlu1 %1437 }
 0x38f   : > { %v1605_v15 = vmul.f32 0.044715, %v1539_v9  ;;  %v1542_v16 = vadd.f32 %v1541_v13, %v1388_v41  ;;  %v1650_v33 = vadd.f32 %v1634_v45, %v26411_v53  ;;  %v1665_v18 = vmul.f32 0.7978846, %v1649_v20  ;;  %v1433_v13 = vpop.permute.xlu0 %1432 }
 0x390   : > { %v1608_v19 = vmul.f32 0.044715, %v26422_v61  ;;  %v1668_v21 = vmul.f32 0.7978846, %v1652_v24  ;;  %24707 = vtanh.f32 %v1667_v14  ;;  %v1623_v27 = vmul.f32 %v1607_v10, %v26417_v62 }
 0x391   : > { %v1606_v29 = vmul.f32 0.044715, %v1542_v16  ;;  %v1666_v26 = vmul.f32 0.7978846, %v1650_v33  ;;  %24709 = vtanh.f32 %v1665_v18  ;;  %v1621_v22 = vmul.f32 %v1605_v15, %v1539_v9 }
 0x392   : > { %24711 = vtanh.f32 %v1668_v21  ;;  %v1624_v28 = vmul.f32 %v1608_v19, %v26422_v61  ;;  %v1639_v35 = vmul.f32 %v1623_v27, %v26417_v62  ;;  %v1585_v41 = vmul.f32 0.5, %v1523_v44 }
 0x393   : > { %v21219_v11 = vpop.f32.mrb[24].mxu0  ;;  %24713 = vtanh.f32 %v1666_v26  ;;  %v1622_v32 = vmul.f32 %v1606_v29, %v1542_v16  ;;  %v1637_v1 = vmul.f32 %v1621_v22, %v1539_v9  ;;  %v26446_v60 = vmul.f32 0.5, %v1539_v9 }
 0x394   : > { %v26428_v23 = vadd.f32 %v21219_v11, %v1413_v17  ;;  %v1554_v7 = vpop.f32.mrb[25].mxu0  ;;  %v1640_v38 = vmul.f32 %v1624_v28, %v26422_v61  ;;  %v1655_v50 = vadd.f32 %v1639_v35, %v26417_v62  ;;  %v26448_v63 = vmul.f32 0.5, %v1542_v16 }
 0x395   : > { %v26430_v31 = vadd.f32 %v1554_v7, %v1403_v2  ;;  %v21220_v36 = vpop.f32.mrb[26].mxu0  ;;  %v1638_v34 = vmul.f32 %v1622_v32, %v1542_v16  ;;  %v1653_v42 = vadd.f32 %v1637_v1, %v1539_v9 }
 0x396   : > { %v1557_v40 = vpop.f32.mrb[27].mxu0  ;;  %v1611_v52 = vmul.f32 0.044715, %v26428_v23  ;;  %v26440_v55 = vadd.f32 %v21220_v36, %v1418_v4  ;;  %v1656_v54 = vadd.f32 %v1640_v38, %v26422_v61  ;;  %v1671_v49 = vmul.f32 0.7978846, %v1655_v50 }
 0x397   : > { %v1609_v37 = vmul.f32 0.044715, %v26430_v31  ;;  %v26436_v46 = vadd.f32 %v1557_v40, %v1408_v59  ;;  %v1654_v47 = vadd.f32 %v1638_v34, %v1542_v16  ;;  %v1669_v56 = vmul.f32 0.7978846, %v1653_v42 }
 0x398   : > { %v1586_v59 = vmul.f32 0.5, %v26411_v53  ;;  %v1672_v2 = vmul.f32 0.7978846, %v1656_v54  ;;  %v1612_v45 = vmul.f32 0.044715, %v26440_v55  ;;  %v1627_v16 = vmul.f32 %v1611_v52, %v26428_v23 }
 0x399   : > { %v1610_v44 = vmul.f32 0.044715, %v26436_v46  ;;  %v1670_v43 = vmul.f32 0.7978846, %v1654_v47  ;;  %v1625_v58 = vmul.f32 %v1609_v37, %v26430_v31  ;;  %24715 = vtanh.f32 %v1669_v56 }
 0x39a   : > { %v24708_v51 = vpop.eup %24707  ;;  %v1628_v28 = vmul.f32 %v1612_v45, %v26440_v55  ;;  %v1643_v34 = vmul.f32 %v1627_v16, %v26428_v23  ;;  %v1591_v38 = vmul.f32 0.5, %v26417_v62 }
 0x39b   : > { %v24710_v30 = vpop.eup %24709  ;;  %v21223_v48 = vpop.f32.mrb[28].mxu0  ;;  %v1699_v3 = vadd.f32 1.0, %v24708_v51  ;;  %24717 = vtanh.f32 %v1670_v43  ;;  %v1626_v5 = vmul.f32 %v1610_v44, %v26436_v46  ;;  %v1641_v53 = vmul.f32 %v1625_v58, %v26430_v31 }
 0x39c   : > { %v24712_v6 = vpop.eup %24711  ;;  %v1570_v20 = vpop.f32.mrb[29].mxu0  ;;  %v1697_v10 = vadd.f32 1.0, %v24710_v30  ;;  %24719 = vtanh.f32 %v1671_v49  ;;  %v26456_v33 = vadd.f32 %v21223_v48, %v1433_v13  ;;  %v1644_v40 = vmul.f32 %v1628_v28, %v26440_v55 }
 0x39d   : > { %v24714_v9 = vpop.eup %24713  ;;  %v26453_v24 = vadd.f32 %v1570_v20, %v1423_v25  ;;  %v21224_v14 = vpop.f32.mrb[30].mxu0  ;;  %v1700_v15 = vadd.f32 1.0, %v24712_v6  ;;  %24721 = vtanh.f32 %v1672_v2  ;;  %v1715_v21 = vmul.f32 %v1699_v3, %v1587_v57 }
 0x39e   : > { %v26458_v18 = vadd.f32 %v21224_v14, %v1438_v12  ;;  %v1573_v4 = vpop.f32.mrb[31].mxu0  ;;  %v1698_v19 = vadd.f32 1.0, %v24714_v9  ;;  %v1642_v22 = vmul.f32 %v1626_v5, %v26436_v46  ;;  %v1713_v11 = vmul.f32 %v1697_v10, %v1585_v41 }
 0x39f   : > { %v1613_v17 = vmul.f32 0.044715, %v26453_v24  ;;  %v26461_v29 = vadd.f32 %v1573_v4, %v1428_v39  ;;  %v1716_v26 = vmul.f32 %v1700_v15, %v1588_v8  ;;  %v1657_v27 = vadd.f32 %v1641_v53, %v26430_v31 }
 0x3a0   : > { %v1714_v32 = vmul.f32 %v1698_v19, %v1586_v59  ;;  %v1658_v36 = vadd.f32 %v1642_v22, %v26436_v46  ;;  %v1615_v41 = vmul.f32 0.044715, %v26456_v33  ;;  %v1659_v8 = vadd.f32 %v1643_v34, %v26428_v23 }
 0x3a1   : > { %v1614_v7 = vmul.f32 0.044715, %v26461_v29  ;;  %v1730_v1 = vpack.c.bf16 %v1716_v26, %v1715_v21  ;;  %v1673_v39 = vmul.f32 0.7978846, %v1657_v27  ;;  %v1629_v42 = vmul.f32 %v1613_v17, %v26453_v24 }
 0x3a2   : > { %v1729_v35 = vpack.c.bf16 %v1714_v32, %v1713_v11  ;;  %v1674_v57 = vmul.f32 0.7978846, %v1658_v36  ;;  %v1616_v37 = vmul.f32 0.044715, %v26458_v18  ;;  %v1660_v47 = vadd.f32 %v1644_v40, %v26440_v55 }
 0x3a3   : > { %v24716_v25 = vpop.eup %24715  ;;  %24723 = vtanh.f32 %v1673_v39  ;;  %v1630_v50 = vmul.f32 %v1614_v7, %v26461_v29  ;;  %v1675_v56 = vmul.f32 0.7978846, %v1659_v8  ;;  %v1645_v54 = vmul.f32 %v1629_v42, %v26453_v24 }
 0x3a4   : > { %21225 = vmatprep.subr.bf16.mxu0 %v1729_v35  ;;  %v1701_v52 = vadd.f32 1.0, %v24716_v25  ;;  %24725 = vtanh.f32 %v1674_v57  ;;  %v1592_v49 = vmul.f32 0.5, %v26422_v61  ;;  %v1676_v58 = vmul.f32 0.7978846, %v1660_v47 }
 0x3a5   : > { %v24718_v62 = vpop.eup %24717  ;;  %21226 = vmatpush3.bf16.msra.mxu0 %v1729_v35  ;;  %v1646_v51 = vmul.f32 %v1630_v50, %v26461_v29  ;;  %24727 = vtanh.f32 %v1675_v56  ;;  %v1661_v48 = vadd.f32 %v1645_v54, %v26453_v24  ;;  %v1631_v61 = vmul.f32 %v1615_v41, %v26456_v33 }
 0x3a6   : > { %v24720_v44 = vpop.eup %24719  ;;  %21227 = vmatprep.subr.bf16.mxu0 %v1730_v1  ;;  %v1702_v43 = vadd.f32 1.0, %v24718_v62  ;;  %v1717_v2 = vmul.f32 %v1701_v52, %v26446_v60  ;;  %24729 = vtanh.f32 %v1676_v58  ;;  %v1632_v45 = vmul.f32 %v1616_v37, %v26458_v18  ;;  %v23719_v58 = vld [vmem:[#allocation5 + $0x18] sm:$0xff]  }
 0x3a7   : > { %v24722_v59 = vpop.eup %24721  ;;  %v1703_v30 = vadd.f32 1.0, %v24720_v44  ;;  %v1662_v6 = vadd.f32 %v1646_v51, %v26461_v29  ;;  %v1677_v12 = vmul.f32 0.7978846, %v1661_v48  ;;  %v1647_v9 = vmul.f32 %v1631_v61, %v26456_v33  ;;  %v23720_v51 = vld [vmem:[#allocation5 + $0x20] sm:$0xff]   ;;  %v23726_v48 = vld [vmem:[#allocation5 + $0x50] sm:$0xff]   ;;  %v23731_v61 = vld [vmem:[#allocation5 + $0x78] sm:$0xff]  }
 0x3a8   : > { %v1718_v3 = vmul.f32 %v1702_v43, %v26448_v63  ;;  %v1704_v5 = vadd.f32 1.0, %v24722_v59  ;;  %v1648_v13 = vmul.f32 %v1632_v45, %v26458_v18  ;;  %v1593_v26 = vmul.f32 0.5, %v26430_v31  ;;  %v23721_v59 = vld [vmem:[#allocation5 + $0x28] sm:$0xff]   ;;  %v23732_v45 = vld [vmem:[#allocation5 + $0x80] sm:$0xff]  }
 0x3a9   : > { %21228 = vmatpush3.bf16.msra.mxu0 %v1730_v1  ;;  %v1719_v10 = vmul.f32 %v1703_v30, %v1591_v38  ;;  %v1678_v60 = vmul.f32 0.7978846, %v1662_v6  ;;  %24731 = vtanh.f32 %v1677_v12  ;;  %v1663_v14 = vadd.f32 %v1647_v9, %v26456_v33  ;;  %v23725_v30 = vld [vmem:[#allocation5 + $0x48] sm:$0xff]   ;;  %v23730_v12 = vld [vmem:[#allocation5 + $0x70] sm:$0xff]  }
 0x3aa   : > { %v1731_v20 = vpack.c.bf16 %v1718_v3, %v1717_v2  ;;  %v1720_v53 = vmul.f32 %v1704_v5, %v1592_v49  ;;  %v1664_v15 = vadd.f32 %v1648_v13, %v26458_v18  ;;  %v1594_v22 = vmul.f32 0.5, %v26436_v46  ;;  %v23718_v49 = vld [vmem:[#allocation5 + $0x10] sm:$0xff]   ;;  %v23727_v3 = vld [vmem:[#allocation5 + $0x58] sm:$0xff]   ;;  %v23728_v5 = vld [vmem:[#allocation5 + $0x60] sm:$0xff]  }
 0x3ab   : > { %24733 = vtanh.f32 %v1678_v60  ;;  %v1679_v21 = vmul.f32 0.7978846, %v1663_v14  ;;  %v1595_v36 = vmul.f32 0.5, %v26428_v23  ;;  %v1596_v34 = vmul.f32 0.5, %v26440_v55  ;;  %v23722_v2 = vld [vmem:[#allocation5 + $0x30] sm:$0xff]   ;;  %v23729_v6 = vld [vmem:[#allocation5 + $0x68] sm:$0xff]  }
 0x3ac   : > { %21229 = vmatprep.subr.bf16.mxu0 %v1731_v20  ;;  %v1732_v63 = vpack.c.bf16 %v1720_v53, %v1719_v10  ;;  %v1680_v17 = vmul.f32 0.7978846, %v1664_v15  ;;  %v1597_v8 = vmul.f32 0.5, %v26453_v24  ;;  %v1598_v42 = vmul.f32 0.5, %v26461_v29  ;;  %v23717_v29 = vld [vmem:[#allocation5 + $0x8] sm:$0xff]   ;;  %v23734_v10 = vld [vmem:[#allocation5 + $0x90] sm:$0xff]  }
 0x3ad   : > { %21230 = vmatpush3.bf16.msra.mxu0 %v1731_v20  ;;  %v24724_v16 = vpop.eup %24723  ;;  %24735 = vtanh.f32 %v1679_v21  ;;  %v1599_v52 = vmul.f32 0.5, %v26456_v33  ;;  %v1600_v56 = vmul.f32 0.5, %v26458_v18  ;;  %v23723_v33 = vld [vmem:[#allocation5 + $0x38] sm:$0xff]   ;;  %v23724_v18 = vld [vmem:[#allocation5 + $0x40] sm:$0xff]   ;;  %v23733_v20 = vld [vmem:[#allocation5 + $0x88] sm:$0xff]  }
 0x3ae   : > { %21231 = vmatprep.subr.bf16.mxu0 %v1732_v63  ;;  %v24726_v4 = vpop.eup %24725  ;;  %v1705_v19 = vadd.f32 1.0, %v24724_v16  ;;  %24737 = vtanh.f32 %v1680_v17  ;;  %v23735_v53 = vld [vmem:[#allocation5 + $0x98] sm:$0xff]   ;;  %v23736_v60 = vld [vmem:[#allocation5 + $0xa0] sm:$0xff]   ;;  %v23737_v9 = vld [vmem:[#allocation5 + $0xa8] sm:$0xff]  }
 0x3af   : > { %v1706_v11 = vadd.f32 1.0, %v24726_v4  ;;  %v24728_v32 = vpop.eup %24727  ;;  %v23738_v13 = vld [vmem:[#allocation5 + $0xb0] sm:$0xff]   ;;  %v23740_v14 = vld [vmem:[#allocation5 + $0xc0] sm:$0xff]   ;;  %v23741_v15 = vld [vmem:[#allocation5 + $0xc8] sm:$0xff]  }
 0x3b0   : > { %v24730_v27 = vpop.eup %24729  ;;  %v1721_v28 = vmul.f32 %v1705_v19, %v1593_v26  ;;  %v1707_v1 = vadd.f32 1.0, %v24728_v32  ;;  %v23742_v16 = vld [vmem:[#allocation5 + $0xd0] sm:$0xff]   ;;  %v23743_v4 = vld [vmem:[#allocation5 + $0xd8] sm:$0xff]   ;;  %v23744_v19 = vld [vmem:[#allocation5 + $0xe0] sm:$0xff]  }
 0x3b1   : > { %21232 = vmatpush3.bf16.msra.mxu0 %v1732_v63  ;;  %v1722_v7 = vmul.f32 %v1706_v11, %v1594_v22  ;;  %v1708_v35 = vadd.f32 1.0, %v24730_v27  ;;  %v23739_v63 = vld [vmem:[#allocation5 + $0xb8] sm:$0xff]   ;;  %v23745_v21 = vld [vmem:[#allocation5 + $0xe8] sm:$0xff]   ;;  %v23746_v17 = vld [vmem:[#allocation5 + $0xf0] sm:$0xff]  }
 0x3b2   : > { %v1723_v40 = vmul.f32 %v1707_v1, %v1595_v36  ;;  %v23747_v26 = vld [vmem:[#allocation5 + $0xf8] sm:$0xff]   ;;  %v23748_v22 = vld [vmem:[#allocation5 + $0x100] sm:$0xff]   ;;  %v23749_v27 = vld [vmem:[#allocation5 + $0x108] sm:$0xff]  }
 0x3b3   : > { %v1733_v38 = vpack.c.bf16 %v1722_v7, %v1721_v28  ;;  %v24732_v39 = vpop.eup %24731  ;;  %v1724_v31 = vmul.f32 %v1708_v35, %v1596_v34  ;;  %v2940_v11 = vld [vmem:[#allocation7 + $0x2] sm:$0x3]  ;;  %v23750_v28 = vld [vmem:[#allocation5 + $0x110] sm:$0xff]   ;;  %v23751_v7 = vld [vmem:[#allocation5 + $0x118] sm:$0xff]  }
 0x3b4   : > { %v1709_v46 = vadd.f32 1.0, %v24732_v39  ;;  %23512 = vmatprep.subr.msk.bf16.mxu1 %vm2966_vm2, %v2940_v11  ;;  %v2968_v32 = vsel %vm2966_vm2, %v2940_v11, 0  ;;  %v23752_v1 = vld [vmem:[#allocation5 + $0x120] sm:$0xff]   ;;  %v23753_v36 = vld [vmem:[#allocation5 + $0x128] sm:$0xff]   ;;  %v23754_v34 = vld [vmem:[#allocation5 + $0x130] sm:$0xff]  }
 0x3b5   : > { %v24734_v41 = vpop.eup %24733  ;;  %21233 = vmatprep.subr.bf16.mxu0 %v1733_v38  ;;  %v1734_v57 = vpack.c.bf16 %v1724_v31, %v1723_v40  ;;  %21386 = vmatpush3.bf16.msra.mxu1 %v2968_v32  ;;  %v26500_v35 = vld [vmem:[#allocation7] sm:$0x3]  ;;  %v23757_v40 = vld [vmem:[#allocation5 + $0x148] sm:$0xff]   ;;  %v23758_v31 = vld [vmem:[#allocation5 + $0x150] sm:$0xff]  }
 0x3b6   : > { %21234 = vmatpush3.bf16.msra.mxu0 %v1733_v38  ;;  %v1710_v25 = vadd.f32 1.0, %v24734_v41  ;;  %v1725_v37 = vmul.f32 %v1709_v46, %v1597_v8  ;;  %v23755_v38 = vld [vmem:[#allocation5 + $0x138] sm:$0xff]   ;;  %23513 = vmatprep.subr.msk.bf16.mxu1 %vm2966_vm2, %v26500_v35  ;;  %v23756_v39 = vld [vmem:[#allocation5 + $0x140] sm:$0xff]   ;;  %v23762_v8 = vld [vmem:[#allocation5 + $0x170] sm:$0xff]  }
 0x3b7   : > { %21235 = vmatprep.subr.bf16.mxu0 %v1734_v57  ;;  %v24736_v47 = vpop.eup %24735  ;;  %v23759_v41 = vld [vmem:[#allocation5 + $0x158] sm:$0xff]   ;;  %v23760_v46 = vld [vmem:[#allocation5 + $0x160] sm:$0xff]  }
 0x3b8   : > { %v1726_v23 = vmul.f32 %v1710_v25, %v1598_v42  ;;  %v24738_v50 = vpop.eup %24737  ;;  %v1711_v62 = vadd.f32 1.0, %v24736_v47  ;;  %v23763_v42 = vld [vmem:[#allocation5 + $0x178] sm:$0xff]   ;;  %v23764_v25 = vld [vmem:[#allocation5 + $0x180] sm:$0xff]  }
 0x3b9   : > { %v1712_v54 = vadd.f32 1.0, %v24738_v50  ;;  %v23767_v47 = vld [vmem:[#allocation5 + $0x198] sm:$0xff]   ;;  %v23769_v50 = vld [vmem:[#allocation5 + $0x1a8] sm:$0xff]  }
 0x3ba   : > { %21236 = vmatpush3.bf16.msra.mxu0 %v1734_v57  ;;  %v1735_v55 = vpack.c.bf16 %v1726_v23, %v1725_v37  ;;  %v1727_v44 = vmul.f32 %v1711_v62, %v1599_v52  ;;  %v23761_v57 = vld [vmem:[#allocation5 + $0x168] sm:$0xff]   ;;  %v23766_v23 = vld [vmem:[#allocation5 + $0x190] sm:$0xff]  }
 0x3bb   : > { %v1728_v24 = vmul.f32 %v1712_v54, %v1600_v56  ;;  %v23765_v37 = vld [vmem:[#allocation5 + $0x188] sm:$0xff]   ;;  %v23770_v62 = vld [vmem:[#allocation5 + $0x1b0] sm:$0xff]   ;;  %v23771_v54 = vld [vmem:[#allocation5 + $0x1b8] sm:$0xff]  }
 0x3bc   : > { %21237 = vmatprep.subr.bf16.mxu0 %v1735_v55 }
 0x3bd   : > { %v1736_v43 = vpack.c.bf16 %v1728_v24, %v1727_v44  ;;  %v23772_v24 = vld [vmem:[#allocation5 + $0x1c0] sm:$0xff]  }
 0x3be   : > { %21238 = vmatpush3.bf16.msra.mxu0 %v1735_v55  ;;  %v23768_v55 = vld [vmem:[#allocation5 + $0x1a0] sm:$0xff]  }
 0x3bf   : > { %21239 = vmatprep.subr.bf16.mxu0 %v1736_v43 }
 0x3c2   : > { %21240 = vmatpush3.bf16.msra.mxu0 %v1736_v43 }
 0x3c5   : > { %21242 = vmatmul.mubr.bf16.vlgmr.msra.gmra.mrb[32].mxu0 %v23717_v29 }
 0x3c6   : > { %21245 = vmatprep.mubr.bf16.mxu0 %v23718_v49 }
 0x3cd   : > { %21246 = vmatmul.mubr.bf16.gmra.mrb[36].mxu0 %v23719_v58 }
 0x3ce   : > { %21249 = vmatprep.mubr.bf16.mxu0 %v23720_v51 }
 0x3d5   : > { %21250 = vmatmul.mubr.bf16.gmra.mrb[40].mxu0 %v23721_v59  ;;  %v23773_v59 = vld [vmem:[#allocation5 + $0x1c8] sm:$0xff]  }
 0x3d6   : > { %21253 = vmatprep.mubr.bf16.mxu0 %v23722_v2 }
 0x3dd   : > { %21254 = vmatmul.mubr.bf16.gmra.mrb[44].mxu0 %v23723_v33  ;;  %v23774_v33 = vld [vmem:[#allocation5 + $0x1d0] sm:$0xff]  }
 0x3de   : > { %21257 = vmatprep.mubr.bf16.mxu0 %v23724_v18 }
 0x3e5   : > { %21258 = vmatmul.mubr.bf16.gmra.mrb[48].mxu0 %v23725_v30 }
 0x3e6   : > { %21261 = vmatprep.mubr.bf16.mxu0 %v23726_v48 }
 0x3ed   : > { %21262 = vmatmul.mubr.bf16.gmra.mrb[52].mxu0 %v23727_v3 }
 0x3ee   : > { %21265 = vmatprep.mubr.bf16.mxu0 %v23728_v5 }
 0x3f5   : > { %21266 = vmatmul.mubr.bf16.gmra.mrb[56].mxu0 %v23729_v6  ;;  %v23775_v6 = vld [vmem:[#allocation5 + $0x1d8] sm:$0xff]  }
 0x3f6   : > { %21269 = vmatprep.mubr.bf16.mxu0 %v23730_v12 }
 0x3fd   : > { %21270 = vmatmul.mubr.bf16.gmra.mrb[60].mxu0 %v23731_v61  ;;  %v23776_v61 = vld [vmem:[#allocation5 + $0x1e0] sm:$0xff]  }
 0x3fe   : > { %21273 = vmatprep.mubr.bf16.mxu0 %v23732_v45 }
 0x405   : > { %21274 = vmatmul.mubr.bf16.gmra.mrb[64].mxu0 %v23733_v20 }
 0x406   : > { %21277 = vmatprep.mubr.bf16.mxu0 %v23734_v10 }
 0x40d   : > { %21278 = vmatmul.mubr.bf16.gmra.mrb[68].mxu0 %v23735_v53 }
 0x40e   : > { %21281 = vmatprep.mubr.bf16.mxu0 %v23736_v60 }
 0x415   : > { %21282 = vmatmul.mubr.bf16.gmra.mrb[72].mxu0 %v23737_v9  ;;  %v23777_v9 = vld [vmem:[#allocation5 + $0x1e8] sm:$0xff]  }
 0x416   : > { %21285 = vmatprep.mubr.bf16.mxu0 %v23738_v13 }
 0x41d   : > { %21286 = vmatmul.mubr.bf16.gmra.mrb[76].mxu0 %v23739_v63  ;;  %v23778_v63 = vld [vmem:[#allocation5 + $0x1f0] sm:$0xff]  }
 0x41e   : > { %21289 = vmatprep.mubr.bf16.mxu0 %v23740_v14 }
 0x425   : > { %21290 = vmatmul.mubr.bf16.gmra.mrb[80].mxu0 %v23741_v15 }
 0x426   : > { %21293 = vmatprep.mubr.bf16.mxu0 %v23742_v16 }
 0x42d   : > { %21294 = vmatmul.mubr.bf16.gmra.mrb[84].mxu0 %v23743_v4 }
 0x42e   : > { %21297 = vmatprep.mubr.bf16.mxu0 %v23744_v19 }
 0x435   : > { %21298 = vmatmul.mubr.bf16.gmra.mrb[88].mxu0 %v23745_v21  ;;  %v23779_v21 = vld [vmem:[#allocation5 + $0x1f8] sm:$0xff]  }
 0x436   : > { %21301 = vmatprep.mubr.bf16.mxu0 %v23746_v17 }
 0x43d   : > { %21302 = vmatmul.mubr.bf16.gmra.mrb[92].mxu0 %v23747_v26  ;;  %v23780_v26 = vld [vmem:[#allocation5 + $0x200] sm:$0xff]  }
 0x43e   : > { %21305 = vmatprep.mubr.bf16.mxu0 %v23748_v22 }
 0x445   : > { %21306 = vmatmul.mubr.bf16.gmra.mrb[96].mxu0 %v23749_v27  ;;  %v3092_v27 = vsel %vm2966_vm2, %v26500_v35, 0 }
 0x446   : > { %21309 = vmatprep.mubr.bf16.mxu0 %v23750_v28  ;;  %v3200_v28 = vld [vmem:[#allocation7 + $0x4] sm:$0x3] }
 0x44d   : > { %21310 = vmatmul.mubr.bf16.gmra.mrb[100].mxu0 %v23751_v7 }
 0x44e   : > { %21313 = vmatprep.mubr.bf16.mxu0 %v23752_v1 }
 0x455   : > { %21314 = vmatmul.mubr.bf16.gmra.mrb[104].mxu0 %v23753_v36  ;;  %v23781_v36 = vld [vmem:[#allocation5 + $0x208] sm:$0xff]  }
 0x456   : > { %21317 = vmatprep.mubr.bf16.mxu0 %v23754_v34 }
 0x45d   : > { %21318 = vmatmul.mubr.bf16.gmra.mrb[108].mxu0 %v23755_v38  ;;  %v23782_v38 = vld [vmem:[#allocation5 + $0x210] sm:$0xff]  }
 0x45e   : > { %21321 = vmatprep.mubr.bf16.mxu0 %v23756_v39 }
 0x465   : > { %21322 = vmatmul.mubr.bf16.gmra.mrb[112].mxu0 %v23757_v40 }
 0x466   : > { %21325 = vmatprep.mubr.bf16.mxu0 %v23758_v31 }
 0x46d   : > { %21326 = vmatmul.mubr.bf16.gmra.mrb[116].mxu0 %v23759_v41 }
 0x46e   : > { %21329 = vmatprep.mubr.bf16.mxu0 %v23760_v46  ;;  %v23783_v46 = vld [vmem:[#allocation5 + $0x218] sm:$0xff]  }
 0x475   : > { %21330 = vmatmul.mubr.bf16.gmra.mrb[120].mxu0 %v23761_v57 }
 0x476   : > { %21333 = vmatprep.mubr.bf16.mxu0 %v23762_v8  ;;  %v23784_v8 = vld [vmem:[#allocation5 + $0x220] sm:$0xff]  }
 0x47d   : > { %21334 = vmatmul.mubr.bf16.gmra.mrb[124].mxu0 %v23763_v42 }
 0x47e   : > { %21337 = vmatprep.mubr.bf16.mxu0 %v23764_v25 }
 0x485   : > { %21338 = vmatmul.mubr.bf16.gmra.mrb[128].mxu0 %v23765_v37 }
 0x486   : > { %21341 = vmatprep.mubr.bf16.mxu0 %v23766_v23 }
 0x48d   : > { %21342 = vmatmul.mubr.bf16.gmra.mrb[132].mxu0 %v23767_v47 }
 0x48e   : > { %21345 = vmatprep.mubr.bf16.mxu0 %v23768_v55  ;;  %v23785_v55 = vld [vmem:[#allocation5 + $0x228] sm:$0xff]  }
 0x495   : > { %21346 = vmatmul.mubr.bf16.gmra.mrb[136].mxu0 %v23769_v50 }
 0x496   : > { %21349 = vmatprep.mubr.bf16.mxu0 %v23770_v62  ;;  %v23786_v62 = vld [vmem:[#allocation5 + $0x230] sm:$0xff]  }
 0x498   : > { %v26504_v52 = vpop.f32.mrb[32].mxu0 }
 0x499   : > { %v26506_v56 = vpop.f32.mrb[33].mxu0 }
 0x49a   : > { %v26508_v44 = vpop.f32.mrb[34].mxu0 }
 0x49b   : > { %v2923_v43 = vpack.c.bf16 %v26508_v44, %v26504_v52  ;;  %v26512_v29 = vpop.f32.mrb[35].mxu0 }
 0x49c   : > { %v2922_v49 = vpack.c.bf16 %v26512_v29, %v26506_v56 }
 0x49d   : > { %21350 = vmatmul.mubr.bf16.gmra.mrb[140].mxu0 %v23771_v54 }
 0x49e   : > { %21353 = vmatprep.mubr.bf16.mxu0 %v23772_v24 }
 0x4a0   : > { %v26516_v58 = vpop.f32.mrb[36].mxu0 }
 0x4a1   : > { %v26518_v51 = vpop.f32.mrb[37].mxu0 }
 0x4a2   : > { %v26520_v2 = vpop.f32.mrb[38].mxu0 }
 0x4a3   : > { %v2925_v18 = vpack.c.bf16 %v26520_v2, %v26516_v58  ;;  %v26524_v30 = vpop.f32.mrb[39].mxu0 }
 0x4a4   : > { %v2924_v48 = vpack.c.bf16 %v26524_v30, %v26518_v51 }
 0x4a5   : > { %21354 = vmatmul.mubr.bf16.gmra.mrb[144].mxu0 %v23773_v59 }
 0x4a6   : > { %21357 = vmatprep.mubr.bf16.mxu0 %v23774_v33 }
 0x4a8   : > { %v26528_v3 = vpop.f32.mrb[40].mxu0 }
 0x4a9   : > { %v26530_v5 = vpop.f32.mrb[41].mxu0 }
 0x4aa   : > { %v26532_v12 = vpop.f32.mrb[42].mxu0 }
 0x4ab   : > { %v2927_v45 = vpack.c.bf16 %v26532_v12, %v26528_v3  ;;  %v26536_v20 = vpop.f32.mrb[43].mxu0 }
 0x4ac   : > { %v2926_v10 = vpack.c.bf16 %v26536_v20, %v26530_v5 }
 0x4ad   : > { %21358 = vmatmul.mubr.bf16.gmra.mrb[148].mxu0 %v23775_v6 }
 0x4ae   : > { %21361 = vmatprep.mubr.bf16.mxu0 %v23776_v61  ;;  %v23787_v61 = vld [vmem:[#allocation5 + $0x238] sm:$0xff]  }
 0x4b0   : > { %v26540_v53 = vpop.f32.mrb[44].mxu0 }
 0x4b1   : > { %v26542_v60 = vpop.f32.mrb[45].mxu0 }
 0x4b2   : > { %v26544_v13 = vpop.f32.mrb[46].mxu0 }
 0x4b3   : > { %v2929_v14 = vpack.c.bf16 %v26544_v13, %v26540_v53  ;;  %v26548_v15 = vpop.f32.mrb[47].mxu0 }
 0x4b4   : > { %v2928_v16 = vpack.c.bf16 %v26548_v15, %v26542_v60 }
 0x4b5   : > { %21362 = vmatmul.mubr.bf16.gmra.mrb[152].mxu0 %v23777_v9 }
 0x4b6   : > { %21365 = vmatprep.mubr.bf16.mxu0 %v23778_v63 }
 0x4b8   : > { %v21259_v4 = vpop.f32.mrb[48].mxu0 }
 0x4b9   : > { %v2411_v19 = vpop.f32.mrb[49].mxu0 }
 0x4ba   : > { %v21260_v17 = vpop.f32.mrb[50].mxu0 }
 0x4bb   : > { %v2932_v22 = vpack.c.bf16 %v21260_v17, %v21259_v4  ;;  %v2414_v11 = vpop.f32.mrb[51].mxu0  ;;  %v3350_v17 = vld [vmem:[#allocation7 + $0x6] sm:$0x3] }
 0x4bc   : > { %v2931_v32 = vpack.c.bf16 %v2414_v11, %v2411_v19 }
 0x4bd   : > { %21366 = vmatmul.mubr.bf16.gmra.mrb[156].mxu0 %v23779_v21  ;;  %v3226_v21 = vsel %vm2966_vm2, %v3200_v28, 0 }
 0x4be   : > { %21387 = vmatprep.mubr.msk.bf16.mxu1 %vm2941_vm3, %v2931_v32  ;;  %21369 = vmatprep.mubr.bf16.mxu0 %v23780_v26 }
 0x4bf   : > { %21388 = vmatmul.mubr.msk.bf16.vlgmr.msra.gmra.mrb[0].mxu1 %vm2941_vm3, %v2932_v22 }
 0x4c0   : > { %v21263_v7 = vpop.f32.mrb[52].mxu0  ;;  %21404 = vmatpush3.bf16.msra.mxu1 %v3092_v27  ;;  %v3500_v27 = vld [vmem:[#allocation7 + $0x8] sm:$0x3] }
 0x4c1   : > { %v2427_v1 = vpop.f32.mrb[53].mxu0  ;;  %23514 = vmatprep.subr.msk.bf16.mxu1 %vm2966_vm2, %v3200_v28 }
 0x4c2   : > { %v21264_v34 = vpop.f32.mrb[54].mxu0 }
 0x4c3   : > { %v2934_v39 = vpack.c.bf16 %v21264_v34, %v21263_v7  ;;  %v2430_v40 = vpop.f32.mrb[55].mxu0 }
 0x4c4   : > { %v2933_v31 = vpack.c.bf16 %v2430_v40, %v2427_v1 }
 0x4c5   : > { %21370 = vmatmul.mubr.bf16.gmra.mrb[160].mxu0 %v23781_v36 }
 0x4c6   : > { %21391 = vmatprep.mubr.msk.bf16.mxu1 %vm2941_vm3, %v2933_v31  ;;  %21373 = vmatprep.mubr.bf16.mxu0 %v23782_v38 }
 0x4c7   : > { %21392 = vmatmul.mubr.msk.bf16.gmra.mrb[4].mxu1 %vm2941_vm3, %v2934_v39 }
 0x4c8   : > { %v21267_v35 = vpop.f32.mrb[56].mxu0 }
 0x4c9   : > { %v2443_v41 = vpop.f32.mrb[57].mxu0 }
 0x4ca   : > { %v21268_v57 = vpop.f32.mrb[58].mxu0 }
 0x4cb   : > { %v2936_v42 = vpack.c.bf16 %v21268_v57, %v21267_v35  ;;  %v2446_v25 = vpop.f32.mrb[59].mxu0 }
 0x4cc   : > { %v2935_v37 = vpack.c.bf16 %v2446_v25, %v2443_v41 }
 0x4cd   : > { %21374 = vmatmul.mubr.bf16.gmra.mrb[164].mxu0 %v23783_v46 }
 0x4ce   : > { %21395 = vmatprep.mubr.msk.bf16.mxu1 %vm2941_vm3, %v2935_v37  ;;  %21377 = vmatprep.mubr.bf16.mxu0 %v23784_v8 }
 0x4cf   : > { %21396 = vmatmul.mubr.msk.bf16.gmra.mrb[8].mxu1 %vm2941_vm3, %v2936_v42 }
 0x4d0   : > { %v21271_v23 = vpop.f32.mrb[60].mxu0 }
 0x4d1   : > { %v2459_v47 = vpop.f32.mrb[61].mxu0 }
 0x4d2   : > { %v21272_v50 = vpop.f32.mrb[62].mxu0 }
 0x4d3   : > { %v2938_v54 = vpack.c.bf16 %v21272_v50, %v21271_v23  ;;  %v2462_v24 = vpop.f32.mrb[63].mxu0 }
 0x4d4   : > { %v2937_v59 = vpack.c.bf16 %v2462_v24, %v2459_v47 }
 0x4d5   : > { %21378 = vmatmul.mubr.bf16.gmra.mrb[168].mxu0 %v23785_v55 }
 0x4d6   : > { %21399 = vmatprep.mubr.msk.bf16.mxu1 %vm2941_vm3, %v2937_v59  ;;  %21381 = vmatprep.mubr.bf16.mxu0 %v23786_v62  ;;  %v3526_v62 = vsel %vm2966_vm2, %v3500_v27, 0 }
 0x4d7   : > { %21400 = vmatmul.mubr.msk.bf16.gmra.mrb[12].mxu1 %vm2941_vm3, %v2938_v54  ;;  %v3650_v54 = vld [vmem:[#allocation7 + $0xa] sm:$0x3] }
 0x4d8   : > { %21405 = vmatprep.mubr.msk.bf16.mxu1 %vm2941_vm3, %v2922_v49  ;;  %v21275_v33 = vpop.f32.mrb[64].mxu0 }
 0x4d9   : > { %v2475_v6 = vpop.f32.mrb[65].mxu0 }
 0x4da   : > { %v21276_v9 = vpop.f32.mrb[66].mxu0 }
 0x4db   : > { %v3192_v63 = vpack.c.bf16 %v21276_v9, %v21275_v33  ;;  %v2478_v4 = vpop.f32.mrb[67].mxu0 }
 0x4dc   : > { %v3191_v19 = vpack.c.bf16 %v2478_v4, %v2475_v6 }
 0x4dd   : > { %21382 = vmatmul.mubr.bf16.gmra.mrb[172].mxu0 %v23787_v61 }
 0x4df   : > { %21406 = vmatmul.mubr.msk.bf16.vlgmr.msra.gmra.mrb[0].mxu1 %vm2941_vm3, %v2923_v43 }
 0x4e0   : > { %21409 = vmatprep.mubr.msk.bf16.mxu1 %vm2941_vm3, %v2924_v48  ;;  %21422 = vmatpush3.bf16.msra.mxu1 %v3226_v21  ;;  %v21279_v56 = vpop.f32.mrb[68].mxu0 }
 0x4e1   : > { %v2491_v29 = vpop.f32.mrb[69].mxu0  ;;  %23515 = vmatprep.subr.msk.bf16.mxu1 %vm2966_vm2, %v3350_v17 }
 0x4e2   : > { %v21280_v49 = vpop.f32.mrb[70].mxu0 }
 0x4e3   : > { %v3194_v26 = vpack.c.bf16 %v21280_v49, %v21279_v56  ;;  %v2494_v22 = vpop.f32.mrb[71].mxu0 }
 0x4e4   : > { %v3193_v11 = vpack.c.bf16 %v2494_v22, %v2491_v29 }
 0x4e7   : > { %21410 = vmatmul.mubr.msk.bf16.gmra.mrb[4].mxu1 %vm2941_vm3, %v2925_v18 }
 0x4e8   : > { %21413 = vmatprep.mubr.msk.bf16.mxu1 %vm2941_vm3, %v2926_v10  ;;  %v21283_v52 = vpop.f32.mrb[72].mxu0 }
 0x4e9   : > { %v2507_v44 = vpop.f32.mrb[73].mxu0 }
 0x4ea   : > { %v21284_v43 = vpop.f32.mrb[74].mxu0 }
 0x4eb   : > { %v3196_v51 = vpack.c.bf16 %v21284_v43, %v21283_v52  ;;  %v2510_v30 = vpop.f32.mrb[75].mxu0 }
 0x4ec   : > { %v3195_v48 = vpack.c.bf16 %v2510_v30, %v2507_v44 }
 0x4ef   : > { %21414 = vmatmul.mubr.msk.bf16.gmra.mrb[8].mxu1 %vm2941_vm3, %v2927_v45 }
 0x4f0   : > { %21417 = vmatprep.mubr.msk.bf16.mxu1 %vm2941_vm3, %v2928_v16  ;;  %v21287_v58 = vpop.f32.mrb[76].mxu0  ;;  %v3376_v16 = vsel %vm2966_vm2, %v3350_v17, 0 }
 0x4f1   : > { %v2523_v2 = vpop.f32.mrb[77].mxu0 }
 0x4f2   : > { %v21288_v18 = vpop.f32.mrb[78].mxu0 }
 0x4f3   : > { %v3198_v5 = vpack.c.bf16 %v21288_v18, %v21287_v58  ;;  %v2526_v20 = vpop.f32.mrb[79].mxu0  ;;  %v3800_v18 = vld [vmem:[#allocation7 + $0xc] sm:$0x3] }
 0x4f4   : > { %v3197_v10 = vpack.c.bf16 %v2526_v20, %v2523_v2  ;;  %v3676_v2 = vsel %vm2966_vm2, %v3650_v54, 0 }
 0x4f7   : > { %21418 = vmatmul.mubr.msk.bf16.gmra.mrb[12].mxu1 %vm2941_vm3, %v2929_v14 }
 0x4f8   : > { %21423 = vmatprep.mubr.msk.bf16.mxu1 %vm2941_vm3, %v3191_v19  ;;  %v21291_v3 = vpop.f32.mrb[80].mxu0 }
 0x4f9   : > { %v2539_v12 = vpop.f32.mrb[81].mxu0 }
 0x4fa   : > { %v21292_v45 = vpop.f32.mrb[82].mxu0 }
 0x4fb   : > { %v3342_v32 = vpack.c.bf16 %v21292_v45, %v21291_v3  ;;  %v2542_v60 = vpop.f32.mrb[83].mxu0 }
 0x4fc   : > { %v3341_v15 = vpack.c.bf16 %v2542_v60, %v2539_v12 }
 0x4ff   : > { %21424 = vmatmul.mubr.msk.bf16.vlgmr.msra.gmra.mrb[0].mxu1 %vm2941_vm3, %v3192_v63 }
 0x500   : > { %21427 = vmatprep.mubr.msk.bf16.mxu1 %vm2941_vm3, %v3193_v11  ;;  %21440 = vmatpush3.bf16.msra.mxu1 %v3376_v16  ;;  %v21295_v28 = vpop.f32.mrb[84].mxu0 }
 0x501   : > { %v2555_v53 = vpop.f32.mrb[85].mxu0  ;;  %23516 = vmatprep.subr.msk.bf16.mxu1 %vm2966_vm2, %v3500_v27 }
 0x502   : > { %v21296_v13 = vpop.f32.mrb[86].mxu0 }
 0x503   : > { %v3344_v14 = vpack.c.bf16 %v21296_v13, %v21295_v28  ;;  %v2558_v7 = vpop.f32.mrb[87].mxu0 }
 0x504   : > { %v3343_v1 = vpack.c.bf16 %v2558_v7, %v2555_v53 }
 0x507   : > { %21428 = vmatmul.mubr.msk.bf16.gmra.mrb[4].mxu1 %vm2941_vm3, %v3194_v26 }
 0x508   : > { %21431 = vmatprep.mubr.msk.bf16.mxu1 %vm2941_vm3, %v3195_v48  ;;  %v21299_v36 = vpop.f32.mrb[88].mxu0 }
 0x509   : > { %v2571_v34 = vpop.f32.mrb[89].mxu0 }
 0x50a   : > { %v21300_v38 = vpop.f32.mrb[90].mxu0 }
 0x50b   : > { %v3346_v39 = vpack.c.bf16 %v21300_v38, %v21299_v36  ;;  %v2574_v40 = vpop.f32.mrb[91].mxu0 }
 0x50c   : > { %v3345_v31 = vpack.c.bf16 %v2574_v40, %v2571_v34 }
 0x50f   : > { %21432 = vmatmul.mubr.msk.bf16.gmra.mrb[8].mxu1 %vm2941_vm3, %v3196_v51 }
 0x510   : > { %21435 = vmatprep.mubr.msk.bf16.mxu1 %vm2941_vm3, %v3197_v10  ;;  %v21303_v35 = vpop.f32.mrb[92].mxu0 }
 0x511   : > { %v2587_v41 = vpop.f32.mrb[93].mxu0 }
 0x512   : > { %v21304_v46 = vpop.f32.mrb[94].mxu0 }
 0x513   : > { %v3348_v57 = vpack.c.bf16 %v21304_v46, %v21303_v35  ;;  %v2590_v8 = vpop.f32.mrb[95].mxu0  ;;  %v3950_v46 = vld [vmem:[#allocation7 + $0xe] sm:$0x3] }
 0x514   : > { %v3347_v42 = vpack.c.bf16 %v2590_v8, %v2587_v41  ;;  %v3826_v41 = vsel %vm2966_vm2, %v3800_v18, 0 }
 0x517   : > { %21436 = vmatmul.mubr.msk.bf16.gmra.mrb[12].mxu1 %vm2941_vm3, %v3198_v5 }
 0x518   : > { %21441 = vmatprep.mubr.msk.bf16.mxu1 %vm2941_vm3, %v3341_v15  ;;  %v21307_v25 = vpop.f32.mrb[96].mxu0 }
 0x519   : > { %v2603_v37 = vpop.f32.mrb[97].mxu0 }
 0x51a   : > { %v21308_v23 = vpop.f32.mrb[98].mxu0 }
 0x51b   : > { %v3492_v47 = vpack.c.bf16 %v21308_v23, %v21307_v25  ;;  %v2606_v55 = vpop.f32.mrb[99].mxu0 }
 0x51c   : > { %v3491_v50 = vpack.c.bf16 %v2606_v55, %v2603_v37 }
 0x51f   : > { %21442 = vmatmul.mubr.msk.bf16.vlgmr.msra.gmra.mrb[0].mxu1 %vm2941_vm3, %v3342_v32 }
 0x520   : > { %21445 = vmatprep.mubr.msk.bf16.mxu1 %vm2941_vm3, %v3343_v1  ;;  %21458 = vmatpush3.bf16.msra.mxu1 %v3526_v62  ;;  %v21311_v24 = vpop.f32.mrb[100].mxu0 }
 0x521   : > { %v2619_v59 = vpop.f32.mrb[101].mxu0  ;;  %23517 = vmatprep.subr.msk.bf16.mxu1 %vm2966_vm2, %v3650_v54 }
 0x522   : > { %v21312_v33 = vpop.f32.mrb[102].mxu0 }
 0x523   : > { %v3494_v6 = vpack.c.bf16 %v21312_v33, %v21311_v24  ;;  %v2622_v61 = vpop.f32.mrb[103].mxu0 }
 0x524   : > { %v3493_v9 = vpack.c.bf16 %v2622_v61, %v2619_v59 }
 0x527   : > { %21446 = vmatmul.mubr.msk.bf16.gmra.mrb[4].mxu1 %vm2941_vm3, %v3344_v14 }
 0x528   : > { %21449 = vmatprep.mubr.msk.bf16.mxu1 %vm2941_vm3, %v3345_v31  ;;  %v21315_v63 = vpop.f32.mrb[104].mxu0 }
 0x529   : > { %v2635_v4 = vpop.f32.mrb[105].mxu0 }
 0x52a   : > { %v21316_v19 = vpop.f32.mrb[106].mxu0 }
 0x52b   : > { %v3496_v21 = vpack.c.bf16 %v21316_v19, %v21315_v63  ;;  %v2638_v17 = vpop.f32.mrb[107].mxu0 }
 0x52c   : > { %v3495_v56 = vpack.c.bf16 %v2638_v17, %v2635_v4 }
 0x52f   : > { %21450 = vmatmul.mubr.msk.bf16.gmra.mrb[8].mxu1 %vm2941_vm3, %v3346_v39 }
 0x530   : > { %21453 = vmatprep.mubr.msk.bf16.mxu1 %vm2941_vm3, %v3347_v42  ;;  %v21319_v29 = vpop.f32.mrb[108].mxu0 }
 0x531   : > { %v2651_v49 = vpop.f32.mrb[109].mxu0 }
 0x532   : > { %v21320_v26 = vpop.f32.mrb[110].mxu0 }
 0x533   : > { %v3498_v22 = vpack.c.bf16 %v21320_v26, %v21319_v29  ;;  %v2654_v11 = vpop.f32.mrb[111].mxu0  ;;  %v4100_v26 = vld [vmem:[#allocation7 + $0x10] sm:$0x3] }
 0x534   : > { %v3497_v52 = vpack.c.bf16 %v2654_v11, %v2651_v49  ;;  %v3976_v49 = vsel %vm2966_vm2, %v3950_v46, 0 }
 0x537   : > { %21454 = vmatmul.mubr.msk.bf16.gmra.mrb[12].mxu1 %vm2941_vm3, %v3348_v57 }
 0x538   : > { %21459 = vmatprep.mubr.msk.bf16.mxu1 %vm2941_vm3, %v3491_v50  ;;  %v21323_v44 = vpop.f32.mrb[112].mxu0 }
 0x539   : > { %v2667_v43 = vpop.f32.mrb[113].mxu0 }
 0x53a   : > { %v21324_v51 = vpop.f32.mrb[114].mxu0 }
 0x53b   : > { %v3642_v30 = vpack.c.bf16 %v21324_v51, %v21323_v44  ;;  %v2670_v48 = vpop.f32.mrb[115].mxu0 }
 0x53c   : > { %v3641_v58 = vpack.c.bf16 %v2670_v48, %v2667_v43 }
 0x53f   : > { %21460 = vmatmul.mubr.msk.bf16.vlgmr.msra.gmra.mrb[0].mxu1 %vm2941_vm3, %v3492_v47 }
 0x540   : > { %21463 = vmatprep.mubr.msk.bf16.mxu1 %vm2941_vm3, %v3493_v9  ;;  %21476 = vmatpush3.bf16.msra.mxu1 %v3676_v2  ;;  %v21327_v5 = vpop.f32.mrb[116].mxu0 }
 0x541   : > { %v2683_v20 = vpop.f32.mrb[117].mxu0  ;;  %23518 = vmatprep.subr.msk.bf16.mxu1 %vm2966_vm2, %v3800_v18 }
 0x542   : > { %v21328_v10 = vpop.f32.mrb[118].mxu0 }
 0x543   : > { %v3644_v3 = vpack.c.bf16 %v21328_v10, %v21327_v5  ;;  %v2686_v12 = vpop.f32.mrb[119].mxu0 }
 0x544   : > { %v3643_v45 = vpack.c.bf16 %v2686_v12, %v2683_v20 }
 0x547   : > { %21464 = vmatmul.mubr.msk.bf16.gmra.mrb[4].mxu1 %vm2941_vm3, %v3494_v6 }
 0x548   : > { %21467 = vmatprep.mubr.msk.bf16.mxu1 %vm2941_vm3, %v3495_v56  ;;  %v21331_v32 = vpop.f32.mrb[120].mxu0 }
 0x549   : > { %v2699_v60 = vpop.f32.mrb[121].mxu0 }
 0x54a   : > { %v21332_v15 = vpop.f32.mrb[122].mxu0 }
 0x54b   : > { %v3646_v16 = vpack.c.bf16 %v21332_v15, %v21331_v32  ;;  %v2702_v27 = vpop.f32.mrb[123].mxu0 }
 0x54c   : > { %v3645_v28 = vpack.c.bf16 %v2702_v27, %v2699_v60 }
 0x54f   : > { %21468 = vmatmul.mubr.msk.bf16.gmra.mrb[8].mxu1 %vm2941_vm3, %v3496_v21 }
 0x550   : > { %21471 = vmatprep.mubr.msk.bf16.mxu1 %vm2941_vm3, %v3497_v52  ;;  %v21335_v53 = vpop.f32.mrb[124].mxu0 }
 0x551   : > { %v2715_v13 = vpop.f32.mrb[125].mxu0 }
 0x552   : > { %v21336_v14 = vpop.f32.mrb[126].mxu0 }
 0x553   : > { %v3648_v7 = vpack.c.bf16 %v21336_v14, %v21335_v53  ;;  %v2718_v1 = vpop.f32.mrb[127].mxu0 }
 0x554   : > { %v3647_v36 = vpack.c.bf16 %v2718_v1, %v2715_v13  ;;  %v4126_v13 = vsel %vm2966_vm2, %v4100_v26, 0 }
 0x557   : > { %21472 = vmatmul.mubr.msk.bf16.gmra.mrb[12].mxu1 %vm2941_vm3, %v3498_v22 }
 0x558   : > { %21477 = vmatprep.mubr.msk.bf16.mxu1 %vm2941_vm3, %v3641_v58  ;;  %v21339_v34 = vpop.f32.mrb[128].mxu0 }
 0x559   : > { %v2731_v38 = vpop.f32.mrb[129].mxu0 }
 0x55a   : > { %v21340_v39 = vpop.f32.mrb[130].mxu0 }
 0x55b   : > { %v3792_v40 = vpack.c.bf16 %v21340_v39, %v21339_v34  ;;  %v2734_v31 = vpop.f32.mrb[131].mxu0 }
 0x55c   : > { %v3791_v35 = vpack.c.bf16 %v2734_v31, %v2731_v38 }
 0x55f   : > { %21478 = vmatmul.mubr.msk.bf16.vlgmr.msra.gmra.mrb[0].mxu1 %vm2941_vm3, %v3642_v30 }
 0x560   : > { %21481 = vmatprep.mubr.msk.bf16.mxu1 %vm2941_vm3, %v3643_v45  ;;  %21494 = vmatpush3.bf16.msra.mxu1 %v3826_v41  ;;  %v21343_v57 = vpop.f32.mrb[132].mxu0 }
 0x561   : > { %v2747_v8 = vpop.f32.mrb[133].mxu0  ;;  %23519 = vmatprep.subr.msk.bf16.mxu1 %vm2966_vm2, %v3950_v46 }
 0x562   : > { %v21344_v42 = vpop.f32.mrb[134].mxu0 }
 0x563   : > { %v3794_v25 = vpack.c.bf16 %v21344_v42, %v21343_v57  ;;  %v2750_v37 = vpop.f32.mrb[135].mxu0 }
 0x564   : > { %v3793_v23 = vpack.c.bf16 %v2750_v37, %v2747_v8 }
 0x567   : > { %21482 = vmatmul.mubr.msk.bf16.gmra.mrb[4].mxu1 %vm2941_vm3, %v3644_v3 }
 0x568   : > { %21485 = vmatprep.mubr.msk.bf16.mxu1 %vm2941_vm3, %v3645_v28  ;;  %v21347_v47 = vpop.f32.mrb[136].mxu0 }
 0x569   : > { %v2763_v55 = vpop.f32.mrb[137].mxu0 }
 0x56a   : > { %v21348_v50 = vpop.f32.mrb[138].mxu0 }
 0x56b   : > { %v3796_v62 = vpack.c.bf16 %v21348_v50, %v21347_v47  ;;  %v2766_v54 = vpop.f32.mrb[139].mxu0  ;;  %v23788_v47 = vld [vmem:[#allocation8] sm:$0xff]   ;;  %v4265_v50 = vpop.permute.xlu1 %4264 }
 0x56c   : > { %v3795_v24 = vpack.c.bf16 %v2766_v54, %v2763_v55  ;;  %21563 = vmatprep.mubr.bf16.mxu0 %v23788_v47  ;;  %v4260_v55 = vpop.permute.xlu0 %4259 }
 0x56f   : > { %21486 = vmatmul.mubr.msk.bf16.gmra.mrb[8].mxu1 %vm2941_vm3, %v3646_v16  ;;  %v4275_v54 = vpop.permute.xlu1 %4274 }
 0x570   : > { %21489 = vmatprep.mubr.msk.bf16.mxu1 %vm2941_vm3, %v3647_v36  ;;  %v21351_v59 = vpop.f32.mrb[140].mxu0 }
 0x571   : > { %v2779_v33 = vpop.f32.mrb[141].mxu0 }
 0x572   : > { %v21352_v6 = vpop.f32.mrb[142].mxu0 }
 0x573   : > { %v3798_v61 = vpack.c.bf16 %v21352_v6, %v21351_v59  ;;  %v2782_v9 = vpop.f32.mrb[143].mxu0  ;;  %v4285_v59 = vpop.permute.xlu1 %4284 }
 0x574   : > { %v3797_v63 = vpack.c.bf16 %v2782_v9, %v2779_v33 }
 0x577   : > { %21490 = vmatmul.mubr.msk.bf16.gmra.mrb[12].mxu1 %vm2941_vm3, %v3648_v7 }
 0x578   : > { %21495 = vmatprep.mubr.msk.bf16.mxu1 %vm2941_vm3, %v3791_v35  ;;  %v21355_v4 = vpop.f32.mrb[144].mxu0 }
 0x579   : > { %v2795_v19 = vpop.f32.mrb[145].mxu0 }
 0x57a   : > { %v21356_v21 = vpop.f32.mrb[146].mxu0 }
 0x57b   : > { %v3942_v17 = vpack.c.bf16 %v21356_v21, %v21355_v4  ;;  %v2798_v56 = vpop.f32.mrb[147].mxu0 }
 0x57c   : > { %v3941_v29 = vpack.c.bf16 %v2798_v56, %v2795_v19 }
 0x57f   : > { %21496 = vmatmul.mubr.msk.bf16.vlgmr.msra.gmra.mrb[0].mxu1 %vm2941_vm3, %v3792_v40 }
 0x580   : > { %21499 = vmatprep.mubr.msk.bf16.mxu1 %vm2941_vm3, %v3793_v23  ;;  %21512 = vmatpush3.bf16.msra.mxu1 %v3976_v49  ;;  %v21359_v22 = vpop.f32.mrb[148].mxu0 }
 0x581   : > { %v2811_v11 = vpop.f32.mrb[149].mxu0  ;;  %23520 = vmatprep.subr.msk.bf16.mxu1 %vm2966_vm2, %v4100_v26 }
 0x582   : > { %v21360_v52 = vpop.f32.mrb[150].mxu0 }
 0x583   : > { %v3944_v44 = vpack.c.bf16 %v21360_v52, %v21359_v22  ;;  %v2814_v43 = vpop.f32.mrb[151].mxu0 }
 0x584   : > { %v3943_v51 = vpack.c.bf16 %v2814_v43, %v2811_v11 }
 0x587   : > { %21500 = vmatmul.mubr.msk.bf16.gmra.mrb[4].mxu1 %vm2941_vm3, %v3794_v25 }
 0x588   : > { %21503 = vmatprep.mubr.msk.bf16.mxu1 %vm2941_vm3, %v3795_v24  ;;  %v21363_v30 = vpop.f32.mrb[152].mxu0 }
 0x589   : > { %v2827_v48 = vpop.f32.mrb[153].mxu0 }
 0x58a   : > { %v21364_v58 = vpop.f32.mrb[154].mxu0 }
 0x58b   : > { %v3946_v2 = vpack.c.bf16 %v21364_v58, %v21363_v30  ;;  %v2830_v18 = vpop.f32.mrb[155].mxu0 }
 0x58c   : > { %v3945_v5 = vpack.c.bf16 %v2830_v18, %v2827_v48 }
 0x58f   : > { %21504 = vmatmul.mubr.msk.bf16.gmra.mrb[8].mxu1 %vm2941_vm3, %v3796_v62  ;;  %v4270_v62 = vpop.permute.xlu0 %4269 }
 0x590   : > { %21507 = vmatprep.mubr.msk.bf16.mxu1 %vm2941_vm3, %v3797_v63  ;;  %v21367_v20 = vpop.f32.mrb[156].mxu0  ;;  %v4295_v63 = vpop.permute.xlu1 %4294 }
 0x591   : > { %v2843_v10 = vpop.f32.mrb[157].mxu0 }
 0x592   : > { %v21368_v3 = vpop.f32.mrb[158].mxu0 }
 0x593   : > { %v3948_v12 = vpack.c.bf16 %v21368_v3, %v21367_v20  ;;  %v2846_v45 = vpop.f32.mrb[159].mxu0  ;;  %v4280_v24 = vpop.permute.xlu0 %4279 }
 0x594   : > { %v3947_v32 = vpack.c.bf16 %v2846_v45, %v2843_v10  ;;  %v4305_v30 = vpop.permute.xlu1 %4304 }
 0x597   : > { %21508 = vmatmul.mubr.msk.bf16.gmra.mrb[12].mxu1 %vm2941_vm3, %v3798_v61  ;;  %v4290_v33 = vpop.permute.xlu0 %4289 }
 0x598   : > { %21513 = vmatprep.mubr.msk.bf16.mxu1 %vm2941_vm3, %v3941_v29  ;;  %v21371_v60 = vpop.f32.mrb[160].mxu0 }
 0x599   : > { %v2859_v15 = vpop.f32.mrb[161].mxu0 }
 0x59a   : > { %v21372_v16 = vpop.f32.mrb[162].mxu0 }
 0x59b   : > { %v4092_v27 = vpack.c.bf16 %v21372_v16, %v21371_v60  ;;  %v2862_v28 = vpop.f32.mrb[163].mxu0  ;;  %v4300_v11 = vpop.permute.xlu0 %4299 }
 0x59c   : > { %v4091_v53 = vpack.c.bf16 %v2862_v28, %v2859_v15 }
 0x59f   : > { %21514 = vmatmul.mubr.msk.bf16.vlgmr.msra.gmra.mrb[0].mxu1 %vm2941_vm3, %v3942_v17 }
 0x5a0   : > { %21517 = vmatprep.mubr.msk.bf16.mxu1 %vm2941_vm3, %v3943_v51  ;;  %21530 = vmatpush3.bf16.msra.mxu1 %v4126_v13  ;;  %v21375_v14 = vpop.f32.mrb[164].mxu0 }
 0x5a1   : > { %v2875_v7 = vpop.f32.mrb[165].mxu0 }
 0x5a2   : > { %v21376_v1 = vpop.f32.mrb[166].mxu0 }
 0x5a3   : > { %v4094_v36 = vpack.c.bf16 %v21376_v1, %v21375_v14  ;;  %v2878_v34 = vpop.f32.mrb[167].mxu0  ;;  %v4310_v14 = vpop.permute.xlu0 %4309 }
 0x5a4   : > { %v4093_v38 = vpack.c.bf16 %v2878_v34, %v2875_v7 }
 0x5a7   : > { %21518 = vmatmul.mubr.msk.bf16.gmra.mrb[4].mxu1 %vm2941_vm3, %v3944_v44 }
 0x5a8   : > { %21521 = vmatprep.mubr.msk.bf16.mxu1 %vm2941_vm3, %v3945_v5  ;;  %v21379_v39 = vpop.f32.mrb[168].mxu0 }
 0x5a9   : > { %v2891_v40 = vpop.f32.mrb[169].mxu0 }
 0x5aa   : > { %v21380_v31 = vpop.f32.mrb[170].mxu0 }
 0x5ab   : > { %v4096_v35 = vpack.c.bf16 %v21380_v31, %v21379_v39  ;;  %v2894_v41 = vpop.f32.mrb[171].mxu0  ;;  %v4315_v31 = vpop.permute.xlu1 %4314 }
 0x5ac   : > { %v4095_v46 = vpack.c.bf16 %v2894_v41, %v2891_v40 }
 0x5af   : > { %21522 = vmatmul.mubr.msk.bf16.gmra.mrb[8].mxu1 %vm2941_vm3, %v3946_v2 }
 0x5b0   : > { %21525 = vmatprep.mubr.msk.bf16.mxu1 %vm2941_vm3, %v3947_v32  ;;  %v21383_v57 = vpop.f32.mrb[172].mxu0 }
 0x5b1   : > { %v2907_v8 = vpop.f32.mrb[173].mxu0 }
 0x5b2   : > { %v21384_v42 = vpop.f32.mrb[174].mxu0 }
 0x5b3   : > { %v4098_v25 = vpack.c.bf16 %v21384_v42, %v21383_v57  ;;  %v2910_v37 = vpop.f32.mrb[175].mxu0 }
 0x5b4   : > { %v4097_v23 = vpack.c.bf16 %v2910_v37, %v2907_v8 }
 0x5b7   : > { %21526 = vmatmul.mubr.msk.bf16.gmra.mrb[12].mxu1 %vm2941_vm3, %v3948_v12 }
 0x5b8   : > { %21531 = vmatprep.mubr.msk.bf16.mxu1 %vm2941_vm3, %v4091_v53 }
 0x5bf   : > { %21532 = vmatmul.mubr.msk.bf16.vlgmr.msra.gmra.mrb[0].mxu1 %vm2941_vm3, %v4092_v27 }
 0x5c0   : > { %21535 = vmatprep.mubr.msk.bf16.mxu1 %vm2941_vm3, %v4093_v38 }
 0x5c7   : > { %21536 = vmatmul.mubr.msk.bf16.gmra.mrb[4].mxu1 %vm2941_vm3, %v4094_v36 }
 0x5c8   : > { %21539 = vmatprep.mubr.msk.bf16.mxu1 %vm2941_vm3, %v4095_v46 }
 0x5cf   : > { %21540 = vmatmul.mubr.msk.bf16.gmra.mrb[8].mxu1 %vm2941_vm3, %v4096_v35 }
 0x5d0   : > { %21543 = vmatprep.mubr.msk.bf16.mxu1 %vm2941_vm3, %v4097_v23 }
 0x5d7   : > { %21544 = vmatmul.mubr.msk.bf16.gmra.mrb[12].mxu1 %vm2941_vm3, %v4098_v25 }
 0x692   : > { %v21533_v6 = vpop.f32.mrb[0].mxu1 }
 0x693   : > { %v4339_v61 = vadd.f32 %v21533_v6, %v4270_v62  ;;  %v4162_v9 = vpop.f32.mrb[1].mxu1 }
 0x694   : > { %v4337_v4 = vadd.f32 %v4260_v55, %v4162_v9  ;;  %v21534_v19 = vpop.f32.mrb[2].mxu1 }
 0x695   : > { %v4371_v21 = vmul.f32 0.044715, %v4339_v61  ;;  %v4340_v17 = vadd.f32 %v21534_v19, %v4275_v54  ;;  %v4165_v56 = vpop.f32.mrb[3].mxu1  ;;  %v26666_v3 = vmul.f32 0.5, %v4339_v61 }
 0x696   : > { %v4369_v29 = vmul.f32 0.044715, %v4337_v4  ;;  %v4338_v49 = vadd.f32 %v4265_v50, %v4165_v56  ;;  %v26668_v15 = vmul.f32 0.5, %v4337_v4 }
 0x697   : > { %v4387_v26 = vmul.f32 %v4371_v21, %v4339_v61  ;;  %v4372_v22 = vmul.f32 0.044715, %v4340_v17  ;;  %v26677_v42 = vmul.f32 0.5, %v4340_v17 }
 0x698   : > { %v4385_v52 = vmul.f32 %v4369_v29, %v4337_v4  ;;  %v4370_v44 = vmul.f32 0.044715, %v4338_v49  ;;  %v26679_v47 = vmul.f32 0.5, %v4338_v49  ;;  %v4325_v29 = vpop.permute.xlu1 %4324 }
 0x699   : > { %v4403_v43 = vmul.f32 %v4387_v26, %v4339_v61  ;;  %v4388_v51 = vmul.f32 %v4372_v22, %v4340_v17 }
 0x69a   : > { %v4401_v48 = vmul.f32 %v4385_v52, %v4337_v4  ;;  %v4386_v58 = vmul.f32 %v4370_v44, %v4338_v49  ;;  %v21537_v2 = vpop.f32.mrb[4].mxu1 }
 0x69b   : > { %v4419_v18 = vadd.f32 %v4403_v43, %v4339_v61  ;;  %v4404_v5 = vmul.f32 %v4388_v51, %v4340_v17  ;;  %v26664_v20 = vadd.f32 %v21537_v2, %v4290_v33  ;;  %v4178_v10 = vpop.f32.mrb[5].mxu1 }
 0x69c   : > { %v4417_v12 = vadd.f32 %v4401_v48, %v4337_v4  ;;  %v4402_v45 = vmul.f32 %v4386_v58, %v4338_v49  ;;  %v4341_v32 = vadd.f32 %v4280_v24, %v4178_v10  ;;  %v21538_v60 = vpop.f32.mrb[6].mxu1 }
 0x69d   : > { %v4435_v16 = vmul.f32 0.7978846, %v4419_v18  ;;  %v4420_v27 = vadd.f32 %v4404_v5, %v4340_v17  ;;  %v4375_v28 = vmul.f32 0.044715, %v26664_v20  ;;  %v26671_v53 = vadd.f32 %v21538_v60, %v4295_v63  ;;  %v4181_v13 = vpop.f32.mrb[7].mxu1 }
 0x69e   : > { %v4433_v7 = vmul.f32 0.7978846, %v4417_v12  ;;  %v4418_v1 = vadd.f32 %v4402_v45, %v4338_v49  ;;  %v4373_v36 = vmul.f32 0.044715, %v4341_v32  ;;  %v4342_v34 = vadd.f32 %v4285_v59, %v4181_v13  ;;  %v4320_v59 = vpop.permute.xlu0 %4319 }
 0x69f   : > { %24739 = vtanh.f32 %v4435_v16  ;;  %v4436_v38 = vmul.f32 0.7978846, %v4420_v27  ;;  %v4391_v39 = vmul.f32 %v4375_v28, %v26664_v20  ;;  %v4376_v40 = vmul.f32 0.044715, %v26671_v53 }
 0x6a0   : > { %24741 = vtanh.f32 %v4433_v7  ;;  %v4434_v35 = vmul.f32 0.7978846, %v4418_v1  ;;  %v4389_v41 = vmul.f32 %v4373_v36, %v4341_v32  ;;  %v4374_v46 = vmul.f32 0.044715, %v4342_v34 }
 0x6a1   : > { %24743 = vtanh.f32 %v4436_v38  ;;  %v4407_v57 = vmul.f32 %v4391_v39, %v26664_v20  ;;  %v4392_v8 = vmul.f32 %v4376_v40, %v26671_v53  ;;  %v26681_v55 = vmul.f32 0.5, %v4341_v32 }
 0x6a2   : > { %v4405_v25 = vmul.f32 %v4389_v41, %v4341_v32  ;;  %v4390_v37 = vmul.f32 %v4374_v46, %v4342_v34  ;;  %v21541_v23 = vpop.f32.mrb[8].mxu1  ;;  %24745 = vtanh.f32 %v4434_v35  ;;  %v26689_v63 = vmul.f32 0.5, %v4342_v34  ;;  %v4330_v12 = vpop.permute.xlu0 %4329 }
 0x6a3   : > { %v4423_v50 = vadd.f32 %v4407_v57, %v26664_v20  ;;  %v4408_v62 = vmul.f32 %v4392_v8, %v26671_v53  ;;  %v26685_v54 = vadd.f32 %v21541_v23, %v4310_v14  ;;  %v4194_v24 = vpop.f32.mrb[9].mxu1 }
 0x6a4   : > { %v4421_v33 = vadd.f32 %v4405_v25, %v4341_v32  ;;  %v4406_v6 = vmul.f32 %v4390_v37, %v4342_v34  ;;  %v26687_v61 = vadd.f32 %v4300_v11, %v4194_v24  ;;  %v21542_v9 = vpop.f32.mrb[10].mxu1 }
 0x6a5   : > { %v4439_v4 = vmul.f32 0.7978846, %v4423_v50  ;;  %v4424_v19 = vadd.f32 %v4408_v62, %v26671_v53  ;;  %v4379_v21 = vmul.f32 0.044715, %v26685_v54  ;;  %v26693_v17 = vadd.f32 %v21542_v9, %v4315_v31  ;;  %v4197_v56 = vpop.f32.mrb[11].mxu1 }
 0x6a6   : > { %v4437_v49 = vmul.f32 0.7978846, %v4421_v33  ;;  %v4422_v26 = vadd.f32 %v4406_v6, %v4342_v34  ;;  %v4377_v22 = vmul.f32 0.044715, %v26687_v61  ;;  %v26696_v52 = vadd.f32 %v4305_v30, %v4197_v56 }
 0x6a7   : > { %24747 = vtanh.f32 %v4439_v4  ;;  %v4440_v11 = vmul.f32 0.7978846, %v4424_v19  ;;  %v4395_v44 = vmul.f32 %v4379_v21, %v26685_v54  ;;  %v4380_v43 = vmul.f32 0.044715, %v26693_v17 }
 0x6a8   : > { %24749 = vtanh.f32 %v4437_v49  ;;  %v4438_v51 = vmul.f32 0.7978846, %v4422_v26  ;;  %v4393_v48 = vmul.f32 %v4377_v22, %v26687_v61  ;;  %v4378_v58 = vmul.f32 0.044715, %v26696_v52 }
 0x6a9   : > { %v24740_v2 = vpop.eup %24739  ;;  %24751 = vtanh.f32 %v4440_v11  ;;  %v4411_v18 = vmul.f32 %v4395_v44, %v26685_v54  ;;  %v4396_v5 = vmul.f32 %v4380_v43, %v26693_v17  ;;  %v26705_v30 = vmul.f32 0.5, %v26664_v20  ;;  %v4335_v20 = vpop.permute.xlu1 %4334 }
 0x6aa   : > { %v24742_v10 = vpop.eup %24741  ;;  %24753 = vtanh.f32 %v4438_v51  ;;  %v4409_v45 = vmul.f32 %v4393_v48, %v26687_v61  ;;  %v4394_v32 = vmul.f32 %v4378_v58, %v26696_v52  ;;  %v21545_v60 = vpop.f32.mrb[12].mxu1  ;;  %v4467_v16 = vadd.f32 1.0, %v24740_v2 }
 0x6ab   : > { %v24744_v27 = vpop.eup %24743  ;;  %v4427_v28 = vadd.f32 %v4411_v18, %v26685_v54  ;;  %v4412_v13 = vmul.f32 %v4396_v5, %v26693_v17  ;;  %v26711_v14 = vadd.f32 %v21545_v60, %v4330_v12  ;;  %v4210_v7 = vpop.f32.mrb[13].mxu1  ;;  %v4465_v1 = vadd.f32 1.0, %v24742_v10 }
 0x6ac   : > { %v4425_v36 = vadd.f32 %v4409_v45, %v26687_v61  ;;  %v4410_v34 = vmul.f32 %v4394_v32, %v26696_v52  ;;  %v26715_v38 = vadd.f32 %v4320_v59, %v4210_v7  ;;  %v21546_v39 = vpop.f32.mrb[14].mxu1  ;;  %v4468_v40 = vadd.f32 1.0, %v24744_v27  ;;  %v24746_v31 = vpop.eup %24745 }
 0x6ad   : > { %v4443_v35 = vmul.f32 0.7978846, %v4427_v28  ;;  %v4428_v41 = vadd.f32 %v4412_v13, %v26693_v17  ;;  %v4383_v46 = vmul.f32 0.044715, %v26711_v14  ;;  %v26719_v57 = vadd.f32 %v21546_v39, %v4335_v20  ;;  %v4213_v8 = vpop.f32.mrb[15].mxu1 }
 0x6ae   : > { %v4441_v25 = vmul.f32 0.7978846, %v4425_v36  ;;  %v4426_v37 = vadd.f32 %v4410_v34, %v26696_v52  ;;  %v4381_v23 = vmul.f32 0.044715, %v26715_v38  ;;  %v26723_v50 = vadd.f32 %v4325_v29, %v4213_v8 }
 0x6af   : > { %24755 = vtanh.f32 %v4443_v35  ;;  %v4444_v62 = vmul.f32 0.7978846, %v4428_v41  ;;  %v4399_v24 = vmul.f32 %v4383_v46, %v26711_v14  ;;  %v4384_v59 = vmul.f32 0.044715, %v26719_v57 }
 0x6b0   : > { %24757 = vtanh.f32 %v4441_v25  ;;  %v4442_v33 = vmul.f32 0.7978846, %v4426_v37  ;;  %v4397_v6 = vmul.f32 %v4381_v23, %v26715_v38  ;;  %v4382_v9 = vmul.f32 0.044715, %v26723_v50 }
 0x6b1   : > { %v24748_v4 = vpop.eup %24747  ;;  %24759 = vtanh.f32 %v4444_v62  ;;  %v4415_v19 = vmul.f32 %v4399_v24, %v26711_v14  ;;  %v4400_v21 = vmul.f32 %v4384_v59, %v26719_v57  ;;  %v4466_v56 = vadd.f32 1.0, %v24746_v31 }
 0x6b2   : > { %v24750_v29 = vpop.eup %24749  ;;  %24761 = vtanh.f32 %v4442_v33  ;;  %v4413_v49 = vmul.f32 %v4397_v6, %v26715_v38  ;;  %v4398_v26 = vmul.f32 %v4382_v9, %v26723_v50  ;;  %v4481_v22 = vmul.f32 %v4465_v1, %v26668_v15 }
 0x6b3   : > { %v24752_v11 = vpop.eup %24751  ;;  %v4431_v44 = vadd.f32 %v4415_v19, %v26711_v14  ;;  %v4416_v43 = vmul.f32 %v4400_v21, %v26719_v57  ;;  %v4482_v51 = vmul.f32 %v4466_v56, %v26679_v47  ;;  %v4483_v48 = vmul.f32 %v4467_v16, %v26666_v3 }
 0x6b4   : > { %v24754_v58 = vpop.eup %24753  ;;  %v4429_v2 = vadd.f32 %v4413_v49, %v26715_v38  ;;  %v4414_v18 = vmul.f32 %v4398_v26, %v26723_v50  ;;  %v4484_v5 = vmul.f32 %v4468_v40, %v26677_v42  ;;  %v4469_v10 = vadd.f32 1.0, %v24750_v29 }
 0x6b5   : > { %v4447_v12 = vmul.f32 0.7978846, %v4431_v44  ;;  %v4432_v15 = vadd.f32 %v4416_v43, %v26719_v57  ;;  %v4497_v45 = vpack.c.bf16 %v4482_v51, %v4481_v22  ;;  %v4470_v32 = vadd.f32 1.0, %v24754_v58  ;;  %v23793_v58 = vld [vmem:[#allocation8 + $0x28] sm:$0xff]  }
 0x6b6   : > { %v4445_v60 = vmul.f32 0.7978846, %v4429_v2  ;;  %v4430_v27 = vadd.f32 %v4414_v18, %v26723_v50  ;;  %v4498_v28 = vpack.c.bf16 %v4484_v5, %v4483_v48  ;;  %v4485_v47 = vmul.f32 %v4469_v10, %v26681_v55  ;;  %v23792_v48 = vld [vmem:[#allocation8 + $0x20] sm:$0xff]   ;;  %v23794_v2 = vld [vmem:[#allocation8 + $0x30] sm:$0xff]   ;;  %v23795_v18 = vld [vmem:[#allocation8 + $0x38] sm:$0xff]  }
 0x6b7   : > { %24763 = vtanh.f32 %v4447_v12  ;;  %v4448_v3 = vmul.f32 0.7978846, %v4432_v15  ;;  %21547 = vmatprep.subr.bf16.mxu0 %v4497_v45  ;;  %22727 = vmatprep.subr.bf16.mxu1 %v4497_v45  ;;  %v4486_v16 = vmul.f32 %v4470_v32, %v26689_v63  ;;  %v4471_v13 = vadd.f32 1.0, %v24748_v4  ;;  %v23796_v5 = vld [vmem:[#allocation8 + $0x40] sm:$0xff]   ;;  %v23797_v10 = vld [vmem:[#allocation8 + $0x48] sm:$0xff]   ;;  %v23798_v12 = vld [vmem:[#allocation8 + $0x50] sm:$0xff]  }
 0x6b8   : > { %24765 = vtanh.f32 %v4445_v60  ;;  %v4446_v42 = vmul.f32 0.7978846, %v4430_v27  ;;  %21548 = vmatpush3.bf16.msra.mxu0 %v4497_v45  ;;  %22735 = vmatpush3.bf16.msra.mxu1 %v4497_v45  ;;  %v4360_v7 = vmul.f32 0.5, %v26671_v53  ;;  %v4472_v1 = vadd.f32 1.0, %v24752_v11  ;;  %v23799_v15 = vld [vmem:[#allocation8 + $0x58] sm:$0xff]   ;;  %v23800_v45 = vld [vmem:[#allocation8 + $0x60] sm:$0xff]  }
 0x6b9   : > { %v24756_v20 = vpop.eup %24755  ;;  %24767 = vtanh.f32 %v4448_v3  ;;  %21549 = vmatprep.subr.bf16.mxu0 %v4498_v28  ;;  %22728 = vmatprep.subr.bf16.mxu1 %v4498_v28  ;;  %v4499_v36 = vpack.c.bf16 %v4486_v16, %v4485_v47  ;;  %v4487_v34 = vmul.f32 %v4471_v13, %v26705_v30  ;;  %v4363_v53 = vmul.f32 0.5, %v26685_v54  ;;  %v23801_v32 = vld [vmem:[#allocation8 + $0x68] sm:$0xff]   ;;  %v23802_v60 = vld [vmem:[#allocation8 + $0x70] sm:$0xff]   ;;  %v23803_v27 = vld [vmem:[#allocation8 + $0x78] sm:$0xff]  }
 0x6ba   : > { %v24758_v55 = vpop.eup %24757  ;;  %24769 = vtanh.f32 %v4446_v42  ;;  %v4488_v39 = vmul.f32 %v4472_v1, %v4360_v7  ;;  %v4475_v40 = vadd.f32 1.0, %v24756_v20  ;;  %v4364_v46 = vmul.f32 0.5, %v26693_v17  ;;  %v23805_v47 = vld [vmem:[#allocation8 + $0x88] sm:$0xff]   ;;  %v23806_v3 = vld [vmem:[#allocation8 + $0x90] sm:$0xff]   ;;  %v23807_v16 = vld [vmem:[#allocation8 + $0x98] sm:$0xff]  }
 0x6bb   : > { %v24760_v63 = vpop.eup %24759  ;;  %v4473_v31 = vadd.f32 1.0, %v24758_v55  ;;  %v4361_v25 = vmul.f32 0.5, %v26687_v61  ;;  %v4362_v37 = vmul.f32 0.5, %v26696_v52  ;;  %v4367_v61 = vmul.f32 0.5, %v26711_v14  ;;  %v23808_v13 = vld [vmem:[#allocation8 + $0xa0] sm:$0xff]   ;;  %v23809_v42 = vld [vmem:[#allocation8 + $0xa8] sm:$0xff]  }
 0x6bc   : > { %v24762_v35 = vpop.eup %24761  ;;  %21550 = vmatpush3.bf16.msra.mxu0 %v4498_v28  ;;  %22736 = vmatpush3.bf16.msra.mxu1 %v4498_v28  ;;  %v4500_v41 = vpack.c.bf16 %v4488_v39, %v4487_v34  ;;  %v4476_v8 = vadd.f32 1.0, %v24760_v63  ;;  %v4491_v23 = vmul.f32 %v4475_v40, %v4363_v53  ;;  %v4368_v52 = vmul.f32 0.5, %v26719_v57  ;;  %v23790_v57 = vld [vmem:[#allocation8 + $0x10] sm:$0xff]   ;;  %v23804_v28 = vld [vmem:[#allocation8 + $0x80] sm:$0xff]   ;;  %v23811_v1 = vld [vmem:[#allocation8 + $0xb8] sm:$0xff]  }
 0x6bd   : > { %21551 = vmatprep.subr.bf16.mxu0 %v4499_v36  ;;  %22729 = vmatprep.subr.bf16.mxu1 %v4499_v36  ;;  %v4474_v30 = vadd.f32 1.0, %v24762_v35  ;;  %v4489_v24 = vmul.f32 %v4473_v31, %v4361_v25  ;;  %v4365_v29 = vmul.f32 0.5, %v26715_v38  ;;  %v4366_v49 = vmul.f32 0.5, %v26723_v50  ;;  %v23789_v38 = vld [vmem:[#allocation8 + $0x8] sm:$0xff]   ;;  %v23791_v50 = vld [vmem:[#allocation8 + $0x18] sm:$0xff]   ;;  %v23810_v7 = vld [vmem:[#allocation8 + $0xb0] sm:$0xff]  }
 0x6be   : > { %v4492_v62 = vmul.f32 %v4476_v8, %v4364_v46  ;;  %v23812_v20 = vld [vmem:[#allocation8 + $0xc0] sm:$0xff]   ;;  %v23814_v55 = vld [vmem:[#allocation8 + $0xd0] sm:$0xff]   ;;  %v23815_v34 = vld [vmem:[#allocation8 + $0xd8] sm:$0xff]  }
 0x6bf   : > { %v4490_v59 = vmul.f32 %v4474_v30, %v4362_v37  ;;  %v23816_v39 = vld [vmem:[#allocation8 + $0xe0] sm:$0xff]   ;;  %v23841_v63 = vld [vmem:[#allocation8 + $0x228] sm:$0xff]   ;;  %v23818_v35 = vld [vmem:[#allocation8 + $0xf0] sm:$0xff]  }
 0x6c0   : > { %21552 = vmatpush3.bf16.msra.mxu0 %v4499_v36  ;;  %22737 = vmatpush3.bf16.msra.mxu1 %v4499_v36  ;;  %v4502_v33 = vpack.c.bf16 %v4492_v62, %v4491_v23  ;;  %v23813_v36 = vld [vmem:[#allocation8 + $0xc8] sm:$0xff]   ;;  %v23840_v40 = vld [vmem:[#allocation8 + $0x220] sm:$0xff]   ;;  %v23845_v53 = vld [vmem:[#allocation8 + $0x238] sm:$0xff]  }
 0x6c1   : > { %v24764_v6 = vpop.eup %24763  ;;  %21553 = vmatprep.subr.bf16.mxu0 %v4500_v41  ;;  %22730 = vmatprep.subr.bf16.mxu1 %v4500_v41  ;;  %v4501_v54 = vpack.c.bf16 %v4490_v59, %v4489_v24  ;;  %v23817_v31 = vld [vmem:[#allocation8 + $0xe8] sm:$0xff]   ;;  %v23819_v46 = vld [vmem:[#allocation8 + $0xf8] sm:$0xff]   ;;  %v23820_v8 = vld [vmem:[#allocation8 + $0x100] sm:$0xff]  }
 0x6c2   : > { %v24766_v17 = vpop.eup %24765  ;;  %v4479_v9 = vadd.f32 1.0, %v24764_v6  ;;  %21699 = vmatprep.mubr.bf16.mxu1 %v23840_v40  ;;  %v23848_v25 = vld [vmem:[#allocation10 + $0x8] sm:$0xff]   ;;  %v23822_v30 = vld [vmem:[#allocation8 + $0x110] sm:$0xff]   ;;  %v23823_v23 = vld [vmem:[#allocation8 + $0x118] sm:$0xff]  }
 0x6c3   : > { %v24768_v4 = vpop.eup %24767  ;;  %v4477_v19 = vadd.f32 1.0, %v24766_v17  ;;  %v23821_v37 = vld [vmem:[#allocation8 + $0x108] sm:$0xff]   ;;  %v23824_v62 = vld [vmem:[#allocation8 + $0x120] sm:$0xff]   ;;  %v23826_v59 = vld [vmem:[#allocation8 + $0x130] sm:$0xff]  }
 0x6c4   : > { %v24770_v21 = vpop.eup %24769  ;;  %21554 = vmatpush3.bf16.msra.mxu0 %v4500_v41  ;;  %22738 = vmatpush3.bf16.msra.mxu1 %v4500_v41  ;;  %v4480_v56 = vadd.f32 1.0, %v24768_v4  ;;  %v4495_v22 = vmul.f32 %v4479_v9, %v4367_v61  ;;  %v23844_v41 = vld [vmem:[#allocation8 + $0x230] sm:$0xff]   ;;  %v23825_v24 = vld [vmem:[#allocation8 + $0x128] sm:$0xff]   ;;  %v23827_v6 = vld [vmem:[#allocation8 + $0x138] sm:$0xff]  }
 0x6c5   : > { %21555 = vmatprep.subr.bf16.mxu0 %v4501_v54  ;;  %22731 = vmatprep.subr.bf16.mxu1 %v4501_v54  ;;  %v4478_v26 = vadd.f32 1.0, %v24770_v21  ;;  %v4493_v44 = vmul.f32 %v4477_v19, %v4365_v29  ;;  %v23829_v17 = vld [vmem:[#allocation8 + $0x148] sm:$0xff]   ;;  %v23830_v9 = vld [vmem:[#allocation8 + $0x150] sm:$0xff]   ;;  %v23831_v4 = vld [vmem:[#allocation8 + $0x158] sm:$0xff]  }
 0x6c6   : > { %v4496_v11 = vmul.f32 %v4480_v56, %v4368_v52  ;;  %v23832_v19 = vld [vmem:[#allocation8 + $0x160] sm:$0xff]   ;;  %v23833_v21 = vld [vmem:[#allocation8 + $0x168] sm:$0xff]   ;;  %v23834_v61 = vld [vmem:[#allocation8 + $0x170] sm:$0xff]  }
 0x6c7   : > { %v4494_v43 = vmul.f32 %v4478_v26, %v4366_v49  ;;  %v23835_v52 = vld [vmem:[#allocation8 + $0x178] sm:$0xff]   ;;  %v23836_v56 = vld [vmem:[#allocation8 + $0x180] sm:$0xff]   ;;  %v23837_v29 = vld [vmem:[#allocation8 + $0x188] sm:$0xff]  }
 0x6c8   : > { %21556 = vmatpush3.bf16.msra.mxu0 %v4501_v54  ;;  %22739 = vmatpush3.bf16.msra.mxu1 %v4501_v54  ;;  %v4504_v51 = vpack.c.bf16 %v4496_v11, %v4495_v22  ;;  %v23828_v54 = vld [vmem:[#allocation8 + $0x140] sm:$0xff]   ;;  %v23838_v49 = vld [vmem:[#allocation8 + $0x190] sm:$0xff]   ;;  %v23839_v26 = vld [vmem:[#allocation8 + $0x198] sm:$0xff]  }
 0x6c9   : > { %21557 = vmatprep.subr.bf16.mxu0 %v4502_v33  ;;  %22732 = vmatprep.subr.bf16.mxu1 %v4502_v33  ;;  %v4503_v14 = vpack.c.bf16 %v4494_v43, %v4493_v44  ;;  %v23842_v22 = vld [vmem:[#allocation8 + $0x1a0] sm:$0xff]   ;;  %v23843_v11 = vld [vmem:[#allocation8 + $0x1a8] sm:$0xff]   ;;  %v23846_v44 = vld [vmem:[#allocation8 + $0x1b0] sm:$0xff]  }
 0x6cc   : > { %21558 = vmatpush3.bf16.msra.mxu0 %v4502_v33  ;;  %22740 = vmatpush3.bf16.msra.mxu1 %v4502_v33  ;;  %v26755_v33 = vld [vmem:[#allocation10] sm:$0xff]  }
 0x6cd   : > { %21559 = vmatprep.subr.bf16.mxu0 %v4503_v14  ;;  %22733 = vmatprep.subr.bf16.mxu1 %v4503_v14 }
 0x6d0   : > { %21560 = vmatpush3.bf16.msra.mxu0 %v4503_v14  ;;  %22741 = vmatpush3.bf16.msra.mxu1 %v4503_v14  ;;  %v23847_v14 = vld [vmem:[#allocation8 + $0x1b8] sm:$0xff]  }
 0x6d1   : > { %21561 = vmatprep.subr.bf16.mxu0 %v4504_v51  ;;  %22734 = vmatprep.subr.bf16.mxu1 %v4504_v51 }
 0x6d4   : > { %21562 = vmatpush3.bf16.msra.mxu0 %v4504_v51  ;;  %22742 = vmatpush3.bf16.msra.mxu1 %v4504_v51 }
 0x6d5   : > { %21707 = vmatprep.subr.bf16.mxu1 %v23848_v25 }
 0x6d7   : > { %21564 = vmatmul.mubr.bf16.vlgmr.msra.gmra.mrb[176].mxu0 %v23789_v38  ;;  %21700 = vmatmul.mubr.bf16.vlgmr.msra.gmra.mrb[16].mxu1 %v23841_v63 }
 0x6d8   : > { %21567 = vmatprep.mubr.bf16.mxu0 %v23790_v57  ;;  %21703 = vmatprep.mubr.bf16.mxu1 %v23844_v41  ;;  %v23849_v57 = vld [vmem:[#allocation8 + $0x1c0] sm:$0xff]  }
 0x6d9   : > { %21708 = vmatpush3.bf16.msra.mxu1 %v23848_v25 }
 0x6da   : > { %21725 = vmatprep.subr.bf16.mxu1 %v26755_v33 }
 0x6df   : > { %21568 = vmatmul.mubr.bf16.gmra.mrb[180].mxu0 %v23791_v50  ;;  %21704 = vmatmul.mubr.bf16.gmra.mrb[20].mxu1 %v23845_v53  ;;  %v23858_v53 = vld [vmem:[#allocation8 + $0x200] sm:$0xff]  }
 0x6e0   : > { %21571 = vmatprep.mubr.bf16.mxu0 %v23792_v48 }
 0x6e7   : > { %21572 = vmatmul.mubr.bf16.gmra.mrb[184].mxu0 %v23793_v58 }
 0x6e8   : > { %21575 = vmatprep.mubr.bf16.mxu0 %v23794_v2 }
 0x6ef   : > { %21576 = vmatmul.mubr.bf16.gmra.mrb[188].mxu0 %v23795_v18 }
 0x6f0   : > { %21579 = vmatprep.mubr.bf16.mxu0 %v23796_v5  ;;  %v23850_v5 = vld [vmem:[#allocation8 + $0x1c8] sm:$0xff]  }
 0x6f7   : > { %21580 = vmatmul.mubr.bf16.gmra.mrb[192].mxu0 %v23797_v10 }
 0x6f8   : > { %21583 = vmatprep.mubr.bf16.mxu0 %v23798_v12  ;;  %v23851_v12 = vld [vmem:[#allocation8 + $0x1d0] sm:$0xff]  }
 0x6ff   : > { %21584 = vmatmul.mubr.bf16.gmra.mrb[196].mxu0 %v23799_v15 }
 0x700   : > { %21587 = vmatprep.mubr.bf16.mxu0 %v23800_v45 }
 0x707   : > { %21588 = vmatmul.mubr.bf16.gmra.mrb[200].mxu0 %v23801_v32 }
 0x708   : > { %21591 = vmatprep.mubr.bf16.mxu0 %v23802_v60 }
 0x70f   : > { %21592 = vmatmul.mubr.bf16.gmra.mrb[204].mxu0 %v23803_v27 }
 0x710   : > { %21595 = vmatprep.mubr.bf16.mxu0 %v23804_v28  ;;  %v23852_v28 = vld [vmem:[#allocation8 + $0x1d8] sm:$0xff]  }
 0x717   : > { %21596 = vmatmul.mubr.bf16.gmra.mrb[208].mxu0 %v23805_v47 }
 0x718   : > { %21599 = vmatprep.mubr.bf16.mxu0 %v23806_v3  ;;  %v23853_v3 = vld [vmem:[#allocation8 + $0x1e0] sm:$0xff]  }
 0x71f   : > { %21600 = vmatmul.mubr.bf16.gmra.mrb[212].mxu0 %v23807_v16 }
 0x720   : > { %21603 = vmatprep.mubr.bf16.mxu0 %v23808_v13 }
 0x727   : > { %21604 = vmatmul.mubr.bf16.gmra.mrb[216].mxu0 %v23809_v42 }
 0x728   : > { %21607 = vmatprep.mubr.bf16.mxu0 %v23810_v7 }
 0x72f   : > { %21608 = vmatmul.mubr.bf16.gmra.mrb[220].mxu0 %v23811_v1 }
 0x730   : > { %21611 = vmatprep.mubr.bf16.mxu0 %v23812_v20  ;;  %v23854_v20 = vld [vmem:[#allocation8 + $0x1e8] sm:$0xff]  }
 0x737   : > { %21612 = vmatmul.mubr.bf16.gmra.mrb[224].mxu0 %v23813_v36 }
 0x738   : > { %21615 = vmatprep.mubr.bf16.mxu0 %v23814_v55  ;;  %v23855_v55 = vld [vmem:[#allocation8 + $0x1f0] sm:$0xff]  }
 0x73f   : > { %21616 = vmatmul.mubr.bf16.gmra.mrb[228].mxu0 %v23815_v34 }
 0x740   : > { %21619 = vmatprep.mubr.bf16.mxu0 %v23816_v39 }
 0x747   : > { %21620 = vmatmul.mubr.bf16.gmra.mrb[232].mxu0 %v23817_v31 }
 0x748   : > { %21623 = vmatprep.mubr.bf16.mxu0 %v23818_v35  ;;  %v23856_v35 = vld [vmem:[#allocation8 + $0x1f8] sm:$0xff]  }
 0x74f   : > { %21624 = vmatmul.mubr.bf16.gmra.mrb[236].mxu0 %v23819_v46 }
 0x750   : > { %21627 = vmatprep.mubr.bf16.mxu0 %v23820_v8 }
 0x757   : > { %21628 = vmatmul.mubr.bf16.gmra.mrb[240].mxu0 %v23821_v37  ;;  %v23862_v37 = vld [vmem:[#allocation10 + $0x10] sm:$0xff]  }
 0x758   : > { %21631 = vmatprep.mubr.bf16.mxu0 %v23822_v30 }
 0x75f   : > { %21632 = vmatmul.mubr.bf16.gmra.mrb[244].mxu0 %v23823_v23 }
 0x760   : > { %21635 = vmatprep.mubr.bf16.mxu0 %v23824_v62  ;;  %v23859_v62 = vld [vmem:[#allocation8 + $0x208] sm:$0xff]  }
 0x767   : > { %21636 = vmatmul.mubr.bf16.gmra.mrb[248].mxu0 %v23825_v24 }
 0x768   : > { %21639 = vmatprep.mubr.bf16.mxu0 %v23826_v59  ;;  %v23860_v59 = vld [vmem:[#allocation8 + $0x210] sm:$0xff]  }
 0x76f   : > { %21640 = vmatmul.mubr.bf16.gmra.mrb[252].mxu0 %v23827_v6 }
 0x770   : > { %21643 = vmatprep.mubr.bf16.mxu0 %v23828_v54 }
 0x777   : > { %21644 = vmatmul.mubr.bf16.gmra.mrb[0].mxu0 %v23829_v17 }
 0x778   : > { %21647 = vmatprep.mubr.bf16.mxu0 %v23830_v9 }
 0x77f   : > { %21648 = vmatmul.mubr.bf16.gmra.mrb[4].mxu0 %v23831_v4 }
 0x780   : > { %21651 = vmatprep.mubr.bf16.mxu0 %v23832_v19  ;;  %v23861_v19 = vld [vmem:[#allocation8 + $0x218] sm:$0xff]  }
 0x787   : > { %21652 = vmatmul.mubr.bf16.gmra.mrb[8].mxu0 %v23833_v21 }
 0x788   : > { %21655 = vmatprep.mubr.bf16.mxu0 %v23834_v61 }
 0x78f   : > { %21656 = vmatmul.mubr.bf16.gmra.mrb[12].mxu0 %v23835_v52 }
 0x790   : > { %21659 = vmatprep.mubr.bf16.mxu0 %v23836_v56 }
 0x797   : > { %21660 = vmatmul.mubr.bf16.gmra.mrb[16].mxu0 %v23837_v29 }
 0x798   : > { %21663 = vmatprep.mubr.bf16.mxu0 %v23838_v49 }
 0x79f   : > { %21664 = vmatmul.mubr.bf16.gmra.mrb[20].mxu0 %v23839_v26 }
 0x7a0   : > { %21667 = vmatprep.mubr.bf16.mxu0 %v23842_v22 }
 0x7a7   : > { %21668 = vmatmul.mubr.bf16.gmra.mrb[24].mxu0 %v23843_v11 }
 0x7a8   : > { %21671 = vmatprep.mubr.bf16.mxu0 %v23846_v44 }
 0x7aa   : > { %v26758_v43 = vpop.f32.mrb[176].mxu0 }
 0x7ab   : > { %v26760_v51 = vpop.f32.mrb[177].mxu0 }
 0x7ac   : > { %v26762_v38 = vpop.f32.mrb[178].mxu0 }
 0x7ad   : > { %v5691_v50 = vpack.c.bf16 %v26762_v38, %v26758_v43  ;;  %v26766_v48 = vpop.f32.mrb[179].mxu0 }
 0x7ae   : > { %v5690_v58 = vpack.c.bf16 %v26766_v48, %v26760_v51 }
 0x7af   : > { %21672 = vmatmul.mubr.bf16.gmra.mrb[28].mxu0 %v23847_v14 }
 0x7b0   : > { %21675 = vmatprep.mubr.bf16.mxu0 %v23849_v57 }
 0x7b2   : > { %v26770_v2 = vpop.f32.mrb[180].mxu0 }
 0x7b3   : > { %v26772_v18 = vpop.f32.mrb[181].mxu0 }
 0x7b4   : > { %v26774_v10 = vpop.f32.mrb[182].mxu0 }
 0x7b5   : > { %v5693_v15 = vpack.c.bf16 %v26774_v10, %v26770_v2  ;;  %v26778_v45 = vpop.f32.mrb[183].mxu0 }
 0x7b6   : > { %v5692_v32 = vpack.c.bf16 %v26778_v45, %v26772_v18 }
 0x7b7   : > { %21676 = vmatmul.mubr.bf16.gmra.mrb[32].mxu0 %v23850_v5 }
 0x7b8   : > { %21679 = vmatprep.mubr.bf16.mxu0 %v23851_v12 }
 0x7ba   : > { %v26782_v60 = vpop.f32.mrb[184].mxu0 }
 0x7bb   : > { %v26784_v27 = vpop.f32.mrb[185].mxu0 }
 0x7bc   : > { %v26786_v47 = vpop.f32.mrb[186].mxu0 }
 0x7bd   : > { %v5695_v16 = vpack.c.bf16 %v26786_v47, %v26782_v60  ;;  %v26790_v13 = vpop.f32.mrb[187].mxu0 }
 0x7be   : > { %v5694_v42 = vpack.c.bf16 %v26790_v13, %v26784_v27 }
 0x7bf   : > { %21680 = vmatmul.mubr.bf16.gmra.mrb[36].mxu0 %v23852_v28 }
 0x7c0   : > { %21683 = vmatprep.mubr.bf16.mxu0 %v23853_v3  ;;  %v23863_v3 = vld [vmem:[#allocation10 + $0x18] sm:$0xff]  }
 0x7c2   : > { %v26794_v7 = vpop.f32.mrb[188].mxu0 }
 0x7c3   : > { %v26796_v1 = vpop.f32.mrb[189].mxu0 }
 0x7c4   : > { %v26798_v36 = vpop.f32.mrb[190].mxu0 }
 0x7c5   : > { %v5697_v34 = vpack.c.bf16 %v26798_v36, %v26794_v7  ;;  %v26802_v39 = vpop.f32.mrb[191].mxu0  ;;  %v26850_v36 = vpop.f32.mrb[16].mxu1 }
 0x7c6   : > { %v5696_v40 = vpack.c.bf16 %v26802_v39, %v26796_v1 }
 0x7c7   : > { %21684 = vmatmul.mubr.bf16.gmra.mrb[40].mxu0 %v23854_v20 }
 0x7c8   : > { %21687 = vmatprep.mubr.bf16.mxu0 %v23855_v55 }
 0x7ca   : > { %v21581_v63 = vpop.f32.mrb[192].mxu0 }
 0x7cb   : > { %v5179_v31 = vpop.f32.mrb[193].mxu0 }
 0x7cc   : > { %v21582_v41 = vpop.f32.mrb[194].mxu0 }
 0x7cd   : > { %v5701_v46 = vpack.c.bf16 %v21582_v41, %v21581_v63  ;;  %v5182_v8 = vpop.f32.mrb[195].mxu0 }
 0x7ce   : > { %v5700_v25 = vpack.c.bf16 %v5182_v8, %v5179_v31 }
 0x7cf   : > { %21688 = vmatmul.mubr.bf16.gmra.mrb[44].mxu0 %v23856_v35 }
 0x7d0   : > { %21709 = vmatprep.mubr.msk.bf16.mxu1 %vm5717_vm4, %v5700_v25  ;;  %21691 = vmatprep.mubr.bf16.mxu0 %v23858_v53 }
 0x7d1   : > { %21710 = vmatmul.mubr.msk.bf16.vlgmr.msra.gmra.mrb[24].mxu1 %vm5717_vm4, %v5701_v46  ;;  %v26852_v46 = vpop.f32.mrb[17].mxu1 }
 0x7d2   : > { %v21585_v30 = vpop.f32.mrb[196].mxu0  ;;  %21726 = vmatpush3.bf16.msra.mxu1 %v26755_v33  ;;  %v26854_v25 = vpop.f32.mrb[18].mxu1 }
 0x7d3   : > { %v5195_v23 = vpop.f32.mrb[197].mxu0  ;;  %21743 = vmatprep.subr.bf16.mxu1 %v23862_v37 }
 0x7d4   : > { %v21586_v24 = vpop.f32.mrb[198].mxu0 }
 0x7d5   : > { %v5703_v6 = vpack.c.bf16 %v21586_v24, %v21585_v30  ;;  %v5198_v54 = vpop.f32.mrb[199].mxu0  ;;  %v26858_v30 = vpop.f32.mrb[19].mxu1 }
 0x7d6   : > { %v5702_v17 = vpack.c.bf16 %v5198_v54, %v5195_v23  ;;  %v6894_v23 = vpack.c.bf16 %v26858_v30, %v26852_v46  ;;  %v7063_v46 = vpop.permute.xlu0 %7062  ;;  %v7068_v30 = vpop.permute.xlu1 %7067 }
 0x7d7   : > { %21692 = vmatmul.mubr.bf16.gmra.mrb[48].mxu0 %v23859_v62 }
 0x7d8   : > { %21713 = vmatprep.mubr.msk.bf16.mxu1 %vm5717_vm4, %v5702_v17  ;;  %21695 = vmatprep.mubr.bf16.mxu0 %v23860_v59 }
 0x7d9   : > { %21714 = vmatmul.mubr.msk.bf16.gmra.mrb[28].mxu1 %vm5717_vm4, %v5703_v6  ;;  %v26864_v6 = vpop.f32.mrb[20].mxu1 }
 0x7da   : > { %v21589_v9 = vpop.f32.mrb[200].mxu0 }
 0x7db   : > { %v5211_v4 = vpop.f32.mrb[201].mxu0 }
 0x7dc   : > { %v21590_v21 = vpop.f32.mrb[202].mxu0 }
 0x7dd   : > { %v5705_v61 = vpack.c.bf16 %v21590_v21, %v21589_v9  ;;  %v5214_v33 = vpop.f32.mrb[203].mxu0  ;;  %v26866_v9 = vpop.f32.mrb[21].mxu1 }
 0x7de   : > { %v5704_v52 = vpack.c.bf16 %v5214_v33, %v5211_v4 }
 0x7df   : > { %21696 = vmatmul.mubr.bf16.gmra.mrb[52].mxu0 %v23861_v19  ;;  %v26868_v19 = vpop.f32.mrb[22].mxu1 }
 0x7e0   : > { %21717 = vmatprep.mubr.msk.bf16.mxu1 %vm5717_vm4, %v5704_v52  ;;  %v6897_v21 = vpack.c.bf16 %v26868_v19, %v26864_v6 }
 0x7e1   : > { %21718 = vmatmul.mubr.msk.bf16.gmra.mrb[32].mxu1 %vm5717_vm4, %v5705_v61  ;;  %v26872_v61 = vpop.f32.mrb[23].mxu1 }
 0x7e2   : > { %v21593_v56 = vpop.f32.mrb[204].mxu0  ;;  %v6896_v33 = vpack.c.bf16 %v26872_v61, %v26866_v9 }
 0x7e3   : > { %v5227_v29 = vpop.f32.mrb[205].mxu0 }
 0x7e4   : > { %v21594_v49 = vpop.f32.mrb[206].mxu0 }
 0x7e5   : > { %v5707_v26 = vpack.c.bf16 %v21594_v49, %v21593_v56  ;;  %v5230_v22 = vpop.f32.mrb[207].mxu0 }
 0x7e6   : > { %v5706_v11 = vpack.c.bf16 %v5230_v22, %v5227_v29 }
 0x7e8   : > { %21721 = vmatprep.mubr.msk.bf16.mxu1 %vm5717_vm4, %v5706_v11 }
 0x7e9   : > { %21722 = vmatmul.mubr.msk.bf16.gmra.mrb[36].mxu1 %vm5717_vm4, %v5707_v26 }
 0x7ea   : > { %21727 = vmatprep.mubr.msk.bf16.mxu1 %vm5717_vm4, %v5690_v58  ;;  %v21597_v44 = vpop.f32.mrb[208].mxu0 }
 0x7eb   : > { %v5243_v14 = vpop.f32.mrb[209].mxu0 }
 0x7ec   : > { %v21598_v57 = vpop.f32.mrb[210].mxu0 }
 0x7ed   : > { %v5967_v5 = vpack.c.bf16 %v21598_v57, %v21597_v44  ;;  %v5246_v12 = vpop.f32.mrb[211].mxu0 }
 0x7ee   : > { %v5966_v28 = vpack.c.bf16 %v5246_v12, %v5243_v14 }
 0x7f1   : > { %21728 = vmatmul.mubr.msk.bf16.vlgmr.msra.gmra.mrb[24].mxu1 %vm5717_vm4, %v5691_v50 }
 0x7f2   : > { %21731 = vmatprep.mubr.msk.bf16.mxu1 %vm5717_vm4, %v5692_v32  ;;  %21744 = vmatpush3.bf16.msra.mxu1 %v23862_v37  ;;  %v21601_v51 = vpop.f32.mrb[212].mxu0  ;;  %v6895_v37 = vpack.c.bf16 %v26854_v25, %v26850_v36 }
 0x7f3   : > { %v5259_v48 = vpop.f32.mrb[213].mxu0  ;;  %21761 = vmatprep.subr.bf16.mxu1 %v23863_v3 }
 0x7f4   : > { %v21602_v58 = vpop.f32.mrb[214].mxu0 }
 0x7f5   : > { %v5969_v20 = vpack.c.bf16 %v21602_v58, %v21601_v51  ;;  %v5262_v55 = vpop.f32.mrb[215].mxu0 }
 0x7f6   : > { %v5968_v63 = vpack.c.bf16 %v5262_v55, %v5259_v48 }
 0x7f9   : > { %21732 = vmatmul.mubr.msk.bf16.gmra.mrb[28].mxu1 %vm5717_vm4, %v5693_v15 }
 0x7fa   : > { %21735 = vmatprep.mubr.msk.bf16.mxu1 %vm5717_vm4, %v5694_v42  ;;  %v21605_v43 = vpop.f32.mrb[216].mxu0 }
 0x7fb   : > { %v5275_v38 = vpop.f32.mrb[217].mxu0 }
 0x7fc   : > { %v21606_v50 = vpop.f32.mrb[218].mxu0 }
 0x7fd   : > { %v5971_v18 = vpack.c.bf16 %v21606_v50, %v21605_v43  ;;  %v5278_v45 = vpop.f32.mrb[219].mxu0 }
 0x7fe   : > { %v5970_v32 = vpack.c.bf16 %v5278_v45, %v5275_v38 }
 0x801   : > { %21736 = vmatmul.mubr.msk.bf16.gmra.mrb[32].mxu1 %vm5717_vm4, %v5695_v16 }
 0x802   : > { %21739 = vmatprep.mubr.msk.bf16.mxu1 %vm5717_vm4, %v5696_v40  ;;  %v21609_v2 = vpop.f32.mrb[220].mxu0  ;;  %v23864_v40 = vld [vmem:[#allocation10 + $0x20] sm:$0xff]  }
 0x803   : > { %v5291_v10 = vpop.f32.mrb[221].mxu0 }
 0x804   : > { %v21610_v15 = vpop.f32.mrb[222].mxu0 }
 0x805   : > { %v5973_v27 = vpack.c.bf16 %v21610_v15, %v21609_v2  ;;  %v5294_v13 = vpop.f32.mrb[223].mxu0 }
 0x806   : > { %v5972_v42 = vpack.c.bf16 %v5294_v13, %v5291_v10 }
 0x809   : > { %21740 = vmatmul.mubr.msk.bf16.gmra.mrb[36].mxu1 %vm5717_vm4, %v5697_v34 }
 0x80a   : > { %21745 = vmatprep.mubr.msk.bf16.mxu1 %vm5717_vm4, %v5966_v28  ;;  %v21613_v60 = vpop.f32.mrb[224].mxu0  ;;  %v23865_v28 = vld [vmem:[#allocation10 + $0x28] sm:$0xff]  }
 0x80b   : > { %v5307_v47 = vpop.f32.mrb[225].mxu0 }
 0x80c   : > { %v21614_v16 = vpop.f32.mrb[226].mxu0 }
 0x80d   : > { %v6121_v31 = vpack.c.bf16 %v21614_v16, %v21613_v60  ;;  %v5310_v1 = vpop.f32.mrb[227].mxu0 }
 0x80e   : > { %v6120_v39 = vpack.c.bf16 %v5310_v1, %v5307_v47 }
 0x811   : > { %21746 = vmatmul.mubr.msk.bf16.vlgmr.msra.gmra.mrb[24].mxu1 %vm5717_vm4, %v5967_v5 }
 0x812   : > { %21749 = vmatprep.mubr.msk.bf16.mxu1 %vm5717_vm4, %v5968_v63  ;;  %21762 = vmatpush3.bf16.msra.mxu1 %v23863_v3  ;;  %v21617_v35 = vpop.f32.mrb[228].mxu0 }
 0x813   : > { %v5323_v41 = vpop.f32.mrb[229].mxu0  ;;  %21779 = vmatprep.subr.bf16.mxu1 %v23864_v40 }
 0x814   : > { %v21618_v7 = vpop.f32.mrb[230].mxu0 }
 0x815   : > { %v6123_v34 = vpack.c.bf16 %v21618_v7, %v21617_v35  ;;  %v5326_v53 = vpop.f32.mrb[231].mxu0 }
 0x816   : > { %v6122_v8 = vpack.c.bf16 %v5326_v53, %v5323_v41 }
 0x819   : > { %21750 = vmatmul.mubr.msk.bf16.gmra.mrb[28].mxu1 %vm5717_vm4, %v5969_v20 }
 0x81a   : > { %21753 = vmatprep.mubr.msk.bf16.mxu1 %vm5717_vm4, %v5970_v32  ;;  %v21621_v62 = vpop.f32.mrb[232].mxu0 }
 0x81b   : > { %v5339_v24 = vpop.f32.mrb[233].mxu0 }
 0x81c   : > { %v21622_v59 = vpop.f32.mrb[234].mxu0 }
 0x81d   : > { %v6125_v54 = vpack.c.bf16 %v21622_v59, %v21621_v62  ;;  %v5342_v17 = vpop.f32.mrb[235].mxu0 }
 0x81e   : > { %v6124_v4 = vpack.c.bf16 %v5342_v17, %v5339_v24 }
 0x821   : > { %21754 = vmatmul.mubr.msk.bf16.gmra.mrb[32].mxu1 %vm5717_vm4, %v5971_v18 }
 0x822   : > { %21757 = vmatprep.mubr.msk.bf16.mxu1 %vm5717_vm4, %v5972_v42  ;;  %v21625_v52 = vpop.f32.mrb[236].mxu0 }
 0x823   : > { %v5355_v56 = vpop.f32.mrb[237].mxu0 }
 0x824   : > { %v21626_v29 = vpop.f32.mrb[238].mxu0 }
 0x825   : > { %v6127_v49 = vpack.c.bf16 %v21626_v29, %v21625_v52  ;;  %v5358_v26 = vpop.f32.mrb[239].mxu0 }
 0x826   : > { %v6126_v22 = vpack.c.bf16 %v5358_v26, %v5355_v56 }
 0x829   : > { %21758 = vmatmul.mubr.msk.bf16.gmra.mrb[36].mxu1 %vm5717_vm4, %v5973_v27 }
 0x82a   : > { %21763 = vmatprep.mubr.msk.bf16.mxu1 %vm5717_vm4, %v6120_v39  ;;  %v21629_v11 = vpop.f32.mrb[240].mxu0  ;;  %v23866_v39 = vld [vmem:[#allocation10 + $0x30] sm:$0xff]  }
 0x82b   : > { %v5371_v44 = vpop.f32.mrb[241].mxu0 }
 0x82c   : > { %v21630_v14 = vpop.f32.mrb[242].mxu0 }
 0x82d   : > { %v6275_v57 = vpack.c.bf16 %v21630_v14, %v21629_v11  ;;  %v5374_v5 = vpop.f32.mrb[243].mxu0 }
 0x82e   : > { %v6274_v12 = vpack.c.bf16 %v5374_v5, %v5371_v44 }
 0x831   : > { %21764 = vmatmul.mubr.msk.bf16.vlgmr.msra.gmra.mrb[24].mxu1 %vm5717_vm4, %v6121_v31 }
 0x832   : > { %21767 = vmatprep.mubr.msk.bf16.mxu1 %vm5717_vm4, %v6122_v8  ;;  %21780 = vmatpush3.bf16.msra.mxu1 %v23864_v40  ;;  %v21633_v3 = vpop.f32.mrb[244].mxu0 }
 0x833   : > { %v5387_v51 = vpop.f32.mrb[245].mxu0  ;;  %21797 = vmatprep.subr.bf16.mxu1 %v23865_v28 }
 0x834   : > { %v21634_v48 = vpop.f32.mrb[246].mxu0 }
 0x835   : > { %v6277_v58 = vpack.c.bf16 %v21634_v48, %v21633_v3  ;;  %v5390_v20 = vpop.f32.mrb[247].mxu0 }
 0x836   : > { %v6276_v55 = vpack.c.bf16 %v5390_v20, %v5387_v51 }
 0x839   : > { %21768 = vmatmul.mubr.msk.bf16.gmra.mrb[28].mxu1 %vm5717_vm4, %v6123_v34 }
 0x83a   : > { %21771 = vmatprep.mubr.msk.bf16.mxu1 %vm5717_vm4, %v6124_v4  ;;  %v21637_v63 = vpop.f32.mrb[248].mxu0 }
 0x83b   : > { %v5403_v43 = vpop.f32.mrb[249].mxu0 }
 0x83c   : > { %v21638_v38 = vpop.f32.mrb[250].mxu0 }
 0x83d   : > { %v6279_v50 = vpack.c.bf16 %v21638_v38, %v21637_v63  ;;  %v5406_v18 = vpop.f32.mrb[251].mxu0 }
 0x83e   : > { %v6278_v45 = vpack.c.bf16 %v5406_v18, %v5403_v43 }
 0x841   : > { %21772 = vmatmul.mubr.msk.bf16.gmra.mrb[32].mxu1 %vm5717_vm4, %v6125_v54 }
 0x842   : > { %21775 = vmatprep.mubr.msk.bf16.mxu1 %vm5717_vm4, %v6126_v22  ;;  %v21641_v32 = vpop.f32.mrb[252].mxu0 }
 0x843   : > { %v5419_v2 = vpop.f32.mrb[253].mxu0 }
 0x844   : > { %v21642_v10 = vpop.f32.mrb[254].mxu0 }
 0x845   : > { %v6281_v15 = vpack.c.bf16 %v21642_v10, %v21641_v32  ;;  %v5422_v27 = vpop.f32.mrb[255].mxu0 }
 0x846   : > { %v6280_v13 = vpack.c.bf16 %v5422_v27, %v5419_v2 }
 0x849   : > { %21776 = vmatmul.mubr.msk.bf16.gmra.mrb[36].mxu1 %vm5717_vm4, %v6127_v49 }
 0x84a   : > { %21781 = vmatprep.mubr.msk.bf16.mxu1 %vm5717_vm4, %v6274_v12  ;;  %v21645_v42 = vpop.f32.mrb[0].mxu0  ;;  %v23867_v12 = vld [vmem:[#allocation10 + $0x38] sm:$0xff]  }
 0x84b   : > { %v5435_v60 = vpop.f32.mrb[1].mxu0 }
 0x84c   : > { %v21646_v47 = vpop.f32.mrb[2].mxu0 }
 0x84d   : > { %v6429_v16 = vpack.c.bf16 %v21646_v47, %v21645_v42  ;;  %v5438_v31 = vpop.f32.mrb[3].mxu0 }
 0x84e   : > { %v6428_v1 = vpack.c.bf16 %v5438_v31, %v5435_v60 }
 0x851   : > { %21782 = vmatmul.mubr.msk.bf16.vlgmr.msra.gmra.mrb[24].mxu1 %vm5717_vm4, %v6275_v57 }
 0x852   : > { %21785 = vmatprep.mubr.msk.bf16.mxu1 %vm5717_vm4, %v6276_v55  ;;  %21798 = vmatpush3.bf16.msra.mxu1 %v23865_v28  ;;  %v21649_v40 = vpop.f32.mrb[4].mxu0 }
 0x853   : > { %v5451_v35 = vpop.f32.mrb[5].mxu0  ;;  %21815 = vmatprep.subr.bf16.mxu1 %v23866_v39 }
 0x854   : > { %v21650_v41 = vpop.f32.mrb[6].mxu0 }
 0x855   : > { %v6431_v7 = vpack.c.bf16 %v21650_v41, %v21649_v40  ;;  %v5454_v34 = vpop.f32.mrb[7].mxu0 }
 0x856   : > { %v6430_v53 = vpack.c.bf16 %v5454_v34, %v5451_v35 }
 0x859   : > { %21786 = vmatmul.mubr.msk.bf16.gmra.mrb[28].mxu1 %vm5717_vm4, %v6277_v58 }
 0x85a   : > { %21789 = vmatprep.mubr.msk.bf16.mxu1 %vm5717_vm4, %v6278_v45  ;;  %v21653_v8 = vpop.f32.mrb[8].mxu0 }
 0x85b   : > { %v5467_v62 = vpop.f32.mrb[9].mxu0 }
 0x85c   : > { %v21654_v24 = vpop.f32.mrb[10].mxu0 }
 0x85d   : > { %v6433_v59 = vpack.c.bf16 %v21654_v24, %v21653_v8  ;;  %v5470_v54 = vpop.f32.mrb[11].mxu0 }
 0x85e   : > { %v6432_v17 = vpack.c.bf16 %v5470_v54, %v5467_v62 }
 0x861   : > { %21790 = vmatmul.mubr.msk.bf16.gmra.mrb[32].mxu1 %vm5717_vm4, %v6279_v50 }
 0x862   : > { %21793 = vmatprep.mubr.msk.bf16.mxu1 %vm5717_vm4, %v6280_v13  ;;  %v21657_v4 = vpop.f32.mrb[12].mxu0 }
 0x863   : > { %v5483_v52 = vpop.f32.mrb[13].mxu0 }
 0x864   : > { %v21658_v56 = vpop.f32.mrb[14].mxu0 }
 0x865   : > { %v6435_v29 = vpack.c.bf16 %v21658_v56, %v21657_v4  ;;  %v5486_v49 = vpop.f32.mrb[15].mxu0 }
 0x866   : > { %v6434_v26 = vpack.c.bf16 %v5486_v49, %v5483_v52 }
 0x869   : > { %21794 = vmatmul.mubr.msk.bf16.gmra.mrb[36].mxu1 %vm5717_vm4, %v6281_v15 }
 0x86a   : > { %21799 = vmatprep.mubr.msk.bf16.mxu1 %vm5717_vm4, %v6428_v1  ;;  %v21661_v22 = vpop.f32.mrb[16].mxu0  ;;  %v23868_v1 = vld [vmem:[#allocation10 + $0x40] sm:$0xff]  }
 0x86b   : > { %v5499_v11 = vpop.f32.mrb[17].mxu0 }
 0x86c   : > { %v21662_v44 = vpop.f32.mrb[18].mxu0 }
 0x86d   : > { %v6583_v14 = vpack.c.bf16 %v21662_v44, %v21661_v22  ;;  %v5502_v57 = vpop.f32.mrb[19].mxu0 }
 0x86e   : > { %v6582_v5 = vpack.c.bf16 %v5502_v57, %v5499_v11 }
 0x871   : > { %21800 = vmatmul.mubr.msk.bf16.vlgmr.msra.gmra.mrb[24].mxu1 %vm5717_vm4, %v6429_v16 }
 0x872   : > { %21803 = vmatprep.mubr.msk.bf16.mxu1 %vm5717_vm4, %v6430_v53  ;;  %21816 = vmatpush3.bf16.msra.mxu1 %v23866_v39  ;;  %v21665_v28 = vpop.f32.mrb[20].mxu0 }
 0x873   : > { %v5515_v3 = vpop.f32.mrb[21].mxu0  ;;  %21833 = vmatprep.subr.bf16.mxu1 %v23867_v12 }
 0x874   : > { %v21666_v51 = vpop.f32.mrb[22].mxu0 }
 0x875   : > { %v6585_v48 = vpack.c.bf16 %v21666_v51, %v21665_v28  ;;  %v5518_v58 = vpop.f32.mrb[23].mxu0 }
 0x876   : > { %v6584_v20 = vpack.c.bf16 %v5518_v58, %v5515_v3  ;;  %v23869_v58 = vld [vmem:[#allocation11] sm:$0xff]  }
 0x877   : > { %21885 = vmatprep.mubr.bf16.mxu0 %v23869_v58 }
 0x879   : > { %21804 = vmatmul.mubr.msk.bf16.gmra.mrb[28].mxu1 %vm5717_vm4, %v6431_v7 }
 0x87a   : > { %21807 = vmatprep.mubr.msk.bf16.mxu1 %vm5717_vm4, %v6432_v17  ;;  %v21669_v55 = vpop.f32.mrb[24].mxu0 }
 0x87b   : > { %v5531_v63 = vpop.f32.mrb[25].mxu0 }
 0x87c   : > { %v21670_v43 = vpop.f32.mrb[26].mxu0 }
 0x87d   : > { %v6587_v38 = vpack.c.bf16 %v21670_v43, %v21669_v55  ;;  %v5534_v50 = vpop.f32.mrb[27].mxu0 }
 0x87e   : > { %v6586_v18 = vpack.c.bf16 %v5534_v50, %v5531_v63 }
 0x881   : > { %21808 = vmatmul.mubr.msk.bf16.gmra.mrb[32].mxu1 %vm5717_vm4, %v6433_v59 }
 0x882   : > { %21811 = vmatprep.mubr.msk.bf16.mxu1 %vm5717_vm4, %v6434_v26  ;;  %v21673_v45 = vpop.f32.mrb[28].mxu0 }
 0x883   : > { %v5547_v32 = vpop.f32.mrb[29].mxu0 }
 0x884   : > { %v21674_v2 = vpop.f32.mrb[30].mxu0 }
 0x885   : > { %v6589_v10 = vpack.c.bf16 %v21674_v2, %v21673_v45  ;;  %v5550_v15 = vpop.f32.mrb[31].mxu0 }
 0x886   : > { %v6588_v27 = vpack.c.bf16 %v5550_v15, %v5547_v32 }
 0x889   : > { %21812 = vmatmul.mubr.msk.bf16.gmra.mrb[36].mxu1 %vm5717_vm4, %v6435_v29 }
 0x88a   : > { %21817 = vmatprep.mubr.msk.bf16.mxu1 %vm5717_vm4, %v6582_v5  ;;  %v21677_v13 = vpop.f32.mrb[32].mxu0 }
 0x88b   : > { %v5563_v42 = vpop.f32.mrb[33].mxu0 }
 0x88c   : > { %v21678_v60 = vpop.f32.mrb[34].mxu0 }
 0x88d   : > { %v6737_v47 = vpack.c.bf16 %v21678_v60, %v21677_v13  ;;  %v5566_v16 = vpop.f32.mrb[35].mxu0 }
 0x88e   : > { %v6736_v31 = vpack.c.bf16 %v5566_v16, %v5563_v42 }
 0x891   : > { %21818 = vmatmul.mubr.msk.bf16.vlgmr.msra.gmra.mrb[24].mxu1 %vm5717_vm4, %v6583_v14 }
 0x892   : > { %21821 = vmatprep.mubr.msk.bf16.mxu1 %vm5717_vm4, %v6584_v20  ;;  %21834 = vmatpush3.bf16.msra.mxu1 %v23867_v12  ;;  %v21681_v39 = vpop.f32.mrb[36].mxu0  ;;  %v7078_v20 = vpop.permute.xlu1 %7077 }
 0x893   : > { %v5579_v40 = vpop.f32.mrb[37].mxu0  ;;  %21851 = vmatprep.subr.bf16.mxu1 %v23868_v1 }
 0x894   : > { %v21682_v35 = vpop.f32.mrb[38].mxu0 }
 0x895   : > { %v6739_v41 = vpack.c.bf16 %v21682_v35, %v21681_v39  ;;  %v5582_v7 = vpop.f32.mrb[39].mxu0 }
 0x896   : > { %v6738_v34 = vpack.c.bf16 %v5582_v7, %v5579_v40  ;;  %v7088_v36 = vpop.permute.xlu1 %7087 }
 0x899   : > { %21822 = vmatmul.mubr.msk.bf16.gmra.mrb[28].mxu1 %vm5717_vm4, %v6585_v48 }
 0x89a   : > { %21825 = vmatprep.mubr.msk.bf16.mxu1 %vm5717_vm4, %v6586_v18  ;;  %v21685_v53 = vpop.f32.mrb[40].mxu0  ;;  %v7098_v9 = vpop.permute.xlu1 %7097 }
 0x89b   : > { %v5595_v8 = vpop.f32.mrb[41].mxu0 }
 0x89c   : > { %v21686_v62 = vpop.f32.mrb[42].mxu0 }
 0x89d   : > { %v6741_v24 = vpack.c.bf16 %v21686_v62, %v21685_v53  ;;  %v5598_v59 = vpop.f32.mrb[43].mxu0 }
 0x89e   : > { %v6740_v54 = vpack.c.bf16 %v5598_v59, %v5595_v8  ;;  %v7108_v13 = vpop.permute.xlu1 %7107 }
 0x8a1   : > { %21826 = vmatmul.mubr.msk.bf16.gmra.mrb[32].mxu1 %vm5717_vm4, %v6587_v38 }
 0x8a2   : > { %21829 = vmatprep.mubr.msk.bf16.mxu1 %vm5717_vm4, %v6588_v27  ;;  %v21689_v17 = vpop.f32.mrb[44].mxu0 }
 0x8a3   : > { %v5611_v4 = vpop.f32.mrb[45].mxu0 }
 0x8a4   : > { %v21690_v52 = vpop.f32.mrb[46].mxu0 }
 0x8a5   : > { %v6743_v56 = vpack.c.bf16 %v21690_v52, %v21689_v17  ;;  %v5614_v29 = vpop.f32.mrb[47].mxu0 }
 0x8a6   : > { %v6742_v49 = vpack.c.bf16 %v5614_v29, %v5611_v4 }
 0x8a9   : > { %21830 = vmatmul.mubr.msk.bf16.gmra.mrb[36].mxu1 %vm5717_vm4, %v6589_v10 }
 0x8aa   : > { %21835 = vmatprep.mubr.msk.bf16.mxu1 %vm5717_vm4, %v6736_v31  ;;  %v21693_v26 = vpop.f32.mrb[48].mxu0 }
 0x8ab   : > { %v5627_v22 = vpop.f32.mrb[49].mxu0 }
 0x8ac   : > { %v21694_v11 = vpop.f32.mrb[50].mxu0 }
 0x8ad   : > { %v6891_v44 = vpack.c.bf16 %v21694_v11, %v21693_v26  ;;  %v5630_v14 = vpop.f32.mrb[51].mxu0  ;;  %v7118_v26 = vpop.permute.xlu1 %7117 }
 0x8ae   : > { %v6890_v57 = vpack.c.bf16 %v5630_v14, %v5627_v22 }
 0x8b1   : > { %21836 = vmatmul.mubr.msk.bf16.vlgmr.msra.gmra.mrb[24].mxu1 %vm5717_vm4, %v6737_v47 }
 0x8b2   : > { %21839 = vmatprep.mubr.msk.bf16.mxu1 %vm5717_vm4, %v6738_v34  ;;  %21852 = vmatpush3.bf16.msra.mxu1 %v23868_v1  ;;  %v21697_v5 = vpop.f32.mrb[52].mxu0 }
 0x8b3   : > { %v5643_v12 = vpop.f32.mrb[53].mxu0 }
 0x8b4   : > { %v21698_v28 = vpop.f32.mrb[54].mxu0 }
 0x8b5   : > { %v6893_v3 = vpack.c.bf16 %v21698_v28, %v21697_v5  ;;  %v5646_v51 = vpop.f32.mrb[55].mxu0 }
 0x8b6   : > { %v6892_v48 = vpack.c.bf16 %v5646_v51, %v5643_v12 }
 0x8b9   : > { %21840 = vmatmul.mubr.msk.bf16.gmra.mrb[28].mxu1 %vm5717_vm4, %v6739_v41 }
 0x8ba   : > { %21843 = vmatprep.mubr.msk.bf16.mxu1 %vm5717_vm4, %v6740_v54 }
 0x8c1   : > { %21844 = vmatmul.mubr.msk.bf16.gmra.mrb[32].mxu1 %vm5717_vm4, %v6741_v24 }
 0x8c2   : > { %21847 = vmatprep.mubr.msk.bf16.mxu1 %vm5717_vm4, %v6742_v49 }
 0x8c9   : > { %21848 = vmatmul.mubr.msk.bf16.gmra.mrb[36].mxu1 %vm5717_vm4, %v6743_v56 }
 0x8ca   : > { %21853 = vmatprep.mubr.msk.bf16.mxu1 %vm5717_vm4, %v6890_v57 }
 0x8d1   : > { %21854 = vmatmul.mubr.msk.bf16.vlgmr.msra.gmra.mrb[24].mxu1 %vm5717_vm4, %v6891_v44 }
 0x8d2   : > { %21857 = vmatprep.mubr.msk.bf16.mxu1 %vm5717_vm4, %v6892_v48 }
 0x8d9   : > { %21858 = vmatmul.mubr.msk.bf16.gmra.mrb[28].mxu1 %vm5717_vm4, %v6893_v3 }
 0x8da   : > { %21861 = vmatprep.mubr.msk.bf16.mxu1 %vm5717_vm4, %v6894_v23  ;;  %v7073_v23 = vpop.permute.xlu0 %7072 }
 0x8de   : > { %v7083_v55 = vpop.permute.xlu0 %7082 }
 0x8e1   : > { %21862 = vmatmul.mubr.msk.bf16.gmra.mrb[32].mxu1 %vm5717_vm4, %v6895_v37 }
 0x8e2   : > { %21865 = vmatprep.mubr.msk.bf16.mxu1 %vm5717_vm4, %v6896_v33  ;;  %v7093_v25 = vpop.permute.xlu0 %7092 }
 0x8e6   : > { %v7103_v32 = vpop.permute.xlu0 %7102 }
 0x8e9   : > { %21866 = vmatmul.mubr.msk.bf16.gmra.mrb[36].mxu1 %vm5717_vm4, %v6897_v21 }
 0x8ea   : > { %v7113_v59 = vpop.permute.xlu0 %7112 }
 0x9a4   : > { %v21855_v37 = vpop.f32.mrb[24].mxu1 }
 0x9a5   : > { %v7142_v63 = vadd.f32 %v21855_v37, %v7073_v23  ;;  %v6965_v43 = vpop.f32.mrb[25].mxu1 }
 0x9a6   : > { %v26939_v61 = vadd.f32 %v7063_v46, %v6965_v43  ;;  %v21856_v33 = vpop.f32.mrb[26].mxu1  ;;  %v7123_v46 = vpop.permute.xlu0 %7122 }
 0x9a7   : > { %v7174_v38 = vmul.f32 0.044715, %v7142_v63  ;;  %v26941_v6 = vadd.f32 %v21856_v33, %v7078_v20  ;;  %v6968_v19 = vpop.f32.mrb[27].mxu1  ;;  %v7158_v58 = vmul.f32 0.5, %v7142_v63 }
 0x9a8   : > { %v7172_v21 = vmul.f32 0.044715, %v26939_v61  ;;  %v26944_v50 = vadd.f32 %v7068_v30, %v6968_v19 }
 0x9a9   : > { %v7190_v18 = vmul.f32 %v7174_v38, %v7142_v63  ;;  %v7175_v45 = vmul.f32 0.044715, %v26941_v6 }
 0x9aa   : > { %v7188_v2 = vmul.f32 %v7172_v21, %v26939_v61  ;;  %v7173_v10 = vmul.f32 0.044715, %v26944_v50 }
 0x9ab   : > { %v7206_v15 = vmul.f32 %v7190_v18, %v7142_v63  ;;  %v7191_v27 = vmul.f32 %v7175_v45, %v26941_v6 }
 0x9ac   : > { %v7204_v42 = vmul.f32 %v7188_v2, %v26939_v61  ;;  %v7189_v60 = vmul.f32 %v7173_v10, %v26944_v50  ;;  %v21859_v47 = vpop.f32.mrb[28].mxu1 }
 0x9ad   : > { %v7207_v16 = vmul.f32 %v7191_v27, %v26941_v6  ;;  %v26953_v31 = vadd.f32 %v21859_v47, %v7093_v25  ;;  %v6981_v1 = vpop.f32.mrb[29].mxu1  ;;  %v7222_v39 = vadd.f32 %v7206_v15, %v7142_v63  ;;  %v7128_v63 = vpop.permute.xlu1 %7127  ;;  %v7159_v47 = vmul.f32 0.5, %v26941_v6 }
 0x9ae   : > { %v7205_v40 = vmul.f32 %v7189_v60, %v26944_v50  ;;  %v26956_v35 = vadd.f32 %v7083_v55, %v6981_v1  ;;  %v21860_v41 = vpop.f32.mrb[30].mxu1  ;;  %v7220_v7 = vadd.f32 %v7204_v42, %v26939_v61  ;;  %v7133_v1 = vpop.permute.xlu0 %7132 }
 0x9af   : > { %v7178_v34 = vmul.f32 0.044715, %v26953_v31  ;;  %v26960_v53 = vadd.f32 %v21860_v41, %v7098_v9  ;;  %v6984_v8 = vpop.f32.mrb[31].mxu1  ;;  %v7223_v62 = vadd.f32 %v7207_v16, %v26941_v6  ;;  %v7238_v24 = vmul.f32 0.7978846, %v7222_v39 }
 0x9b0   : > { %v7176_v54 = vmul.f32 0.044715, %v26956_v35  ;;  %v26964_v17 = vadd.f32 %v7088_v36, %v6984_v8  ;;  %v7221_v4 = vadd.f32 %v7205_v40, %v26944_v50  ;;  %v7236_v52 = vmul.f32 0.7978846, %v7220_v7 }
 0x9b1   : > { %v7194_v56 = vmul.f32 %v7178_v34, %v26953_v31  ;;  %v7179_v29 = vmul.f32 0.044715, %v26960_v53  ;;  %v7239_v49 = vmul.f32 0.7978846, %v7223_v62  ;;  %24771 = vtanh.f32 %v7238_v24  ;;  %v7138_v6 = vpop.permute.xlu1 %7137 }
 0x9b2   : > { %v7192_v22 = vmul.f32 %v7176_v54, %v26956_v35  ;;  %v7177_v11 = vmul.f32 0.044715, %v26964_v17  ;;  %v7237_v44 = vmul.f32 0.7978846, %v7221_v4  ;;  %24773 = vtanh.f32 %v7236_v52 }
 0x9b3   : > { %v7210_v14 = vmul.f32 %v7194_v56, %v26953_v31  ;;  %v7195_v57 = vmul.f32 %v7179_v29, %v26960_v53  ;;  %24775 = vtanh.f32 %v7239_v49  ;;  %v7156_v9 = vmul.f32 0.5, %v26939_v61 }
 0x9b4   : > { %v7208_v5 = vmul.f32 %v7192_v22, %v26956_v35  ;;  %v7193_v12 = vmul.f32 %v7177_v11, %v26964_v17  ;;  %v21863_v28 = vpop.f32.mrb[32].mxu1  ;;  %24777 = vtanh.f32 %v7237_v44  ;;  %v7160_v7 = vmul.f32 0.5, %v26956_v35 }
 0x9b5   : > { %v7211_v3 = vmul.f32 %v7195_v57, %v26960_v53  ;;  %v26976_v51 = vadd.f32 %v21863_v28, %v7113_v59  ;;  %v6997_v48 = vpop.f32.mrb[33].mxu1  ;;  %v7226_v36 = vadd.f32 %v7210_v14, %v26953_v31 }
 0x9b6   : > { %v7209_v30 = vmul.f32 %v7193_v12, %v26964_v17  ;;  %v26979_v23 = vadd.f32 %v7103_v32, %v6997_v48  ;;  %v21864_v20 = vpop.f32.mrb[34].mxu1  ;;  %v7224_v55 = vadd.f32 %v7208_v5, %v26956_v35 }
 0x9b7   : > { %v7182_v25 = vmul.f32 0.044715, %v26976_v51  ;;  %v26984_v37 = vadd.f32 %v21864_v20, %v7118_v26  ;;  %v7000_v43 = vpop.f32.mrb[35].mxu1  ;;  %v7227_v33 = vadd.f32 %v7211_v3, %v26960_v53  ;;  %v7242_v2 = vmul.f32 0.7978846, %v7226_v36 }
 0x9b8   : > { %v7180_v38 = vmul.f32 0.044715, %v26979_v23  ;;  %v26989_v19 = vadd.f32 %v7108_v13, %v7000_v43  ;;  %v7225_v21 = vadd.f32 %v7209_v30, %v26964_v17  ;;  %v7240_v18 = vmul.f32 0.7978846, %v7224_v55 }
 0x9b9   : > { %v7198_v45 = vmul.f32 %v7182_v25, %v26976_v51  ;;  %v7183_v32 = vmul.f32 0.044715, %v26984_v37  ;;  %v7243_v10 = vmul.f32 0.7978846, %v7227_v33  ;;  %v7157_v13 = vmul.f32 0.5, %v26944_v50 }
 0x9ba   : > { %v7196_v15 = vmul.f32 %v7180_v38, %v26979_v23  ;;  %v7181_v61 = vmul.f32 0.044715, %v26989_v19  ;;  %v7241_v27 = vmul.f32 0.7978846, %v7225_v21  ;;  %24779 = vtanh.f32 %v7240_v18 }
 0x9bb   : > { %v24772_v42 = vpop.eup %24771  ;;  %v7199_v60 = vmul.f32 %v7183_v32, %v26984_v37  ;;  %24781 = vtanh.f32 %v7242_v2  ;;  %v7214_v54 = vmul.f32 %v7198_v45, %v26976_v51  ;;  %v7161_v43 = vmul.f32 0.5, %v26964_v17 }
 0x9bc   : > { %v24774_v16 = vpop.eup %24773  ;;  %v7197_v39 = vmul.f32 %v7181_v61, %v26989_v19  ;;  %v21867_v40 = vpop.f32.mrb[36].mxu1  ;;  %v7270_v41 = vadd.f32 1.0, %v24772_v42  ;;  %24783 = vtanh.f32 %v7241_v27  ;;  %v7212_v8 = vmul.f32 %v7196_v15, %v26979_v23 }
 0x9bd   : > { %v24776_v34 = vpop.eup %24775  ;;  %v27002_v62 = vadd.f32 %v21867_v40, %v7133_v1  ;;  %v7013_v24 = vpop.f32.mrb[37].mxu1  ;;  %v7268_v59 = vadd.f32 1.0, %v24774_v16  ;;  %24785 = vtanh.f32 %v7243_v10  ;;  %v7215_v35 = vmul.f32 %v7199_v60, %v26984_v37 }
 0x9be   : > { %v24778_v50 = vpop.eup %24777  ;;  %v7213_v4 = vmul.f32 %v7197_v39, %v26989_v19  ;;  %v27006_v52 = vadd.f32 %v7123_v46, %v7013_v24  ;;  %v21868_v56 = vpop.f32.mrb[38].mxu1  ;;  %v7271_v29 = vadd.f32 1.0, %v24776_v34  ;;  %v7286_v57 = vmul.f32 %v7270_v41, %v7158_v58 }
 0x9bf   : > { %v7186_v49 = vmul.f32 0.044715, %v27002_v62  ;;  %v27010_v26 = vadd.f32 %v21868_v56, %v7138_v6  ;;  %v7016_v22 = vpop.f32.mrb[39].mxu1  ;;  %v7269_v11 = vadd.f32 1.0, %v24778_v50  ;;  %v7284_v28 = vmul.f32 %v7268_v59, %v7156_v9 }
 0x9c0   : > { %v7184_v44 = vmul.f32 0.044715, %v27006_v52  ;;  %v27013_v14 = vadd.f32 %v7128_v63, %v7016_v22  ;;  %v7287_v5 = vmul.f32 %v7271_v29, %v7159_v47  ;;  %v7228_v48 = vadd.f32 %v7212_v8, %v26979_v23 }
 0x9c1   : > { %v7187_v12 = vmul.f32 0.044715, %v27010_v26  ;;  %v7285_v3 = vmul.f32 %v7269_v11, %v7157_v13  ;;  %v7229_v55 = vadd.f32 %v7213_v4, %v26989_v19  ;;  %v7202_v36 = vmul.f32 %v7186_v49, %v27002_v62 }
 0x9c2   : > { %v7200_v46 = vmul.f32 %v7184_v44, %v27006_v52  ;;  %v7185_v30 = vmul.f32 0.044715, %v27013_v14  ;;  %v7301_v20 = vpack.c.bf16 %v7287_v5, %v7286_v57  ;;  %v7244_v58 = vmul.f32 0.7978846, %v7228_v48 }
 0x9c3   : > { %v7300_v25 = vpack.c.bf16 %v7285_v3, %v7284_v28  ;;  %v7203_v63 = vmul.f32 %v7187_v12, %v27010_v26  ;;  %v7162_v38 = vmul.f32 0.5, %v26953_v31  ;;  %v7245_v21 = vmul.f32 0.7978846, %v7229_v55 }
 0x9c4   : > { %v24780_v33 = vpop.eup %24779  ;;  %v7201_v9 = vmul.f32 %v7185_v30, %v27013_v14  ;;  %v7216_v45 = vmul.f32 %v7200_v46, %v27006_v52  ;;  %24787 = vtanh.f32 %v7244_v58  ;;  %v7230_v2 = vadd.f32 %v7214_v54, %v26976_v51 }
 0x9c5   : > { %v24782_v18 = vpop.eup %24781  ;;  %21869 = vmatprep.subr.bf16.mxu0 %v7300_v25  ;;  %v7272_v32 = vadd.f32 1.0, %v24780_v33  ;;  %24789 = vtanh.f32 %v7245_v21  ;;  %v7231_v61 = vadd.f32 %v7215_v35, %v26984_v37  ;;  %v7218_v31 = vmul.f32 %v7202_v36, %v27002_v62 }
 0x9c6   : > { %v24784_v10 = vpop.eup %24783  ;;  %v7217_v17 = vmul.f32 %v7201_v9, %v27013_v14  ;;  %21870 = vmatpush3.bf16.msra.mxu0 %v7300_v25  ;;  %v7274_v15 = vadd.f32 1.0, %v24782_v18  ;;  %v7163_v60 = vmul.f32 0.5, %v26960_v53  ;;  %v7246_v13 = vmul.f32 0.7978846, %v7230_v2 }
 0x9c7   : > { %v24786_v27 = vpop.eup %24785  ;;  %21871 = vmatprep.subr.bf16.mxu0 %v7301_v20  ;;  %v7273_v42 = vadd.f32 1.0, %v24784_v10  ;;  %v7219_v47 = vmul.f32 %v7203_v63, %v27010_v26  ;;  %v7288_v16 = vmul.f32 %v7272_v32, %v7160_v7  ;;  %v7247_v39 = vmul.f32 0.7978846, %v7231_v61  ;;  %v23873_v61 = vld [vmem:[#allocation11 + $0x20] sm:$0xff]  }
 0x9c8   : > { %v7275_v1 = vadd.f32 1.0, %v24786_v27  ;;  %24791 = vtanh.f32 %v7246_v13  ;;  %v7232_v41 = vadd.f32 %v7216_v45, %v27006_v52  ;;  %v7233_v34 = vadd.f32 %v7217_v17, %v27013_v14  ;;  %v23874_v27 = vld [vmem:[#allocation11 + $0x28] sm:$0xff]   ;;  %v23879_v13 = vld [vmem:[#allocation11 + $0x50] sm:$0xff]  }
 0x9c9   : > { %v7289_v40 = vmul.f32 %v7273_v42, %v7161_v43  ;;  %v7290_v8 = vmul.f32 %v7274_v15, %v7162_v38  ;;  %24793 = vtanh.f32 %v7247_v39  ;;  %v7234_v53 = vadd.f32 %v7218_v31, %v27002_v62  ;;  %v23876_v31 = vld [vmem:[#allocation11 + $0x38] sm:$0xff]   ;;  %v23877_v42 = vld [vmem:[#allocation11 + $0x40] sm:$0xff]   ;;  %v23883_v39 = vld [vmem:[#allocation11 + $0x70] sm:$0xff]  }
 0x9ca   : > { %21872 = vmatpush3.bf16.msra.mxu0 %v7301_v20  ;;  %v7291_v24 = vmul.f32 %v7275_v1, %v7163_v60  ;;  %v7248_v50 = vmul.f32 0.7978846, %v7232_v41  ;;  %v7249_v6 = vmul.f32 0.7978846, %v7233_v34  ;;  %v7235_v7 = vadd.f32 %v7219_v47, %v27010_v26  ;;  %v23878_v60 = vld [vmem:[#allocation11 + $0x48] sm:$0xff]   ;;  %v23880_v47 = vld [vmem:[#allocation11 + $0x58] sm:$0xff]  }
 0x9cb   : > { %v7302_v59 = vpack.c.bf16 %v7289_v40, %v7288_v16  ;;  %v7250_v4 = vmul.f32 0.7978846, %v7234_v53  ;;  %v7164_v22 = vmul.f32 0.5, %v26979_v23  ;;  %v7165_v11 = vmul.f32 0.5, %v26989_v19  ;;  %v23881_v16 = vld [vmem:[#allocation11 + $0x60] sm:$0xff]   ;;  %v23882_v1 = vld [vmem:[#allocation11 + $0x68] sm:$0xff]  }
 0x9cc   : > { %v7303_v54 = vpack.c.bf16 %v7291_v24, %v7290_v8  ;;  %24795 = vtanh.f32 %v7248_v50  ;;  %v7251_v56 = vmul.f32 0.7978846, %v7235_v7  ;;  %v7166_v46 = vmul.f32 0.5, %v26976_v51  ;;  %v23884_v40 = vld [vmem:[#allocation11 + $0x78] sm:$0xff]   ;;  %v23885_v41 = vld [vmem:[#allocation11 + $0x80] sm:$0xff]   ;;  %v23886_v34 = vld [vmem:[#allocation11 + $0x88] sm:$0xff]  }
 0x9cd   : > { %21873 = vmatprep.subr.bf16.mxu0 %v7302_v59  ;;  %24797 = vtanh.f32 %v7249_v6  ;;  %v7167_v30 = vmul.f32 0.5, %v26984_v37  ;;  %v7168_v33 = vmul.f32 0.5, %v27006_v52  ;;  %v7169_v63 = vmul.f32 0.5, %v27013_v14  ;;  %v23870_v52 = vld [vmem:[#allocation11 + $0x8] sm:$0xff]   ;;  %v23871_v14 = vld [vmem:[#allocation11 + $0x10] sm:$0xff]   ;;  %v23888_v24 = vld [vmem:[#allocation11 + $0x98] sm:$0xff]  }
 0x9ce   : > { %21874 = vmatpush3.bf16.msra.mxu0 %v7302_v59  ;;  %v24788_v29 = vpop.eup %24787  ;;  %24799 = vtanh.f32 %v7250_v4  ;;  %v7170_v51 = vmul.f32 0.5, %v27002_v62  ;;  %v7171_v45 = vmul.f32 0.5, %v27010_v26  ;;  %v23872_v62 = vld [vmem:[#allocation11 + $0x18] sm:$0xff]   ;;  %v23875_v26 = vld [vmem:[#allocation11 + $0x30] sm:$0xff]   ;;  %v23889_v59 = vld [vmem:[#allocation11 + $0xa0] sm:$0xff]  }
 0x9cf   : > { %21875 = vmatprep.subr.bf16.mxu0 %v7303_v54  ;;  %v24790_v35 = vpop.eup %24789  ;;  %v7276_v49 = vadd.f32 1.0, %v24788_v29  ;;  %24801 = vtanh.f32 %v7251_v56  ;;  %v23887_v8 = vld [vmem:[#allocation11 + $0x90] sm:$0xff]   ;;  %v23890_v50 = vld [vmem:[#allocation11 + $0xa8] sm:$0xff]   ;;  %v23892_v53 = vld [vmem:[#allocation11 + $0xb8] sm:$0xff]  }
 0x9d0   : > { %v7277_v44 = vadd.f32 1.0, %v24790_v35  ;;  %v23891_v6 = vld [vmem:[#allocation11 + $0xb0] sm:$0xff]   ;;  %v23894_v7 = vld [vmem:[#allocation11 + $0xc8] sm:$0xff]   ;;  %v23896_v56 = vld [vmem:[#allocation11 + $0xd8] sm:$0xff]  }
 0x9d1   : > { %v7292_v5 = vmul.f32 %v7276_v49, %v7164_v22  ;;  %v23895_v4 = vld [vmem:[#allocation11 + $0xd0] sm:$0xff]   ;;  %v23897_v29 = vld [vmem:[#allocation11 + $0xe0] sm:$0xff]   ;;  %v23898_v35 = vld [vmem:[#allocation11 + $0xe8] sm:$0xff]  }
 0x9d2   : > { %21876 = vmatpush3.bf16.msra.mxu0 %v7303_v54  ;;  %v24792_v57 = vpop.eup %24791  ;;  %v7293_v12 = vmul.f32 %v7277_v44, %v7165_v11  ;;  %v23893_v54 = vld [vmem:[#allocation11 + $0xc0] sm:$0xff]   ;;  %v23899_v49 = vld [vmem:[#allocation11 + $0xf0] sm:$0xff]   ;;  %v23900_v22 = vld [vmem:[#allocation11 + $0xf8] sm:$0xff]  }
 0x9d3   : > { %v24794_v28 = vpop.eup %24793  ;;  %v7278_v3 = vadd.f32 1.0, %v24792_v57  ;;  %v23901_v11 = vld [vmem:[#allocation11 + $0x100] sm:$0xff]   ;;  %v23925_v44 = vld [vmem:[#allocation13 + $0x8] sm:$0xff]  }
 0x9d4   : > { %v7304_v48 = vpack.c.bf16 %v7293_v12, %v7292_v5  ;;  %v7279_v20 = vadd.f32 1.0, %v24794_v28  ;;  %22029 = vmatprep.subr.bf16.mxu1 %v23925_v44  ;;  %v23902_v57 = vld [vmem:[#allocation11 + $0x108] sm:$0xff]   ;;  %v23903_v5 = vld [vmem:[#allocation11 + $0x110] sm:$0xff]   ;;  %v23904_v12 = vld [vmem:[#allocation11 + $0x118] sm:$0xff]  }
 0x9d5   : > { %v7294_v36 = vmul.f32 %v7278_v3, %v7166_v46  ;;  %22030 = vmatpush3.bf16.msra.mxu1 %v23925_v44  ;;  %v23905_v28 = vld [vmem:[#allocation11 + $0x120] sm:$0xff]   ;;  %v23906_v3 = vld [vmem:[#allocation11 + $0x128] sm:$0xff]  }
 0x9d6   : > { %v24796_v55 = vpop.eup %24795  ;;  %21877 = vmatprep.subr.bf16.mxu0 %v7304_v48  ;;  %v7295_v25 = vmul.f32 %v7279_v20, %v7167_v30  ;;  %v27044_v46 = vld [vmem:[#allocation13] sm:$0xff]   ;;  %v23908_v30 = vld [vmem:[#allocation11 + $0x138] sm:$0xff]  }
 0x9d7   : > { %v24798_v23 = vpop.eup %24797  ;;  %21878 = vmatpush3.bf16.msra.mxu0 %v7304_v48  ;;  %v7280_v19 = vadd.f32 1.0, %v24796_v55  ;;  %v23907_v48 = vld [vmem:[#allocation11 + $0x130] sm:$0xff]   ;;  %v23909_v20 = vld [vmem:[#allocation11 + $0x140] sm:$0xff]   ;;  %22047 = vmatprep.subr.bf16.mxu1 %v27044_v46  ;;  %v23910_v55 = vld [vmem:[#allocation11 + $0x148] sm:$0xff]  }
 0x9d8   : > { %v24800_v43 = vpop.eup %24799  ;;  %v7305_v58 = vpack.c.bf16 %v7295_v25, %v7294_v36  ;;  %v7281_v9 = vadd.f32 1.0, %v24798_v23  ;;  %v23911_v36 = vld [vmem:[#allocation11 + $0x150] sm:$0xff]   ;;  %v23912_v25 = vld [vmem:[#allocation11 + $0x158] sm:$0xff]   ;;  %v23913_v23 = vld [vmem:[#allocation11 + $0x160] sm:$0xff]  }
 0x9d9   : > { %v24802_v38 = vpop.eup %24801  ;;  %v7282_v21 = vadd.f32 1.0, %v24800_v43  ;;  %v7296_v37 = vmul.f32 %v7280_v19, %v7168_v33  ;;  %v23914_v19 = vld [vmem:[#allocation11 + $0x168] sm:$0xff]   ;;  %v23915_v43 = vld [vmem:[#allocation11 + $0x170] sm:$0xff]   ;;  %v23917_v33 = vld [vmem:[#allocation11 + $0x180] sm:$0xff]  }
 0x9da   : > { %21879 = vmatprep.subr.bf16.mxu0 %v7305_v58  ;;  %v7297_v18 = vmul.f32 %v7281_v9, %v7169_v63  ;;  %v7283_v32 = vadd.f32 1.0, %v24802_v38  ;;  %v23918_v63 = vld [vmem:[#allocation11 + $0x188] sm:$0xff]   ;;  %v23919_v9 = vld [vmem:[#allocation11 + $0x190] sm:$0xff]   ;;  %v23920_v38 = vld [vmem:[#allocation11 + $0x198] sm:$0xff]  }
 0x9db   : > { %21880 = vmatpush3.bf16.msra.mxu0 %v7305_v58  ;;  %v7298_v10 = vmul.f32 %v7282_v21, %v7170_v51  ;;  %v23916_v58 = vld [vmem:[#allocation11 + $0x178] sm:$0xff]   ;;  %v23921_v51 = vld [vmem:[#allocation11 + $0x1a0] sm:$0xff]   ;;  %v23922_v21 = vld [vmem:[#allocation11 + $0x1a8] sm:$0xff]  }
 0x9dc   : > { %v7306_v2 = vpack.c.bf16 %v7297_v18, %v7296_v37  ;;  %v7299_v17 = vmul.f32 %v7283_v32, %v7171_v45  ;;  %v23923_v37 = vld [vmem:[#allocation11 + $0x1b0] sm:$0xff]   ;;  %v23924_v32 = vld [vmem:[#allocation11 + $0x1b8] sm:$0xff]  }
 0x9de   : > { %21881 = vmatprep.subr.bf16.mxu0 %v7306_v2  ;;  %v7307_v15 = vpack.c.bf16 %v7299_v17, %v7298_v10  ;;  %v23926_v10 = vld [vmem:[#allocation11 + $0x1c0] sm:$0xff]  }
 0x9df   : > { %21882 = vmatpush3.bf16.msra.mxu0 %v7306_v2 }
 0x9e0   : > { %21883 = vmatprep.subr.bf16.mxu0 %v7307_v15 }
 0x9e3   : > { %21884 = vmatpush3.bf16.msra.mxu0 %v7307_v15 }
 0x9e6   : > { %21886 = vmatmul.mubr.bf16.vlgmr.msra.gmra.mrb[56].mxu0 %v23870_v52 }
 0x9e7   : > { %21889 = vmatprep.mubr.bf16.mxu0 %v23871_v14 }
 0x9ee   : > { %21890 = vmatmul.mubr.bf16.gmra.mrb[60].mxu0 %v23872_v62 }
 0x9ef   : > { %21893 = vmatprep.mubr.bf16.mxu0 %v23873_v61  ;;  %v23927_v61 = vld [vmem:[#allocation11 + $0x1c8] sm:$0xff]  }
 0x9f6   : > { %21894 = vmatmul.mubr.bf16.gmra.mrb[64].mxu0 %v23874_v27 }
 0x9f7   : > { %21897 = vmatprep.mubr.bf16.mxu0 %v23875_v26  ;;  %v23928_v26 = vld [vmem:[#allocation11 + $0x1d0] sm:$0xff]  }
 0x9fe   : > { %21898 = vmatmul.mubr.bf16.gmra.mrb[68].mxu0 %v23876_v31 }
 0x9ff   : > { %21901 = vmatprep.mubr.bf16.mxu0 %v23877_v42 }
 0xa06   : > { %21902 = vmatmul.mubr.bf16.gmra.mrb[72].mxu0 %v23878_v60 }
 0xa07   : > { %21905 = vmatprep.mubr.bf16.mxu0 %v23879_v13 }
 0xa0e   : > { %21906 = vmatmul.mubr.bf16.gmra.mrb[76].mxu0 %v23880_v47 }
 0xa0f   : > { %21909 = vmatprep.mubr.bf16.mxu0 %v23881_v16  ;;  %v23929_v16 = vld [vmem:[#allocation11 + $0x1d8] sm:$0xff]  }
 0xa16   : > { %21910 = vmatmul.mubr.bf16.gmra.mrb[80].mxu0 %v23882_v1 }
 0xa17   : > { %21913 = vmatprep.mubr.bf16.mxu0 %v23883_v39  ;;  %v23930_v39 = vld [vmem:[#allocation11 + $0x1e0] sm:$0xff]  }
 0xa1e   : > { %21914 = vmatmul.mubr.bf16.gmra.mrb[84].mxu0 %v23884_v40 }
 0xa1f   : > { %21917 = vmatprep.mubr.bf16.mxu0 %v23885_v41 }
 0xa26   : > { %21918 = vmatmul.mubr.bf16.gmra.mrb[88].mxu0 %v23886_v34 }
 0xa27   : > { %21921 = vmatprep.mubr.bf16.mxu0 %v23887_v8 }
 0xa2e   : > { %21922 = vmatmul.mubr.bf16.gmra.mrb[92].mxu0 %v23888_v24 }
 0xa2f   : > { %21925 = vmatprep.mubr.bf16.mxu0 %v23889_v59  ;;  %v23931_v59 = vld [vmem:[#allocation11 + $0x1e8] sm:$0xff]  }
 0xa36   : > { %21926 = vmatmul.mubr.bf16.gmra.mrb[96].mxu0 %v23890_v50 }
 0xa37   : > { %21929 = vmatprep.mubr.bf16.mxu0 %v23891_v6  ;;  %v23932_v6 = vld [vmem:[#allocation11 + $0x1f0] sm:$0xff]  }
 0xa3e   : > { %21930 = vmatmul.mubr.bf16.gmra.mrb[100].mxu0 %v23892_v53 }
 0xa3f   : > { %21933 = vmatprep.mubr.bf16.mxu0 %v23893_v54 }
 0xa46   : > { %21934 = vmatmul.mubr.bf16.gmra.mrb[104].mxu0 %v23894_v7 }
 0xa47   : > { %21937 = vmatprep.mubr.bf16.mxu0 %v23895_v4 }
 0xa4e   : > { %21938 = vmatmul.mubr.bf16.gmra.mrb[108].mxu0 %v23896_v56 }
 0xa4f   : > { %21941 = vmatprep.mubr.bf16.mxu0 %v23897_v29  ;;  %v23933_v29 = vld [vmem:[#allocation11 + $0x1f8] sm:$0xff]  }
 0xa56   : > { %21942 = vmatmul.mubr.bf16.gmra.mrb[112].mxu0 %v23898_v35 }
 0xa57   : > { %21945 = vmatprep.mubr.bf16.mxu0 %v23899_v49  ;;  %v23935_v49 = vld [vmem:[#allocation11 + $0x200] sm:$0xff]  }
 0xa5e   : > { %21946 = vmatmul.mubr.bf16.gmra.mrb[116].mxu0 %v23900_v22 }
 0xa5f   : > { %21949 = vmatprep.mubr.bf16.mxu0 %v23901_v11 }
 0xa66   : > { %21950 = vmatmul.mubr.bf16.gmra.mrb[120].mxu0 %v23902_v57  ;;  %v23943_v57 = vld [vmem:[#allocation13 + $0x10] sm:$0xff]  }
 0xa67   : > { %21953 = vmatprep.mubr.bf16.mxu0 %v23903_v5 }
 0xa6e   : > { %21954 = vmatmul.mubr.bf16.gmra.mrb[124].mxu0 %v23904_v12 }
 0xa6f   : > { %21957 = vmatprep.mubr.bf16.mxu0 %v23905_v28  ;;  %v23936_v28 = vld [vmem:[#allocation11 + $0x208] sm:$0xff]  }
 0xa76   : > { %21958 = vmatmul.mubr.bf16.gmra.mrb[128].mxu0 %v23906_v3 }
 0xa77   : > { %21961 = vmatprep.mubr.bf16.mxu0 %v23907_v48  ;;  %v23937_v48 = vld [vmem:[#allocation11 + $0x210] sm:$0xff]  }
 0xa7e   : > { %21962 = vmatmul.mubr.bf16.gmra.mrb[132].mxu0 %v23908_v30 }
 0xa7f   : > { %21965 = vmatprep.mubr.bf16.mxu0 %v23909_v20 }
 0xa86   : > { %21966 = vmatmul.mubr.bf16.gmra.mrb[136].mxu0 %v23910_v55 }
 0xa87   : > { %21969 = vmatprep.mubr.bf16.mxu0 %v23911_v36 }
 0xa8e   : > { %21970 = vmatmul.mubr.bf16.gmra.mrb[140].mxu0 %v23912_v25 }
 0xa8f   : > { %21973 = vmatprep.mubr.bf16.mxu0 %v23913_v23  ;;  %v23938_v23 = vld [vmem:[#allocation11 + $0x218] sm:$0xff]  }
 0xa96   : > { %21974 = vmatmul.mubr.bf16.gmra.mrb[144].mxu0 %v23914_v19 }
 0xa97   : > { %21977 = vmatprep.mubr.bf16.mxu0 %v23915_v43  ;;  %v23939_v43 = vld [vmem:[#allocation11 + $0x220] sm:$0xff]  }
 0xa9e   : > { %21978 = vmatmul.mubr.bf16.gmra.mrb[148].mxu0 %v23916_v58 }
 0xa9f   : > { %21981 = vmatprep.mubr.bf16.mxu0 %v23917_v33 }
 0xaa6   : > { %21982 = vmatmul.mubr.bf16.gmra.mrb[152].mxu0 %v23918_v63 }
 0xaa7   : > { %21985 = vmatprep.mubr.bf16.mxu0 %v23919_v9 }
 0xaae   : > { %21986 = vmatmul.mubr.bf16.gmra.mrb[156].mxu0 %v23920_v38  ;;  %v23940_v38 = vld [vmem:[#allocation11 + $0x228] sm:$0xff]  }
 0xaaf   : > { %21989 = vmatprep.mubr.bf16.mxu0 %v23921_v51 }
 0xab6   : > { %21990 = vmatmul.mubr.bf16.gmra.mrb[160].mxu0 %v23922_v21  ;;  %v23941_v21 = vld [vmem:[#allocation11 + $0x230] sm:$0xff]  }
 0xab7   : > { %21993 = vmatprep.mubr.bf16.mxu0 %v23923_v37 }
 0xab9   : > { %v27047_v18 = vpop.f32.mrb[56].mxu0 }
 0xaba   : > { %v27049_v45 = vpop.f32.mrb[57].mxu0 }
 0xabb   : > { %v27051_v2 = vpop.f32.mrb[58].mxu0 }
 0xabc   : > { %v8494_v17 = vpack.c.bf16 %v27051_v2, %v27047_v18  ;;  %v27055_v15 = vpop.f32.mrb[59].mxu0 }
 0xabd   : > { %v8493_v52 = vpack.c.bf16 %v27055_v15, %v27049_v45 }
 0xabe   : > { %21994 = vmatmul.mubr.bf16.gmra.mrb[164].mxu0 %v23924_v32 }
 0xabf   : > { %21997 = vmatprep.mubr.bf16.mxu0 %v23926_v10 }
 0xac1   : > { %v27059_v14 = vpop.f32.mrb[60].mxu0 }
 0xac2   : > { %v27061_v62 = vpop.f32.mrb[61].mxu0 }
 0xac3   : > { %v27063_v27 = vpop.f32.mrb[62].mxu0 }
 0xac4   : > { %v8496_v31 = vpack.c.bf16 %v27063_v27, %v27059_v14  ;;  %v27067_v42 = vpop.f32.mrb[63].mxu0 }
 0xac5   : > { %v8495_v60 = vpack.c.bf16 %v27067_v42, %v27061_v62 }
 0xac6   : > { %21998 = vmatmul.mubr.bf16.gmra.mrb[168].mxu0 %v23927_v61 }
 0xac7   : > { %22001 = vmatprep.mubr.bf16.mxu0 %v23928_v26 }
 0xac9   : > { %v27071_v13 = vpop.f32.mrb[64].mxu0 }
 0xaca   : > { %v27073_v47 = vpop.f32.mrb[65].mxu0 }
 0xacb   : > { %v27075_v1 = vpop.f32.mrb[66].mxu0 }
 0xacc   : > { %v8498_v40 = vpack.c.bf16 %v27075_v1, %v27071_v13  ;;  %v27079_v41 = vpop.f32.mrb[67].mxu0 }
 0xacd   : > { %v8497_v34 = vpack.c.bf16 %v27079_v41, %v27073_v47 }
 0xace   : > { %22002 = vmatmul.mubr.bf16.gmra.mrb[172].mxu0 %v23929_v16  ;;  %v23942_v16 = vld [vmem:[#allocation11 + $0x238] sm:$0xff]  }
 0xacf   : > { %22005 = vmatprep.mubr.bf16.mxu0 %v23930_v39 }
 0xad1   : > { %v27083_v8 = vpop.f32.mrb[68].mxu0 }
 0xad2   : > { %v27085_v24 = vpop.f32.mrb[69].mxu0 }
 0xad3   : > { %v27087_v50 = vpop.f32.mrb[70].mxu0 }
 0xad4   : > { %v8500_v53 = vpack.c.bf16 %v27087_v50, %v27083_v8  ;;  %v27091_v54 = vpop.f32.mrb[71].mxu0 }
 0xad5   : > { %v8499_v7 = vpack.c.bf16 %v27091_v54, %v27085_v24 }
 0xad6   : > { %22006 = vmatmul.mubr.bf16.gmra.mrb[176].mxu0 %v23931_v59 }
 0xad7   : > { %22009 = vmatprep.mubr.bf16.mxu0 %v23932_v6 }
 0xad9   : > { %v21903_v4 = vpop.f32.mrb[72].mxu0 }
 0xada   : > { %v7982_v56 = vpop.f32.mrb[73].mxu0 }
 0xadb   : > { %v21904_v35 = vpop.f32.mrb[74].mxu0 }
 0xadc   : > { %v8504_v22 = vpack.c.bf16 %v21904_v35, %v21903_v4  ;;  %v7985_v11 = vpop.f32.mrb[75].mxu0 }
 0xadd   : > { %v8503_v44 = vpack.c.bf16 %v7985_v11, %v7982_v56  ;;  %v23944_v56 = vld [vmem:[#allocation13 + $0x18] sm:$0xff]  }
 0xade   : > { %22010 = vmatmul.mubr.bf16.gmra.mrb[180].mxu0 %v23933_v29 }
 0xadf   : > { %22031 = vmatprep.mubr.msk.bf16.mxu1 %vm5717_vm4, %v8503_v44  ;;  %22013 = vmatprep.mubr.bf16.mxu0 %v23935_v49 }
 0xae0   : > { %22032 = vmatmul.mubr.msk.bf16.vlgmr.msra.gmra.mrb[40].mxu1 %vm5717_vm4, %v8504_v22 }
 0xae1   : > { %v21907_v5 = vpop.f32.mrb[76].mxu0  ;;  %22048 = vmatpush3.bf16.msra.mxu1 %v27044_v46 }
 0xae2   : > { %v7998_v12 = vpop.f32.mrb[77].mxu0  ;;  %22065 = vmatprep.subr.bf16.mxu1 %v23943_v57 }
 0xae3   : > { %v21908_v3 = vpop.f32.mrb[78].mxu0 }
 0xae4   : > { %v8506_v30 = vpack.c.bf16 %v21908_v3, %v21907_v5  ;;  %v8001_v20 = vpop.f32.mrb[79].mxu0 }
 0xae5   : > { %v8505_v55 = vpack.c.bf16 %v8001_v20, %v7998_v12 }
 0xae6   : > { %22014 = vmatmul.mubr.bf16.gmra.mrb[184].mxu0 %v23936_v28 }
 0xae7   : > { %22035 = vmatprep.mubr.msk.bf16.mxu1 %vm5717_vm4, %v8505_v55  ;;  %22017 = vmatprep.mubr.bf16.mxu0 %v23937_v48 }
 0xae8   : > { %22036 = vmatmul.mubr.msk.bf16.gmra.mrb[44].mxu1 %vm5717_vm4, %v8506_v30 }
 0xae9   : > { %v21911_v36 = vpop.f32.mrb[80].mxu0 }
 0xaea   : > { %v8014_v25 = vpop.f32.mrb[81].mxu0 }
 0xaeb   : > { %v21912_v19 = vpop.f32.mrb[82].mxu0 }
 0xaec   : > { %v8508_v46 = vpack.c.bf16 %v21912_v19, %v21911_v36  ;;  %v8017_v58 = vpop.f32.mrb[83].mxu0 }
 0xaed   : > { %v8507_v33 = vpack.c.bf16 %v8017_v58, %v8014_v25 }
 0xaee   : > { %22018 = vmatmul.mubr.bf16.gmra.mrb[188].mxu0 %v23938_v23 }
 0xaef   : > { %22039 = vmatprep.mubr.msk.bf16.mxu1 %vm5717_vm4, %v8507_v33  ;;  %22021 = vmatprep.mubr.bf16.mxu0 %v23939_v43 }
 0xaf0   : > { %22040 = vmatmul.mubr.msk.bf16.gmra.mrb[48].mxu1 %vm5717_vm4, %v8508_v46 }
 0xaf1   : > { %v21915_v63 = vpop.f32.mrb[84].mxu0 }
 0xaf2   : > { %v8030_v9 = vpop.f32.mrb[85].mxu0 }
 0xaf3   : > { %v21916_v51 = vpop.f32.mrb[86].mxu0 }
 0xaf4   : > { %v8510_v37 = vpack.c.bf16 %v21916_v51, %v21915_v63  ;;  %v8033_v32 = vpop.f32.mrb[87].mxu0 }
 0xaf5   : > { %v8509_v10 = vpack.c.bf16 %v8033_v32, %v8030_v9 }
 0xaf6   : > { %22022 = vmatmul.mubr.bf16.gmra.mrb[192].mxu0 %v23940_v38  ;;  %v23946_v38 = vld [vmem:[#allocation13 + $0x28] sm:$0xff]  }
 0xaf7   : > { %22043 = vmatprep.mubr.msk.bf16.mxu1 %vm5717_vm4, %v8509_v10  ;;  %22025 = vmatprep.mubr.bf16.mxu0 %v23941_v21 }
 0xaf8   : > { %22044 = vmatmul.mubr.msk.bf16.gmra.mrb[52].mxu1 %vm5717_vm4, %v8510_v37 }
 0xaf9   : > { %22049 = vmatprep.mubr.msk.bf16.mxu1 %vm5717_vm4, %v8493_v52  ;;  %v21919_v61 = vpop.f32.mrb[88].mxu0 }
 0xafa   : > { %v8046_v26 = vpop.f32.mrb[89].mxu0 }
 0xafb   : > { %v21920_v39 = vpop.f32.mrb[90].mxu0 }
 0xafc   : > { %v8769_v59 = vpack.c.bf16 %v21920_v39, %v21919_v61  ;;  %v8049_v6 = vpop.f32.mrb[91].mxu0 }
 0xafd   : > { %v8768_v4 = vpack.c.bf16 %v8049_v6, %v8046_v26 }
 0xafe   : > { %22026 = vmatmul.mubr.bf16.gmra.mrb[196].mxu0 %v23942_v16 }
 0xb00   : > { %22050 = vmatmul.mubr.msk.bf16.vlgmr.msra.gmra.mrb[40].mxu1 %vm5717_vm4, %v8494_v17 }
 0xb01   : > { %22053 = vmatprep.mubr.msk.bf16.mxu1 %vm5717_vm4, %v8495_v60  ;;  %22066 = vmatpush3.bf16.msra.mxu1 %v23943_v57  ;;  %v21923_v45 = vpop.f32.mrb[92].mxu0 }
 0xb02   : > { %v8062_v15 = vpop.f32.mrb[93].mxu0  ;;  %22083 = vmatprep.subr.bf16.mxu1 %v23944_v56 }
 0xb03   : > { %v21924_v52 = vpop.f32.mrb[94].mxu0 }
 0xb04   : > { %v8771_v29 = vpack.c.bf16 %v21924_v52, %v21923_v45  ;;  %v8065_v35 = vpop.f32.mrb[95].mxu0 }
 0xb05   : > { %v8770_v49 = vpack.c.bf16 %v8065_v35, %v8062_v15 }
 0xb08   : > { %22054 = vmatmul.mubr.msk.bf16.gmra.mrb[44].mxu1 %vm5717_vm4, %v8496_v31 }
 0xb09   : > { %22057 = vmatprep.mubr.msk.bf16.mxu1 %vm5717_vm4, %v8497_v34  ;;  %v21927_v18 = vpop.f32.mrb[96].mxu0 }
 0xb0a   : > { %v8078_v2 = vpop.f32.mrb[97].mxu0 }
 0xb0b   : > { %v21928_v17 = vpop.f32.mrb[98].mxu0 }
 0xb0c   : > { %v8773_v62 = vpack.c.bf16 %v21928_v17, %v21927_v18  ;;  %v8081_v42 = vpop.f32.mrb[99].mxu0 }
 0xb0d   : > { %v8772_v60 = vpack.c.bf16 %v8081_v42, %v8078_v2 }
 0xb10   : > { %22058 = vmatmul.mubr.msk.bf16.gmra.mrb[48].mxu1 %vm5717_vm4, %v8498_v40 }
 0xb11   : > { %22061 = vmatprep.mubr.msk.bf16.mxu1 %vm5717_vm4, %v8499_v7  ;;  %v21931_v14 = vpop.f32.mrb[100].mxu0  ;;  %v23945_v7 = vld [vmem:[#allocation13 + $0x20] sm:$0xff]  }
 0xb12   : > { %v8094_v27 = vpop.f32.mrb[101].mxu0 }
 0xb13   : > { %v21932_v31 = vpop.f32.mrb[102].mxu0 }
 0xb14   : > { %v8775_v47 = vpack.c.bf16 %v21932_v31, %v21931_v14  ;;  %v8097_v41 = vpop.f32.mrb[103].mxu0 }
 0xb15   : > { %v8774_v34 = vpack.c.bf16 %v8097_v41, %v8094_v27 }
 0xb18   : > { %22062 = vmatmul.mubr.msk.bf16.gmra.mrb[52].mxu1 %vm5717_vm4, %v8500_v53 }
 0xb19   : > { %22067 = vmatprep.mubr.msk.bf16.mxu1 %vm5717_vm4, %v8768_v4  ;;  %v21935_v13 = vpop.f32.mrb[104].mxu0 }
 0xb1a   : > { %v8110_v1 = vpop.f32.mrb[105].mxu0 }
 0xb1b   : > { %v21936_v40 = vpop.f32.mrb[106].mxu0 }
 0xb1c   : > { %v8923_v22 = vpack.c.bf16 %v21936_v40, %v21935_v13  ;;  %v8113_v24 = vpop.f32.mrb[107].mxu0 }
 0xb1d   : > { %v8922_v54 = vpack.c.bf16 %v8113_v24, %v8110_v1 }
 0xb20   : > { %22068 = vmatmul.mubr.msk.bf16.vlgmr.msra.gmra.mrb[40].mxu1 %vm5717_vm4, %v8769_v59 }
 0xb21   : > { %22071 = vmatprep.mubr.msk.bf16.mxu1 %vm5717_vm4, %v8770_v49  ;;  %22084 = vmatpush3.bf16.msra.mxu1 %v23944_v56  ;;  %v21939_v11 = vpop.f32.mrb[108].mxu0 }
 0xb22   : > { %v8126_v44 = vpop.f32.mrb[109].mxu0  ;;  %22101 = vmatprep.subr.bf16.mxu1 %v23945_v7 }
 0xb23   : > { %v21940_v8 = vpop.f32.mrb[110].mxu0 }
 0xb24   : > { %v8925_v50 = vpack.c.bf16 %v21940_v8, %v21939_v11  ;;  %v8129_v53 = vpop.f32.mrb[111].mxu0 }
 0xb25   : > { %v8924_v57 = vpack.c.bf16 %v8129_v53, %v8126_v44 }
 0xb28   : > { %22072 = vmatmul.mubr.msk.bf16.gmra.mrb[44].mxu1 %vm5717_vm4, %v8771_v29 }
 0xb29   : > { %22075 = vmatprep.mubr.msk.bf16.mxu1 %vm5717_vm4, %v8772_v60  ;;  %v21943_v5 = vpop.f32.mrb[112].mxu0  ;;  %v23947_v60 = vld [vmem:[#allocation13 + $0x30] sm:$0xff]  }
 0xb2a   : > { %v8142_v12 = vpop.f32.mrb[113].mxu0 }
 0xb2b   : > { %v21944_v28 = vpop.f32.mrb[114].mxu0 }
 0xb2c   : > { %v8927_v3 = vpack.c.bf16 %v21944_v28, %v21943_v5  ;;  %v8145_v48 = vpop.f32.mrb[115].mxu0 }
 0xb2d   : > { %v8926_v30 = vpack.c.bf16 %v8145_v48, %v8142_v12 }
 0xb30   : > { %22076 = vmatmul.mubr.msk.bf16.gmra.mrb[48].mxu1 %vm5717_vm4, %v8773_v62 }
 0xb31   : > { %22079 = vmatprep.mubr.msk.bf16.mxu1 %vm5717_vm4, %v8774_v34  ;;  %v21947_v20 = vpop.f32.mrb[116].mxu0 }
 0xb32   : > { %v8158_v55 = vpop.f32.mrb[117].mxu0 }
 0xb33   : > { %v21948_v36 = vpop.f32.mrb[118].mxu0 }
 0xb34   : > { %v8929_v25 = vpack.c.bf16 %v21948_v36, %v21947_v20  ;;  %v8161_v23 = vpop.f32.mrb[119].mxu0 }
 0xb35   : > { %v8928_v19 = vpack.c.bf16 %v8161_v23, %v8158_v55 }
 0xb38   : > { %22080 = vmatmul.mubr.msk.bf16.gmra.mrb[52].mxu1 %vm5717_vm4, %v8775_v47 }
 0xb39   : > { %22085 = vmatprep.mubr.msk.bf16.mxu1 %vm5717_vm4, %v8922_v54  ;;  %v21951_v43 = vpop.f32.mrb[120].mxu0 }
 0xb3a   : > { %v8174_v46 = vpop.f32.mrb[121].mxu0 }
 0xb3b   : > { %v21952_v58 = vpop.f32.mrb[122].mxu0 }
 0xb3c   : > { %v9077_v33 = vpack.c.bf16 %v21952_v58, %v21951_v43  ;;  %v8177_v63 = vpop.f32.mrb[123].mxu0 }
 0xb3d   : > { %v9076_v9 = vpack.c.bf16 %v8177_v63, %v8174_v46 }
 0xb40   : > { %22086 = vmatmul.mubr.msk.bf16.vlgmr.msra.gmra.mrb[40].mxu1 %vm5717_vm4, %v8923_v22 }
 0xb41   : > { %22089 = vmatprep.mubr.msk.bf16.mxu1 %vm5717_vm4, %v8924_v57  ;;  %22102 = vmatpush3.bf16.msra.mxu1 %v23945_v7  ;;  %v21955_v51 = vpop.f32.mrb[124].mxu0 }
 0xb42   : > { %v8190_v21 = vpop.f32.mrb[125].mxu0  ;;  %22119 = vmatprep.subr.bf16.mxu1 %v23946_v38 }
 0xb43   : > { %v21956_v37 = vpop.f32.mrb[126].mxu0 }
 0xb44   : > { %v9079_v32 = vpack.c.bf16 %v21956_v37, %v21955_v51  ;;  %v8193_v10 = vpop.f32.mrb[127].mxu0 }
 0xb45   : > { %v9078_v61 = vpack.c.bf16 %v8193_v10, %v8190_v21 }
 0xb48   : > { %22090 = vmatmul.mubr.msk.bf16.gmra.mrb[44].mxu1 %vm5717_vm4, %v8925_v50 }
 0xb49   : > { %22093 = vmatprep.mubr.msk.bf16.mxu1 %vm5717_vm4, %v8926_v30  ;;  %v21959_v26 = vpop.f32.mrb[128].mxu0  ;;  %v23948_v30 = vld [vmem:[#allocation13 + $0x38] sm:$0xff]  }
 0xb4a   : > { %v8206_v16 = vpop.f32.mrb[129].mxu0 }
 0xb4b   : > { %v21960_v39 = vpop.f32.mrb[130].mxu0 }
 0xb4c   : > { %v9081_v59 = vpack.c.bf16 %v21960_v39, %v21959_v26  ;;  %v8209_v6 = vpop.f32.mrb[131].mxu0 }
 0xb4d   : > { %v9080_v4 = vpack.c.bf16 %v8209_v6, %v8206_v16 }
 0xb50   : > { %22094 = vmatmul.mubr.msk.bf16.gmra.mrb[48].mxu1 %vm5717_vm4, %v8927_v3 }
 0xb51   : > { %22097 = vmatprep.mubr.msk.bf16.mxu1 %vm5717_vm4, %v8928_v19  ;;  %v21963_v56 = vpop.f32.mrb[132].mxu0 }
 0xb52   : > { %v8222_v45 = vpop.f32.mrb[133].mxu0 }
 0xb53   : > { %v21964_v15 = vpop.f32.mrb[134].mxu0 }
 0xb54   : > { %v9083_v52 = vpack.c.bf16 %v21964_v15, %v21963_v56  ;;  %v8225_v29 = vpop.f32.mrb[135].mxu0 }
 0xb55   : > { %v9082_v35 = vpack.c.bf16 %v8225_v29, %v8222_v45 }
 0xb58   : > { %22098 = vmatmul.mubr.msk.bf16.gmra.mrb[52].mxu1 %vm5717_vm4, %v8929_v25 }
 0xb59   : > { %22103 = vmatprep.mubr.msk.bf16.mxu1 %vm5717_vm4, %v9076_v9  ;;  %v21967_v49 = vpop.f32.mrb[136].mxu0 }
 0xb5a   : > { %v8238_v18 = vpop.f32.mrb[137].mxu0 }
 0xb5b   : > { %v21968_v2 = vpop.f32.mrb[138].mxu0 }
 0xb5c   : > { %v9231_v17 = vpack.c.bf16 %v21968_v2, %v21967_v49  ;;  %v8241_v62 = vpop.f32.mrb[139].mxu0 }
 0xb5d   : > { %v9230_v42 = vpack.c.bf16 %v8241_v62, %v8238_v18 }
 0xb60   : > { %22104 = vmatmul.mubr.msk.bf16.vlgmr.msra.gmra.mrb[40].mxu1 %vm5717_vm4, %v9077_v33 }
 0xb61   : > { %22107 = vmatprep.mubr.msk.bf16.mxu1 %vm5717_vm4, %v9078_v61  ;;  %22120 = vmatpush3.bf16.msra.mxu1 %v23946_v38  ;;  %v21971_v14 = vpop.f32.mrb[140].mxu0 }
 0xb62   : > { %v8254_v27 = vpop.f32.mrb[141].mxu0  ;;  %22137 = vmatprep.subr.bf16.mxu1 %v23947_v60 }
 0xb63   : > { %v21972_v31 = vpop.f32.mrb[142].mxu0 }
 0xb64   : > { %v9233_v47 = vpack.c.bf16 %v21972_v31, %v21971_v14  ;;  %v8257_v41 = vpop.f32.mrb[143].mxu0 }
 0xb65   : > { %v9232_v34 = vpack.c.bf16 %v8257_v41, %v8254_v27 }
 0xb68   : > { %22108 = vmatmul.mubr.msk.bf16.gmra.mrb[44].mxu1 %vm5717_vm4, %v9079_v32 }
 0xb69   : > { %22111 = vmatprep.mubr.msk.bf16.mxu1 %vm5717_vm4, %v9080_v4  ;;  %v21975_v13 = vpop.f32.mrb[144].mxu0  ;;  %v23949_v4 = vld [vmem:[#allocation13 + $0x40] sm:$0xff]  }
 0xb6a   : > { %v8270_v1 = vpop.f32.mrb[145].mxu0 }
 0xb6b   : > { %v21976_v40 = vpop.f32.mrb[146].mxu0 }
 0xb6c   : > { %v9235_v22 = vpack.c.bf16 %v21976_v40, %v21975_v13  ;;  %v8273_v24 = vpop.f32.mrb[147].mxu0 }
 0xb6d   : > { %v9234_v54 = vpack.c.bf16 %v8273_v24, %v8270_v1 }
 0xb70   : > { %22112 = vmatmul.mubr.msk.bf16.gmra.mrb[48].mxu1 %vm5717_vm4, %v9081_v59 }
 0xb71   : > { %22115 = vmatprep.mubr.msk.bf16.mxu1 %vm5717_vm4, %v9082_v35  ;;  %v21979_v7 = vpop.f32.mrb[148].mxu0 }
 0xb72   : > { %v8286_v11 = vpop.f32.mrb[149].mxu0 }
 0xb73   : > { %v21980_v44 = vpop.f32.mrb[150].mxu0 }
 0xb74   : > { %v9237_v8 = vpack.c.bf16 %v21980_v44, %v21979_v7  ;;  %v8289_v50 = vpop.f32.mrb[151].mxu0 }
 0xb75   : > { %v9236_v53 = vpack.c.bf16 %v8289_v50, %v8286_v11 }
 0xb78   : > { %22116 = vmatmul.mubr.msk.bf16.gmra.mrb[52].mxu1 %vm5717_vm4, %v9083_v52 }
 0xb79   : > { %22121 = vmatprep.mubr.msk.bf16.mxu1 %vm5717_vm4, %v9230_v42  ;;  %v21983_v57 = vpop.f32.mrb[152].mxu0 }
 0xb7a   : > { %v8302_v5 = vpop.f32.mrb[153].mxu0 }
 0xb7b   : > { %v21984_v12 = vpop.f32.mrb[154].mxu0 }
 0xb7c   : > { %v9385_v28 = vpack.c.bf16 %v21984_v12, %v21983_v57  ;;  %v8305_v3 = vpop.f32.mrb[155].mxu0 }
 0xb7d   : > { %v9384_v48 = vpack.c.bf16 %v8305_v3, %v8302_v5 }
 0xb80   : > { %22122 = vmatmul.mubr.msk.bf16.vlgmr.msra.gmra.mrb[40].mxu1 %vm5717_vm4, %v9231_v17 }
 0xb81   : > { %22125 = vmatprep.mubr.msk.bf16.mxu1 %vm5717_vm4, %v9232_v34  ;;  %22138 = vmatpush3.bf16.msra.mxu1 %v23947_v60  ;;  %v21987_v20 = vpop.f32.mrb[156].mxu0 }
 0xb82   : > { %v8318_v55 = vpop.f32.mrb[157].mxu0  ;;  %22155 = vmatprep.subr.bf16.mxu1 %v23948_v30 }
 0xb83   : > { %v21988_v36 = vpop.f32.mrb[158].mxu0 }
 0xb84   : > { %v9387_v25 = vpack.c.bf16 %v21988_v36, %v21987_v20  ;;  %v8321_v23 = vpop.f32.mrb[159].mxu0 }
 0xb85   : > { %v9386_v19 = vpack.c.bf16 %v8321_v23, %v8318_v55  ;;  %v23950_v23 = vld [vmem:[#allocation14] sm:$0xff]  }
 0xb86   : > { %22207 = vmatprep.mubr.bf16.mxu0 %v23950_v23 }
 0xb88   : > { %22126 = vmatmul.mubr.msk.bf16.gmra.mrb[44].mxu1 %vm5717_vm4, %v9233_v47 }
 0xb89   : > { %22129 = vmatprep.mubr.msk.bf16.mxu1 %vm5717_vm4, %v9234_v54  ;;  %v21991_v43 = vpop.f32.mrb[160].mxu0 }
 0xb8a   : > { %v8334_v46 = vpop.f32.mrb[161].mxu0 }
 0xb8b   : > { %v21992_v58 = vpop.f32.mrb[162].mxu0 }
 0xb8c   : > { %v9389_v33 = vpack.c.bf16 %v21992_v58, %v21991_v43  ;;  %v8337_v63 = vpop.f32.mrb[163].mxu0  ;;  %v9870_v43 = vpop.permute.xlu1 %9869 }
 0xb8d   : > { %v9388_v9 = vpack.c.bf16 %v8337_v63, %v8334_v46 }
 0xb90   : > { %22130 = vmatmul.mubr.msk.bf16.gmra.mrb[48].mxu1 %vm5717_vm4, %v9235_v22  ;;  %v9880_v58 = vpop.permute.xlu1 %9879 }
 0xb91   : > { %22133 = vmatprep.mubr.msk.bf16.mxu1 %vm5717_vm4, %v9236_v53  ;;  %v21995_v38 = vpop.f32.mrb[164].mxu0 }
 0xb92   : > { %v8350_v51 = vpop.f32.mrb[165].mxu0 }
 0xb93   : > { %v21996_v21 = vpop.f32.mrb[166].mxu0 }
 0xb94   : > { %v9391_v37 = vpack.c.bf16 %v21996_v21, %v21995_v38  ;;  %v8353_v32 = vpop.f32.mrb[167].mxu0  ;;  %v9890_v63 = vpop.permute.xlu1 %9889 }
 0xb95   : > { %v9390_v10 = vpack.c.bf16 %v8353_v32, %v8350_v51 }
 0xb98   : > { %22134 = vmatmul.mubr.msk.bf16.gmra.mrb[52].mxu1 %vm5717_vm4, %v9237_v8 }
 0xb99   : > { %22139 = vmatprep.mubr.msk.bf16.mxu1 %vm5717_vm4, %v9384_v48  ;;  %v21999_v61 = vpop.f32.mrb[168].mxu0 }
 0xb9a   : > { %v8366_v26 = vpop.f32.mrb[169].mxu0 }
 0xb9b   : > { %v22000_v16 = vpop.f32.mrb[170].mxu0 }
 0xb9c   : > { %v9539_v39 = vpack.c.bf16 %v22000_v16, %v21999_v61  ;;  %v8369_v59 = vpop.f32.mrb[171].mxu0 }
 0xb9d   : > { %v9538_v6 = vpack.c.bf16 %v8369_v59, %v8366_v26 }
 0xba0   : > { %22140 = vmatmul.mubr.msk.bf16.vlgmr.msra.gmra.mrb[40].mxu1 %vm5717_vm4, %v9385_v28 }
 0xba1   : > { %22143 = vmatprep.mubr.msk.bf16.mxu1 %vm5717_vm4, %v9386_v19  ;;  %22156 = vmatpush3.bf16.msra.mxu1 %v23948_v30  ;;  %v22003_v56 = vpop.f32.mrb[172].mxu0  ;;  %v9865_v19 = vpop.permute.xlu0 %9864 }
 0xba2   : > { %v8382_v45 = vpop.f32.mrb[173].mxu0  ;;  %22173 = vmatprep.subr.bf16.mxu1 %v23949_v4 }
 0xba3   : > { %v22004_v15 = vpop.f32.mrb[174].mxu0 }
 0xba4   : > { %v9541_v52 = vpack.c.bf16 %v22004_v15, %v22003_v56  ;;  %v8385_v29 = vpop.f32.mrb[175].mxu0 }
 0xba5   : > { %v9540_v35 = vpack.c.bf16 %v8385_v29, %v8382_v45  ;;  %v9875_v46 = vpop.permute.xlu0 %9874 }
 0xba8   : > { %22144 = vmatmul.mubr.msk.bf16.gmra.mrb[44].mxu1 %vm5717_vm4, %v9387_v25 }
 0xba9   : > { %22147 = vmatprep.mubr.msk.bf16.mxu1 %vm5717_vm4, %v9388_v9  ;;  %v22007_v49 = vpop.f32.mrb[176].mxu0 }
 0xbaa   : > { %v8398_v18 = vpop.f32.mrb[177].mxu0 }
 0xbab   : > { %v22008_v2 = vpop.f32.mrb[178].mxu0 }
 0xbac   : > { %v9543_v17 = vpack.c.bf16 %v22008_v2, %v22007_v49  ;;  %v8401_v62 = vpop.f32.mrb[179].mxu0 }
 0xbad   : > { %v9542_v42 = vpack.c.bf16 %v8401_v62, %v8398_v18 }
 0xbb0   : > { %22148 = vmatmul.mubr.msk.bf16.gmra.mrb[48].mxu1 %vm5717_vm4, %v9389_v33  ;;  %v9885_v33 = vpop.permute.xlu0 %9884 }
 0xbb1   : > { %22151 = vmatprep.mubr.msk.bf16.mxu1 %vm5717_vm4, %v9390_v10  ;;  %v22011_v60 = vpop.f32.mrb[180].mxu0 }
 0xbb2   : > { %v8414_v14 = vpop.f32.mrb[181].mxu0 }
 0xbb3   : > { %v22012_v27 = vpop.f32.mrb[182].mxu0 }
 0xbb4   : > { %v9545_v31 = vpack.c.bf16 %v22012_v27, %v22011_v60  ;;  %v8417_v47 = vpop.f32.mrb[183].mxu0  ;;  %v9895_v9 = vpop.permute.xlu0 %9894 }
 0xbb5   : > { %v9544_v41 = vpack.c.bf16 %v8417_v47, %v8414_v14 }
 0xbb8   : > { %22152 = vmatmul.mubr.msk.bf16.gmra.mrb[52].mxu1 %vm5717_vm4, %v9391_v37  ;;  %v9900_v37 = vpop.permute.xlu1 %9899  ;;  %v9905_v56 = vpop.permute.xlu0 %9904 }
 0xbb9   : > { %22157 = vmatprep.mubr.msk.bf16.mxu1 %vm5717_vm4, %v9538_v6  ;;  %v22015_v34 = vpop.f32.mrb[184].mxu0 }
 0xbba   : > { %v8430_v13 = vpop.f32.mrb[185].mxu0 }
 0xbbb   : > { %v22016_v1 = vpop.f32.mrb[186].mxu0 }
 0xbbc   : > { %v9693_v40 = vpack.c.bf16 %v22016_v1, %v22015_v34  ;;  %v8433_v22 = vpop.f32.mrb[187].mxu0 }
 0xbbd   : > { %v9692_v24 = vpack.c.bf16 %v8433_v22, %v8430_v13  ;;  %v9915_v22 = vpop.permute.xlu0 %9914 }
 0xbc0   : > { %22158 = vmatmul.mubr.msk.bf16.vlgmr.msra.gmra.mrb[40].mxu1 %vm5717_vm4, %v9539_v39 }
 0xbc1   : > { %22161 = vmatprep.mubr.msk.bf16.mxu1 %vm5717_vm4, %v9540_v35  ;;  %22174 = vmatpush3.bf16.msra.mxu1 %v23949_v4  ;;  %v22019_v54 = vpop.f32.mrb[188].mxu0  ;;  %v9910_v35 = vpop.permute.xlu1 %9909 }
 0xbc2   : > { %v8446_v7 = vpop.f32.mrb[189].mxu0 }
 0xbc3   : > { %v22020_v11 = vpop.f32.mrb[190].mxu0 }
 0xbc4   : > { %v9695_v44 = vpack.c.bf16 %v22020_v11, %v22019_v54  ;;  %v8449_v8 = vpop.f32.mrb[191].mxu0 }
 0xbc5   : > { %v9694_v50 = vpack.c.bf16 %v8449_v8, %v8446_v7 }
 0xbc8   : > { %22162 = vmatmul.mubr.msk.bf16.gmra.mrb[44].mxu1 %vm5717_vm4, %v9541_v52 }
 0xbc9   : > { %22165 = vmatprep.mubr.msk.bf16.mxu1 %vm5717_vm4, %v9542_v42  ;;  %v22023_v53 = vpop.f32.mrb[192].mxu0 }
 0xbca   : > { %v8462_v57 = vpop.f32.mrb[193].mxu0 }
 0xbcb   : > { %v22024_v5 = vpop.f32.mrb[194].mxu0 }
 0xbcc   : > { %v9697_v12 = vpack.c.bf16 %v22024_v5, %v22023_v53  ;;  %v8465_v28 = vpop.f32.mrb[195].mxu0  ;;  %v9920_v53 = vpop.permute.xlu1 %9919 }
 0xbcd   : > { %v9696_v3 = vpack.c.bf16 %v8465_v28, %v8462_v57 }
 0xbd0   : > { %22166 = vmatmul.mubr.msk.bf16.gmra.mrb[48].mxu1 %vm5717_vm4, %v9543_v17 }
 0xbd1   : > { %22169 = vmatprep.mubr.msk.bf16.mxu1 %vm5717_vm4, %v9544_v41  ;;  %v22027_v48 = vpop.f32.mrb[196].mxu0 }
 0xbd2   : > { %v8478_v30 = vpop.f32.mrb[197].mxu0 }
 0xbd3   : > { %v22028_v20 = vpop.f32.mrb[198].mxu0 }
 0xbd4   : > { %v9699_v55 = vpack.c.bf16 %v22028_v20, %v22027_v48  ;;  %v8481_v36 = vpop.f32.mrb[199].mxu0 }
 0xbd5   : > { %v9698_v25 = vpack.c.bf16 %v8481_v36, %v8478_v30 }
 0xbd8   : > { %22170 = vmatmul.mubr.msk.bf16.gmra.mrb[52].mxu1 %vm5717_vm4, %v9545_v31 }
 0xbd9   : > { %22175 = vmatprep.mubr.msk.bf16.mxu1 %vm5717_vm4, %v9692_v24 }
 0xbe0   : > { %22176 = vmatmul.mubr.msk.bf16.vlgmr.msra.gmra.mrb[40].mxu1 %vm5717_vm4, %v9693_v40 }
 0xbe1   : > { %22179 = vmatprep.mubr.msk.bf16.mxu1 %vm5717_vm4, %v9694_v50 }
 0xbe8   : > { %22180 = vmatmul.mubr.msk.bf16.gmra.mrb[44].mxu1 %vm5717_vm4, %v9695_v44 }
 0xbe9   : > { %22183 = vmatprep.mubr.msk.bf16.mxu1 %vm5717_vm4, %v9696_v3 }
 0xbf0   : > { %22184 = vmatmul.mubr.msk.bf16.gmra.mrb[48].mxu1 %vm5717_vm4, %v9697_v12 }
 0xbf1   : > { %22187 = vmatprep.mubr.msk.bf16.mxu1 %vm5717_vm4, %v9698_v25 }
 0xbf8   : > { %22188 = vmatmul.mubr.msk.bf16.gmra.mrb[52].mxu1 %vm5717_vm4, %v9699_v55 }
 0xcb3   : > { %v22177_v38 = vpop.f32.mrb[40].mxu1 }
 0xcb4   : > { %v9944_v51 = vadd.f32 %v22177_v38, %v9875_v46  ;;  %v9767_v21 = vpop.f32.mrb[41].mxu1 }
 0xcb5   : > { %v27192_v32 = vadd.f32 %v9865_v19, %v9767_v21  ;;  %v22178_v10 = vpop.f32.mrb[42].mxu1  ;;  %v9925_v19 = vpop.permute.xlu0 %9924 }
 0xcb6   : > { %v9976_v61 = vmul.f32 0.044715, %v9944_v51  ;;  %v27194_v26 = vadd.f32 %v22178_v10, %v9880_v58  ;;  %v9770_v16 = vpop.f32.mrb[43].mxu1  ;;  %v9960_v23 = vmul.f32 0.5, %v9944_v51 }
 0xcb7   : > { %v9974_v39 = vmul.f32 0.044715, %v27192_v32  ;;  %v27197_v59 = vadd.f32 %v9870_v43, %v9770_v16 }
 0xcb8   : > { %v9992_v6 = vmul.f32 %v9976_v61, %v9944_v51  ;;  %v9977_v4 = vmul.f32 0.044715, %v27194_v26 }
 0xcb9   : > { %v9990_v45 = vmul.f32 %v9974_v39, %v27192_v32  ;;  %v9975_v15 = vmul.f32 0.044715, %v27197_v59 }
 0xcba   : > { %v10008_v52 = vmul.f32 %v9992_v6, %v9944_v51  ;;  %v9993_v29 = vmul.f32 %v9977_v4, %v27194_v26 }
 0xcbb   : > { %v10006_v49 = vmul.f32 %v9990_v45, %v27192_v32  ;;  %v9991_v18 = vmul.f32 %v9975_v15, %v27197_v59  ;;  %v22181_v2 = vpop.f32.mrb[44].mxu1 }
 0xcbc   : > { %v10009_v17 = vmul.f32 %v9993_v29, %v27194_v26  ;;  %v27206_v62 = vadd.f32 %v22181_v2, %v9895_v9  ;;  %v9783_v42 = vpop.f32.mrb[45].mxu1  ;;  %v10024_v60 = vadd.f32 %v10008_v52, %v9944_v51  ;;  %v9930_v51 = vpop.permute.xlu1 %9929  ;;  %v9961_v2 = vmul.f32 0.5, %v27194_v26 }
 0xcbd   : > { %v10007_v14 = vmul.f32 %v9991_v18, %v27197_v59  ;;  %v27209_v27 = vadd.f32 %v9885_v33, %v9783_v42  ;;  %v22182_v31 = vpop.f32.mrb[46].mxu1  ;;  %v10022_v47 = vadd.f32 %v10006_v49, %v27192_v32  ;;  %v9935_v42 = vpop.permute.xlu0 %9934 }
 0xcbe   : > { %v9980_v41 = vmul.f32 0.044715, %v27206_v62  ;;  %v27213_v34 = vadd.f32 %v22182_v31, %v9900_v37  ;;  %v9786_v13 = vpop.f32.mrb[47].mxu1  ;;  %v10025_v1 = vadd.f32 %v10009_v17, %v27194_v26  ;;  %v10040_v40 = vmul.f32 0.7978846, %v10024_v60 }
 0xcbf   : > { %v9978_v24 = vmul.f32 0.044715, %v27209_v27  ;;  %v27217_v54 = vadd.f32 %v9890_v63, %v9786_v13  ;;  %v10023_v7 = vadd.f32 %v10007_v14, %v27197_v59  ;;  %v10038_v11 = vmul.f32 0.7978846, %v10022_v47 }
 0xcc0   : > { %v9996_v44 = vmul.f32 %v9980_v41, %v27206_v62  ;;  %v9981_v8 = vmul.f32 0.044715, %v27213_v34  ;;  %v10041_v50 = vmul.f32 0.7978846, %v10025_v1  ;;  %24803 = vtanh.f32 %v10040_v40  ;;  %v9940_v26 = vpop.permute.xlu1 %9939 }
 0xcc1   : > { %v9994_v57 = vmul.f32 %v9978_v24, %v27209_v27  ;;  %v9979_v5 = vmul.f32 0.044715, %v27217_v54  ;;  %v10039_v12 = vmul.f32 0.7978846, %v10023_v7  ;;  %24805 = vtanh.f32 %v10038_v11 }
 0xcc2   : > { %v10012_v28 = vmul.f32 %v9996_v44, %v27206_v62  ;;  %v9997_v3 = vmul.f32 %v9981_v8, %v27213_v34  ;;  %24807 = vtanh.f32 %v10041_v50  ;;  %v9958_v37 = vmul.f32 0.5, %v27192_v32 }
 0xcc3   : > { %v10010_v48 = vmul.f32 %v9994_v57, %v27209_v27  ;;  %v9995_v30 = vmul.f32 %v9979_v5, %v27217_v54  ;;  %v22185_v20 = vpop.f32.mrb[48].mxu1  ;;  %24809 = vtanh.f32 %v10039_v12  ;;  %v9962_v47 = vmul.f32 0.5, %v27209_v27 }
 0xcc4   : > { %v10013_v55 = vmul.f32 %v9997_v3, %v27213_v34  ;;  %v27229_v36 = vadd.f32 %v22185_v20, %v9915_v22  ;;  %v9799_v25 = vpop.f32.mrb[49].mxu1  ;;  %v10028_v63 = vadd.f32 %v10012_v28, %v27206_v62 }
 0xcc5   : > { %v10011_v43 = vmul.f32 %v9995_v30, %v27217_v54  ;;  %v27232_v46 = vadd.f32 %v9905_v56, %v9799_v25  ;;  %v22186_v58 = vpop.f32.mrb[50].mxu1  ;;  %v10026_v33 = vadd.f32 %v10010_v48, %v27209_v27 }
 0xcc6   : > { %v9984_v9 = vmul.f32 0.044715, %v27229_v36  ;;  %v27237_v38 = vadd.f32 %v22186_v58, %v9920_v53  ;;  %v9802_v21 = vpop.f32.mrb[51].mxu1  ;;  %v10029_v10 = vadd.f32 %v10013_v55, %v27213_v34  ;;  %v10044_v45 = vmul.f32 0.7978846, %v10028_v63 }
 0xcc7   : > { %v9982_v61 = vmul.f32 0.044715, %v27232_v46  ;;  %v27242_v16 = vadd.f32 %v9910_v35, %v9802_v21  ;;  %v10027_v39 = vadd.f32 %v10011_v43, %v27217_v54  ;;  %v10042_v6 = vmul.f32 0.7978846, %v10026_v33 }
 0xcc8   : > { %v10000_v4 = vmul.f32 %v9984_v9, %v27229_v36  ;;  %v9985_v56 = vmul.f32 0.044715, %v27237_v38  ;;  %v10045_v15 = vmul.f32 0.7978846, %v10029_v10  ;;  %v9959_v35 = vmul.f32 0.5, %v27197_v59 }
 0xcc9   : > { %v9998_v52 = vmul.f32 %v9982_v61, %v27232_v46  ;;  %v9983_v32 = vmul.f32 0.044715, %v27242_v16  ;;  %v10043_v29 = vmul.f32 0.7978846, %v10027_v39  ;;  %24811 = vtanh.f32 %v10042_v6 }
 0xcca   : > { %v24804_v49 = vpop.eup %24803  ;;  %v10001_v18 = vmul.f32 %v9985_v56, %v27237_v38  ;;  %24813 = vtanh.f32 %v10044_v45  ;;  %v10016_v24 = vmul.f32 %v10000_v4, %v27229_v36  ;;  %v9963_v21 = vmul.f32 0.5, %v27217_v54 }
 0xccb   : > { %v24806_v17 = vpop.eup %24805  ;;  %v9999_v60 = vmul.f32 %v9983_v32, %v27242_v16  ;;  %v22189_v14 = vpop.f32.mrb[52].mxu1  ;;  %v10072_v31 = vadd.f32 1.0, %v24804_v49  ;;  %24815 = vtanh.f32 %v10043_v29  ;;  %v10014_v13 = vmul.f32 %v9998_v52, %v27232_v46 }
 0xccc   : > { %v24808_v41 = vpop.eup %24807  ;;  %v27255_v1 = vadd.f32 %v22189_v14, %v9935_v42  ;;  %v9815_v40 = vpop.f32.mrb[53].mxu1  ;;  %v10070_v22 = vadd.f32 1.0, %v24806_v17  ;;  %24817 = vtanh.f32 %v10045_v15  ;;  %v10017_v27 = vmul.f32 %v10001_v18, %v27237_v38 }
 0xccd   : > { %v24810_v59 = vpop.eup %24809  ;;  %v10015_v7 = vmul.f32 %v9999_v60, %v27242_v16  ;;  %v27259_v11 = vadd.f32 %v9925_v19, %v9815_v40  ;;  %v22190_v44 = vpop.f32.mrb[54].mxu1  ;;  %v10073_v8 = vadd.f32 1.0, %v24808_v41  ;;  %v10088_v3 = vmul.f32 %v10072_v31, %v9960_v23 }
 0xcce   : > { %v9988_v50 = vmul.f32 0.044715, %v27255_v1  ;;  %v27263_v53 = vadd.f32 %v22190_v44, %v9940_v26  ;;  %v9818_v57 = vpop.f32.mrb[55].mxu1  ;;  %v10071_v5 = vadd.f32 1.0, %v24810_v59  ;;  %v10086_v20 = vmul.f32 %v10070_v22, %v9958_v37 }
 0xccf   : > { %v9986_v12 = vmul.f32 0.044715, %v27259_v11  ;;  %v27266_v28 = vadd.f32 %v9930_v51, %v9818_v57  ;;  %v10089_v48 = vmul.f32 %v10073_v8, %v9961_v2  ;;  %v10030_v25 = vadd.f32 %v10014_v13, %v27232_v46 }
 0xcd0   : > { %v9989_v30 = vmul.f32 0.044715, %v27263_v53  ;;  %v10087_v55 = vmul.f32 %v10071_v5, %v9959_v35  ;;  %v10031_v33 = vadd.f32 %v10015_v7, %v27242_v16  ;;  %v10004_v63 = vmul.f32 %v9988_v50, %v27255_v1 }
 0xcd1   : > { %v10002_v19 = vmul.f32 %v9986_v12, %v27259_v11  ;;  %v9987_v43 = vmul.f32 0.044715, %v27266_v28  ;;  %v10103_v58 = vpack.c.bf16 %v10089_v48, %v10088_v3  ;;  %v10046_v23 = vmul.f32 0.7978846, %v10030_v25 }
 0xcd2   : > { %v10102_v9 = vpack.c.bf16 %v10087_v55, %v10086_v20  ;;  %v10005_v51 = vmul.f32 %v9989_v30, %v27263_v53  ;;  %v9964_v61 = vmul.f32 0.5, %v27206_v62  ;;  %v10047_v39 = vmul.f32 0.7978846, %v10031_v33 }
 0xcd3   : > { %v24812_v10 = vpop.eup %24811  ;;  %v10003_v37 = vmul.f32 %v9987_v43, %v27266_v28  ;;  %v10018_v4 = vmul.f32 %v10002_v19, %v27259_v11  ;;  %24819 = vtanh.f32 %v10046_v23  ;;  %v10032_v45 = vadd.f32 %v10016_v24, %v27229_v36 }
 0xcd4   : > { %v24814_v6 = vpop.eup %24813  ;;  %22191 = vmatprep.subr.bf16.mxu0 %v10102_v9  ;;  %v10074_v56 = vadd.f32 1.0, %v24812_v10  ;;  %24821 = vtanh.f32 %v10047_v39  ;;  %v10033_v32 = vadd.f32 %v10017_v27, %v27237_v38  ;;  %v10020_v62 = vmul.f32 %v10004_v63, %v27255_v1 }
 0xcd5   : > { %v24816_v15 = vpop.eup %24815  ;;  %v10019_v54 = vmul.f32 %v10003_v37, %v27266_v28  ;;  %22192 = vmatpush3.bf16.msra.mxu0 %v10102_v9  ;;  %v10076_v52 = vadd.f32 1.0, %v24814_v6  ;;  %v9965_v18 = vmul.f32 0.5, %v27213_v34  ;;  %v10048_v35 = vmul.f32 0.7978846, %v10032_v45 }
 0xcd6   : > { %v24818_v29 = vpop.eup %24817  ;;  %22193 = vmatprep.subr.bf16.mxu0 %v10103_v58  ;;  %v10075_v49 = vadd.f32 1.0, %v24816_v15  ;;  %v10021_v2 = vmul.f32 %v10005_v51, %v27263_v53  ;;  %v10090_v17 = vmul.f32 %v10074_v56, %v9962_v47  ;;  %v10049_v60 = vmul.f32 0.7978846, %v10033_v32  ;;  %v23954_v32 = vld [vmem:[#allocation14 + $0x20] sm:$0xff]  }
 0xcd7   : > { %v10077_v42 = vadd.f32 1.0, %v24818_v29  ;;  %24823 = vtanh.f32 %v10048_v35  ;;  %v10034_v31 = vadd.f32 %v10018_v4, %v27259_v11  ;;  %v10035_v41 = vadd.f32 %v10019_v54, %v27266_v28  ;;  %v23955_v29 = vld [vmem:[#allocation14 + $0x28] sm:$0xff]   ;;  %v23960_v35 = vld [vmem:[#allocation14 + $0x50] sm:$0xff]  }
 0xcd8   : > { %v10091_v14 = vmul.f32 %v10075_v49, %v9963_v21  ;;  %v10092_v13 = vmul.f32 %v10076_v52, %v9964_v61  ;;  %24825 = vtanh.f32 %v10049_v60  ;;  %v10036_v34 = vadd.f32 %v10020_v62, %v27255_v1  ;;  %v23957_v62 = vld [vmem:[#allocation14 + $0x38] sm:$0xff]   ;;  %v23958_v49 = vld [vmem:[#allocation14 + $0x40] sm:$0xff]   ;;  %v23964_v60 = vld [vmem:[#allocation14 + $0x70] sm:$0xff]  }
 0xcd9   : > { %22194 = vmatpush3.bf16.msra.mxu0 %v10103_v58  ;;  %v10093_v40 = vmul.f32 %v10077_v42, %v9965_v18  ;;  %v10050_v59 = vmul.f32 0.7978846, %v10034_v31  ;;  %v10051_v26 = vmul.f32 0.7978846, %v10035_v41  ;;  %v10037_v47 = vadd.f32 %v10021_v2, %v27263_v53  ;;  %v23959_v18 = vld [vmem:[#allocation14 + $0x48] sm:$0xff]   ;;  %v23961_v2 = vld [vmem:[#allocation14 + $0x58] sm:$0xff]  }
 0xcda   : > { %v10104_v22 = vpack.c.bf16 %v10091_v14, %v10090_v17  ;;  %v10052_v7 = vmul.f32 0.7978846, %v10036_v34  ;;  %v9966_v57 = vmul.f32 0.5, %v27232_v46  ;;  %v9967_v5 = vmul.f32 0.5, %v27242_v16  ;;  %v23962_v17 = vld [vmem:[#allocation14 + $0x60] sm:$0xff]   ;;  %v23963_v42 = vld [vmem:[#allocation14 + $0x68] sm:$0xff]  }
 0xcdb   : > { %v10105_v24 = vpack.c.bf16 %v10093_v40, %v10092_v13  ;;  %24827 = vtanh.f32 %v10050_v59  ;;  %v10053_v44 = vmul.f32 0.7978846, %v10037_v47  ;;  %v9968_v19 = vmul.f32 0.5, %v27229_v36  ;;  %v23965_v14 = vld [vmem:[#allocation14 + $0x78] sm:$0xff]   ;;  %v23966_v31 = vld [vmem:[#allocation14 + $0x80] sm:$0xff]   ;;  %v23967_v41 = vld [vmem:[#allocation14 + $0x88] sm:$0xff]  }
 0xcdc   : > { %22195 = vmatprep.subr.bf16.mxu0 %v10104_v22  ;;  %24829 = vtanh.f32 %v10051_v26  ;;  %v9969_v43 = vmul.f32 0.5, %v27237_v38  ;;  %v9970_v10 = vmul.f32 0.5, %v27259_v11  ;;  %v9971_v51 = vmul.f32 0.5, %v27266_v28  ;;  %v23951_v11 = vld [vmem:[#allocation14 + $0x8] sm:$0xff]   ;;  %v23952_v28 = vld [vmem:[#allocation14 + $0x10] sm:$0xff]   ;;  %v23969_v40 = vld [vmem:[#allocation14 + $0x98] sm:$0xff]  }
 0xcdd   : > { %22196 = vmatpush3.bf16.msra.mxu0 %v10104_v22  ;;  %v24820_v8 = vpop.eup %24819  ;;  %24831 = vtanh.f32 %v10052_v7  ;;  %v9972_v36 = vmul.f32 0.5, %v27255_v1  ;;  %v9973_v4 = vmul.f32 0.5, %v27263_v53  ;;  %v23953_v1 = vld [vmem:[#allocation14 + $0x18] sm:$0xff]   ;;  %v23956_v53 = vld [vmem:[#allocation14 + $0x30] sm:$0xff]   ;;  %v23970_v22 = vld [vmem:[#allocation14 + $0xa0] sm:$0xff]  }
 0xcde   : > { %22197 = vmatprep.subr.bf16.mxu0 %v10105_v24  ;;  %v24822_v27 = vpop.eup %24821  ;;  %v10078_v50 = vadd.f32 1.0, %v24820_v8  ;;  %24833 = vtanh.f32 %v10053_v44  ;;  %v23968_v13 = vld [vmem:[#allocation14 + $0x90] sm:$0xff]   ;;  %v23971_v59 = vld [vmem:[#allocation14 + $0xa8] sm:$0xff]   ;;  %v23973_v34 = vld [vmem:[#allocation14 + $0xb8] sm:$0xff]  }
 0xcdf   : > { %v10079_v12 = vadd.f32 1.0, %v24822_v27  ;;  %v23972_v26 = vld [vmem:[#allocation14 + $0xb0] sm:$0xff]   ;;  %v23975_v47 = vld [vmem:[#allocation14 + $0xc8] sm:$0xff]   ;;  %v23977_v44 = vld [vmem:[#allocation14 + $0xd8] sm:$0xff]  }
 0xce0   : > { %v10094_v48 = vmul.f32 %v10078_v50, %v9966_v57  ;;  %v23976_v7 = vld [vmem:[#allocation14 + $0xd0] sm:$0xff]   ;;  %v23978_v8 = vld [vmem:[#allocation14 + $0xe0] sm:$0xff]   ;;  %v23979_v50 = vld [vmem:[#allocation14 + $0xe8] sm:$0xff]  }
 0xce1   : > { %22198 = vmatpush3.bf16.msra.mxu0 %v10105_v24  ;;  %v24824_v3 = vpop.eup %24823  ;;  %v10095_v30 = vmul.f32 %v10079_v12, %v9967_v5  ;;  %v23974_v24 = vld [vmem:[#allocation14 + $0xc0] sm:$0xff]   ;;  %v23980_v57 = vld [vmem:[#allocation14 + $0xf0] sm:$0xff]   ;;  %v24005_v5 = vld [vmem:[#allocation16 + $0x28] sm:$0xff]  }
 0xce2   : > { %v24826_v20 = vpop.eup %24825  ;;  %v10080_v55 = vadd.f32 1.0, %v24824_v3  ;;  %v24002_v27 = vld [vmem:[#allocation16 + $0x20] sm:$0xff]   ;;  %v24006_v12 = vld [vmem:[#allocation16 + $0x30] sm:$0xff]   ;;  %v23981_v3 = vld [vmem:[#allocation14 + $0xf8] sm:$0xff]  }
 0xce3   : > { %v10106_v25 = vpack.c.bf16 %v10095_v30, %v10094_v48  ;;  %v10081_v58 = vadd.f32 1.0, %v24826_v20  ;;  %22351 = vmatprep.subr.bf16.mxu1 %v24002_v27  ;;  %v23982_v48 = vld [vmem:[#allocation14 + $0x100] sm:$0xff]   ;;  %v24009_v30 = vld [vmem:[#allocation16 + $0x38] sm:$0xff]   ;;  %v23983_v20 = vld [vmem:[#allocation14 + $0x108] sm:$0xff]  }
 0xce4   : > { %v10096_v63 = vmul.f32 %v10080_v55, %v9968_v19  ;;  %22352 = vmatpush3.bf16.msra.mxu1 %v24002_v27  ;;  %v23984_v55 = vld [vmem:[#allocation14 + $0x110] sm:$0xff]   ;;  %v23986_v19 = vld [vmem:[#allocation14 + $0x120] sm:$0xff]  }
 0xce5   : > { %v24828_v33 = vpop.eup %24827  ;;  %22199 = vmatprep.subr.bf16.mxu0 %v10106_v25  ;;  %v10097_v9 = vmul.f32 %v10081_v58, %v9969_v43  ;;  %22353 = vmatprep.subr.bf16.mxu1 %v24005_v5  ;;  %v27297_v43 = vld [vmem:[#allocation16] sm:$0xff]   ;;  %v23987_v58 = vld [vmem:[#allocation14 + $0x128] sm:$0xff]  }
 0xce6   : > { %v24830_v46 = vpop.eup %24829  ;;  %22200 = vmatpush3.bf16.msra.mxu0 %v10106_v25  ;;  %v10082_v16 = vadd.f32 1.0, %v24828_v33  ;;  %v23985_v25 = vld [vmem:[#allocation14 + $0x118] sm:$0xff]   ;;  %v23988_v33 = vld [vmem:[#allocation14 + $0x130] sm:$0xff]  }
 0xce7   : > { %v24832_v21 = vpop.eup %24831  ;;  %v10107_v23 = vpack.c.bf16 %v10097_v9, %v10096_v63  ;;  %v10083_v37 = vadd.f32 1.0, %v24830_v46  ;;  %v23989_v63 = vld [vmem:[#allocation14 + $0x138] sm:$0xff]   ;;  %v23990_v9 = vld [vmem:[#allocation14 + $0x140] sm:$0xff]   ;;  %v23991_v46 = vld [vmem:[#allocation14 + $0x148] sm:$0xff]  }
 0xce8   : > { %v24834_v61 = vpop.eup %24833  ;;  %v10084_v39 = vadd.f32 1.0, %v24832_v21  ;;  %v10098_v38 = vmul.f32 %v10082_v16, %v9970_v10  ;;  %22354 = vmatpush3.bf16.msra.mxu1 %v24005_v5  ;;  %v23992_v16 = vld [vmem:[#allocation14 + $0x150] sm:$0xff]   ;;  %v23993_v21 = vld [vmem:[#allocation14 + $0x158] sm:$0xff]   ;;  %v23995_v10 = vld [vmem:[#allocation14 + $0x168] sm:$0xff]  }
 0xce9   : > { %22201 = vmatprep.subr.bf16.mxu0 %v10107_v23  ;;  %v10099_v6 = vmul.f32 %v10083_v37, %v9971_v51  ;;  %v10085_v56 = vadd.f32 1.0, %v24834_v61  ;;  %22355 = vmatprep.subr.bf16.mxu1 %v24006_v12  ;;  %v23996_v51 = vld [vmem:[#allocation14 + $0x170] sm:$0xff]   ;;  %v23997_v37 = vld [vmem:[#allocation14 + $0x178] sm:$0xff]   ;;  %v23998_v61 = vld [vmem:[#allocation14 + $0x180] sm:$0xff]  }
 0xcea   : > { %22202 = vmatpush3.bf16.msra.mxu0 %v10107_v23  ;;  %v10100_v15 = vmul.f32 %v10084_v39, %v9972_v36  ;;  %v23994_v23 = vld [vmem:[#allocation14 + $0x160] sm:$0xff]   ;;  %v23999_v36 = vld [vmem:[#allocation14 + $0x188] sm:$0xff]   ;;  %v24000_v39 = vld [vmem:[#allocation14 + $0x190] sm:$0xff]  }
 0xceb   : > { %v10108_v45 = vpack.c.bf16 %v10099_v6, %v10098_v38  ;;  %v10101_v54 = vmul.f32 %v10085_v56, %v9973_v4  ;;  %v24001_v38 = vld [vmem:[#allocation14 + $0x198] sm:$0xff]   ;;  %v24003_v6 = vld [vmem:[#allocation14 + $0x1a0] sm:$0xff]   ;;  %v24004_v4 = vld [vmem:[#allocation14 + $0x1a8] sm:$0xff]  }
 0xcec   : > { %22356 = vmatpush3.bf16.msra.mxu1 %v24006_v12  ;;  %v24007_v56 = vld [vmem:[#allocation14 + $0x1b0] sm:$0xff]   ;;  %v24022_v12 = vld [vmem:[#allocation14 + $0x200] sm:$0xff]  }
 0xced   : > { %22203 = vmatprep.subr.bf16.mxu0 %v10108_v45  ;;  %v10109_v52 = vpack.c.bf16 %v10101_v54, %v10100_v15  ;;  %22357 = vmatprep.subr.bf16.mxu1 %v24009_v30  ;;  %v24008_v54 = vld [vmem:[#allocation14 + $0x1b8] sm:$0xff]  }
 0xcee   : > { %22204 = vmatpush3.bf16.msra.mxu0 %v10108_v45 }
 0xcef   : > { %22205 = vmatprep.subr.bf16.mxu0 %v10109_v52 }
 0xcf0   : > { %22358 = vmatpush3.bf16.msra.mxu1 %v24009_v30 }
 0xcf1   : > { %22375 = vmatprep.subr.bf16.mxu1 %v27297_v43 }
 0xcf2   : > { %22206 = vmatpush3.bf16.msra.mxu0 %v10109_v52 }
 0xcf5   : > { %22208 = vmatmul.mubr.bf16.vlgmr.msra.gmra.mrb[200].mxu0 %v23951_v11  ;;  %v24010_v11 = vld [vmem:[#allocation14 + $0x1c0] sm:$0xff]  }
 0xcf6   : > { %22211 = vmatprep.mubr.bf16.mxu0 %v23952_v28 }
 0xcfd   : > { %22212 = vmatmul.mubr.bf16.gmra.mrb[204].mxu0 %v23953_v1 }
 0xcfe   : > { %22215 = vmatprep.mubr.bf16.mxu0 %v23954_v32 }
 0xd05   : > { %22216 = vmatmul.mubr.bf16.gmra.mrb[208].mxu0 %v23955_v29 }
 0xd06   : > { %22219 = vmatprep.mubr.bf16.mxu0 %v23956_v53 }
 0xd0d   : > { %22220 = vmatmul.mubr.bf16.gmra.mrb[212].mxu0 %v23957_v62  ;;  %v24011_v62 = vld [vmem:[#allocation14 + $0x1c8] sm:$0xff]  }
 0xd0e   : > { %22223 = vmatprep.mubr.bf16.mxu0 %v23958_v49 }
 0xd15   : > { %22224 = vmatmul.mubr.bf16.gmra.mrb[216].mxu0 %v23959_v18  ;;  %v24012_v18 = vld [vmem:[#allocation14 + $0x1d0] sm:$0xff]  }
 0xd16   : > { %22227 = vmatprep.mubr.bf16.mxu0 %v23960_v35 }
 0xd1d   : > { %22228 = vmatmul.mubr.bf16.gmra.mrb[220].mxu0 %v23961_v2 }
 0xd1e   : > { %22231 = vmatprep.mubr.bf16.mxu0 %v23962_v17 }
 0xd25   : > { %22232 = vmatmul.mubr.bf16.gmra.mrb[224].mxu0 %v23963_v42 }
 0xd26   : > { %22235 = vmatprep.mubr.bf16.mxu0 %v23964_v60 }
 0xd2d   : > { %22236 = vmatmul.mubr.bf16.gmra.mrb[228].mxu0 %v23965_v14  ;;  %v24013_v14 = vld [vmem:[#allocation14 + $0x1d8] sm:$0xff]  }
 0xd2e   : > { %22239 = vmatprep.mubr.bf16.mxu0 %v23966_v31 }
 0xd35   : > { %22240 = vmatmul.mubr.bf16.gmra.mrb[232].mxu0 %v23967_v41  ;;  %v24015_v41 = vld [vmem:[#allocation14 + $0x1e0] sm:$0xff]  }
 0xd36   : > { %22243 = vmatprep.mubr.bf16.mxu0 %v23968_v13 }
 0xd3d   : > { %22244 = vmatmul.mubr.bf16.gmra.mrb[236].mxu0 %v23969_v40 }
 0xd3e   : > { %22247 = vmatprep.mubr.bf16.mxu0 %v23970_v22 }
 0xd45   : > { %22248 = vmatmul.mubr.bf16.gmra.mrb[240].mxu0 %v23971_v59 }
 0xd46   : > { %22251 = vmatprep.mubr.bf16.mxu0 %v23972_v26 }
 0xd4d   : > { %22252 = vmatmul.mubr.bf16.gmra.mrb[244].mxu0 %v23973_v34  ;;  %v24016_v34 = vld [vmem:[#allocation14 + $0x1e8] sm:$0xff]  }
 0xd4e   : > { %22255 = vmatprep.mubr.bf16.mxu0 %v23974_v24 }
 0xd55   : > { %22256 = vmatmul.mubr.bf16.gmra.mrb[248].mxu0 %v23975_v47  ;;  %v24019_v47 = vld [vmem:[#allocation14 + $0x1f0] sm:$0xff]  }
 0xd56   : > { %22259 = vmatprep.mubr.bf16.mxu0 %v23976_v7 }
 0xd5d   : > { %22260 = vmatmul.mubr.bf16.gmra.mrb[252].mxu0 %v23977_v44 }
 0xd5e   : > { %22263 = vmatprep.mubr.bf16.mxu0 %v23978_v8 }
 0xd65   : > { %22264 = vmatmul.mubr.bf16.gmra.mrb[0].mxu0 %v23979_v50 }
 0xd66   : > { %22267 = vmatprep.mubr.bf16.mxu0 %v23980_v57  ;;  %v24020_v57 = vld [vmem:[#allocation14 + $0x1f8] sm:$0xff]  }
 0xd6d   : > { %22268 = vmatmul.mubr.bf16.gmra.mrb[4].mxu0 %v23981_v3 }
 0xd6e   : > { %22271 = vmatprep.mubr.bf16.mxu0 %v23982_v48 }
 0xd75   : > { %22272 = vmatmul.mubr.bf16.gmra.mrb[8].mxu0 %v23983_v20  ;;  %v24017_v20 = vld [vmem:[#allocation16 + $0x8] sm:$0xff]  }
 0xd76   : > { %22275 = vmatprep.mubr.bf16.mxu0 %v23984_v55 }
 0xd7d   : > { %22276 = vmatmul.mubr.bf16.gmra.mrb[12].mxu0 %v23985_v25 }
 0xd7e   : > { %22279 = vmatprep.mubr.bf16.mxu0 %v23986_v19  ;;  %v24018_v19 = vld [vmem:[#allocation16 + $0x10] sm:$0xff]  }
 0xd85   : > { %22280 = vmatmul.mubr.bf16.gmra.mrb[16].mxu0 %v23987_v58  ;;  %v24023_v58 = vld [vmem:[#allocation14 + $0x208] sm:$0xff]  }
 0xd86   : > { %22283 = vmatprep.mubr.bf16.mxu0 %v23988_v33 }
 0xd8d   : > { %22284 = vmatmul.mubr.bf16.gmra.mrb[20].mxu0 %v23989_v63  ;;  %v24024_v63 = vld [vmem:[#allocation14 + $0x210] sm:$0xff]  }
 0xd8e   : > { %22287 = vmatprep.mubr.bf16.mxu0 %v23990_v9 }
 0xd95   : > { %22288 = vmatmul.mubr.bf16.gmra.mrb[24].mxu0 %v23991_v46 }
 0xd96   : > { %22291 = vmatprep.mubr.bf16.mxu0 %v23992_v16 }
 0xd9d   : > { %22292 = vmatmul.mubr.bf16.gmra.mrb[28].mxu0 %v23993_v21  ;;  %v24021_v21 = vld [vmem:[#allocation16 + $0x18] sm:$0xff]  }
 0xd9e   : > { %22295 = vmatprep.mubr.bf16.mxu0 %v23994_v23 }
 0xda5   : > { %22296 = vmatmul.mubr.bf16.gmra.mrb[32].mxu0 %v23995_v10  ;;  %v24025_v10 = vld [vmem:[#allocation14 + $0x218] sm:$0xff]  }
 0xda6   : > { %22299 = vmatprep.mubr.bf16.mxu0 %v23996_v51  ;;  %v24026_v51 = vld [vmem:[#allocation16 + $0x40] sm:$0xff]  }
 0xdad   : > { %22300 = vmatmul.mubr.bf16.gmra.mrb[36].mxu0 %v23997_v37 }
 0xdae   : > { %22303 = vmatprep.mubr.bf16.mxu0 %v23998_v61  ;;  %v24028_v61 = vld [vmem:[#allocation14 + $0x220] sm:$0xff]  }
 0xdb5   : > { %22304 = vmatmul.mubr.bf16.gmra.mrb[40].mxu0 %v23999_v36 }
 0xdb6   : > { %22307 = vmatprep.mubr.bf16.mxu0 %v24000_v39 }
 0xdbd   : > { %22308 = vmatmul.mubr.bf16.gmra.mrb[44].mxu0 %v24001_v38 }
 0xdbe   : > { %22311 = vmatprep.mubr.bf16.mxu0 %v24003_v6 }
 0xdc5   : > { %22312 = vmatmul.mubr.bf16.gmra.mrb[48].mxu0 %v24004_v4 }
 0xdc6   : > { %22315 = vmatprep.mubr.bf16.mxu0 %v24007_v56  ;;  %v24029_v56 = vld [vmem:[#allocation14 + $0x228] sm:$0xff]  }
 0xdc8   : > { %v27300_v45 = vpop.f32.mrb[200].mxu0 }
 0xdc9   : > { %v27302_v15 = vpop.f32.mrb[201].mxu0 }
 0xdca   : > { %v27304_v52 = vpop.f32.mrb[202].mxu0 }
 0xdcb   : > { %v11296_v28 = vpack.c.bf16 %v27304_v52, %v27300_v45  ;;  %v27308_v1 = vpop.f32.mrb[203].mxu0 }
 0xdcc   : > { %v11295_v32 = vpack.c.bf16 %v27308_v1, %v27302_v15  ;;  %v24030_v1 = vld [vmem:[#allocation16 + $0x50] sm:$0xff]  }
 0xdcd   : > { %22316 = vmatmul.mubr.bf16.gmra.mrb[52].mxu0 %v24008_v54 }
 0xdce   : > { %22319 = vmatprep.mubr.bf16.mxu0 %v24010_v11  ;;  %v24032_v11 = vld [vmem:[#allocation14 + $0x230] sm:$0xff]  }
 0xdd0   : > { %v27312_v29 = vpop.f32.mrb[204].mxu0 }
 0xdd1   : > { %v27314_v53 = vpop.f32.mrb[205].mxu0 }
 0xdd2   : > { %v27316_v49 = vpop.f32.mrb[206].mxu0 }
 0xdd3   : > { %v11298_v35 = vpack.c.bf16 %v27316_v49, %v27312_v29  ;;  %v27320_v2 = vpop.f32.mrb[207].mxu0 }
 0xdd4   : > { %v11297_v17 = vpack.c.bf16 %v27320_v2, %v27314_v53 }
 0xdd5   : > { %22320 = vmatmul.mubr.bf16.gmra.mrb[56].mxu0 %v24011_v62 }
 0xdd6   : > { %22323 = vmatprep.mubr.bf16.mxu0 %v24012_v18 }
 0xdd8   : > { %v27324_v42 = vpop.f32.mrb[208].mxu0 }
 0xdd9   : > { %v27326_v60 = vpop.f32.mrb[209].mxu0 }
 0xdda   : > { %v27328_v31 = vpop.f32.mrb[210].mxu0 }
 0xddb   : > { %v11300_v13 = vpack.c.bf16 %v27328_v31, %v27324_v42  ;;  %v27332_v40 = vpop.f32.mrb[211].mxu0 }
 0xddc   : > { %v11299_v22 = vpack.c.bf16 %v27332_v40, %v27326_v60 }
 0xddd   : > { %22324 = vmatmul.mubr.bf16.gmra.mrb[60].mxu0 %v24013_v14 }
 0xdde   : > { %22327 = vmatprep.mubr.bf16.mxu0 %v24015_v41 }
 0xde0   : > { %v27336_v59 = vpop.f32.mrb[212].mxu0 }
 0xde1   : > { %v27338_v26 = vpop.f32.mrb[213].mxu0 }
 0xde2   : > { %v27340_v24 = vpop.f32.mrb[214].mxu0 }
 0xde3   : > { %v11302_v7 = vpack.c.bf16 %v27340_v24, %v27336_v59  ;;  %v27344_v44 = vpop.f32.mrb[215].mxu0 }
 0xde4   : > { %v11301_v8 = vpack.c.bf16 %v27344_v44, %v27338_v26 }
 0xde5   : > { %22328 = vmatmul.mubr.bf16.gmra.mrb[64].mxu0 %v24016_v34 }
 0xde6   : > { %22331 = vmatprep.mubr.bf16.mxu0 %v24019_v47  ;;  %v24033_v47 = vld [vmem:[#allocation14 + $0x238] sm:$0xff]  }
 0xde8   : > { %v22225_v27 = vpop.f32.mrb[216].mxu0 }
 0xde9   : > { %v10784_v50 = vpop.f32.mrb[217].mxu0 }
 0xdea   : > { %v22226_v5 = vpop.f32.mrb[218].mxu0 }
 0xdeb   : > { %v11312_v3 = vpack.c.bf16 %v22226_v5, %v22225_v27  ;;  %v10787_v48 = vpop.f32.mrb[219].mxu0 }
 0xdec   : > { %v11311_v30 = vpack.c.bf16 %v10787_v48, %v10784_v50 }
 0xded   : > { %22332 = vmatmul.mubr.bf16.gmra.mrb[68].mxu0 %v24020_v57 }
 0xdee   : > { %22359 = vmatprep.mubr.msk.bf16.mxu1 %vm11352_vm5, %v11311_v30  ;;  %22335 = vmatprep.mubr.bf16.mxu0 %v24022_v12  ;;  %v24027_v12 = vld [vmem:[#allocation16 + $0x48] sm:$0xff]  }
 0xdef   : > { %22360 = vmatmul.mubr.msk.bf16.vlgmr.msra.gmra.mrb[56].mxu1 %vm11352_vm5, %v11312_v3 }
 0xdf0   : > { %v22229_v55 = vpop.f32.mrb[220].mxu0  ;;  %22376 = vmatpush3.bf16.msra.mxu1 %v27297_v43 }
 0xdf1   : > { %v10800_v25 = vpop.f32.mrb[221].mxu0  ;;  %22377 = vmatprep.subr.bf16.mxu1 %v24017_v20 }
 0xdf2   : > { %v22230_v33 = vpop.f32.mrb[222].mxu0 }
 0xdf3   : > { %v11314_v9 = vpack.c.bf16 %v22230_v33, %v22229_v55  ;;  %v10803_v46 = vpop.f32.mrb[223].mxu0  ;;  %v24031_v55 = vld [vmem:[#allocation16 + $0x58] sm:$0xff]   ;;  %v24036_v33 = vld [vmem:[#allocation16 + $0x70] sm:$0xff]  }
 0xdf4   : > { %v11313_v16 = vpack.c.bf16 %v10803_v46, %v10800_v25  ;;  %22378 = vmatpush3.bf16.msra.mxu1 %v24017_v20  ;;  %v24037_v46 = vld [vmem:[#allocation16 + $0x78] sm:$0xff]  }
 0xdf5   : > { %22379 = vmatprep.subr.bf16.mxu1 %v24018_v19  ;;  %22336 = vmatmul.mubr.bf16.gmra.mrb[72].mxu0 %v24023_v58 }
 0xdf6   : > { %22363 = vmatprep.mubr.msk.bf16.mxu1 %vm11352_vm5, %v11313_v16  ;;  %22339 = vmatprep.mubr.bf16.mxu0 %v24024_v63 }
 0xdf7   : > { %22364 = vmatmul.mubr.msk.bf16.gmra.mrb[60].mxu1 %vm11352_vm5, %v11314_v9 }
 0xdf8   : > { %v22233_v23 = vpop.f32.mrb[224].mxu0  ;;  %22380 = vmatpush3.bf16.msra.mxu1 %v24018_v19 }
 0xdf9   : > { %v10816_v43 = vpop.f32.mrb[225].mxu0  ;;  %22381 = vmatprep.subr.bf16.mxu1 %v24021_v21 }
 0xdfa   : > { %v22234_v37 = vpop.f32.mrb[226].mxu0 }
 0xdfb   : > { %v11316_v36 = vpack.c.bf16 %v22234_v37, %v22233_v23  ;;  %v10819_v39 = vpop.f32.mrb[227].mxu0  ;;  %v24038_v23 = vld [vmem:[#allocation16 + $0x80] sm:$0xff]  }
 0xdfc   : > { %v11315_v38 = vpack.c.bf16 %v10819_v39, %v10816_v43  ;;  %22382 = vmatpush3.bf16.msra.mxu1 %v24021_v21 }
 0xdfd   : > { %22340 = vmatmul.mubr.bf16.gmra.mrb[76].mxu0 %v24025_v10  ;;  %22399 = vmatprep.subr.bf16.mxu1 %v24026_v51 }
 0xdfe   : > { %22367 = vmatprep.mubr.msk.bf16.mxu1 %vm11352_vm5, %v11315_v38  ;;  %22343 = vmatprep.mubr.bf16.mxu0 %v24028_v61 }
 0xdff   : > { %22368 = vmatmul.mubr.msk.bf16.gmra.mrb[64].mxu1 %vm11352_vm5, %v11316_v36 }
 0xe00   : > { %v22237_v6 = vpop.f32.mrb[228].mxu0 }
 0xe01   : > { %v10832_v4 = vpop.f32.mrb[229].mxu0 }
 0xe02   : > { %v22238_v54 = vpop.f32.mrb[230].mxu0 }
 0xe03   : > { %v11318_v62 = vpack.c.bf16 %v22238_v54, %v22237_v6  ;;  %v10835_v18 = vpop.f32.mrb[231].mxu0 }
 0xe04   : > { %v11317_v14 = vpack.c.bf16 %v10835_v18, %v10832_v4 }
 0xe05   : > { %22344 = vmatmul.mubr.bf16.gmra.mrb[80].mxu0 %v24029_v56 }
 0xe06   : > { %22371 = vmatprep.mubr.msk.bf16.mxu1 %vm11352_vm5, %v11317_v14  ;;  %22347 = vmatprep.mubr.bf16.mxu0 %v24032_v11 }
 0xe07   : > { %22372 = vmatmul.mubr.msk.bf16.gmra.mrb[68].mxu1 %vm11352_vm5, %v11318_v62 }
 0xe08   : > { %22383 = vmatprep.mubr.msk.bf16.mxu1 %vm11352_vm5, %v11295_v32  ;;  %v22241_v41 = vpop.f32.mrb[232].mxu0 }
 0xe09   : > { %v10848_v34 = vpop.f32.mrb[233].mxu0 }
 0xe0a   : > { %v22242_v27 = vpop.f32.mrb[234].mxu0 }
 0xe0b   : > { %v11620_v50 = vpack.c.bf16 %v22242_v27, %v22241_v41  ;;  %v10851_v57 = vpop.f32.mrb[235].mxu0  ;;  %v24039_v41 = vld [vmem:[#allocation16 + $0x88] sm:$0xff]  }
 0xe0c   : > { %v11619_v5 = vpack.c.bf16 %v10851_v57, %v10848_v34 }
 0xe0d   : > { %22348 = vmatmul.mubr.bf16.gmra.mrb[84].mxu0 %v24033_v47  ;;  %v24040_v47 = vld [vmem:[#allocation16 + $0x90] sm:$0xff]  }
 0xe0f   : > { %22384 = vmatmul.mubr.msk.bf16.vlgmr.msra.gmra.mrb[56].mxu1 %vm11352_vm5, %v11296_v28  ;;  %v24034_v28 = vld [vmem:[#allocation16 + $0x60] sm:$0xff]  }
 0xe10   : > { %22387 = vmatprep.mubr.msk.bf16.mxu1 %vm11352_vm5, %v11297_v17  ;;  %22400 = vmatpush3.bf16.msra.mxu1 %v24026_v51  ;;  %v22245_v15 = vpop.f32.mrb[236].mxu0 }
 0xe11   : > { %22401 = vmatprep.subr.bf16.mxu1 %v24027_v12  ;;  %v10864_v32 = vpop.f32.mrb[237].mxu0 }
 0xe12   : > { %v22246_v3 = vpop.f32.mrb[238].mxu0 }
 0xe13   : > { %v11622_v48 = vpack.c.bf16 %v22246_v3, %v22245_v15  ;;  %v10867_v30 = vpop.f32.mrb[239].mxu0  ;;  %v24041_v15 = vld [vmem:[#allocation16 + $0x98] sm:$0xff]   ;;  %v24042_v3 = vld [vmem:[#allocation16 + $0xa0] sm:$0xff]  }
 0xe14   : > { %22402 = vmatpush3.bf16.msra.mxu1 %v24027_v12  ;;  %v11621_v20 = vpack.c.bf16 %v10867_v30, %v10864_v32 }
 0xe15   : > { %22403 = vmatprep.subr.bf16.mxu1 %v24030_v1 }
 0xe17   : > { %22388 = vmatmul.mubr.msk.bf16.gmra.mrb[60].mxu1 %vm11352_vm5, %v11298_v35 }
 0xe18   : > { %22391 = vmatprep.mubr.msk.bf16.mxu1 %vm11352_vm5, %v11299_v22  ;;  %22404 = vmatpush3.bf16.msra.mxu1 %v24030_v1  ;;  %v22249_v45 = vpop.f32.mrb[240].mxu0 }
 0xe19   : > { %22405 = vmatprep.subr.bf16.mxu1 %v24031_v55  ;;  %v10880_v52 = vpop.f32.mrb[241].mxu0 }
 0xe1a   : > { %v22250_v53 = vpop.f32.mrb[242].mxu0 }
 0xe1b   : > { %v11624_v2 = vpack.c.bf16 %v22250_v53, %v22249_v45  ;;  %v10883_v17 = vpop.f32.mrb[243].mxu0 }
 0xe1c   : > { %22406 = vmatpush3.bf16.msra.mxu1 %v24031_v55  ;;  %v11623_v25 = vpack.c.bf16 %v10883_v17, %v10880_v52 }
 0xe1d   : > { %22423 = vmatprep.subr.bf16.mxu1 %v24034_v28 }
 0xe1f   : > { %22392 = vmatmul.mubr.msk.bf16.gmra.mrb[64].mxu1 %vm11352_vm5, %v11300_v13 }
 0xe20   : > { %22395 = vmatprep.mubr.msk.bf16.mxu1 %vm11352_vm5, %v11301_v8  ;;  %v22253_v29 = vpop.f32.mrb[244].mxu0  ;;  %v24035_v8 = vld [vmem:[#allocation16 + $0x68] sm:$0xff]  }
 0xe21   : > { %v10896_v49 = vpop.f32.mrb[245].mxu0 }
 0xe22   : > { %v22254_v35 = vpop.f32.mrb[246].mxu0 }
 0xe23   : > { %v11626_v60 = vpack.c.bf16 %v22254_v35, %v22253_v29  ;;  %v10899_v40 = vpop.f32.mrb[247].mxu0 }
 0xe24   : > { %v11625_v22 = vpack.c.bf16 %v10899_v40, %v10896_v49 }
 0xe27   : > { %22396 = vmatmul.mubr.msk.bf16.gmra.mrb[68].mxu1 %vm11352_vm5, %v11302_v7 }
 0xe28   : > { %22407 = vmatprep.mubr.msk.bf16.mxu1 %vm11352_vm5, %v11619_v5  ;;  %v22257_v42 = vpop.f32.mrb[248].mxu0 }
 0xe29   : > { %v10912_v31 = vpop.f32.mrb[249].mxu0 }
 0xe2a   : > { %v22258_v13 = vpop.f32.mrb[250].mxu0 }
 0xe2b   : > { %v11798_v19 = vpack.c.bf16 %v22258_v13, %v22257_v42  ;;  %v10915_v26 = vpop.f32.mrb[251].mxu0 }
 0xe2c   : > { %v11797_v44 = vpack.c.bf16 %v10915_v26, %v10912_v31  ;;  %v24044_v31 = vld [vmem:[#allocation16 + $0xb0] sm:$0xff]  }
 0xe2f   : > { %22408 = vmatmul.mubr.msk.bf16.vlgmr.msra.gmra.mrb[56].mxu1 %vm11352_vm5, %v11620_v50 }
 0xe30   : > { %22411 = vmatprep.mubr.msk.bf16.mxu1 %vm11352_vm5, %v11621_v20  ;;  %22424 = vmatpush3.bf16.msra.mxu1 %v24034_v28  ;;  %v22261_v58 = vpop.f32.mrb[252].mxu0 }
 0xe31   : > { %22425 = vmatprep.subr.bf16.mxu1 %v24035_v8  ;;  %v10928_v59 = vpop.f32.mrb[253].mxu0 }
 0xe32   : > { %v22262_v24 = vpop.f32.mrb[254].mxu0 }
 0xe33   : > { %v11800_v7 = vpack.c.bf16 %v22262_v24, %v22261_v58  ;;  %v10931_v63 = vpop.f32.mrb[255].mxu0  ;;  %v24045_v58 = vld [vmem:[#allocation16 + $0xb8] sm:$0xff]   ;;  %v24046_v24 = vld [vmem:[#allocation16 + $0xc0] sm:$0xff]  }
 0xe34   : > { %22426 = vmatpush3.bf16.msra.mxu1 %v24035_v8  ;;  %v11799_v9 = vpack.c.bf16 %v10931_v63, %v10928_v59 }
 0xe35   : > { %22427 = vmatprep.subr.bf16.mxu1 %v24036_v33 }
 0xe37   : > { %22412 = vmatmul.mubr.msk.bf16.gmra.mrb[60].mxu1 %vm11352_vm5, %v11622_v48 }
 0xe38   : > { %22415 = vmatprep.mubr.msk.bf16.mxu1 %vm11352_vm5, %v11623_v25  ;;  %22428 = vmatpush3.bf16.msra.mxu1 %v24036_v33  ;;  %v22265_v16 = vpop.f32.mrb[0].mxu0 }
 0xe39   : > { %22429 = vmatprep.subr.bf16.mxu1 %v24037_v46  ;;  %v10944_v21 = vpop.f32.mrb[1].mxu0 }
 0xe3a   : > { %v22266_v43 = vpop.f32.mrb[2].mxu0 }
 0xe3b   : > { %v11802_v10 = vpack.c.bf16 %v22266_v43, %v22265_v16  ;;  %v10947_v51 = vpop.f32.mrb[3].mxu0 }
 0xe3c   : > { %22430 = vmatpush3.bf16.msra.mxu1 %v24037_v46  ;;  %v11801_v37 = vpack.c.bf16 %v10947_v51, %v10944_v21 }
 0xe3d   : > { %22447 = vmatprep.subr.bf16.mxu1 %v24038_v23 }
 0xe3f   : > { %22416 = vmatmul.mubr.msk.bf16.gmra.mrb[64].mxu1 %vm11352_vm5, %v11624_v2 }
 0xe40   : > { %22419 = vmatprep.mubr.msk.bf16.mxu1 %vm11352_vm5, %v11625_v22  ;;  %v22269_v61 = vpop.f32.mrb[4].mxu0  ;;  %v24043_v22 = vld [vmem:[#allocation16 + $0xa8] sm:$0xff]  }
 0xe41   : > { %v10960_v36 = vpop.f32.mrb[5].mxu0 }
 0xe42   : > { %v22270_v39 = vpop.f32.mrb[6].mxu0 }
 0xe43   : > { %v11804_v38 = vpack.c.bf16 %v22270_v39, %v22269_v61  ;;  %v10963_v6 = vpop.f32.mrb[7].mxu0 }
 0xe44   : > { %v11803_v4 = vpack.c.bf16 %v10963_v6, %v10960_v36 }
 0xe47   : > { %22420 = vmatmul.mubr.msk.bf16.gmra.mrb[68].mxu1 %vm11352_vm5, %v11626_v60 }
 0xe48   : > { %22431 = vmatprep.mubr.msk.bf16.mxu1 %vm11352_vm5, %v11797_v44  ;;  %v22273_v56 = vpop.f32.mrb[8].mxu0 }
 0xe49   : > { %v10976_v54 = vpop.f32.mrb[9].mxu0 }
 0xe4a   : > { %v22274_v11 = vpop.f32.mrb[10].mxu0 }
 0xe4b   : > { %v11976_v62 = vpack.c.bf16 %v22274_v11, %v22273_v56  ;;  %v10979_v18 = vpop.f32.mrb[11].mxu0 }
 0xe4c   : > { %v11975_v14 = vpack.c.bf16 %v10979_v18, %v10976_v54  ;;  %v24048_v54 = vld [vmem:[#allocation16 + $0xd0] sm:$0xff]  }
 0xe4f   : > { %22432 = vmatmul.mubr.msk.bf16.vlgmr.msra.gmra.mrb[56].mxu1 %vm11352_vm5, %v11798_v19 }
 0xe50   : > { %22435 = vmatprep.mubr.msk.bf16.mxu1 %vm11352_vm5, %v11799_v9  ;;  %22448 = vmatpush3.bf16.msra.mxu1 %v24038_v23  ;;  %v22277_v34 = vpop.f32.mrb[12].mxu0 }
 0xe51   : > { %22449 = vmatprep.subr.bf16.mxu1 %v24039_v41  ;;  %v10992_v27 = vpop.f32.mrb[13].mxu0 }
 0xe52   : > { %v22278_v50 = vpop.f32.mrb[14].mxu0 }
 0xe53   : > { %v11978_v57 = vpack.c.bf16 %v22278_v50, %v22277_v34  ;;  %v10995_v5 = vpop.f32.mrb[15].mxu0  ;;  %v24049_v34 = vld [vmem:[#allocation16 + $0xd8] sm:$0xff]   ;;  %v24050_v50 = vld [vmem:[#allocation16 + $0xe0] sm:$0xff]  }
 0xe54   : > { %22450 = vmatpush3.bf16.msra.mxu1 %v24039_v41  ;;  %v11977_v12 = vpack.c.bf16 %v10995_v5, %v10992_v27 }
 0xe55   : > { %22451 = vmatprep.subr.bf16.mxu1 %v24040_v47 }
 0xe57   : > { %22436 = vmatmul.mubr.msk.bf16.gmra.mrb[60].mxu1 %vm11352_vm5, %v11800_v7 }
 0xe58   : > { %22439 = vmatprep.mubr.msk.bf16.mxu1 %vm11352_vm5, %v11801_v37  ;;  %22452 = vmatpush3.bf16.msra.mxu1 %v24040_v47  ;;  %v22281_v1 = vpop.f32.mrb[16].mxu0 }
 0xe59   : > { %22453 = vmatprep.subr.bf16.mxu1 %v24041_v15  ;;  %v11008_v32 = vpop.f32.mrb[17].mxu0 }
 0xe5a   : > { %v22282_v48 = vpop.f32.mrb[18].mxu0 }
 0xe5b   : > { %v11980_v30 = vpack.c.bf16 %v22282_v48, %v22281_v1  ;;  %v11011_v20 = vpop.f32.mrb[19].mxu0 }
 0xe5c   : > { %22454 = vmatpush3.bf16.msra.mxu1 %v24041_v15  ;;  %v11979_v55 = vpack.c.bf16 %v11011_v20, %v11008_v32 }
 0xe5d   : > { %22471 = vmatprep.subr.bf16.mxu1 %v24042_v3 }
 0xe5f   : > { %22440 = vmatmul.mubr.msk.bf16.gmra.mrb[64].mxu1 %vm11352_vm5, %v11802_v10 }
 0xe60   : > { %22443 = vmatprep.mubr.msk.bf16.mxu1 %vm11352_vm5, %v11803_v4  ;;  %v22285_v45 = vpop.f32.mrb[20].mxu0  ;;  %v24047_v4 = vld [vmem:[#allocation16 + $0xc8] sm:$0xff]  }
 0xe61   : > { %v11024_v52 = vpop.f32.mrb[21].mxu0 }
 0xe62   : > { %v22286_v28 = vpop.f32.mrb[22].mxu0 }
 0xe63   : > { %v11982_v53 = vpack.c.bf16 %v22286_v28, %v22285_v45  ;;  %v11027_v2 = vpop.f32.mrb[23].mxu0 }
 0xe64   : > { %v11981_v17 = vpack.c.bf16 %v11027_v2, %v11024_v52 }
 0xe67   : > { %22444 = vmatmul.mubr.msk.bf16.gmra.mrb[68].mxu1 %vm11352_vm5, %v11804_v38 }
 0xe68   : > { %22455 = vmatprep.mubr.msk.bf16.mxu1 %vm11352_vm5, %v11975_v14  ;;  %v22289_v25 = vpop.f32.mrb[24].mxu0 }
 0xe69   : > { %v11040_v29 = vpop.f32.mrb[25].mxu0 }
 0xe6a   : > { %v22290_v49 = vpop.f32.mrb[26].mxu0 }
 0xe6b   : > { %v12154_v35 = vpack.c.bf16 %v22290_v49, %v22289_v25  ;;  %v11043_v60 = vpop.f32.mrb[27].mxu0 }
 0xe6c   : > { %v12153_v40 = vpack.c.bf16 %v11043_v60, %v11040_v29  ;;  %v24052_v29 = vld [vmem:[#allocation16 + $0xf0] sm:$0xff]  }
 0xe6f   : > { %22456 = vmatmul.mubr.msk.bf16.vlgmr.msra.gmra.mrb[56].mxu1 %vm11352_vm5, %v11976_v62 }
 0xe70   : > { %22459 = vmatprep.mubr.msk.bf16.mxu1 %vm11352_vm5, %v11977_v12  ;;  %22472 = vmatpush3.bf16.msra.mxu1 %v24042_v3  ;;  %v22293_v42 = vpop.f32.mrb[28].mxu0 }
 0xe71   : > { %22473 = vmatprep.subr.bf16.mxu1 %v24043_v22  ;;  %v11056_v13 = vpop.f32.mrb[29].mxu0 }
 0xe72   : > { %v22294_v19 = vpop.f32.mrb[30].mxu0 }
 0xe73   : > { %v12156_v26 = vpack.c.bf16 %v22294_v19, %v22293_v42  ;;  %v11059_v44 = vpop.f32.mrb[31].mxu0  ;;  %v24053_v42 = vld [vmem:[#allocation16 + $0xf8] sm:$0xff]   ;;  %v24054_v19 = vld [vmem:[#allocation16 + $0x100] sm:$0xff]  }
 0xe74   : > { %22474 = vmatpush3.bf16.msra.mxu1 %v24043_v22  ;;  %v12155_v8 = vpack.c.bf16 %v11059_v44, %v11056_v13 }
 0xe75   : > { %22475 = vmatprep.subr.bf16.mxu1 %v24044_v31 }
 0xe77   : > { %22460 = vmatmul.mubr.msk.bf16.gmra.mrb[60].mxu1 %vm11352_vm5, %v11978_v57 }
 0xe78   : > { %22463 = vmatprep.mubr.msk.bf16.mxu1 %vm11352_vm5, %v11979_v55  ;;  %22476 = vmatpush3.bf16.msra.mxu1 %v24044_v31  ;;  %v22297_v33 = vpop.f32.mrb[32].mxu0 }
 0xe79   : > { %22477 = vmatprep.subr.bf16.mxu1 %v24045_v58  ;;  %v11072_v59 = vpop.f32.mrb[33].mxu0 }
 0xe7a   : > { %v22298_v7 = vpop.f32.mrb[34].mxu0 }
 0xe7b   : > { %v12158_v63 = vpack.c.bf16 %v22298_v7, %v22297_v33  ;;  %v11075_v9 = vpop.f32.mrb[35].mxu0 }
 0xe7c   : > { %22478 = vmatpush3.bf16.msra.mxu1 %v24045_v58  ;;  %v12157_v46 = vpack.c.bf16 %v11075_v9, %v11072_v59 }
 0xe7d   : > { %22495 = vmatprep.subr.bf16.mxu1 %v24046_v24 }
 0xe7f   : > { %22464 = vmatmul.mubr.msk.bf16.gmra.mrb[64].mxu1 %vm11352_vm5, %v11980_v30 }
 0xe80   : > { %22467 = vmatprep.mubr.msk.bf16.mxu1 %vm11352_vm5, %v11981_v17  ;;  %v22301_v16 = vpop.f32.mrb[36].mxu0  ;;  %v24051_v17 = vld [vmem:[#allocation16 + $0xe8] sm:$0xff]  }
 0xe81   : > { %v11088_v21 = vpop.f32.mrb[37].mxu0 }
 0xe82   : > { %v22302_v23 = vpop.f32.mrb[38].mxu0 }
 0xe83   : > { %v12160_v43 = vpack.c.bf16 %v22302_v23, %v22301_v16  ;;  %v11091_v10 = vpop.f32.mrb[39].mxu0 }
 0xe84   : > { %v12159_v51 = vpack.c.bf16 %v11091_v10, %v11088_v21 }
 0xe87   : > { %22468 = vmatmul.mubr.msk.bf16.gmra.mrb[68].mxu1 %vm11352_vm5, %v11982_v53 }
 0xe88   : > { %22479 = vmatprep.mubr.msk.bf16.mxu1 %vm11352_vm5, %v12153_v40  ;;  %v22305_v37 = vpop.f32.mrb[40].mxu0 }
 0xe89   : > { %v11104_v61 = vpop.f32.mrb[41].mxu0 }
 0xe8a   : > { %v22306_v36 = vpop.f32.mrb[42].mxu0 }
 0xe8b   : > { %v12332_v39 = vpack.c.bf16 %v22306_v36, %v22305_v37  ;;  %v11107_v38 = vpop.f32.mrb[43].mxu0 }
 0xe8c   : > { %v12331_v6 = vpack.c.bf16 %v11107_v38, %v11104_v61  ;;  %v24056_v61 = vld [vmem:[#allocation16 + $0x110] sm:$0xff]  }
 0xe8f   : > { %22480 = vmatmul.mubr.msk.bf16.vlgmr.msra.gmra.mrb[56].mxu1 %vm11352_vm5, %v12154_v35 }
 0xe90   : > { %22483 = vmatprep.mubr.msk.bf16.mxu1 %vm11352_vm5, %v12155_v8  ;;  %22496 = vmatpush3.bf16.msra.mxu1 %v24046_v24  ;;  %v22309_v56 = vpop.f32.mrb[44].mxu0 }
 0xe91   : > { %22497 = vmatprep.subr.bf16.mxu1 %v24047_v4  ;;  %v11120_v11 = vpop.f32.mrb[45].mxu0 }
 0xe92   : > { %v22310_v62 = vpop.f32.mrb[46].mxu0 }
 0xe93   : > { %v12334_v18 = vpack.c.bf16 %v22310_v62, %v22309_v56  ;;  %v11123_v14 = vpop.f32.mrb[47].mxu0  ;;  %v24057_v56 = vld [vmem:[#allocation16 + $0x118] sm:$0xff]  }
 0xe94   : > { %22498 = vmatpush3.bf16.msra.mxu1 %v24047_v4  ;;  %v12333_v41 = vpack.c.bf16 %v11123_v14, %v11120_v11 }
 0xe95   : > { %22499 = vmatprep.subr.bf16.mxu1 %v24048_v54 }
 0xe97   : > { %22484 = vmatmul.mubr.msk.bf16.gmra.mrb[60].mxu1 %vm11352_vm5, %v12156_v26 }
 0xe98   : > { %22487 = vmatprep.mubr.msk.bf16.mxu1 %vm11352_vm5, %v12157_v46  ;;  %22500 = vmatpush3.bf16.msra.mxu1 %v24048_v54  ;;  %v22313_v47 = vpop.f32.mrb[48].mxu0 }
 0xe99   : > { %22501 = vmatprep.subr.bf16.mxu1 %v24049_v34  ;;  %v11136_v27 = vpop.f32.mrb[49].mxu0 }
 0xe9a   : > { %v22314_v57 = vpop.f32.mrb[50].mxu0 }
 0xe9b   : > { %v12336_v5 = vpack.c.bf16 %v22314_v57, %v22313_v47  ;;  %v11139_v12 = vpop.f32.mrb[51].mxu0 }
 0xe9c   : > { %22502 = vmatpush3.bf16.msra.mxu1 %v24049_v34  ;;  %v12335_v15 = vpack.c.bf16 %v11139_v12, %v11136_v27  ;;  %v24058_v12 = vld [vmem:[#allocation17] sm:$0xff]  }
 0xe9d   : > { %22519 = vmatprep.subr.bf16.mxu1 %v24050_v50  ;;  %22583 = vmatprep.mubr.bf16.mxu0 %v24058_v12 }
 0xe9f   : > { %22488 = vmatmul.mubr.msk.bf16.gmra.mrb[64].mxu1 %vm11352_vm5, %v12158_v63 }
 0xea0   : > { %22491 = vmatprep.mubr.msk.bf16.mxu1 %vm11352_vm5, %v12159_v51  ;;  %v22317_v1 = vpop.f32.mrb[52].mxu0  ;;  %v24055_v51 = vld [vmem:[#allocation16 + $0x108] sm:$0xff]  }
 0xea1   : > { %v11152_v32 = vpop.f32.mrb[53].mxu0 }
 0xea2   : > { %v22318_v3 = vpop.f32.mrb[54].mxu0 }
 0xea3   : > { %v12338_v48 = vpack.c.bf16 %v22318_v3, %v22317_v1  ;;  %v11155_v30 = vpop.f32.mrb[55].mxu0  ;;  %v12889_v1 = vpop.permute.xlu1 %12888 }
 0xea4   : > { %v12337_v20 = vpack.c.bf16 %v11155_v30, %v11152_v32 }
 0xea7   : > { %22492 = vmatmul.mubr.msk.bf16.gmra.mrb[68].mxu1 %vm11352_vm5, %v12160_v43  ;;  %v12899_v3 = vpop.permute.xlu1 %12898 }
 0xea8   : > { %22503 = vmatprep.mubr.msk.bf16.mxu1 %vm11352_vm5, %v12331_v6  ;;  %v22321_v55 = vpop.f32.mrb[56].mxu0 }
 0xea9   : > { %v11168_v45 = vpop.f32.mrb[57].mxu0 }
 0xeaa   : > { %v22322_v52 = vpop.f32.mrb[58].mxu0 }
 0xeab   : > { %v12510_v28 = vpack.c.bf16 %v22322_v52, %v22321_v55  ;;  %v11171_v53 = vpop.f32.mrb[59].mxu0  ;;  %v12909_v30 = vpop.permute.xlu1 %12908 }
 0xeac   : > { %v12509_v2 = vpack.c.bf16 %v11171_v53, %v11168_v45 }
 0xeaf   : > { %22504 = vmatmul.mubr.msk.bf16.vlgmr.msra.gmra.mrb[56].mxu1 %vm11352_vm5, %v12332_v39 }
 0xeb0   : > { %22507 = vmatprep.mubr.msk.bf16.mxu1 %vm11352_vm5, %v12333_v41  ;;  %22520 = vmatpush3.bf16.msra.mxu1 %v24050_v50  ;;  %v22325_v25 = vpop.f32.mrb[60].mxu0 }
 0xeb1   : > { %22521 = vmatprep.subr.bf16.mxu1 %v24051_v17  ;;  %v11184_v49 = vpop.f32.mrb[61].mxu0 }
 0xeb2   : > { %v22326_v35 = vpop.f32.mrb[62].mxu0 }
 0xeb3   : > { %v12512_v60 = vpack.c.bf16 %v22326_v35, %v22325_v25  ;;  %v11187_v40 = vpop.f32.mrb[63].mxu0 }
 0xeb4   : > { %22522 = vmatpush3.bf16.msra.mxu1 %v24051_v17  ;;  %v12511_v22 = vpack.c.bf16 %v11187_v40, %v11184_v49 }
 0xeb5   : > { %22523 = vmatprep.subr.bf16.mxu1 %v24052_v29 }
 0xeb7   : > { %22508 = vmatmul.mubr.msk.bf16.gmra.mrb[60].mxu1 %vm11352_vm5, %v12334_v18 }
 0xeb8   : > { %22511 = vmatprep.mubr.msk.bf16.mxu1 %vm11352_vm5, %v12335_v15  ;;  %22524 = vmatpush3.bf16.msra.mxu1 %v24052_v29  ;;  %v22329_v31 = vpop.f32.mrb[64].mxu0  ;;  %v12884_v15 = vpop.permute.xlu0 %12883 }
 0xeb9   : > { %22525 = vmatprep.subr.bf16.mxu1 %v24053_v42  ;;  %v11200_v13 = vpop.f32.mrb[65].mxu0 }
 0xeba   : > { %v22330_v26 = vpop.f32.mrb[66].mxu0 }
 0xebb   : > { %v12514_v44 = vpack.c.bf16 %v22330_v26, %v22329_v31  ;;  %v11203_v8 = vpop.f32.mrb[67].mxu0 }
 0xebc   : > { %22526 = vmatpush3.bf16.msra.mxu1 %v24053_v42  ;;  %v12513_v58 = vpack.c.bf16 %v11203_v8, %v11200_v13  ;;  %v12894_v32 = vpop.permute.xlu0 %12893 }
 0xebd   : > { %22543 = vmatprep.subr.bf16.mxu1 %v24054_v19 }
 0xebf   : > { %22512 = vmatmul.mubr.msk.bf16.gmra.mrb[64].mxu1 %vm11352_vm5, %v12336_v5 }
 0xec0   : > { %22515 = vmatprep.mubr.msk.bf16.mxu1 %vm11352_vm5, %v12337_v20  ;;  %v22333_v33 = vpop.f32.mrb[68].mxu0 }
 0xec1   : > { %v11216_v59 = vpop.f32.mrb[69].mxu0 }
 0xec2   : > { %v22334_v24 = vpop.f32.mrb[70].mxu0 }
 0xec3   : > { %v12516_v7 = vpack.c.bf16 %v22334_v24, %v22333_v33  ;;  %v11219_v63 = vpop.f32.mrb[71].mxu0 }
 0xec4   : > { %v12515_v9 = vpack.c.bf16 %v11219_v63, %v11216_v59 }
 0xec7   : > { %22516 = vmatmul.mubr.msk.bf16.gmra.mrb[68].mxu1 %vm11352_vm5, %v12338_v48  ;;  %v12904_v48 = vpop.permute.xlu0 %12903 }
 0xec8   : > { %22527 = vmatprep.mubr.msk.bf16.mxu1 %vm11352_vm5, %v12509_v2  ;;  %v22337_v46 = vpop.f32.mrb[72].mxu0 }
 0xec9   : > { %v11232_v16 = vpop.f32.mrb[73].mxu0 }
 0xeca   : > { %v22338_v21 = vpop.f32.mrb[74].mxu0 }
 0xecb   : > { %v12688_v23 = vpack.c.bf16 %v22338_v21, %v22337_v46  ;;  %v11235_v43 = vpop.f32.mrb[75].mxu0  ;;  %v12914_v20 = vpop.permute.xlu0 %12913 }
 0xecc   : > { %v12687_v10 = vpack.c.bf16 %v11235_v43, %v11232_v16 }
 0xecf   : > { %22528 = vmatmul.mubr.msk.bf16.vlgmr.msra.gmra.mrb[56].mxu1 %vm11352_vm5, %v12510_v28  ;;  %v12919_v28 = vpop.permute.xlu1 %12918 }
 0xed0   : > { %22531 = vmatprep.mubr.msk.bf16.mxu1 %vm11352_vm5, %v12511_v22  ;;  %22544 = vmatpush3.bf16.msra.mxu1 %v24054_v19  ;;  %v22341_v37 = vpop.f32.mrb[76].mxu0  ;;  %v12924_v22 = vpop.permute.xlu0 %12923 }
 0xed1   : > { %22545 = vmatprep.subr.bf16.mxu1 %v24055_v51  ;;  %v11248_v36 = vpop.f32.mrb[77].mxu0 }
 0xed2   : > { %v22342_v39 = vpop.f32.mrb[78].mxu0 }
 0xed3   : > { %v12690_v38 = vpack.c.bf16 %v22342_v39, %v22341_v37  ;;  %v11251_v6 = vpop.f32.mrb[79].mxu0  ;;  %v12929_v26 = vpop.permute.xlu1 %12928 }
 0xed4   : > { %22546 = vmatpush3.bf16.msra.mxu1 %v24055_v51  ;;  %v12689_v4 = vpack.c.bf16 %v11251_v6, %v11248_v36  ;;  %v12934_v37 = vpop.permute.xlu0 %12933 }
 0xed5   : > { %22547 = vmatprep.subr.bf16.mxu1 %v24056_v61 }
 0xed7   : > { %22532 = vmatmul.mubr.msk.bf16.gmra.mrb[60].mxu1 %vm11352_vm5, %v12512_v60 }
 0xed8   : > { %22535 = vmatprep.mubr.msk.bf16.mxu1 %vm11352_vm5, %v12513_v58  ;;  %22548 = vmatpush3.bf16.msra.mxu1 %v24056_v61  ;;  %v22345_v54 = vpop.f32.mrb[80].mxu0 }
 0xed9   : > { %22549 = vmatprep.subr.bf16.mxu1 %v24057_v56  ;;  %v11264_v11 = vpop.f32.mrb[81].mxu0 }
 0xeda   : > { %v22346_v62 = vpop.f32.mrb[82].mxu0 }
 0xedb   : > { %v12692_v18 = vpack.c.bf16 %v22346_v62, %v22345_v54  ;;  %v11267_v14 = vpop.f32.mrb[83].mxu0  ;;  %v12939_v54 = vpop.permute.xlu1 %12938 }
 0xedc   : > { %22550 = vmatpush3.bf16.msra.mxu1 %v24057_v56  ;;  %v12691_v41 = vpack.c.bf16 %v11267_v14, %v11264_v11 }
 0xedf   : > { %22536 = vmatmul.mubr.msk.bf16.gmra.mrb[64].mxu1 %vm11352_vm5, %v12514_v44 }
 0xee0   : > { %22539 = vmatprep.mubr.msk.bf16.mxu1 %vm11352_vm5, %v12515_v9  ;;  %v22349_v34 = vpop.f32.mrb[84].mxu0 }
 0xee1   : > { %v11280_v47 = vpop.f32.mrb[85].mxu0 }
 0xee2   : > { %v22350_v27 = vpop.f32.mrb[86].mxu0 }
 0xee3   : > { %v12694_v50 = vpack.c.bf16 %v22350_v27, %v22349_v34  ;;  %v11283_v57 = vpop.f32.mrb[87].mxu0 }
 0xee4   : > { %v12693_v5 = vpack.c.bf16 %v11283_v57, %v11280_v47 }
 0xee7   : > { %22540 = vmatmul.mubr.msk.bf16.gmra.mrb[68].mxu1 %vm11352_vm5, %v12516_v7 }
 0xee8   : > { %22551 = vmatprep.mubr.msk.bf16.mxu1 %vm11352_vm5, %v12687_v10 }
 0xeef   : > { %22552 = vmatmul.mubr.msk.bf16.vlgmr.msra.gmra.mrb[56].mxu1 %vm11352_vm5, %v12688_v23 }
 0xef0   : > { %22555 = vmatprep.mubr.msk.bf16.mxu1 %vm11352_vm5, %v12689_v4 }
 0xef7   : > { %22556 = vmatmul.mubr.msk.bf16.gmra.mrb[60].mxu1 %vm11352_vm5, %v12690_v38 }
 0xef8   : > { %22559 = vmatprep.mubr.msk.bf16.mxu1 %vm11352_vm5, %v12691_v41 }
 0xeff   : > { %22560 = vmatmul.mubr.msk.bf16.gmra.mrb[64].mxu1 %vm11352_vm5, %v12692_v18 }
 0xf00   : > { %22563 = vmatprep.mubr.msk.bf16.mxu1 %vm11352_vm5, %v12693_v5 }
 0xf07   : > { %22564 = vmatmul.mubr.msk.bf16.gmra.mrb[68].mxu1 %vm11352_vm5, %v12694_v50 }
 0xf08   : > { %14443 = vmatprep.mubr.bf16.mxu1 %v25410_v0 }
 0xfc2   : > { %v22553_v55 = vpop.f32.mrb[56].mxu1 }
 0xfc3   : > { %v12963_v45 = vadd.f32 %v22553_v55, %v12894_v32  ;;  %v12786_v52 = vpop.f32.mrb[57].mxu1 }
 0xfc4   : > { %v27446_v53 = vadd.f32 %v12884_v15, %v12786_v52  ;;  %v22554_v2 = vpop.f32.mrb[58].mxu1  ;;  %v12944_v15 = vpop.permute.xlu0 %12943 }
 0xfc5   : > { %v12995_v17 = vmul.f32 0.044715, %v12963_v45  ;;  %v27448_v25 = vadd.f32 %v22554_v2, %v12899_v3  ;;  %v12789_v29 = vpop.f32.mrb[59].mxu1  ;;  %v12979_v12 = vmul.f32 0.5, %v12963_v45 }
 0xfc6   : > { %v12993_v49 = vmul.f32 0.044715, %v27446_v53  ;;  %v27451_v35 = vadd.f32 %v12889_v1, %v12789_v29 }
 0xfc7   : > { %v13011_v60 = vmul.f32 %v12995_v17, %v12963_v45  ;;  %v12996_v40 = vmul.f32 0.044715, %v27448_v25 }
 0xfc8   : > { %v13009_v42 = vmul.f32 %v12993_v49, %v27446_v53  ;;  %v12994_v31 = vmul.f32 0.044715, %v27451_v35 }
 0xfc9   : > { %v13027_v13 = vmul.f32 %v13011_v60, %v12963_v45  ;;  %v13012_v19 = vmul.f32 %v12996_v40, %v27448_v25 }
 0xfca   : > { %v13025_v44 = vmul.f32 %v13009_v42, %v27446_v53  ;;  %v13010_v8 = vmul.f32 %v12994_v31, %v27451_v35  ;;  %v22557_v58 = vpop.f32.mrb[60].mxu1 }
 0xfcb   : > { %v13028_v33 = vmul.f32 %v13012_v19, %v27448_v25  ;;  %v27460_v59 = vadd.f32 %v22557_v58, %v12914_v20  ;;  %v12802_v24 = vpop.f32.mrb[61].mxu1  ;;  %v13043_v7 = vadd.f32 %v13027_v13, %v12963_v45  ;;  %v12949_v45 = vpop.permute.xlu1 %12948  ;;  %v12980_v58 = vmul.f32 0.5, %v27448_v25 }
 0xfcc   : > { %v13026_v63 = vmul.f32 %v13010_v8, %v27451_v35  ;;  %v27463_v9 = vadd.f32 %v12904_v48, %v12802_v24  ;;  %v22558_v46 = vpop.f32.mrb[62].mxu1  ;;  %v13041_v16 = vadd.f32 %v13025_v44, %v27446_v53  ;;  %v12954_v24 = vpop.permute.xlu0 %12953 }
 0xfcd   : > { %v12999_v21 = vmul.f32 0.044715, %v27460_v59  ;;  %v27467_v23 = vadd.f32 %v22558_v46, %v12919_v28  ;;  %v12805_v43 = vpop.f32.mrb[63].mxu1  ;;  %v13044_v10 = vadd.f32 %v13028_v33, %v27448_v25  ;;  %v13059_v51 = vmul.f32 0.7978846, %v13043_v7 }
 0xfce   : > { %v12997_v61 = vmul.f32 0.044715, %v27463_v9  ;;  %v27471_v36 = vadd.f32 %v12909_v30, %v12805_v43  ;;  %v13042_v39 = vadd.f32 %v13026_v63, %v27451_v35  ;;  %v13057_v38 = vmul.f32 0.7978846, %v13041_v16 }
 0xfcf   : > { %v13015_v6 = vmul.f32 %v12999_v21, %v27460_v59  ;;  %v13000_v4 = vmul.f32 0.044715, %v27467_v23  ;;  %v13060_v56 = vmul.f32 0.7978846, %v13044_v10  ;;  %24835 = vtanh.f32 %v13059_v51  ;;  %v12959_v25 = vpop.permute.xlu1 %12958 }
 0xfd0   : > { %v13013_v11 = vmul.f32 %v12997_v61, %v27463_v9  ;;  %v12998_v62 = vmul.f32 0.044715, %v27471_v36  ;;  %v13058_v18 = vmul.f32 0.7978846, %v13042_v39  ;;  %24837 = vtanh.f32 %v13057_v38 }
 0xfd1   : > { %v13031_v14 = vmul.f32 %v13015_v6, %v27460_v59  ;;  %v13016_v41 = vmul.f32 %v13000_v4, %v27467_v23  ;;  %24839 = vtanh.f32 %v13060_v56  ;;  %v12977_v28 = vmul.f32 0.5, %v27446_v53 }
 0xfd2   : > { %v13029_v34 = vmul.f32 %v13013_v11, %v27463_v9  ;;  %v13014_v47 = vmul.f32 %v12998_v62, %v27471_v36  ;;  %v22561_v27 = vpop.f32.mrb[64].mxu1  ;;  %24841 = vtanh.f32 %v13058_v18  ;;  %v12981_v16 = vmul.f32 0.5, %v27463_v9 }
 0xfd3   : > { %v13032_v50 = vmul.f32 %v13016_v41, %v27467_v23  ;;  %v27483_v57 = vadd.f32 %v22561_v27, %v12934_v37  ;;  %v12818_v5 = vpop.f32.mrb[65].mxu1  ;;  %v13047_v30 = vadd.f32 %v13031_v14, %v27460_v59 }
 0xfd4   : > { %v13030_v1 = vmul.f32 %v13014_v47, %v27471_v36  ;;  %v27486_v32 = vadd.f32 %v12924_v22, %v12818_v5  ;;  %v22562_v3 = vpop.f32.mrb[66].mxu1  ;;  %v13045_v48 = vadd.f32 %v13029_v34, %v27463_v9 }
 0xfd5   : > { %v13003_v20 = vmul.f32 0.044715, %v27483_v57  ;;  %v27491_v55 = vadd.f32 %v22562_v3, %v12939_v54  ;;  %v12821_v52 = vpop.f32.mrb[67].mxu1  ;;  %v13048_v2 = vadd.f32 %v13032_v50, %v27467_v23  ;;  %v13063_v42 = vmul.f32 0.7978846, %v13047_v30 }
 0xfd6   : > { %v13001_v17 = vmul.f32 0.044715, %v27486_v32  ;;  %v27496_v29 = vadd.f32 %v12929_v26, %v12821_v52  ;;  %v13046_v49 = vadd.f32 %v13030_v1, %v27471_v36  ;;  %v13061_v60 = vmul.f32 0.7978846, %v13045_v48 }
 0xfd7   : > { %v13019_v40 = vmul.f32 %v13003_v20, %v27483_v57  ;;  %v13004_v22 = vmul.f32 0.044715, %v27491_v55  ;;  %v13064_v31 = vmul.f32 0.7978846, %v13048_v2  ;;  %v12978_v26 = vmul.f32 0.5, %v27451_v35 }
 0xfd8   : > { %v13017_v13 = vmul.f32 %v13001_v17, %v27486_v32  ;;  %v13002_v53 = vmul.f32 0.044715, %v27496_v29  ;;  %v13062_v19 = vmul.f32 0.7978846, %v13046_v49  ;;  %24843 = vtanh.f32 %v13061_v60 }
 0xfd9   : > { %v24836_v44 = vpop.eup %24835  ;;  %v13020_v8 = vmul.f32 %v13004_v22, %v27491_v55  ;;  %24845 = vtanh.f32 %v13063_v42  ;;  %v13035_v61 = vmul.f32 %v13019_v40, %v27483_v57  ;;  %v12982_v52 = vmul.f32 0.5, %v27471_v36 }
 0xfda   : > { %v24838_v33 = vpop.eup %24837  ;;  %v13018_v7 = vmul.f32 %v13002_v53, %v27496_v29  ;;  %v22565_v63 = vpop.f32.mrb[68].mxu1  ;;  %v13091_v46 = vadd.f32 1.0, %v24836_v44  ;;  %24847 = vtanh.f32 %v13062_v19  ;;  %v13033_v43 = vmul.f32 %v13017_v13, %v27486_v32 }
 0xfdb   : > { %v24840_v21 = vpop.eup %24839  ;;  %v27509_v10 = vadd.f32 %v22565_v63, %v12954_v24  ;;  %v12834_v51 = vpop.f32.mrb[69].mxu1  ;;  %v13089_v37 = vadd.f32 1.0, %v24838_v33  ;;  %24849 = vtanh.f32 %v13064_v31  ;;  %v13036_v9 = vmul.f32 %v13020_v8, %v27491_v55 }
 0xfdc   : > { %v24842_v35 = vpop.eup %24841  ;;  %v13034_v39 = vmul.f32 %v13018_v7, %v27496_v29  ;;  %v27513_v38 = vadd.f32 %v12944_v15, %v12834_v51  ;;  %v22566_v6 = vpop.f32.mrb[70].mxu1  ;;  %v13092_v4 = vadd.f32 1.0, %v24840_v21  ;;  %v13107_v41 = vmul.f32 %v13091_v46, %v12979_v12 }
 0xfdd   : > { %v13007_v56 = vmul.f32 0.044715, %v27509_v10  ;;  %v27517_v54 = vadd.f32 %v22566_v6, %v12959_v25  ;;  %v12837_v11 = vpop.f32.mrb[71].mxu1  ;;  %v13090_v62 = vadd.f32 1.0, %v24842_v35  ;;  %v13105_v27 = vmul.f32 %v13089_v37, %v12977_v28 }
 0xfde   : > { %v13005_v18 = vmul.f32 0.044715, %v27513_v38  ;;  %v27520_v14 = vadd.f32 %v12949_v45, %v12837_v11  ;;  %v13108_v34 = vmul.f32 %v13092_v4, %v12980_v58  ;;  %v13049_v5 = vadd.f32 %v13033_v43, %v27486_v32 }
 0xfdf   : > { %v13008_v47 = vmul.f32 0.044715, %v27517_v54  ;;  %v13106_v50 = vmul.f32 %v13090_v62, %v12978_v26  ;;  %v13050_v48 = vadd.f32 %v13034_v39, %v27496_v29  ;;  %v13023_v30 = vmul.f32 %v13007_v56, %v27509_v10 }
 0xfe0   : > { %v13021_v15 = vmul.f32 %v13005_v18, %v27513_v38  ;;  %v13006_v1 = vmul.f32 0.044715, %v27520_v14  ;;  %v13122_v3 = vpack.c.bf16 %v13108_v34, %v13107_v41  ;;  %v13065_v12 = vmul.f32 0.7978846, %v13049_v5 }
 0xfe1   : > { %v13121_v20 = vpack.c.bf16 %v13106_v50, %v13105_v27  ;;  %v13024_v45 = vmul.f32 %v13008_v47, %v27517_v54  ;;  %v12983_v17 = vmul.f32 0.5, %v27460_v59  ;;  %v13066_v49 = vmul.f32 0.7978846, %v13050_v48 }
 0xfe2   : > { %v24844_v2 = vpop.eup %24843  ;;  %v13022_v28 = vmul.f32 %v13006_v1, %v27520_v14  ;;  %v13037_v40 = vmul.f32 %v13021_v15, %v27513_v38  ;;  %24851 = vtanh.f32 %v13065_v12  ;;  %v13051_v42 = vadd.f32 %v13035_v61, %v27483_v57 }
 0xfe3   : > { %v24846_v60 = vpop.eup %24845  ;;  %22567 = vmatprep.subr.bf16.mxu0 %v13121_v20  ;;  %v13093_v22 = vadd.f32 1.0, %v24844_v2  ;;  %24853 = vtanh.f32 %v13066_v49  ;;  %v13052_v53 = vadd.f32 %v13036_v9, %v27491_v55  ;;  %v13039_v59 = vmul.f32 %v13023_v30, %v27509_v10 }
 0xfe4   : > { %v24848_v31 = vpop.eup %24847  ;;  %v13038_v36 = vmul.f32 %v13022_v28, %v27520_v14  ;;  %22568 = vmatpush3.bf16.msra.mxu0 %v13121_v20  ;;  %v13095_v13 = vadd.f32 1.0, %v24846_v60  ;;  %v12984_v8 = vmul.f32 0.5, %v27467_v23  ;;  %v13067_v26 = vmul.f32 0.7978846, %v13051_v42 }
 0xfe5   : > { %v24850_v19 = vpop.eup %24849  ;;  %22569 = vmatprep.subr.bf16.mxu0 %v13122_v3  ;;  %v13094_v44 = vadd.f32 1.0, %v24848_v31  ;;  %v13040_v58 = vmul.f32 %v13024_v45, %v27517_v54  ;;  %v13109_v33 = vmul.f32 %v13093_v22, %v12981_v16  ;;  %v13068_v7 = vmul.f32 0.7978846, %v13052_v53  ;;  %v24062_v53 = vld [vmem:[#allocation17 + $0x20] sm:$0xff]  }
 0xfe6   : > { %v13096_v24 = vadd.f32 1.0, %v24850_v19  ;;  %24855 = vtanh.f32 %v13067_v26  ;;  %v13053_v46 = vadd.f32 %v13037_v40, %v27513_v38  ;;  %v13054_v21 = vadd.f32 %v13038_v36, %v27520_v14  ;;  %v24063_v19 = vld [vmem:[#allocation17 + $0x28] sm:$0xff]   ;;  %v24068_v26 = vld [vmem:[#allocation17 + $0x50] sm:$0xff]  }
 0xfe7   : > { %v13110_v63 = vmul.f32 %v13094_v44, %v12982_v52  ;;  %v13111_v43 = vmul.f32 %v13095_v13, %v12983_v17  ;;  %24857 = vtanh.f32 %v13068_v7  ;;  %v13055_v23 = vadd.f32 %v13039_v59, %v27509_v10  ;;  %v24065_v59 = vld [vmem:[#allocation17 + $0x38] sm:$0xff]   ;;  %v24066_v44 = vld [vmem:[#allocation17 + $0x40] sm:$0xff]   ;;  %v24072_v7 = vld [vmem:[#allocation17 + $0x70] sm:$0xff]  }
 0xfe8   : > { %22570 = vmatpush3.bf16.msra.mxu0 %v13122_v3  ;;  %v13112_v51 = vmul.f32 %v13096_v24, %v12984_v8  ;;  %v13069_v35 = vmul.f32 0.7978846, %v13053_v46  ;;  %v13070_v25 = vmul.f32 0.7978846, %v13054_v21  ;;  %v13056_v16 = vadd.f32 %v13040_v58, %v27517_v54  ;;  %v24067_v8 = vld [vmem:[#allocation17 + $0x48] sm:$0xff]   ;;  %v24069_v58 = vld [vmem:[#allocation17 + $0x58] sm:$0xff]  }
 0xfe9   : > { %v13123_v37 = vpack.c.bf16 %v13110_v63, %v13109_v33  ;;  %v13071_v39 = vmul.f32 0.7978846, %v13055_v23  ;;  %v12985_v11 = vmul.f32 0.5, %v27486_v32  ;;  %v12986_v62 = vmul.f32 0.5, %v27496_v29  ;;  %v24070_v33 = vld [vmem:[#allocation17 + $0x60] sm:$0xff]   ;;  %v24071_v24 = vld [vmem:[#allocation17 + $0x68] sm:$0xff]  }
 0xfea   : > { %v13124_v61 = vpack.c.bf16 %v13112_v51, %v13111_v43  ;;  %24859 = vtanh.f32 %v13069_v35  ;;  %v13072_v6 = vmul.f32 0.7978846, %v13056_v16  ;;  %v12987_v15 = vmul.f32 0.5, %v27483_v57  ;;  %v24073_v63 = vld [vmem:[#allocation17 + $0x78] sm:$0xff]   ;;  %v24074_v46 = vld [vmem:[#allocation17 + $0x80] sm:$0xff]   ;;  %v24075_v21 = vld [vmem:[#allocation17 + $0x88] sm:$0xff]  }
 0xfeb   : > { %22571 = vmatprep.subr.bf16.mxu0 %v13123_v37  ;;  %24861 = vtanh.f32 %v13070_v25  ;;  %v12988_v1 = vmul.f32 0.5, %v27491_v55  ;;  %v12989_v2 = vmul.f32 0.5, %v27513_v38  ;;  %v12990_v45 = vmul.f32 0.5, %v27520_v14  ;;  %v24059_v38 = vld [vmem:[#allocation17 + $0x8] sm:$0xff]   ;;  %v24060_v14 = vld [vmem:[#allocation17 + $0x10] sm:$0xff]   ;;  %v24077_v51 = vld [vmem:[#allocation17 + $0x98] sm:$0xff]  }
 0xfec   : > { %22572 = vmatpush3.bf16.msra.mxu0 %v13123_v37  ;;  %v24852_v4 = vpop.eup %24851  ;;  %24863 = vtanh.f32 %v13071_v39  ;;  %v12991_v57 = vmul.f32 0.5, %v27509_v10  ;;  %v12992_v40 = vmul.f32 0.5, %v27517_v54  ;;  %v24061_v10 = vld [vmem:[#allocation17 + $0x18] sm:$0xff]   ;;  %v24064_v54 = vld [vmem:[#allocation17 + $0x30] sm:$0xff]   ;;  %v24078_v37 = vld [vmem:[#allocation17 + $0xa0] sm:$0xff]  }
 0xfed   : > { %22573 = vmatprep.subr.bf16.mxu0 %v13124_v61  ;;  %v24854_v9 = vpop.eup %24853  ;;  %v13097_v56 = vadd.f32 1.0, %v24852_v4  ;;  %24865 = vtanh.f32 %v13072_v6  ;;  %v24076_v43 = vld [vmem:[#allocation17 + $0x90] sm:$0xff]   ;;  %v24079_v35 = vld [vmem:[#allocation17 + $0xa8] sm:$0xff]   ;;  %v24081_v23 = vld [vmem:[#allocation17 + $0xb8] sm:$0xff]  }
 0xfee   : > { %v13098_v18 = vadd.f32 1.0, %v24854_v9  ;;  %v24080_v25 = vld [vmem:[#allocation17 + $0xb0] sm:$0xff]   ;;  %v24083_v16 = vld [vmem:[#allocation17 + $0xc8] sm:$0xff]  }
 0xfef   : > { %v13113_v34 = vmul.f32 %v13097_v56, %v12985_v11  ;;  %v24084_v39 = vld [vmem:[#allocation19 + $0x40] ss:$8 sps:$4 sm:$0xff]   ;;  %v24086_v6 = vld [vmem:[#allocation19 + $0x44] ss:$8 sps:$4 sm:$0xff]   ;;  %v24087_v4 = vld [vmem:[#allocation19 + $0x50] ss:$8 sps:$4 sm:$0xff]  }
 0xff0   : > { %22574 = vmatpush3.bf16.msra.mxu0 %v13124_v61  ;;  %v24856_v41 = vpop.eup %24855  ;;  %v13114_v47 = vmul.f32 %v13098_v18, %v12986_v62  ;;  %v24082_v61 = vld [vmem:[#allocation17 + $0xc0] sm:$0xff]   ;;  %14411 = vmatprep.subr.bf16.mxu1 %v24086_v6  ;;  %v24089_v9 = vld [vmem:[#allocation19 + $0x54] ss:$8 sps:$4 sm:$0xff]  }
 0xff1   : > { %v24858_v27 = vpop.eup %24857  ;;  %v13099_v50 = vadd.f32 1.0, %v24856_v41  ;;  %14412 = vmatpush1.bf16.msra.mxu1 %v24084_v39  ;;  %v24090_v56 = vld [vmem:[#allocation17 + $0xd0] sm:$0xff]   ;;  %v24091_v11 = vld [vmem:[#allocation17 + $0xd8] sm:$0xff]   ;;  %v24092_v62 = vld [vmem:[#allocation19 + $0x60] ss:$8 sps:$4 sm:$0xff]  }
 0xff2   : > { %v13125_v5 = vpack.c.bf16 %v13114_v47, %v13113_v34  ;;  %v13100_v3 = vadd.f32 1.0, %v24858_v27  ;;  %14413 = vmatprep.subr.bf16.mxu1 %v24089_v9  ;;  %v24094_v18 = vld [vmem:[#allocation19 + $0x64] ss:$8 sps:$4 sm:$0xff]   ;;  %v24095_v41 = vld [vmem:[#allocation19 + $0x70] ss:$8 sps:$4 sm:$0xff]  }
 0xff3   : > { %v13115_v30 = vmul.f32 %v13099_v50, %v12987_v15  ;;  %v24097_v34 = vld [vmem:[#allocation19 + $0x74] ss:$8 sps:$4 sm:$0xff]   ;;  %v24098_v47 = vld [vmem:[#allocation17 + $0xe0] sm:$0xff]   ;;  %v24099_v27 = vld [vmem:[#allocation17 + $0xe8] sm:$0xff]  }
 0xff4   : > { %v24860_v48 = vpop.eup %24859  ;;  %22575 = vmatprep.subr.bf16.mxu0 %v13125_v5  ;;  %v13116_v20 = vmul.f32 %v13100_v3, %v12988_v1  ;;  %v24100_v50 = vld [vmem:[#allocation17 + $0xf0] sm:$0xff]   ;;  %v24102_v15 = vld [vmem:[#allocation17 + $0x100] sm:$0xff]   ;;  %v24103_v1 = vld [vmem:[#allocation17 + $0x108] sm:$0xff]  }
 0xff5   : > { %v24862_v32 = vpop.eup %24861  ;;  %22576 = vmatpush3.bf16.msra.mxu0 %v13125_v5  ;;  %v13101_v29 = vadd.f32 1.0, %v24860_v48  ;;  %14414 = vmatpush1.bf16.msra.mxu1 %v24087_v4  ;;  %v24101_v5 = vld [vmem:[#allocation17 + $0xf8] sm:$0xff]   ;;  %v24106_v3 = vld [vmem:[#allocation19 + $0x4] ss:$8 sps:$4 sm:$0xff]   ;;  %v24110_v48 = vld [vmem:[#allocation17 + $0x110] sm:$0xff]  }
 0xff6   : > { %v24864_v52 = vpop.eup %24863  ;;  %v13126_v12 = vpack.c.bf16 %v13116_v20, %v13115_v30  ;;  %v13102_v28 = vadd.f32 1.0, %v24862_v32  ;;  %14415 = vmatprep.subr.bf16.mxu1 %v24094_v18  ;;  %v24111_v30 = vld [vmem:[#allocation17 + $0x118] sm:$0xff]   ;;  %v24118_v20 = vld [vmem:[#allocation17 + $0x120] sm:$0xff]   ;;  %v24119_v32 = vld [vmem:[#allocation17 + $0x128] sm:$0xff]  }
 0xff7   : > { %v24866_v17 = vpop.eup %24865  ;;  %v13103_v49 = vadd.f32 1.0, %v24864_v52  ;;  %v13117_v55 = vmul.f32 %v13101_v29, %v12989_v2  ;;  %v24120_v29 = vld [vmem:[#allocation17 + $0x130] sm:$0xff]   ;;  %v24121_v52 = vld [vmem:[#allocation17 + $0x138] sm:$0xff]   ;;  %v24114_v39 = vld [vmem:[#allocation19 + $0x24] ss:$8 sps:$4 sm:$0xff]  }
 0xff8   : > { %22577 = vmatprep.subr.bf16.mxu0 %v13126_v12  ;;  %v13118_v60 = vmul.f32 %v13102_v28, %v12990_v45  ;;  %v13104_v22 = vadd.f32 1.0, %v24866_v17  ;;  %v24117_v18 = vld [vmem:[#allocation19 + $0x34] ss:$8 sps:$4 sm:$0xff]  }
 0xff9   : > { %22578 = vmatpush3.bf16.msra.mxu0 %v13126_v12  ;;  %v13119_v31 = vmul.f32 %v13103_v49, %v12991_v57  ;;  %14416 = vmatpush1.bf16.msra.mxu1 %v24092_v62  ;;  %v24122_v49 = vld [vmem:[#allocation17 + $0x140] sm:$0xff]  }
 0xffa   : > { %v13127_v42 = vpack.c.bf16 %v13118_v60, %v13117_v55  ;;  %v13120_v36 = vmul.f32 %v13104_v22, %v12992_v40  ;;  %14417 = vmatprep.subr.bf16.mxu1 %v24097_v34  ;;  %v24123_v55 = vld [vmem:[#allocation17 + $0x148] sm:$0xff]  }
 0xffc   : > { %22579 = vmatprep.subr.bf16.mxu0 %v13127_v42  ;;  %v13128_v13 = vpack.c.bf16 %v13120_v36, %v13119_v31 }
 0xffd   : > { %22580 = vmatpush3.bf16.msra.mxu0 %v13127_v42  ;;  %14418 = vmatpush1.bf16.msra.mxu1 %v24095_v41  ;;  %v24115_v41 = vld [vmem:[#allocation19 + $0x30] ss:$8 sps:$4 sm:$0xff]  }
 0xffe   : > { %22581 = vmatprep.subr.bf16.mxu0 %v13128_v13  ;;  %14588 = vmatprep.subr.bf16.mxu1 %v24106_v3  ;;  %v24140_v3 = vld [vmem:[#allocation17 + $0x170] sm:$0xff]  }
0x1001   : > { %22582 = vmatpush3.bf16.msra.mxu0 %v13128_v13 }
0x1004   : > { %22584 = vmatmul.mubr.bf16.vlgmr.msra.gmra.mrb[88].mxu0 %v24059_v38 }
0x1005   : > { %22587 = vmatprep.mubr.bf16.mxu0 %v24060_v14 }
0x100c   : > { %22588 = vmatmul.mubr.bf16.gmra.mrb[92].mxu0 %v24061_v10 }
0x100d   : > { %22591 = vmatprep.mubr.bf16.mxu0 %v24062_v53 }
0x1014   : > { %22592 = vmatmul.mubr.bf16.gmra.mrb[96].mxu0 %v24063_v19 }
0x1015   : > { %22595 = vmatprep.mubr.bf16.mxu0 %v24064_v54  ;;  %v24130_v54 = vld [vmem:[#allocation17 + $0x150] sm:$0xff]  }
0x101c   : > { %22596 = vmatmul.mubr.bf16.gmra.mrb[100].mxu0 %v24065_v59  ;;  %v24131_v59 = vld [vmem:[#allocation17 + $0x158] sm:$0xff]  }
0x101d   : > { %22599 = vmatprep.mubr.bf16.mxu0 %v24066_v44 }
0x1024   : > { %22600 = vmatmul.mubr.bf16.gmra.mrb[104].mxu0 %v24067_v8 }
0x1025   : > { %22603 = vmatprep.mubr.bf16.mxu0 %v24068_v26 }
0x102c   : > { %22604 = vmatmul.mubr.bf16.gmra.mrb[108].mxu0 %v24069_v58 }
0x102d   : > { %22607 = vmatprep.mubr.bf16.mxu0 %v24070_v33 }
0x1034   : > { %22608 = vmatmul.mubr.bf16.gmra.mrb[112].mxu0 %v24071_v24 }
0x1035   : > { %22611 = vmatprep.mubr.bf16.mxu0 %v24072_v7 }
0x103c   : > { %22612 = vmatmul.mubr.bf16.gmra.mrb[116].mxu0 %v24073_v63 }
0x103d   : > { %22615 = vmatprep.mubr.bf16.mxu0 %v24074_v46 }
0x1044   : > { %22616 = vmatmul.mubr.bf16.gmra.mrb[120].mxu0 %v24075_v21 }
0x1045   : > { %22619 = vmatprep.mubr.bf16.mxu0 %v24076_v43 }
0x104c   : > { %22620 = vmatmul.mubr.bf16.gmra.mrb[124].mxu0 %v24077_v51  ;;  %v24104_v51 = vld [vmem:[#allocation19] ss:$8 sps:$4 sm:$0xff]  }
0x104d   : > { %22623 = vmatprep.mubr.bf16.mxu0 %v24078_v37 }
0x1054   : > { %22624 = vmatmul.mubr.bf16.gmra.mrb[128].mxu0 %v24079_v35  ;;  %v24109_v35 = vld [vmem:[#allocation19 + $0x14] ss:$8 sps:$4 sm:$0xff]  }
0x1055   : > { %22627 = vmatprep.mubr.bf16.mxu0 %v24080_v25  ;;  %v24138_v25 = vld [vmem:[#allocation17 + $0x160] sm:$0xff]  }
0x105c   : > { %22628 = vmatmul.mubr.bf16.gmra.mrb[132].mxu0 %v24081_v23  ;;  %v24139_v23 = vld [vmem:[#allocation17 + $0x168] sm:$0xff]  }
0x105d   : > { %22631 = vmatprep.mubr.bf16.mxu0 %v24082_v61  ;;  %v24107_v61 = vld [vmem:[#allocation19 + $0x10] ss:$8 sps:$4 sm:$0xff]  }
0x1064   : > { %22632 = vmatmul.mubr.bf16.gmra.mrb[136].mxu0 %v24083_v16 }
0x1065   : > { %22635 = vmatprep.mubr.bf16.mxu0 %v24090_v56 }
0x106c   : > { %22636 = vmatmul.mubr.bf16.gmra.mrb[140].mxu0 %v24091_v11  ;;  %v24112_v11 = vld [vmem:[#allocation19 + $0x20] ss:$8 sps:$4 sm:$0xff]  }
0x106d   : > { %22639 = vmatprep.mubr.bf16.mxu0 %v24098_v47  ;;  %v24126_v47 = vld [vmem:[#allocation19 + $0x84] ss:$8 sps:$4 sm:$0xff]  }
0x1074   : > { %22640 = vmatmul.mubr.bf16.gmra.mrb[144].mxu0 %v24099_v27 }
0x1075   : > { %22643 = vmatprep.mubr.bf16.mxu0 %v24100_v50 }
0x107c   : > { %22644 = vmatmul.mubr.bf16.gmra.mrb[148].mxu0 %v24101_v5 }
0x107d   : > { %22647 = vmatprep.mubr.bf16.mxu0 %v24102_v15 }
0x1084   : > { %22648 = vmatmul.mubr.bf16.gmra.mrb[152].mxu0 %v24103_v1 }
0x1085   : > { %22651 = vmatprep.mubr.bf16.mxu0 %v24110_v48  ;;  %v24141_v48 = vld [vmem:[#allocation17 + $0x178] sm:$0xff]  }
0x108c   : > { %22652 = vmatmul.mubr.bf16.gmra.mrb[156].mxu0 %v24111_v30 }
0x108d   : > { %22655 = vmatprep.mubr.bf16.mxu0 %v24118_v20 }
0x1094   : > { %22656 = vmatmul.mubr.bf16.gmra.mrb[160].mxu0 %v24119_v32 }
0x1095   : > { %22659 = vmatprep.mubr.bf16.mxu0 %v24120_v29 }
0x109c   : > { %22660 = vmatmul.mubr.bf16.gmra.mrb[164].mxu0 %v24121_v52 }
0x109d   : > { %22663 = vmatprep.mubr.bf16.mxu0 %v24122_v49 }
0x10a4   : > { %22664 = vmatmul.mubr.bf16.gmra.mrb[168].mxu0 %v24123_v55 }
0x10a5   : > { %22667 = vmatprep.mubr.bf16.mxu0 %v24130_v54 }
0x10ac   : > { %22668 = vmatmul.mubr.bf16.gmra.mrb[172].mxu0 %v24131_v59 }
0x10ad   : > { %22671 = vmatprep.mubr.bf16.mxu0 %v24138_v25 }
0x10b4   : > { %22672 = vmatmul.mubr.bf16.gmra.mrb[176].mxu0 %v24139_v23 }
0x10b5   : > { %22675 = vmatprep.mubr.bf16.mxu0 %v24140_v3  ;;  %v24124_v3 = vld [vmem:[#allocation19 + $0x80] ss:$8 sps:$4 sm:$0xff]  }
0x10bc   : > { %22676 = vmatmul.mubr.bf16.gmra.mrb[180].mxu0 %v24141_v48 }
0x10d7   : > { %v27551_v12 = vpop.f32.mrb[88].mxu0 }
0x10d8   : > { %v27553_v2 = vpop.f32.mrb[89].mxu0 }
0x10d9   : > { %v27555_v45 = vpop.f32.mrb[90].mxu0 }
0x10da   : > { %v14315_v28 = vpack.c.bf16 %v27555_v45, %v27551_v12  ;;  %v27559_v17 = vpop.f32.mrb[91].mxu0  ;;  %v24160_v45 = vld [vmem:[#allocation17 + $0x1b0] sm:$0xff]  }
0x10db   : > { %v14314_v57 = vpack.c.bf16 %v27559_v17, %v27553_v2  ;;  %v24135_v17 = vld [vmem:[#allocation19 + $0xb0] ss:$8 sps:$4 sm:$0xff]  }
0x10df   : > { %v27563_v60 = vpop.f32.mrb[92].mxu0 }
0x10e0   : > { %v27565_v40 = vpop.f32.mrb[93].mxu0 }
0x10e1   : > { %v27567_v22 = vpop.f32.mrb[94].mxu0 }
0x10e2   : > { %v14317_v42 = vpack.c.bf16 %v27567_v22, %v27563_v60  ;;  %v27571_v31 = vpop.f32.mrb[95].mxu0  ;;  %v24162_v60 = vld [vmem:[#allocation17 + $0x1c0] sm:$0xff]   ;;  %v24163_v22 = vld [vmem:[#allocation17 + $0x1c8] sm:$0xff]  }
0x10e3   : > { %v14316_v36 = vpack.c.bf16 %v27571_v31, %v27565_v40 }
0x10e7   : > { %v27575_v13 = vpop.f32.mrb[96].mxu0 }
0x10e8   : > { %v27577_v38 = vpop.f32.mrb[97].mxu0 }
0x10e9   : > { %v27579_v14 = vpop.f32.mrb[98].mxu0 }
0x10ea   : > { %v14319_v10 = vpack.c.bf16 %v27579_v14, %v27575_v13  ;;  %v27583_v53 = vpop.f32.mrb[99].mxu0  ;;  %v24170_v13 = vld [vmem:[#allocation17 + $0x1d0] sm:$0xff]   ;;  %v24171_v14 = vld [vmem:[#allocation17 + $0x1d8] sm:$0xff]  }
0x10eb   : > { %v14318_v19 = vpack.c.bf16 %v27583_v53, %v27577_v38 }
0x10ef   : > { %v27587_v44 = vpop.f32.mrb[100].mxu0 }
0x10f0   : > { %v27589_v8 = vpop.f32.mrb[101].mxu0 }
0x10f1   : > { %v27591_v26 = vpop.f32.mrb[102].mxu0 }
0x10f2   : > { %v14321_v58 = vpack.c.bf16 %v27591_v26, %v27587_v44  ;;  %v27595_v33 = vpop.f32.mrb[103].mxu0  ;;  %v24149_v44 = vld [vmem:[#allocation19 + $0xd4] ss:$8 sps:$4 sm:$0xff]   ;;  %v24178_v26 = vld [vmem:[#allocation17 + $0x1e0] sm:$0xff]  }
0x10f3   : > { %v14320_v24 = vpack.c.bf16 %v27595_v33, %v27589_v8 }
0x10f7   : > { %v22601_v7 = vpop.f32.mrb[104].mxu0 }
0x10f8   : > { %v13803_v63 = vpop.f32.mrb[105].mxu0 }
0x10f9   : > { %v22602_v46 = vpop.f32.mrb[106].mxu0 }
0x10fa   : > { %v14331_v21 = vpack.c.bf16 %v22602_v46, %v22601_v7  ;;  %v13806_v43 = vpop.f32.mrb[107].mxu0 }
0x10fb   : > { %v14330_v37 = vpack.c.bf16 %v13806_v43, %v13803_v63  ;;  %v24143_v43 = vld [vmem:[#allocation17 + $0x188] sm:$0xff]  }
0x10fd   : > { %19964 = vmatmul.mubr.msk.bf16.vlgmr.msra.gmra.mrb[72].mxu1 %vm11352_vm5, %v14330_v37 }
0x10fe   : > { %14453 = vmatprep.mubr.bf16.mxu1 %v25410_v0  ;;  %14589 = vmatpush1.bf16.msra.mxu1 %v24104_v51 }
0x10ff   : > { %v22605_v16 = vpop.f32.mrb[108].mxu0  ;;  %14590 = vmatprep.subr.bf16.mxu1 %v24109_v35 }
0x1100   : > { %v13819_v6 = vpop.f32.mrb[109].mxu0 }
0x1101   : > { %v22606_v4 = vpop.f32.mrb[110].mxu0 }
0x1102   : > { %v14333_v9 = vpack.c.bf16 %v22606_v4, %v22605_v16  ;;  %v13822_v56 = vpop.f32.mrb[111].mxu0  ;;  %14591 = vmatpush1.bf16.msra.mxu1 %v24107_v61 }
0x1103   : > { %v14332_v62 = vpack.c.bf16 %v13822_v56, %v13819_v6  ;;  %14592 = vmatprep.subr.bf16.mxu1 %v24114_v39 }
0x1105   : > { %19965 = vmatmul.mubr.msk.bf16.gmra.mrb[76].mxu1 %vm11352_vm5, %v14331_v21  ;;  %v24142_v21 = vld [vmem:[#allocation17 + $0x180] sm:$0xff]  }
0x1106   : > { %14463 = vmatprep.mubr.bf16.mxu1 %v25410_v0  ;;  %14593 = vmatpush1.bf16.msra.mxu1 %v24112_v11  ;;  %v24150_v11 = vld [vmem:[#allocation17 + $0x190] sm:$0xff]  }
0x1107   : > { %v22609_v34 = vpop.f32.mrb[112].mxu0  ;;  %14594 = vmatprep.subr.bf16.mxu1 %v24117_v18  ;;  %22679 = vmatprep.mubr.bf16.mxu0 %v24142_v21  ;;  %v24134_v21 = vld [vmem:[#allocation19 + $0xa4] ss:$8 sps:$4 sm:$0xff]  }
0x1108   : > { %v13835_v27 = vpop.f32.mrb[113].mxu0  ;;  %22680 = vmatmul.mubr.bf16.gmra.mrb[184].mxu0 %v24143_v43  ;;  %v24132_v43 = vld [vmem:[#allocation19 + $0xa0] ss:$8 sps:$4 sm:$0xff]  }
0x1109   : > { %v22610_v50 = vpop.f32.mrb[114].mxu0  ;;  %22683 = vmatprep.mubr.bf16.mxu0 %v24150_v11  ;;  %v24137_v11 = vld [vmem:[#allocation19 + $0xb4] ss:$8 sps:$4 sm:$0xff]  }
0x110a   : > { %v14335_v5 = vpack.c.bf16 %v22610_v50, %v22609_v34  ;;  %v13838_v15 = vpop.f32.mrb[115].mxu0  ;;  %14595 = vmatpush1.bf16.msra.mxu1 %v24115_v41 }
0x110b   : > { %v14334_v1 = vpack.c.bf16 %v13838_v15, %v13835_v27  ;;  %14782 = vmatprep.subr.bf16.mxu1 %v24126_v47 }
0x110d   : > { %19966 = vmatmul.mubr.msk.bf16.gmra.mrb[80].mxu1 %vm11352_vm5, %v14332_v62  ;;  %v24151_v62 = vld [vmem:[#allocation17 + $0x198] sm:$0xff]  }
0x110e   : > { %14473 = vmatprep.mubr.bf16.mxu1 %v25410_v0 }
0x110f   : > { %v22613_v30 = vpop.f32.mrb[116].mxu0 }
0x1110   : > { %v13851_v20 = vpop.f32.mrb[117].mxu0  ;;  %22684 = vmatmul.mubr.bf16.gmra.mrb[188].mxu0 %v24151_v62  ;;  %v24146_v62 = vld [vmem:[#allocation19 + $0xc4] ss:$8 sps:$4 sm:$0xff]  }
0x1111   : > { %v22614_v32 = vpop.f32.mrb[118].mxu0 }
0x1112   : > { %v14337_v29 = vpack.c.bf16 %v22614_v32, %v22613_v30  ;;  %v13854_v52 = vpop.f32.mrb[119].mxu0 }
0x1113   : > { %v14336_v49 = vpack.c.bf16 %v13854_v52, %v13851_v20  ;;  %v24129_v20 = vld [vmem:[#allocation19 + $0x94] ss:$8 sps:$4 sm:$0xff]   ;;  %v24159_v52 = vld [vmem:[#allocation17 + $0x1a8] sm:$0xff]  }
0x1115   : > { %19967 = vmatmul.mubr.msk.bf16.gmra.mrb[84].mxu1 %vm11352_vm5, %v14333_v9 }
0x1116   : > { %14483 = vmatprep.mubr.bf16.mxu1 %v25410_v0 }
0x1117   : > { %v27607_v55 = vpop.f32.mrb[120].mxu0 }
0x1118   : > { %v27609_v54 = vpop.f32.mrb[121].mxu0 }
0x1119   : > { %v27611_v59 = vpop.f32.mrb[122].mxu0 }
0x111a   : > { %v14702_v7 = vpack.c.bf16 %v27611_v59, %v27607_v55  ;;  %v27615_v63 = vpop.f32.mrb[123].mxu0  ;;  %v24180_v59 = vld [vmem:[#allocation17 + $0x1f0] sm:$0xff]  }
0x111b   : > { %v14701_v46 = vpack.c.bf16 %v27615_v63, %v27609_v54  ;;  %v24155_v63 = vld [vmem:[#allocation19 + $0xf0] ss:$8 sps:$4 sm:$0xff]  }
0x111d   : > { %19968 = vmatmul.mubr.msk.bf16.gmra.mrb[88].mxu1 %vm11352_vm5, %v14334_v1 }
0x111e   : > { %14493 = vmatprep.mubr.bf16.mxu1 %v25410_v0 }
0x111f   : > { %v27621_v51 = vpop.f32.mrb[124].mxu0 }
0x1120   : > { %v27623_v37 = vpop.f32.mrb[125].mxu0 }
0x1121   : > { %v27625_v35 = vpop.f32.mrb[126].mxu0 }
0x1122   : > { %v14704_v25 = vpack.c.bf16 %v27625_v35, %v27621_v51  ;;  %v27629_v23 = vpop.f32.mrb[127].mxu0  ;;  %v24182_v51 = vld [vmem:[#allocation17 + $0x200] sm:$0xff]   ;;  %v24183_v35 = vld [vmem:[#allocation17 + $0x208] sm:$0xff]  }
0x1123   : > { %v14703_v61 = vpack.c.bf16 %v27629_v23, %v27623_v37 }
0x1125   : > { %19969 = vmatmul.mubr.msk.bf16.gmra.mrb[92].mxu1 %vm11352_vm5, %v14335_v5 }
0x1126   : > { %14503 = vmatprep.mubr.bf16.mxu1 %v25410_v0 }
0x1127   : > { %v27635_v16 = vpop.f32.mrb[128].mxu0 }
0x1128   : > { %v27637_v39 = vpop.f32.mrb[129].mxu0 }
0x1129   : > { %v27639_v6 = vpop.f32.mrb[130].mxu0 }
0x112a   : > { %v14706_v4 = vpack.c.bf16 %v27639_v6, %v27635_v16  ;;  %v27643_v9 = vpop.f32.mrb[131].mxu0  ;;  %v24190_v16 = vld [vmem:[#allocation17 + $0x210] sm:$0xff]   ;;  %v24191_v6 = vld [vmem:[#allocation17 + $0x218] sm:$0xff]  }
0x112b   : > { %v14705_v56 = vpack.c.bf16 %v27643_v9, %v27637_v39 }
0x112d   : > { %19970 = vmatmul.mubr.msk.bf16.gmra.mrb[96].mxu1 %vm11352_vm5, %v14336_v49  ;;  %v24127_v49 = vld [vmem:[#allocation19 + $0x90] ss:$8 sps:$4 sm:$0xff]  }
0x112e   : > { %14513 = vmatprep.mubr.bf16.mxu1 %v25410_v0 }
0x112f   : > { %v27649_v18 = vpop.f32.mrb[132].mxu0 }
0x1130   : > { %v27651_v41 = vpop.f32.mrb[133].mxu0 }
0x1131   : > { %v27653_v34 = vpop.f32.mrb[134].mxu0 }
0x1132   : > { %v14708_v47 = vpack.c.bf16 %v27653_v34, %v27649_v18  ;;  %v27657_v27 = vpop.f32.mrb[135].mxu0  ;;  %v24169_v18 = vld [vmem:[#allocation19 + $0x114] ss:$8 sps:$4 sm:$0xff]   ;;  %v24198_v34 = vld [vmem:[#allocation17 + $0x220] sm:$0xff]  }
0x1133   : > { %v14707_v50 = vpack.c.bf16 %v27657_v27, %v27651_v41 }
0x1135   : > { %19971 = vmatmul.mubr.msk.bf16.gmra.mrb[100].mxu1 %vm11352_vm5, %v14337_v29  ;;  %v24158_v29 = vld [vmem:[#allocation17 + $0x1a0] sm:$0xff]  }
0x1136   : > { %14620 = vmatprep.mubr.bf16.mxu1 %v25410_v0  ;;  %22687 = vmatprep.mubr.bf16.mxu0 %v24158_v29 }
0x1137   : > { %v27663_v5 = vpop.f32.mrb[136].mxu0  ;;  %22688 = vmatmul.mubr.bf16.gmra.mrb[192].mxu0 %v24159_v52 }
0x1138   : > { %v27665_v15 = vpop.f32.mrb[137].mxu0  ;;  %22691 = vmatprep.mubr.bf16.mxu0 %v24160_v45  ;;  %v24144_v45 = vld [vmem:[#allocation19 + $0xc0] ss:$8 sps:$4 sm:$0xff]  }
0x1139   : > { %v27667_v1 = vpop.f32.mrb[138].mxu0 }
0x113a   : > { %v14928_v48 = vpack.c.bf16 %v27667_v1, %v27663_v5  ;;  %v27671_v30 = vpop.f32.mrb[139].mxu0  ;;  %v24200_v1 = vld [vmem:[#allocation17 + $0x230] sm:$0xff]  }
0x113b   : > { %v14927_v32 = vpack.c.bf16 %v27671_v30, %v27665_v15  ;;  %v24175_v30 = vld [vmem:[#allocation19 + $0x130] ss:$8 sps:$4 sm:$0xff]  }
0x113d   : > { %19980 = vmatmul.mubr.msk.bf16.vlgmr.msra.gmra.mrb[72].mxu1 %vm11352_vm5, %v14314_v57 }
0x113e   : > { %14630 = vmatprep.mubr.bf16.mxu1 %v25410_v0  ;;  %14783 = vmatpush1.bf16.msra.mxu1 %v24124_v3 }
0x113f   : > { %14784 = vmatprep.subr.bf16.mxu1 %v24129_v20  ;;  %v27684_v2 = vpop.f32.mrb[140].mxu0 }
0x1140   : > { %v27687_v57 = vpop.f32.mrb[141].mxu0 }
0x1141   : > { %v27689_v3 = vpop.f32.mrb[142].mxu0 }
0x1142   : > { %14785 = vmatpush1.bf16.msra.mxu1 %v24127_v49  ;;  %v14930_v20 = vpack.c.bf16 %v27689_v3, %v27684_v2  ;;  %v27693_v29 = vpop.f32.mrb[143].mxu0 }
0x1143   : > { %14786 = vmatprep.subr.bf16.mxu1 %v24134_v21  ;;  %v14929_v12 = vpack.c.bf16 %v27693_v29, %v27687_v57 }
0x1145   : > { %19981 = vmatmul.mubr.msk.bf16.gmra.mrb[76].mxu1 %vm11352_vm5, %v14315_v28  ;;  %v24161_v28 = vld [vmem:[#allocation17 + $0x1b8] sm:$0xff]  }
0x1146   : > { %14640 = vmatprep.mubr.bf16.mxu1 %v25410_v0  ;;  %14787 = vmatpush1.bf16.msra.mxu1 %v24132_v43 }
0x1147   : > { %14788 = vmatprep.subr.bf16.mxu1 %v24137_v11  ;;  %22692 = vmatmul.mubr.bf16.gmra.mrb[196].mxu0 %v24161_v28  ;;  %v27706_v52 = vpop.f32.mrb[144].mxu0  ;;  %v24147_v28 = vld [vmem:[#allocation19 + $0xd0] ss:$8 sps:$4 sm:$0xff]  }
0x1148   : > { %v27709_v49 = vpop.f32.mrb[145].mxu0  ;;  %22695 = vmatprep.mubr.bf16.mxu0 %v24162_v60  ;;  %v24154_v60 = vld [vmem:[#allocation19 + $0xe4] ss:$8 sps:$4 sm:$0xff]  }
0x1149   : > { %v27711_v40 = vpop.f32.mrb[146].mxu0 }
0x114a   : > { %14789 = vmatpush1.bf16.msra.mxu1 %v24135_v17  ;;  %v14932_v31 = vpack.c.bf16 %v27711_v40, %v27706_v52 }
0x114b   : > { %15008 = vmatprep.subr.bf16.mxu1 %v24146_v62 }
0x114d   : > { %19982 = vmatmul.mubr.msk.bf16.gmra.mrb[80].mxu1 %vm11352_vm5, %v14316_v36  ;;  %v27715_v36 = vpop.f32.mrb[147].mxu0 }
0x114e   : > { %14650 = vmatprep.mubr.bf16.mxu1 %v25410_v0  ;;  %v14931_v21 = vpack.c.bf16 %v27715_v36, %v27709_v49 }
0x114f   : > { %22696 = vmatmul.mubr.bf16.gmra.mrb[200].mxu0 %v24163_v22  ;;  %v24152_v22 = vld [vmem:[#allocation19 + $0xe0] ss:$8 sps:$4 sm:$0xff]  }
0x1150   : > { %22699 = vmatprep.mubr.bf16.mxu0 %v24170_v13  ;;  %v24157_v13 = vld [vmem:[#allocation19 + $0xf4] ss:$8 sps:$4 sm:$0xff]  }
0x1155   : > { %19983 = vmatmul.mubr.msk.bf16.gmra.mrb[84].mxu1 %vm11352_vm5, %v14317_v42  ;;  %v27728_v42 = vpop.f32.mrb[148].mxu0 }
0x1156   : > { %14660 = vmatprep.mubr.bf16.mxu1 %v25410_v0  ;;  %v27731_v43 = vpop.f32.mrb[149].mxu0 }
0x1157   : > { %v27733_v38 = vpop.f32.mrb[150].mxu0  ;;  %22700 = vmatmul.mubr.bf16.gmra.mrb[204].mxu0 %v24171_v14  ;;  %v24166_v14 = vld [vmem:[#allocation19 + $0x104] ss:$8 sps:$4 sm:$0xff]  }
0x1158   : > { %v14934_v53 = vpack.c.bf16 %v27733_v38, %v27728_v42  ;;  %22703 = vmatprep.mubr.bf16.mxu0 %v24178_v26  ;;  %v24189_v42 = vld [vmem:[#allocation19 + $0x154] ss:$8 sps:$4 sm:$0xff]   ;;  %v24187_v38 = vld [vmem:[#allocation19 + $0x150] ss:$8 sps:$4 sm:$0xff]  }
0x115d   : > { %19984 = vmatmul.mubr.msk.bf16.gmra.mrb[88].mxu1 %vm11352_vm5, %v14318_v19  ;;  %v27737_v19 = vpop.f32.mrb[151].mxu0 }
0x115e   : > { %14670 = vmatprep.mubr.bf16.mxu1 %v25410_v0  ;;  %v14933_v11 = vpack.c.bf16 %v27737_v19, %v27731_v43 }
0x1165   : > { %19985 = vmatmul.mubr.msk.bf16.gmra.mrb[92].mxu1 %vm11352_vm5, %v14319_v10  ;;  %v27750_v10 = vpop.f32.mrb[152].mxu0 }
0x1166   : > { %14680 = vmatprep.mubr.bf16.mxu1 %v25410_v0  ;;  %v27753_v17 = vpop.f32.mrb[153].mxu0 }
0x1167   : > { %v27755_v8 = vpop.f32.mrb[154].mxu0 }
0x1168   : > { %v15154_v33 = vpack.c.bf16 %v27755_v8, %v27750_v10 }
0x116d   : > { %19986 = vmatmul.mubr.msk.bf16.gmra.mrb[96].mxu1 %vm11352_vm5, %v14320_v24  ;;  %v27759_v24 = vpop.f32.mrb[155].mxu0 }
0x116e   : > { %14690 = vmatprep.mubr.bf16.mxu1 %v25410_v0  ;;  %v15153_v62 = vpack.c.bf16 %v27759_v24, %v27753_v17  ;;  %v27772_v54 = vpop.f32.mrb[156].mxu0  ;;  %v24195_v17 = vld [vmem:[#allocation19 + $0x170] ss:$8 sps:$4 sm:$0xff]  }
0x1175   : > { %19987 = vmatmul.mubr.msk.bf16.gmra.mrb[100].mxu1 %vm11352_vm5, %v14321_v58  ;;  %v24179_v58 = vld [vmem:[#allocation17 + $0x1e8] sm:$0xff]  }
0x1176   : > { %14814 = vmatprep.mubr.bf16.mxu1 %v25410_v0  ;;  %22704 = vmatmul.mubr.bf16.gmra.mrb[208].mxu0 %v24179_v58 }
0x1177   : > { %22707 = vmatprep.mubr.bf16.mxu0 %v24180_v59  ;;  %v24164_v59 = vld [vmem:[#allocation19 + $0x100] ss:$8 sps:$4 sm:$0xff]  }
0x117d   : > { %19996 = vmatmul.mubr.msk.bf16.vlgmr.msra.gmra.mrb[72].mxu1 %vm11352_vm5, %v14701_v46  ;;  %v27775_v46 = vpop.f32.mrb[157].mxu0 }
0x117e   : > { %14824 = vmatprep.mubr.bf16.mxu1 %v25410_v0  ;;  %15009 = vmatpush1.bf16.msra.mxu1 %v24144_v45  ;;  %v27777_v45 = vpop.f32.mrb[158].mxu0 }
0x117f   : > { %15010 = vmatprep.subr.bf16.mxu1 %v24149_v44  ;;  %v15156_v44 = vpack.c.bf16 %v27777_v45, %v27772_v54  ;;  %v27781_v26 = vpop.f32.mrb[159].mxu0 }
0x1180   : > { %v15155_v55 = vpack.c.bf16 %v27781_v26, %v27775_v46  ;;  %v27794_v58 = vpop.f32.mrb[160].mxu0 }
0x1182   : > { %15011 = vmatpush1.bf16.msra.mxu1 %v24147_v28  ;;  %v27797_v28 = vpop.f32.mrb[161].mxu0 }
0x1183   : > { %15012 = vmatprep.subr.bf16.mxu1 %v24154_v60  ;;  %v27799_v37 = vpop.f32.mrb[162].mxu0 }
0x1184   : > { %v15158_v23 = vpack.c.bf16 %v27799_v37, %v27794_v58 }
0x1185   : > { %19997 = vmatmul.mubr.msk.bf16.gmra.mrb[76].mxu1 %vm11352_vm5, %v14702_v7  ;;  %v24181_v7 = vld [vmem:[#allocation17 + $0x1f8] sm:$0xff]  }
0x1186   : > { %14834 = vmatprep.mubr.bf16.mxu1 %v25410_v0  ;;  %15013 = vmatpush1.bf16.msra.mxu1 %v24152_v22 }
0x1187   : > { %15014 = vmatprep.subr.bf16.mxu1 %v24157_v13  ;;  %22708 = vmatmul.mubr.bf16.gmra.mrb[212].mxu0 %v24181_v7  ;;  %v24167_v7 = vld [vmem:[#allocation19 + $0x110] ss:$8 sps:$4 sm:$0xff]  }
0x1188   : > { %22711 = vmatprep.mubr.bf16.mxu0 %v24182_v51  ;;  %v24174_v51 = vld [vmem:[#allocation19 + $0x124] ss:$8 sps:$4 sm:$0xff]  }
0x118a   : > { %15015 = vmatpush1.bf16.msra.mxu1 %v24155_v63 }
0x118b   : > { %15234 = vmatprep.subr.bf16.mxu1 %v24166_v14 }
0x118d   : > { %19998 = vmatmul.mubr.msk.bf16.gmra.mrb[80].mxu1 %vm11352_vm5, %v14703_v61  ;;  %v27803_v61 = vpop.f32.mrb[163].mxu0 }
0x118e   : > { %14844 = vmatprep.mubr.bf16.mxu1 %v25410_v0  ;;  %v15157_v60 = vpack.c.bf16 %v27803_v61, %v27797_v28 }
0x118f   : > { %22712 = vmatmul.mubr.bf16.gmra.mrb[216].mxu0 %v24183_v35  ;;  %v24172_v35 = vld [vmem:[#allocation19 + $0x120] ss:$8 sps:$4 sm:$0xff]  }
0x1190   : > { %22715 = vmatprep.mubr.bf16.mxu0 %v24190_v16  ;;  %v24177_v16 = vld [vmem:[#allocation19 + $0x134] ss:$8 sps:$4 sm:$0xff]  }
0x1195   : > { %19999 = vmatmul.mubr.msk.bf16.gmra.mrb[84].mxu1 %vm11352_vm5, %v14704_v25  ;;  %v27816_v25 = vpop.f32.mrb[164].mxu0 }
0x1196   : > { %14854 = vmatprep.mubr.bf16.mxu1 %v25410_v0  ;;  %v27819_v22 = vpop.f32.mrb[165].mxu0 }
0x1197   : > { %v27821_v39 = vpop.f32.mrb[166].mxu0  ;;  %22716 = vmatmul.mubr.bf16.gmra.mrb[220].mxu0 %v24191_v6  ;;  %v24186_v6 = vld [vmem:[#allocation19 + $0x144] ss:$8 sps:$4 sm:$0xff]  }
0x1198   : > { %v15160_v9 = vpack.c.bf16 %v27821_v39, %v27816_v25  ;;  %22719 = vmatprep.mubr.bf16.mxu0 %v24198_v34  ;;  %v24207_v25 = vld [vmem:[#allocation19 + $0x194] ss:$8 sps:$4 sm:$0xff]   ;;  %v24205_v39 = vld [vmem:[#allocation19 + $0x190] ss:$8 sps:$4 sm:$0xff]  }
0x119d   : > { %20000 = vmatmul.mubr.msk.bf16.gmra.mrb[88].mxu1 %vm11352_vm5, %v14705_v56  ;;  %v27825_v56 = vpop.f32.mrb[167].mxu0 }
0x119e   : > { %14864 = vmatprep.mubr.bf16.mxu1 %v25410_v0  ;;  %v15159_v13 = vpack.c.bf16 %v27825_v56, %v27819_v22 }
0x11a5   : > { %20001 = vmatmul.mubr.msk.bf16.gmra.mrb[92].mxu1 %vm11352_vm5, %v14706_v4  ;;  %v27838_v4 = vpop.f32.mrb[168].mxu0 }
0x11a6   : > { %14874 = vmatprep.mubr.bf16.mxu1 %v25410_v0  ;;  %v27841_v63 = vpop.f32.mrb[169].mxu0 }
0x11a7   : > { %v27843_v41 = vpop.f32.mrb[170].mxu0 }
0x11a8   : > { %v15380_v27 = vpack.c.bf16 %v27843_v41, %v27838_v4 }
0x11ad   : > { %20002 = vmatmul.mubr.msk.bf16.gmra.mrb[96].mxu1 %vm11352_vm5, %v14707_v50  ;;  %v27847_v50 = vpop.f32.mrb[171].mxu0 }
0x11ae   : > { %14884 = vmatprep.mubr.bf16.mxu1 %v25410_v0  ;;  %v15379_v14 = vpack.c.bf16 %v27847_v50, %v27841_v63  ;;  %v27860_v15 = vpop.f32.mrb[172].mxu0  ;;  %v24211_v63 = vld [vmem:[#allocation19 + $0x1b0] ss:$8 sps:$4 sm:$0xff]  }
0x11b5   : > { %20003 = vmatmul.mubr.msk.bf16.gmra.mrb[100].mxu1 %vm11352_vm5, %v14708_v47  ;;  %v24199_v47 = vld [vmem:[#allocation17 + $0x228] sm:$0xff]  }
0x11b6   : > { %15040 = vmatprep.mubr.bf16.mxu1 %v25410_v0  ;;  %22720 = vmatmul.mubr.bf16.gmra.mrb[224].mxu0 %v24199_v47 }
0x11b7   : > { %22723 = vmatprep.mubr.bf16.mxu0 %v24200_v1 }
0x11bd   : > { %20012 = vmatmul.mubr.msk.bf16.vlgmr.msra.gmra.mrb[72].mxu1 %vm11352_vm5, %v14927_v32  ;;  %v27863_v32 = vpop.f32.mrb[173].mxu0 }
0x11be   : > { %15050 = vmatprep.mubr.bf16.mxu1 %v25410_v0  ;;  %15235 = vmatpush1.bf16.msra.mxu1 %v24164_v59  ;;  %v27865_v59 = vpop.f32.mrb[174].mxu0 }
0x11bf   : > { %15236 = vmatprep.subr.bf16.mxu1 %v24169_v18  ;;  %v15382_v18 = vpack.c.bf16 %v27865_v59, %v27860_v15  ;;  %v27869_v34 = vpop.f32.mrb[175].mxu0 }
0x11c0   : > { %v15381_v5 = vpack.c.bf16 %v27869_v34, %v27863_v32  ;;  %v27883_v47 = vpop.f32.mrb[176].mxu0 }
0x11c1   : > { %v27886_v57 = vpop.f32.mrb[177].mxu0 }
0x11c2   : > { %15237 = vmatpush1.bf16.msra.mxu1 %v24167_v7  ;;  %v27888_v29 = vpop.f32.mrb[178].mxu0 }
0x11c3   : > { %15238 = vmatprep.subr.bf16.mxu1 %v24174_v51  ;;  %v27892_v7 = vpop.f32.mrb[179].mxu0 }
0x11c4   : > { %v15383_v51 = vpack.c.bf16 %v27892_v7, %v27886_v57  ;;  %v27905_v2 = vpop.f32.mrb[180].mxu0 }
0x11c5   : > { %20013 = vmatmul.mubr.msk.bf16.gmra.mrb[76].mxu1 %vm11352_vm5, %v14928_v48  ;;  %v24201_v48 = vld [vmem:[#allocation17 + $0x238] sm:$0xff]   ;;  %v27908_v3 = vpop.f32.mrb[181].mxu0 }
0x11c6   : > { %15060 = vmatprep.mubr.bf16.mxu1 %v25410_v0  ;;  %15239 = vmatpush1.bf16.msra.mxu1 %v24172_v35  ;;  %v24184_v35 = vld [vmem:[#allocation19 + $0x140] ss:$8 sps:$4 sm:$0xff]  }
0x11c7   : > { %15240 = vmatprep.subr.bf16.mxu1 %v24177_v16  ;;  %22724 = vmatmul.mubr.bf16.gmra.mrb[228].mxu0 %v24201_v48  ;;  %v24192_v16 = vld [vmem:[#allocation19 + $0x160] ss:$8 sps:$4 sm:$0xff]  }
0x11c8   : > { %16784 = vmatprep.mubr.bf16.mxu0 %v25410_v0 }
0x11ca   : > { %15241 = vmatpush1.bf16.msra.mxu1 %v24175_v30  ;;  %v24197_v30 = vld [vmem:[#allocation19 + $0x174] ss:$8 sps:$4 sm:$0xff]  }
0x11cb   : > { %15460 = vmatprep.subr.bf16.mxu1 %v24186_v6 }
0x11cd   : > { %20014 = vmatmul.mubr.msk.bf16.gmra.mrb[80].mxu1 %vm11352_vm5, %v14929_v12  ;;  %v15384_v12 = vpack.c.bf16 %v27888_v29, %v27883_v47 }
0x11ce   : > { %15070 = vmatprep.mubr.bf16.mxu1 %v25410_v0 }
0x11d5   : > { %20015 = vmatmul.mubr.msk.bf16.gmra.mrb[84].mxu1 %vm11352_vm5, %v14930_v20  ;;  %v27910_v20 = vpop.f32.mrb[182].mxu0 }
0x11d6   : > { %15080 = vmatprep.mubr.bf16.mxu1 %v25410_v0  ;;  %v15386_v49 = vpack.c.bf16 %v27910_v20, %v27905_v2  ;;  %v27914_v36 = vpop.f32.mrb[183].mxu0  ;;  %v24219_v2 = vld [vmem:[#allocation19 + $0x1d4] ss:$8 sps:$4 sm:$0xff]   ;;  %v24217_v20 = vld [vmem:[#allocation19 + $0x1d0] ss:$8 sps:$4 sm:$0xff]  }
0x11db   : > { %v27927_v52 = vpop.f32.mrb[184].mxu0 }
0x11dc   : > { %v27930_v40 = vpop.f32.mrb[185].mxu0 }
0x11dd   : > { %20016 = vmatmul.mubr.msk.bf16.gmra.mrb[88].mxu1 %vm11352_vm5, %v14931_v21  ;;  %v15385_v21 = vpack.c.bf16 %v27914_v36, %v27908_v3 }
0x11de   : > { %15090 = vmatprep.mubr.bf16.mxu1 %v25410_v0 }
0x11e5   : > { %20017 = vmatmul.mubr.msk.bf16.gmra.mrb[92].mxu1 %vm11352_vm5, %v14932_v31  ;;  %v27932_v31 = vpop.f32.mrb[186].mxu0 }
0x11e6   : > { %15100 = vmatprep.mubr.bf16.mxu1 %v25410_v0  ;;  %v15606_v43 = vpack.c.bf16 %v27932_v31, %v27927_v52  ;;  %v27936_v19 = vpop.f32.mrb[187].mxu0 }
0x11e7   : > { %v27949_v6 = vpop.f32.mrb[188].mxu0 }
0x11e8   : > { %v27952_v24 = vpop.f32.mrb[189].mxu0 }
0x11e9   : > { %v27954_v1 = vpop.f32.mrb[190].mxu0 }
0x11ea   : > { %v15608_v48 = vpack.c.bf16 %v27954_v1, %v27949_v6 }
0x11ed   : > { %20018 = vmatmul.mubr.msk.bf16.gmra.mrb[96].mxu1 %vm11352_vm5, %v14933_v11  ;;  %v15605_v11 = vpack.c.bf16 %v27936_v19, %v27930_v40  ;;  %v24223_v40 = vld [vmem:[#allocation19 + $0x1f0] ss:$8 sps:$4 sm:$0xff]  }
0x11ee   : > { %15110 = vmatprep.mubr.bf16.mxu1 %v25410_v0 }
0x11f5   : > { %20019 = vmatmul.mubr.msk.bf16.gmra.mrb[100].mxu1 %vm11352_vm5, %v14934_v53  ;;  %v24194_v53 = vld [vmem:[#allocation19 + $0x164] ss:$8 sps:$4 sm:$0xff]  }
0x11f6   : > { %15266 = vmatprep.mubr.bf16.mxu1 %v25410_v0 }
0x11fd   : > { %20028 = vmatmul.mubr.msk.bf16.vlgmr.msra.gmra.mrb[72].mxu1 %vm11352_vm5, %v15153_v62  ;;  %v24204_v62 = vld [vmem:[#allocation19 + $0x184] ss:$8 sps:$4 sm:$0xff]  }
0x11fe   : > { %15276 = vmatprep.mubr.bf16.mxu1 %v25410_v0  ;;  %15461 = vmatpush1.bf16.msra.mxu1 %v24184_v35  ;;  %v27958_v35 = vpop.f32.mrb[191].mxu0 }
0x11ff   : > { %15462 = vmatprep.subr.bf16.mxu1 %v24189_v42  ;;  %v15607_v10 = vpack.c.bf16 %v27958_v35, %v27952_v24 }
0x1202   : > { %15463 = vmatpush1.bf16.msra.mxu1 %v24187_v38  ;;  %v24202_v38 = vld [vmem:[#allocation19 + $0x180] ss:$8 sps:$4 sm:$0xff]  }
0x1203   : > { %15464 = vmatprep.subr.bf16.mxu1 %v24194_v53  ;;  %v24208_v53 = vld [vmem:[#allocation19 + $0x1a0] ss:$8 sps:$4 sm:$0xff]  }
0x1205   : > { %20029 = vmatmul.mubr.msk.bf16.gmra.mrb[76].mxu1 %vm11352_vm5, %v15154_v33 }
0x1206   : > { %15286 = vmatprep.mubr.bf16.mxu1 %v25410_v0  ;;  %15465 = vmatpush1.bf16.msra.mxu1 %v24192_v16  ;;  %v24213_v16 = vld [vmem:[#allocation19 + $0x1b4] ss:$8 sps:$4 sm:$0xff]  }
0x1207   : > { %15466 = vmatprep.subr.bf16.mxu1 %v24197_v30 }
0x120a   : > { %15467 = vmatpush1.bf16.msra.mxu1 %v24195_v17  ;;  %v27971_v8 = vpop.f32.mrb[192].mxu0 }
0x120b   : > { %15686 = vmatprep.subr.bf16.mxu1 %v24204_v62  ;;  %v27974_v33 = vpop.f32.mrb[193].mxu0 }
0x120c   : > { %v27976_v42 = vpop.f32.mrb[194].mxu0 }
0x120d   : > { %20030 = vmatmul.mubr.msk.bf16.gmra.mrb[80].mxu1 %vm11352_vm5, %v15155_v55  ;;  %v15610_v46 = vpack.c.bf16 %v27976_v42, %v27971_v8  ;;  %v27980_v26 = vpop.f32.mrb[195].mxu0  ;;  %v24226_v8 = vld [vmem:[#allocation19 + $0x200] ss:$8 sps:$4 sm:$0xff]   ;;  %v24229_v42 = vld [vmem:[#allocation19 + $0x210] ss:$8 sps:$4 sm:$0xff]  }
0x120e   : > { %15296 = vmatprep.mubr.bf16.mxu1 %v25410_v0  ;;  %v15609_v55 = vpack.c.bf16 %v27980_v26, %v27974_v33  ;;  %v24231_v33 = vld [vmem:[#allocation19 + $0x214] ss:$8 sps:$4 sm:$0xff]   ;;  %v24232_v26 = vld [vmem:[#allocation19 + $0x220] ss:$8 sps:$4 sm:$0xff]  }
0x1215   : > { %20031 = vmatmul.mubr.msk.bf16.gmra.mrb[84].mxu1 %vm11352_vm5, %v15156_v44 }
0x1216   : > { %15306 = vmatprep.mubr.bf16.mxu1 %v25410_v0 }
0x121a   : > { %v27993_v54 = vpop.f32.mrb[196].mxu0 }
0x121b   : > { %v27996_v45 = vpop.f32.mrb[197].mxu0 }
0x121c   : > { %v27998_v44 = vpop.f32.mrb[198].mxu0 }
0x121d   : > { %20032 = vmatmul.mubr.msk.bf16.gmra.mrb[88].mxu1 %vm11352_vm5, %v15157_v60  ;;  %v15612_v28 = vpack.c.bf16 %v27998_v44, %v27993_v54  ;;  %v28002_v61 = vpop.f32.mrb[199].mxu0  ;;  %v24235_v54 = vld [vmem:[#allocation19 + $0x230] ss:$8 sps:$4 sm:$0xff]  }
0x121e   : > { %15316 = vmatprep.mubr.bf16.mxu1 %v25410_v0  ;;  %v15611_v60 = vpack.c.bf16 %v28002_v61, %v27996_v45  ;;  %v16302_v45 = vpop.permute.xlu0 %16301 }
0x1222   : > { %v28015_v58 = vpop.f32.mrb[200].mxu0 }
0x1223   : > { %v28018_v37 = vpop.f32.mrb[201].mxu0 }
0x1225   : > { %20033 = vmatmul.mubr.msk.bf16.gmra.mrb[92].mxu1 %vm11352_vm5, %v15158_v23  ;;  %v28020_v23 = vpop.f32.mrb[202].mxu0 }
0x1226   : > { %15326 = vmatprep.mubr.bf16.mxu1 %v25410_v0  ;;  %v15832_v22 = vpack.c.bf16 %v28020_v23, %v28015_v58  ;;  %v28024_v56 = vpop.f32.mrb[203].mxu0 }
0x122a   : > { %v28037_v30 = vpop.f32.mrb[204].mxu0 }
0x122b   : > { %v28040_v50 = vpop.f32.mrb[205].mxu0 }
0x122c   : > { %v28042_v17 = vpop.f32.mrb[206].mxu0 }
0x122d   : > { %20034 = vmatmul.mubr.msk.bf16.gmra.mrb[96].mxu1 %vm11352_vm5, %v15159_v13  ;;  %v15831_v13 = vpack.c.bf16 %v28024_v56, %v28018_v37  ;;  %v15834_v62 = vpack.c.bf16 %v28042_v17, %v28037_v30 }
0x122e   : > { %15336 = vmatprep.mubr.bf16.mxu1 %v25410_v0 }
0x1235   : > { %20035 = vmatmul.mubr.msk.bf16.gmra.mrb[100].mxu1 %vm11352_vm5, %v15160_v9  ;;  %v24210_v9 = vld [vmem:[#allocation19 + $0x1a4] ss:$8 sps:$4 sm:$0xff]  }
0x1236   : > { %15492 = vmatprep.mubr.bf16.mxu1 %v25410_v0 }
0x123d   : > { %20044 = vmatmul.mubr.msk.bf16.vlgmr.msra.gmra.mrb[72].mxu1 %vm11352_vm5, %v15379_v14  ;;  %v24216_v14 = vld [vmem:[#allocation19 + $0x1c4] ss:$8 sps:$4 sm:$0xff]  }
0x123e   : > { %15502 = vmatprep.mubr.bf16.mxu1 %v25410_v0  ;;  %15687 = vmatpush1.bf16.msra.mxu1 %v24202_v38  ;;  %v28046_v38 = vpop.f32.mrb[207].mxu0 }
0x123f   : > { %15688 = vmatprep.subr.bf16.mxu1 %v24207_v25  ;;  %v15833_v4 = vpack.c.bf16 %v28046_v38, %v28040_v50 }
0x1242   : > { %15689 = vmatpush1.bf16.msra.mxu1 %v24205_v39  ;;  %v24214_v39 = vld [vmem:[#allocation19 + $0x1c0] ss:$8 sps:$4 sm:$0xff]  }
0x1243   : > { %15690 = vmatprep.subr.bf16.mxu1 %v24210_v9  ;;  %v24220_v9 = vld [vmem:[#allocation19 + $0x1e0] ss:$8 sps:$4 sm:$0xff]  }
0x1245   : > { %20045 = vmatmul.mubr.msk.bf16.gmra.mrb[76].mxu1 %vm11352_vm5, %v15380_v27 }
0x1246   : > { %15512 = vmatprep.mubr.bf16.mxu1 %v25410_v0  ;;  %15691 = vmatpush1.bf16.msra.mxu1 %v24208_v53  ;;  %v24225_v53 = vld [vmem:[#allocation19 + $0x1f4] ss:$8 sps:$4 sm:$0xff]  }
0x1247   : > { %15692 = vmatprep.subr.bf16.mxu1 %v24213_v16 }
0x1249   : > { %v28059_v41 = vpop.f32.mrb[208].mxu0 }
0x124a   : > { %15693 = vmatpush1.bf16.msra.mxu1 %v24211_v63  ;;  %v28062_v27 = vpop.f32.mrb[209].mxu0 }
0x124b   : > { %15912 = vmatprep.subr.bf16.mxu1 %v24216_v14  ;;  %v28064_v25 = vpop.f32.mrb[210].mxu0 }
0x124c   : > { %v15836_v32 = vpack.c.bf16 %v28064_v25, %v28059_v41  ;;  %v28068_v34 = vpop.f32.mrb[211].mxu0 }
0x124d   : > { %20046 = vmatmul.mubr.msk.bf16.gmra.mrb[80].mxu1 %vm11352_vm5, %v15381_v5  ;;  %v15835_v5 = vpack.c.bf16 %v28068_v34, %v28062_v27  ;;  %v16312_v27 = vpop.permute.xlu0 %16311 }
0x124e   : > { %15522 = vmatprep.mubr.bf16.mxu1 %v25410_v0 }
0x1255   : > { %20047 = vmatmul.mubr.msk.bf16.gmra.mrb[84].mxu1 %vm11352_vm5, %v15382_v18 }
0x1256   : > { %15532 = vmatprep.mubr.bf16.mxu1 %v25410_v0 }
0x125a   : > { %v28081_v15 = vpop.f32.mrb[212].mxu0 }
0x125b   : > { %v28084_v59 = vpop.f32.mrb[213].mxu0 }
0x125c   : > { %v28086_v18 = vpop.f32.mrb[214].mxu0 }
0x125d   : > { %20048 = vmatmul.mubr.msk.bf16.gmra.mrb[88].mxu1 %vm11352_vm5, %v15383_v51  ;;  %v15838_v57 = vpack.c.bf16 %v28086_v18, %v28081_v15  ;;  %v28090_v7 = vpop.f32.mrb[215].mxu0 }
0x125e   : > { %15542 = vmatprep.mubr.bf16.mxu1 %v25410_v0  ;;  %v15837_v51 = vpack.c.bf16 %v28090_v7, %v28084_v59 }
0x1262   : > { %v28103_v47 = vpop.f32.mrb[216].mxu0 }
0x1263   : > { %v28106_v29 = vpop.f32.mrb[217].mxu0 }
0x1265   : > { %20049 = vmatmul.mubr.msk.bf16.gmra.mrb[92].mxu1 %vm11352_vm5, %v15384_v12  ;;  %v28108_v12 = vpop.f32.mrb[218].mxu0 }
0x1266   : > { %15552 = vmatprep.mubr.bf16.mxu1 %v25410_v0  ;;  %v16058_v3 = vpack.c.bf16 %v28108_v12, %v28103_v47  ;;  %v28112_v36 = vpop.f32.mrb[219].mxu0 }
0x126a   : > { %v28125_v16 = vpop.f32.mrb[220].mxu0 }
0x126b   : > { %v28128_v19 = vpop.f32.mrb[221].mxu0 }
0x126c   : > { %v28130_v63 = vpop.f32.mrb[222].mxu0 }
0x126d   : > { %20050 = vmatmul.mubr.msk.bf16.gmra.mrb[96].mxu1 %vm11352_vm5, %v15385_v21  ;;  %v16057_v21 = vpack.c.bf16 %v28112_v36, %v28106_v29  ;;  %v16060_v14 = vpack.c.bf16 %v28130_v63, %v28125_v16 }
0x126e   : > { %15562 = vmatprep.mubr.bf16.mxu1 %v25410_v0 }
0x1275   : > { %20051 = vmatmul.mubr.msk.bf16.gmra.mrb[100].mxu1 %vm11352_vm5, %v15386_v49  ;;  %v24222_v49 = vld [vmem:[#allocation19 + $0x1e4] ss:$8 sps:$4 sm:$0xff]  }
0x1276   : > { %15718 = vmatprep.mubr.bf16.mxu1 %v25410_v0 }
0x127d   : > { %20060 = vmatmul.mubr.msk.bf16.vlgmr.msra.gmra.mrb[72].mxu1 %vm11352_vm5, %v15605_v11  ;;  %v24228_v11 = vld [vmem:[#allocation19 + $0x204] ss:$8 sps:$4 sm:$0xff]  }
0x127e   : > { %15728 = vmatprep.mubr.bf16.mxu1 %v25410_v0  ;;  %15913 = vmatpush1.bf16.msra.mxu1 %v24214_v39  ;;  %v28134_v39 = vpop.f32.mrb[223].mxu0 }
0x127f   : > { %15914 = vmatprep.subr.bf16.mxu1 %v24219_v2  ;;  %v16059_v52 = vpack.c.bf16 %v28134_v39, %v28128_v19 }
0x1282   : > { %15915 = vmatpush1.bf16.msra.mxu1 %v24217_v20 }
0x1283   : > { %15916 = vmatprep.subr.bf16.mxu1 %v24222_v49 }
0x1285   : > { %20061 = vmatmul.mubr.msk.bf16.gmra.mrb[76].mxu1 %vm11352_vm5, %v15606_v43 }
0x1286   : > { %15738 = vmatprep.mubr.bf16.mxu1 %v25410_v0  ;;  %15917 = vmatpush1.bf16.msra.mxu1 %v24220_v9 }
0x1287   : > { %15918 = vmatprep.subr.bf16.mxu1 %v24225_v53 }
0x1289   : > { %v22721_v31 = vpop.f32.mrb[224].mxu0 }
0x128a   : > { %15919 = vmatpush1.bf16.msra.mxu1 %v24223_v40  ;;  %v14283_v43 = vpop.f32.mrb[225].mxu0 }
0x128b   : > { %16138 = vmatprep.subr.bf16.mxu1 %v24228_v11  ;;  %v22722_v2 = vpop.f32.mrb[226].mxu0 }
0x128c   : > { %v16062_v20 = vpack.c.bf16 %v22722_v2, %v22721_v31  ;;  %v14286_v49 = vpop.f32.mrb[227].mxu0 }
0x128d   : > { %20062 = vmatmul.mubr.msk.bf16.gmra.mrb[80].mxu1 %vm11352_vm5, %v15607_v10  ;;  %v16061_v9 = vpack.c.bf16 %v14286_v49, %v14283_v43  ;;  %v16322_v49 = vpop.permute.xlu0 %16321 }
0x128e   : > { %15748 = vmatprep.mubr.bf16.mxu1 %v25410_v0 }
0x1295   : > { %20063 = vmatmul.mubr.msk.bf16.gmra.mrb[84].mxu1 %vm11352_vm5, %v15608_v48 }
0x1296   : > { %15758 = vmatprep.mubr.bf16.mxu1 %v25410_v0 }
0x129a   : > { %v22725_v6 = vpop.f32.mrb[228].mxu0 }
0x129b   : > { %v14299_v24 = vpop.f32.mrb[229].mxu0 }
0x129c   : > { %v22726_v1 = vpop.f32.mrb[230].mxu0 }
0x129d   : > { %20064 = vmatmul.mubr.msk.bf16.gmra.mrb[88].mxu1 %vm11352_vm5, %v15609_v55  ;;  %v16064_v48 = vpack.c.bf16 %v22726_v1, %v22725_v6  ;;  %v14302_v35 = vpop.f32.mrb[231].mxu0  ;;  %v24237_v55 = vld [vmem:[#allocation19 + $0x234] ss:$8 sps:$4 sm:$0xff]  }
0x129e   : > { %15768 = vmatprep.mubr.bf16.mxu1 %v25410_v0  ;;  %v16063_v10 = vpack.c.bf16 %v14302_v35, %v14299_v24 }
0x12a5   : > { %20065 = vmatmul.mubr.msk.bf16.gmra.mrb[92].mxu1 %vm11352_vm5, %v15610_v46  ;;  %v24234_v46 = vld [vmem:[#allocation19 + $0x224] ss:$8 sps:$4 sm:$0xff]  }
0x12a6   : > { %15778 = vmatprep.mubr.bf16.mxu1 %v25410_v0 }
0x12ad   : > { %20066 = vmatmul.mubr.msk.bf16.gmra.mrb[96].mxu1 %vm11352_vm5, %v15611_v60  ;;  %v16307_v60 = vpop.permute.xlu1 %16306 }
0x12ae   : > { %15788 = vmatprep.mubr.bf16.mxu1 %v25410_v0 }
0x12b5   : > { %20067 = vmatmul.mubr.msk.bf16.gmra.mrb[100].mxu1 %vm11352_vm5, %v15612_v28 }
0x12b6   : > { %15944 = vmatprep.mubr.bf16.mxu1 %v25410_v0 }
0x12bd   : > { %20076 = vmatmul.mubr.msk.bf16.vlgmr.msra.gmra.mrb[72].mxu1 %vm11352_vm5, %v15831_v13 }
0x12be   : > { %15954 = vmatprep.mubr.bf16.mxu1 %v25410_v0  ;;  %16139 = vmatpush1.bf16.msra.mxu1 %v24226_v8 }
0x12bf   : > { %16140 = vmatprep.subr.bf16.mxu1 %v24231_v33 }
0x12c2   : > { %16141 = vmatpush1.bf16.msra.mxu1 %v24229_v42 }
0x12c3   : > { %16142 = vmatprep.subr.bf16.mxu1 %v24234_v46 }
0x12c5   : > { %20077 = vmatmul.mubr.msk.bf16.gmra.mrb[76].mxu1 %vm11352_vm5, %v15832_v22 }
0x12c6   : > { %15964 = vmatprep.mubr.bf16.mxu1 %v25410_v0  ;;  %16143 = vmatpush1.bf16.msra.mxu1 %v24232_v26 }
0x12c7   : > { %16144 = vmatprep.subr.bf16.mxu1 %v24237_v55 }
0x12ca   : > { %16145 = vmatpush1.bf16.msra.mxu1 %v24235_v54 }
0x12cd   : > { %20078 = vmatmul.mubr.msk.bf16.gmra.mrb[80].mxu1 %vm11352_vm5, %v15833_v4 }
0x12ce   : > { %15974 = vmatprep.mubr.bf16.mxu1 %v25410_v0 }
0x12d5   : > { %20079 = vmatmul.mubr.msk.bf16.gmra.mrb[84].mxu1 %vm11352_vm5, %v15834_v62 }
0x12d6   : > { %15984 = vmatprep.mubr.bf16.mxu1 %v25410_v0 }
0x12dd   : > { %20080 = vmatmul.mubr.msk.bf16.gmra.mrb[88].mxu1 %vm11352_vm5, %v15835_v5 }
0x12de   : > { %15994 = vmatprep.mubr.bf16.mxu1 %v25410_v0 }
0x12e5   : > { %20081 = vmatmul.mubr.msk.bf16.gmra.mrb[92].mxu1 %vm11352_vm5, %v15836_v32 }
0x12e6   : > { %16004 = vmatprep.mubr.bf16.mxu1 %v25410_v0 }
0x12ed   : > { %20082 = vmatmul.mubr.msk.bf16.gmra.mrb[96].mxu1 %vm11352_vm5, %v15837_v51 }
0x12ee   : > { %16014 = vmatprep.mubr.bf16.mxu1 %v25410_v0 }
0x12f5   : > { %20083 = vmatmul.mubr.msk.bf16.gmra.mrb[100].mxu1 %vm11352_vm5, %v15838_v57  ;;  %v16317_v57 = vpop.permute.xlu1 %16316 }
0x12f6   : > { %16170 = vmatprep.mubr.bf16.mxu1 %v25410_v0 }
0x12f9   : > { %v16327_v33 = vpop.permute.xlu1 %16326 }
0x12fd   : > { %20092 = vmatmul.mubr.msk.bf16.vlgmr.msra.gmra.mrb[72].mxu1 %vm11352_vm5, %v16057_v21 }
0x12fe   : > { %16180 = vmatprep.mubr.bf16.mxu1 %v25410_v0 }
0x1305   : > { %20093 = vmatmul.mubr.msk.bf16.gmra.mrb[76].mxu1 %vm11352_vm5, %v16058_v3 }
0x1306   : > { %16190 = vmatprep.mubr.bf16.mxu1 %v25410_v0 }
0x130d   : > { %20094 = vmatmul.mubr.msk.bf16.gmra.mrb[80].mxu1 %vm11352_vm5, %v16059_v52 }
0x130e   : > { %16200 = vmatprep.mubr.bf16.mxu1 %v25410_v0 }
0x1315   : > { %20095 = vmatmul.mubr.msk.bf16.gmra.mrb[84].mxu1 %vm11352_vm5, %v16060_v14 }
0x1316   : > { %16210 = vmatprep.mubr.bf16.mxu1 %v25410_v0 }
0x131d   : > { %20096 = vmatmul.mubr.msk.bf16.gmra.mrb[88].mxu1 %vm11352_vm5, %v16061_v9 }
0x131e   : > { %16220 = vmatprep.mubr.bf16.mxu1 %v25410_v0 }
0x1325   : > { %20097 = vmatmul.mubr.msk.bf16.gmra.mrb[92].mxu1 %vm11352_vm5, %v16062_v20 }
0x1326   : > { %16230 = vmatprep.mubr.bf16.mxu1 %v25410_v0 }
0x132d   : > { %20098 = vmatmul.mubr.msk.bf16.gmra.mrb[96].mxu1 %vm11352_vm5, %v16063_v10 }
0x132e   : > { %16240 = vmatprep.mubr.bf16.mxu1 %v25410_v0 }
0x1335   : > { %20099 = vmatmul.mubr.msk.bf16.gmra.mrb[100].mxu1 %vm11352_vm5, %v16064_v48 }
0x13d0   : > { %v16172_v44 = vpop.f32.mrb[72].mxu1 }
0x13d1   : > { %v16379_v28 = vadd.f32 %v16302_v45, %v16172_v44  ;;  %v16174_v61 = vpop.f32.mrb[73].mxu1 }
0x13d2   : > { %v16380_v58 = vadd.f32 %v16302_v45, %v16174_v61  ;;  %v16176_v37 = vpop.f32.mrb[74].mxu1 }
0x13d3   : > { %v16443_v23 = vmul.f32 0.044715, %v16379_v28  ;;  %v28232_v22 = vadd.f32 %v16307_v60, %v16176_v37  ;;  %v16178_v56 = vpop.f32.mrb[75].mxu1  ;;  %v16411_v8 = vmul.f32 0.5, %v16379_v28 }
0x13d4   : > { %v16444_v13 = vmul.f32 0.044715, %v16380_v58  ;;  %v28234_v30 = vadd.f32 %v16307_v60, %v16178_v56  ;;  %v16412_v55 = vmul.f32 0.5, %v16380_v58 }
0x13d5   : > { %v16475_v50 = vmul.f32 %v16443_v23, %v16379_v28  ;;  %v16445_v17 = vmul.f32 0.044715, %v28232_v22  ;;  %v16413_v56 = vmul.f32 0.5, %v28232_v22 }
0x13d6   : > { %v16476_v62 = vmul.f32 %v16444_v13, %v16380_v58  ;;  %v16446_v38 = vmul.f32 0.044715, %v28234_v30 }
0x13d7   : > { %v16507_v4 = vmul.f32 %v16475_v50, %v16379_v28  ;;  %v16477_v41 = vmul.f32 %v16445_v17, %v28232_v22 }
0x13d8   : > { %v16508_v25 = vmul.f32 %v16476_v62, %v16380_v58  ;;  %v16478_v32 = vmul.f32 %v16446_v38, %v28234_v30  ;;  %v16182_v34 = vpop.f32.mrb[76].mxu1  ;;  %v16414_v62 = vmul.f32 0.5, %v28234_v30 }
0x13d9   : > { %v16539_v5 = vadd.f32 %v16507_v4, %v16379_v28  ;;  %v16509_v15 = vmul.f32 %v16477_v41, %v28232_v22  ;;  %v28241_v59 = vadd.f32 %v16312_v27, %v16182_v34  ;;  %v16184_v18 = vpop.f32.mrb[77].mxu1  ;;  %v16332_v34 = vpop.permute.xlu0 %16331 }
0x13da   : > { %v16510_v7 = vmul.f32 %v16478_v32, %v28234_v30  ;;  %v16384_v51 = vadd.f32 %v16312_v27, %v16184_v18  ;;  %v16186_v47 = vpop.f32.mrb[78].mxu1  ;;  %v16540_v29 = vadd.f32 %v16508_v25, %v16380_v58 }
0x13db   : > { %v16571_v12 = vmul.f32 0.7978846, %v16539_v5  ;;  %v16541_v3 = vadd.f32 %v16509_v15, %v28232_v22  ;;  %v16447_v36 = vmul.f32 0.044715, %v28241_v59  ;;  %v28246_v21 = vadd.f32 %v16317_v57, %v16186_v47  ;;  %v16188_v53 = vpop.f32.mrb[79].mxu1 }
0x13dc   : > { %v16448_v16 = vmul.f32 0.044715, %v16384_v51  ;;  %v16386_v40 = vadd.f32 %v16317_v57, %v16188_v53  ;;  %v16542_v19 = vadd.f32 %v16510_v7, %v28234_v30  ;;  %v16572_v11 = vmul.f32 0.7978846, %v16540_v29 }
0x13dd   : > { %24867 = vtanh.f32 %v16571_v12  ;;  %v16573_v63 = vmul.f32 0.7978846, %v16541_v3  ;;  %v16479_v14 = vmul.f32 %v16447_v36, %v28241_v59  ;;  %v16449_v39 = vmul.f32 0.044715, %v28246_v21  ;;  %v16337_v36 = vpop.permute.xlu1 %16336 }
0x13de   : > { %v16480_v52 = vmul.f32 %v16448_v16, %v16384_v51  ;;  %v16450_v31 = vmul.f32 0.044715, %v16386_v40  ;;  %v16574_v43 = vmul.f32 0.7978846, %v16542_v19  ;;  %24869 = vtanh.f32 %v16572_v11 }
0x13df   : > { %24871 = vtanh.f32 %v16573_v63  ;;  %v16511_v2 = vmul.f32 %v16479_v14, %v28241_v59  ;;  %v16481_v20 = vmul.f32 %v16449_v39, %v28246_v21  ;;  %v28269_v38 = vmul.f32 0.5, %v16384_v51 }
0x13e0   : > { %v16512_v9 = vmul.f32 %v16480_v52, %v16384_v51  ;;  %v16482_v6 = vmul.f32 %v16450_v31, %v16386_v40  ;;  %v16192_v24 = vpop.f32.mrb[80].mxu1  ;;  %24873 = vtanh.f32 %v16574_v43  ;;  %v28275_v57 = vmul.f32 0.5, %v16386_v40 }
0x13e1   : > { %v16543_v1 = vadd.f32 %v16511_v2, %v28241_v59  ;;  %v16513_v48 = vmul.f32 %v16481_v20, %v28246_v21  ;;  %v28255_v35 = vadd.f32 %v16322_v49, %v16192_v24  ;;  %v16194_v10 = vpop.f32.mrb[81].mxu1  ;;  %v28282_v12 = vmul.f32 0.5, %v28241_v59 }
0x13e2   : > { %v16514_v42 = vmul.f32 %v16482_v6, %v16386_v40  ;;  %v28257_v46 = vadd.f32 %v16322_v49, %v16194_v10  ;;  %v16196_v26 = vpop.f32.mrb[82].mxu1  ;;  %v16544_v54 = vadd.f32 %v16512_v9, %v16384_v51  ;;  %v28287_v11 = vmul.f32 0.5, %v28246_v21 }
0x13e3   : > { %v16575_v45 = vmul.f32 0.7978846, %v16543_v1  ;;  %v16545_v44 = vadd.f32 %v16513_v48, %v28246_v21  ;;  %v16451_v61 = vmul.f32 0.044715, %v28255_v35  ;;  %v28261_v60 = vadd.f32 %v16327_v33, %v16196_v26  ;;  %v16198_v37 = vpop.f32.mrb[83].mxu1 }
0x13e4   : > { %v28263_v23 = vadd.f32 %v16327_v33, %v16198_v37  ;;  %v16546_v28 = vadd.f32 %v16514_v42, %v16386_v40  ;;  %v16576_v13 = vmul.f32 0.7978846, %v16544_v54  ;;  %v16452_v22 = vmul.f32 0.044715, %v28257_v46 }
0x13e5   : > { %24875 = vtanh.f32 %v16575_v45  ;;  %v16577_v50 = vmul.f32 0.7978846, %v16545_v44  ;;  %v16483_v17 = vmul.f32 %v16451_v61, %v28255_v35  ;;  %v16453_v58 = vmul.f32 0.044715, %v28261_v60  ;;  %v16342_v44 = vpop.permute.xlu0 %16341 }
0x13e6   : > { %v16578_v4 = vmul.f32 0.7978846, %v16546_v28  ;;  %24877 = vtanh.f32 %v16576_v13  ;;  %v16454_v5 = vmul.f32 0.044715, %v28263_v23  ;;  %v16484_v63 = vmul.f32 %v16452_v22, %v28257_v46 }
0x13e7   : > { %v24868_v41 = vpop.eup %24867  ;;  %24879 = vtanh.f32 %v16577_v50  ;;  %v16515_v27 = vmul.f32 %v16483_v17, %v28255_v35  ;;  %v16485_v25 = vmul.f32 %v16453_v58, %v28261_v60 }
0x13e8   : > { %v24870_v32 = vpop.eup %24869  ;;  %v16202_v15 = vpop.f32.mrb[84].mxu1  ;;  %v16635_v18 = vadd.f32 1.0, %v24868_v41  ;;  %24881 = vtanh.f32 %v16578_v4  ;;  %v16486_v43 = vmul.f32 %v16454_v5, %v28263_v23  ;;  %v16516_v42 = vmul.f32 %v16484_v63, %v28257_v46 }
0x13e9   : > { %v24872_v30 = vpop.eup %24871  ;;  %v16547_v7 = vadd.f32 %v16515_v27, %v28255_v35  ;;  %v16517_v51 = vmul.f32 %v16485_v25, %v28261_v60  ;;  %v28279_v47 = vadd.f32 %v16332_v34, %v16202_v15  ;;  %v16204_v29 = vpop.f32.mrb[85].mxu1  ;;  %v16636_v19 = vadd.f32 1.0, %v24870_v32 }
0x13ea   : > { %v24874_v3 = vpop.eup %24873  ;;  %v28284_v53 = vadd.f32 %v16332_v34, %v16204_v29  ;;  %v16206_v16 = vpop.f32.mrb[86].mxu1  ;;  %v16637_v40 = vadd.f32 1.0, %v24872_v30  ;;  %v16667_v20 = vmul.f32 %v16635_v18, %v16411_v8  ;;  %v28304_v8 = vmul.f32 0.5, %v28257_v46 }
0x13eb   : > { %v16549_v14 = vadd.f32 %v16517_v51, %v28261_v60  ;;  %v16455_v39 = vmul.f32 0.044715, %v28279_v47  ;;  %v28292_v52 = vadd.f32 %v16337_v36, %v16206_v16  ;;  %v16208_v59 = vpop.f32.mrb[87].mxu1  ;;  %v16579_v31 = vmul.f32 0.7978846, %v16547_v7  ;;  %v16347_v41 = vpop.permute.xlu1 %16346 }
0x13ec   : > { %v16638_v2 = vadd.f32 1.0, %v24874_v3  ;;  %v16456_v9 = vmul.f32 0.044715, %v28284_v53  ;;  %v28298_v6 = vadd.f32 %v16337_v36, %v16208_v59  ;;  %v16668_v1 = vmul.f32 %v16636_v19, %v16412_v55 }
0x13ed   : > { %v16487_v49 = vmul.f32 %v16455_v39, %v28279_v47  ;;  %v16457_v21 = vmul.f32 0.044715, %v28292_v52  ;;  %v16581_v24 = vmul.f32 0.7978846, %v16549_v14  ;;  %v16669_v10 = vmul.f32 %v16637_v40, %v16413_v56 }
0x13ee   : > { %v16670_v48 = vmul.f32 %v16638_v2, %v16414_v62  ;;  %24883 = vtanh.f32 %v16579_v31  ;;  %v16518_v61 = vmul.f32 %v16486_v43, %v28263_v23  ;;  %v16488_v50 = vmul.f32 %v16456_v9, %v28284_v53 }
0x13ef   : > { %v24876_v33 = vpop.eup %24875  ;;  %v16519_v26 = vmul.f32 %v16487_v49, %v28279_v47  ;;  %v16489_v54 = vmul.f32 %v16457_v21, %v28292_v52  ;;  %v16699_v55 = vpack.c.bf16 %v16669_v10, %v16667_v20  ;;  %24885 = vtanh.f32 %v16581_v24  ;;  %v16352_v49 = vpop.permute.xlu0 %16351 }
0x13f0   : > { %v24878_v45 = vpop.eup %24877  ;;  %v16212_v37 = vpop.f32.mrb[88].mxu1  ;;  %v16700_v28 = vpack.c.bf16 %v16670_v48, %v16668_v1  ;;  %v16458_v27 = vmul.f32 0.044715, %v28298_v6  ;;  %v16639_v18 = vadd.f32 1.0, %v24876_v33  ;;  %v28325_v40 = vmul.f32 0.5, %v28263_v23 }
0x13f1   : > { %v24880_v13 = vpop.eup %24879  ;;  %v16551_v56 = vadd.f32 %v16519_v26, %v28279_v47  ;;  %v16521_v17 = vmul.f32 %v16489_v54, %v28292_v52  ;;  %v28310_v58 = vadd.f32 %v16342_v44, %v16212_v37  ;;  %v16214_v62 = vpop.f32.mrb[89].mxu1  ;;  %v16640_v32 = vadd.f32 1.0, %v24878_v45 }
0x13f2   : > { %v24882_v4 = vpop.eup %24881  ;;  %v28313_v22 = vadd.f32 %v16342_v44, %v16214_v62  ;;  %16752 = vmatprep.subr.bf16.mxu0 %v16700_v28  ;;  %v16216_v25 = vpop.f32.mrb[90].mxu1  ;;  %v16641_v30 = vadd.f32 1.0, %v24880_v13  ;;  %v16490_v63 = vmul.f32 %v16458_v27, %v28298_v6  ;;  %v16671_v2 = vmul.f32 %v16639_v18, %v28282_v12 }
0x13f3   : > { %v16459_v34 = vmul.f32 0.044715, %v28310_v58  ;;  %v28316_v5 = vadd.f32 %v16347_v41, %v16216_v25  ;;  %16753 = vmatpush1.bf16.msra.mxu0 %v16699_v55  ;;  %v16218_v15 = vpop.f32.mrb[91].mxu1  ;;  %v16583_v7 = vmul.f32 0.7978846, %v16551_v56  ;;  %v16553_v51 = vadd.f32 %v16521_v17, %v28292_v52  ;;  %v16357_v54 = vpop.permute.xlu1 %16356 }
0x13f4   : > { %v28319_v29 = vadd.f32 %v16347_v41, %v16218_v15  ;;  %v16642_v3 = vadd.f32 1.0, %v24882_v4  ;;  %v16460_v16 = vmul.f32 0.044715, %v28313_v22  ;;  %v16672_v39 = vmul.f32 %v16640_v32, %v28269_v38 }
0x13f5   : > { %v16491_v36 = vmul.f32 %v16459_v34, %v28310_v58  ;;  %v16461_v19 = vmul.f32 0.044715, %v28316_v5  ;;  %v16673_v20 = vmul.f32 %v16641_v30, %v28287_v11  ;;  %24887 = vtanh.f32 %v16583_v7  ;;  %v16362_v30 = vpop.permute.xlu0 %16361 }
0x13f6   : > { %v16462_v14 = vmul.f32 0.044715, %v28319_v29  ;;  %v16674_v59 = vmul.f32 %v16642_v3, %v28275_v57  ;;  %v16585_v9 = vmul.f32 0.7978846, %v16553_v51  ;;  %v16548_v1 = vadd.f32 %v16516_v42, %v28257_v46 }
0x13f7   : > { %v16523_v31 = vmul.f32 %v16491_v36, %v28310_v58  ;;  %v16493_v43 = vmul.f32 %v16461_v19, %v28316_v5  ;;  %v16492_v48 = vmul.f32 %v16460_v16, %v28313_v22  ;;  %v16701_v33 = vpack.c.bf16 %v16673_v20, %v16671_v2 }
0x13f8   : > { %v16222_v21 = vpop.f32.mrb[92].mxu1  ;;  %v16702_v24 = vpack.c.bf16 %v16674_v59, %v16672_v39  ;;  %v24884_v26 = vpop.eup %24883  ;;  %v16494_v12 = vmul.f32 %v16462_v14, %v28319_v29  ;;  %v16550_v44 = vadd.f32 %v16518_v61, %v28263_v23  ;;  %v16580_v37 = vmul.f32 0.7978846, %v16548_v1 }
0x13f9   : > { %v16525_v38 = vmul.f32 %v16493_v43, %v28316_v5  ;;  %v28338_v57 = vadd.f32 %v16352_v49, %v16222_v21  ;;  %v16224_v10 = vpop.f32.mrb[93].mxu1  ;;  %v16555_v46 = vadd.f32 %v16523_v31, %v28310_v58  ;;  %v24886_v56 = vpop.eup %24885  ;;  %v16520_v17 = vmul.f32 %v16488_v50, %v28284_v53 }
0x13fa   : > { %v28341_v11 = vadd.f32 %v16352_v49, %v16224_v10  ;;  %16754 = vmatprep.subr.bf16.mxu0 %v16702_v24  ;;  %v16226_v45 = vpop.f32.mrb[94].mxu1  ;;  %v16522_v62 = vmul.f32 %v16490_v63, %v28298_v6  ;;  %v16582_v4 = vmul.f32 0.7978846, %v16550_v44  ;;  %24889 = vtanh.f32 %v16580_v37  ;;  %v16367_v43 = vpop.permute.xlu1 %16366 }
0x13fb   : > { %v16557_v42 = vadd.f32 %v16525_v38, %v28316_v5  ;;  %v16463_v28 = vmul.f32 0.044715, %v28338_v57  ;;  %v28347_v55 = vadd.f32 %v16357_v54, %v16226_v45  ;;  %16755 = vmatpush1.bf16.msra.mxu0 %v16701_v33  ;;  %v16228_v13 = vpop.f32.mrb[95].mxu1  ;;  %24891 = vtanh.f32 %v16585_v9 }
0x13fc   : > { %v16464_v61 = vmul.f32 0.044715, %v28341_v11  ;;  %v28355_v27 = vmul.f32 %v16492_v48, %v28313_v22  ;;  %v28358_v25 = vmul.f32 %v16494_v12, %v28319_v29  ;;  %v28360_v32 = vadd.f32 %v16357_v54, %v16228_v13 }
0x13fd   : > { %v16495_v23 = vmul.f32 %v16463_v28, %v28338_v57  ;;  %v16465_v41 = vmul.f32 0.044715, %v28347_v55  ;;  %24893 = vtanh.f32 %v16582_v4  ;;  %v16587_v50 = vmul.f32 0.7978846, %v16555_v46 }
0x13fe   : > { %v16589_v34 = vmul.f32 0.7978846, %v16557_v42  ;;  %v16419_v51 = vmul.f32 0.5, %v28255_v35  ;;  %v16421_v3 = vmul.f32 0.5, %v28261_v60  ;;  %v16643_v36 = vadd.f32 1.0, %v24884_v26 }
0x13ff   : > { %v16527_v15 = vmul.f32 %v16495_v23, %v28338_v57  ;;  %v16497_v18 = vmul.f32 %v16465_v41, %v28347_v55  ;;  %v16645_v16 = vadd.f32 1.0, %v24886_v56  ;;  %v16496_v63 = vmul.f32 %v16464_v61, %v28341_v11  ;;  %v28371_v31 = vpop.eup %24887 }
0x1400   : > { %v16232_v7 = vpop.f32.mrb[96].mxu1  ;;  %v16466_v2 = vmul.f32 0.044715, %v28360_v32  ;;  %v28376_v60 = vmul.f32 %v16643_v36, %v16419_v51  ;;  %24895 = vtanh.f32 %v16587_v50  ;;  %v16552_v46 = vadd.f32 %v16520_v17, %v28284_v53 }
0x1401   : > { %v16559_v19 = vadd.f32 %v16527_v15, %v28338_v57  ;;  %v16529_v14 = vmul.f32 %v16497_v18, %v28347_v55  ;;  %v28369_v39 = vadd.f32 %v16362_v30, %v16232_v7  ;;  %v16234_v59 = vpop.f32.mrb[97].mxu1  ;;  %v28378_v49 = vmul.f32 %v16645_v16, %v16421_v3  ;;  %v16372_v18 = vpop.permute.xlu0 %16371 }
0x1402   : > { %v28374_v20 = vadd.f32 %v16362_v30, %v16234_v59  ;;  %v16236_v35 = vpop.f32.mrb[98].mxu1  ;;  %24897 = vtanh.f32 %v16589_v34  ;;  %v28389_v33 = vmul.f32 %v16496_v63, %v28341_v11  ;;  %v16498_v37 = vmul.f32 %v16466_v2, %v28360_v32 }
0x1403   : > { %v16561_v9 = vadd.f32 %v16529_v14, %v28347_v55  ;;  %v16467_v21 = vmul.f32 0.044715, %v28369_v39  ;;  %v28382_v24 = vadd.f32 %v16367_v43, %v16236_v35  ;;  %v16238_v1 = vpop.f32.mrb[99].mxu1  ;;  %v16591_v48 = vmul.f32 0.7978846, %v16559_v19  ;;  %v16377_v19 = vpop.permute.xlu1 %16376 }
0x1404   : > { %v16703_v38 = vpack.c.bf16 %v28378_v49, %v28376_v60  ;;  %v28386_v10 = vadd.f32 %v16367_v43, %v16238_v1  ;;  %v16468_v54 = vmul.f32 0.044715, %v28374_v20  ;;  %v24890_v45 = vpop.eup %24889  ;;  %v16554_v42 = vadd.f32 %v16522_v62, %v28298_v6 }
0x1405   : > { %v16499_v26 = vmul.f32 %v16467_v21, %v28369_v39  ;;  %v16469_v12 = vmul.f32 0.044715, %v28382_v24  ;;  %v16593_v44 = vmul.f32 0.7978846, %v16561_v9  ;;  %v24892_v28 = vpop.eup %24891  ;;  %v16644_v56 = vadd.f32 1.0, %v24890_v45 }
0x1406   : > { %v16470_v23 = vmul.f32 0.044715, %v28386_v10  ;;  %24899 = vtanh.f32 %v16591_v48  ;;  %v28401_v50 = vmul.f32 0.5, %v28284_v53  ;;  %v16584_v34 = vmul.f32 0.7978846, %v16552_v46 }
0x1407   : > { %v16531_v13 = vmul.f32 %v16499_v26, %v28369_v39  ;;  %v16501_v4 = vmul.f32 %v16469_v12, %v28382_v24  ;;  %v24894_v61 = vpop.eup %24893  ;;  %v16586_v15 = vmul.f32 0.7978846, %v16554_v42  ;;  %v16500_v62 = vmul.f32 %v16468_v54, %v28374_v20 }
0x1408   : > { %v16242_v41 = vpop.f32.mrb[100].mxu1  ;;  %v16646_v30 = vadd.f32 1.0, %v24894_v61  ;;  %v28407_v3 = vmul.f32 %v16498_v37, %v28360_v32  ;;  %v28412_v16 = vmul.f32 0.5, %v28298_v6  ;;  %24901 = vtanh.f32 %v16584_v34 }
0x1409   : > { %v16563_v17 = vadd.f32 %v16531_v13, %v28369_v39  ;;  %v16533_v7 = vmul.f32 %v16501_v4, %v28382_v24  ;;  %v16244_v51 = vpop.f32.mrb[101].mxu1  ;;  %v28409_v36 = vadd.f32 %v16372_v18, %v16242_v41  ;;  %v16676_v63 = vmul.f32 %v16644_v56, %v28304_v8 }
0x140a   : > { %v16246_v53 = vpop.f32.mrb[102].mxu1  ;;  %v16678_v14 = vmul.f32 %v16646_v30, %v28325_v40  ;;  %24903 = vtanh.f32 %v16586_v15  ;;  %v16502_v35 = vmul.f32 %v16470_v23, %v28386_v10  ;;  %v24896_v6 = vpop.eup %24895  ;;  %v28422_v9 = vmul.f32 %v16500_v62, %v28374_v20 }
0x140b   : > { %v16565_v59 = vadd.f32 %v16533_v7, %v28382_v24  ;;  %v16248_v43 = vpop.f32.mrb[103].mxu1  ;;  %v16595_v2 = vmul.f32 0.7978846, %v16563_v17  ;;  %v16471_v60 = vmul.f32 0.044715, %v28409_v36  ;;  %v28419_v49 = vadd.f32 %v16377_v19, %v16246_v53 }
0x140c   : > { %24905 = vtanh.f32 %v16593_v44  ;;  %v16704_v21 = vpack.c.bf16 %v16678_v14, %v16676_v63  ;;  %v24898_v1 = vpop.eup %24897  ;;  %v28425_v48 = vadd.f32 %v16372_v18, %v16244_v51  ;;  %v16647_v54 = vadd.f32 1.0, %v28371_v31 }
0x140d   : > { %v16597_v8 = vmul.f32 0.7978846, %v16565_v59  ;;  %v16503_v40 = vmul.f32 %v16471_v60, %v28409_v36  ;;  %v16473_v26 = vmul.f32 0.044715, %v28419_v49  ;;  %v16423_v12 = vmul.f32 0.5, %v28279_v47 }
0x140e   : > { %16756 = vmatprep.subr.bf16.mxu0 %v16704_v21  ;;  %v16425_v45 = vmul.f32 0.5, %v28292_v52  ;;  %v16649_v44 = vadd.f32 1.0, %v24892_v28  ;;  %v28431_v37 = vadd.f32 %v16377_v19, %v16248_v43  ;;  %24907 = vtanh.f32 %v16595_v2 }
0x140f   : > { %16757 = vmatpush1.bf16.msra.mxu0 %v16703_v38  ;;  %v16534_v46 = vmul.f32 %v16502_v35, %v28386_v10  ;;  %v16535_v42 = vmul.f32 %v16503_v40, %v28409_v36  ;;  %v16505_v13 = vmul.f32 %v16473_v26, %v28419_v49  ;;  %24909 = vtanh.f32 %v16597_v8 }
0x1410   : > { %v16679_v56 = vmul.f32 %v16647_v54, %v16423_v12  ;;  %v16681_v4 = vmul.f32 %v16649_v44, %v16425_v45  ;;  %v16556_v31 = vadd.f32 %v28355_v27, %v28313_v22  ;;  %v24900_v47 = vpop.eup %24899  ;;  %v16472_v28 = vmul.f32 0.044715, %v28425_v48 }
0x1411   : > { %v16567_v52 = vadd.f32 %v16535_v42, %v28409_v36  ;;  %v16537_v23 = vmul.f32 %v16505_v13, %v28419_v49  ;;  %v16558_v38 = vadd.f32 %v28358_v25, %v28319_v29  ;;  %v16474_v41 = vmul.f32 0.044715, %v28431_v37 }
0x1412   : > { %v16705_v61 = vpack.c.bf16 %v16681_v4, %v16679_v56  ;;  %v16588_v34 = vmul.f32 0.7978846, %v16556_v31  ;;  %v16427_v15 = vmul.f32 0.5, %v28310_v58  ;;  %v24902_v18 = vpop.eup %24901  ;;  %v16651_v30 = vadd.f32 1.0, %v24896_v6 }
0x1413   : > { %v16599_v17 = vmul.f32 0.7978846, %v16567_v52  ;;  %v16569_v27 = vadd.f32 %v16537_v23, %v28419_v49  ;;  %v16590_v62 = vmul.f32 0.7978846, %v16558_v38  ;;  %v16648_v51 = vadd.f32 1.0, %v24902_v18 }
0x1414   : > { %v24904_v7 = vpop.eup %24903  ;;  %24911 = vtanh.f32 %v16588_v34  ;;  %v16429_v53 = vmul.f32 0.5, %v28316_v5  ;;  %v16653_v19 = vadd.f32 1.0, %v24898_v1  ;;  %v16504_v25 = vmul.f32 %v16472_v28, %v28425_v48 }
0x1415   : > { %24913 = vtanh.f32 %v16599_v17  ;;  %v16650_v63 = vadd.f32 1.0, %v24904_v7  ;;  %v16601_v14 = vmul.f32 0.7978846, %v16569_v27  ;;  %v16506_v58 = vmul.f32 %v16474_v41, %v28431_v37 }
0x1416   : > { %v24906_v59 = vpop.eup %24905  ;;  %24915 = vtanh.f32 %v16590_v62  ;;  %v28449_v43 = vmul.f32 %v16651_v30, %v16427_v15  ;;  %v28451_v2 = vmul.f32 %v16653_v19, %v16429_v53  ;;  %v16680_v35 = vmul.f32 %v16648_v51, %v28401_v50 }
0x1417   : > { %v16682_v60 = vmul.f32 %v16650_v63, %v28412_v16  ;;  %24917 = vtanh.f32 %v16601_v14  ;;  %v16560_v5 = vadd.f32 %v28389_v33, %v28341_v11  ;;  %v16562_v21 = vadd.f32 %v28407_v3, %v28360_v32 }
0x1418   : > { %v16707_v6 = vpack.c.bf16 %v28451_v2, %v28449_v43  ;;  %v16431_v8 = vmul.f32 0.5, %v28338_v57  ;;  %v16433_v1 = vmul.f32 0.5, %v28347_v55  ;;  %v24908_v40 = vpop.eup %24907  ;;  %v16655_v50 = vadd.f32 1.0, %v24900_v47 }
0x1419   : > { %v16706_v26 = vpack.c.bf16 %v16682_v60, %v16680_v35  ;;  %v16592_v54 = vmul.f32 0.7978846, %v16560_v5  ;;  %v16657_v12 = vadd.f32 1.0, %v24906_v59  ;;  %v24910_v16 = vpop.eup %24909  ;;  %v16536_v45 = vmul.f32 %v16504_v25, %v28425_v48 }
0x141a   : > { %v16538_v33 = vmul.f32 %v16506_v58, %v28431_v37  ;;  %v16594_v44 = vmul.f32 0.7978846, %v16562_v21  ;;  %v16564_v42 = vadd.f32 %v28422_v9, %v28374_v20  ;;  %v28467_v3 = vmul.f32 %v16655_v50, %v16431_v8 }
0x141b   : > { %16758 = vmatprep.subr.bf16.mxu0 %v16706_v26  ;;  %24919 = vtanh.f32 %v16592_v54  ;;  %v28469_v57 = vmul.f32 %v16657_v12, %v16433_v1  ;;  %v16566_v55 = vadd.f32 %v16534_v46, %v28386_v10  ;;  %v16435_v56 = vmul.f32 0.5, %v28369_v39 }
0x141c   : > { %16759 = vmatpush1.bf16.msra.mxu0 %v16705_v61  ;;  %24921 = vtanh.f32 %v16594_v44  ;;  %v16596_v13 = vmul.f32 0.7978846, %v16564_v42  ;;  %v16437_v4 = vmul.f32 0.5, %v28382_v24  ;;  %v16659_v9 = vadd.f32 1.0, %v24908_v40 }
0x141d   : > { %v16709_v31 = vpack.c.bf16 %v28469_v57, %v28467_v3  ;;  %v16598_v47 = vmul.f32 0.7978846, %v16566_v55  ;;  %v16661_v52 = vadd.f32 1.0, %v24910_v16  ;;  %v16568_v23 = vadd.f32 %v16536_v45, %v28425_v48  ;;  %v24242_v57 = vld [vmem:[#allocation22 + $0x104] ss:$8 sps:$4 sm:$0xff]   ;;  %v24238_v55 = vld [vmem:[#allocation20] sm:$0xff]  }
0x141e   : > { %v24912_v28 = vpop.eup %24911  ;;  %24923 = vtanh.f32 %v16596_v13  ;;  %v16691_v46 = vmul.f32 %v16659_v9, %v16435_v56  ;;  %v16428_v39 = vmul.f32 0.5, %v28313_v22  ;;  %v16430_v24 = vmul.f32 0.5, %v28319_v29  ;;  %v24240_v13 = vld [vmem:[#allocation22 + $0x100] ss:$8 sps:$4 sm:$0xff]   ;;  %v24245_v56 = vld [vmem:[#allocation22 + $0x114] ss:$8 sps:$4 sm:$0xff]  }
0x141f   : > { %v24914_v38 = vpop.eup %24913  ;;  %v16652_v41 = vadd.f32 1.0, %v24912_v28  ;;  %24925 = vtanh.f32 %v16598_v47  ;;  %v16693_v61 = vmul.f32 %v16661_v52, %v16437_v4  ;;  %v16570_v15 = vadd.f32 %v16538_v33, %v28431_v37  ;;  %v24239_v4 = vld [vmem:[#allocation20 + $0x8] sm:$0xff]   ;;  %v24251_v47 = vld [vmem:[#allocation22 + $0x134] ss:$8 sps:$4 sm:$0xff]   ;;  %v24249_v9 = vld [vmem:[#allocation22 + $0x130] ss:$8 sps:$4 sm:$0xff]  }
0x1420   : > { %v24916_v34 = vpop.eup %24915  ;;  %v16600_v18 = vmul.f32 0.7978846, %v16568_v23  ;;  %v16439_v30 = vmul.f32 0.5, %v28409_v36  ;;  %v16663_v7 = vadd.f32 1.0, %v24914_v38  ;;  %v16441_v53 = vmul.f32 0.5, %v28419_v49  ;;  %v24273_v28 = vld [vmem:[#allocation20 + $0x10] sm:$0xff]  }
0x1421   : > { %v24918_v17 = vpop.eup %24917  ;;  %v16654_v27 = vadd.f32 1.0, %v24916_v34  ;;  %v16711_v62 = vpack.c.bf16 %v16693_v61, %v16691_v46  ;;  %v16602_v51 = vmul.f32 0.7978846, %v16570_v15  ;;  %v16684_v25 = vmul.f32 %v16652_v41, %v16428_v39  ;;  %v24254_v52 = vld [vmem:[#allocation22 + $0x144] ss:$8 sps:$4 sm:$0xff]   ;;  %v24280_v61 = vld [vmem:[#allocation20 + $0x18] sm:$0xff]  }
0x1422   : > { %24927 = vtanh.f32 %v16600_v18  ;;  %v16665_v19 = vadd.f32 1.0, %v24918_v17  ;;  %v16695_v22 = vmul.f32 %v16663_v7, %v16439_v30  ;;  %v16432_v5 = vmul.f32 0.5, %v28341_v11  ;;  %v24252_v23 = vld [vmem:[#allocation22 + $0x140] ss:$8 sps:$4 sm:$0xff]   ;;  %v24257_v38 = vld [vmem:[#allocation22 + $0x154] ss:$8 sps:$4 sm:$0xff]  }
0x1423   : > { %v16686_v63 = vmul.f32 %v16654_v27, %v16430_v24  ;;  %24929 = vtanh.f32 %v16602_v51  ;;  %v16434_v36 = vmul.f32 0.5, %v28360_v32  ;;  %v16436_v54 = vmul.f32 0.5, %v28374_v20  ;;  %v24255_v41 = vld [vmem:[#allocation22 + $0x150] ss:$8 sps:$4 sm:$0xff]   ;;  %v24260_v46 = vld [vmem:[#allocation22 + $0x164] ss:$8 sps:$4 sm:$0xff]  }
0x1424   : > { %v16697_v14 = vmul.f32 %v16665_v19, %v16441_v53  ;;  %v16438_v50 = vmul.f32 0.5, %v28386_v10  ;;  %v16440_v43 = vmul.f32 0.5, %v28425_v48  ;;  %v16442_v2 = vmul.f32 0.5, %v28431_v37  ;;  %v24243_v48 = vld [vmem:[#allocation22 + $0x110] ss:$8 sps:$4 sm:$0xff]  }
0x1425   : > { %v24920_v29 = vpop.eup %24919  ;;  %v16708_v59 = vpack.c.bf16 %v16686_v63, %v16684_v25  ;;  %v24248_v37 = vld [vmem:[#allocation22 + $0x124] ss:$8 sps:$4 sm:$0xff]   ;;  %v24258_v34 = vld [vmem:[#allocation22 + $0x160] ss:$8 sps:$4 sm:$0xff]   ;;  %v24263_v39 = vld [vmem:[#allocation22 + $0x174] ss:$8 sps:$4 sm:$0xff]  }
0x1426   : > { %v24922_v58 = vpop.eup %24921  ;;  %v16656_v35 = vadd.f32 1.0, %v24920_v29  ;;  %v16713_v60 = vpack.c.bf16 %v16697_v14, %v16695_v22  ;;  %v24261_v24 = vld [vmem:[#allocation22 + $0x170] ss:$8 sps:$4 sm:$0xff]   ;;  %v24266_v15 = vld [vmem:[#allocation22 + $0x184] ss:$8 sps:$4 sm:$0xff]  }
0x1427   : > { %16760 = vmatprep.subr.bf16.mxu0 %v16708_v59  ;;  %v16658_v21 = vadd.f32 1.0, %v24922_v58  ;;  %v24287_v18 = vld [vmem:[#allocation20 + $0x20] ss:$0 sps:$4 sm:$0xff]   ;;  %v24264_v17 = vld [vmem:[#allocation22 + $0x180] ss:$8 sps:$4 sm:$0xff]  }
0x1428   : > { %v24924_v8 = vpop.eup %24923  ;;  %16761 = vmatpush1.bf16.msra.mxu0 %v16707_v6  ;;  %v16688_v1 = vmul.f32 %v16656_v35, %v16432_v5  ;;  %v24269_v27 = vld [vmem:[#allocation22 + $0x194] ss:$8 sps:$4 sm:$0xff]   ;;  %v24272_v30 = vld [vmem:[#allocation22 + $0x1a4] ss:$8 sps:$4 sm:$0xff]   ;;  %v24270_v7 = vld [vmem:[#allocation22 + $0x1a0] ss:$8 sps:$4 sm:$0xff]  }
0x1429   : > { %v24926_v49 = vpop.eup %24925  ;;  %v16690_v40 = vmul.f32 %v16658_v21, %v16434_v36  ;;  %v16660_v26 = vadd.f32 1.0, %v24924_v8  ;;  %v24276_v51 = vld [vmem:[#allocation22 + $0x1b4] ss:$8 sps:$4 sm:$0xff]   ;;  %v24274_v53 = vld [vmem:[#allocation22 + $0x1b0] ss:$8 sps:$4 sm:$0xff]  }
0x142a   : > { %v16662_v12 = vadd.f32 1.0, %v24926_v49  ;;  %v24277_v19 = vld [vmem:[#allocation22 + $0x1c0] ss:$8 sps:$4 sm:$0xff]   ;;  %v24283_v25 = vld [vmem:[#allocation22 + $0x1d4] ss:$8 sps:$4 sm:$0xff]  }
0x142b   : > { %v16710_v16 = vpack.c.bf16 %v16690_v40, %v16688_v1  ;;  %v16692_v11 = vmul.f32 %v16660_v26, %v16436_v54  ;;  %v24281_v63 = vld [vmem:[#allocation22 + $0x1d0] ss:$8 sps:$4 sm:$0xff]   ;;  %v24286_v22 = vld [vmem:[#allocation22 + $0x1e4] ss:$8 sps:$4 sm:$0xff]   ;;  %v24284_v14 = vld [vmem:[#allocation22 + $0x1e0] ss:$8 sps:$4 sm:$0xff]  }
0x142c   : > { %v24928_v45 = vpop.eup %24927  ;;  %v16694_v33 = vmul.f32 %v16662_v12, %v16438_v50  ;;  %v24288_v29 = vld [vmem:[#allocation22 + $0x1f0] ss:$8 sps:$4 sm:$0xff]   ;;  %v24290_v59 = vld [vmem:[#allocation22 + $0x1f4] ss:$8 sps:$4 sm:$0xff]   ;;  %v24293_v58 = vld [vmem:[#allocation22 + $0x4] ss:$8 sps:$4 sm:$0xff]  }
0x142d   : > { %16762 = vmatprep.subr.bf16.mxu0 %v16710_v16  ;;  %v16664_v32 = vadd.f32 1.0, %v24928_v45  ;;  %v24930_v44 = vpop.eup %24929  ;;  %v24392_v35 = vld [vmem:[#allocation22 + $0x404] ss:$8 sps:$4 sm:$0xff]   ;;  %v24398_v5 = vld [vmem:[#allocation22 + $0x414] ss:$8 sps:$4 sm:$0xff]  }
0x142e   : > { %16763 = vmatpush1.bf16.msra.mxu0 %v16709_v31  ;;  %v16712_v42 = vpack.c.bf16 %v16694_v33, %v16692_v11  ;;  %v16666_v6 = vadd.f32 1.0, %v24930_v44  ;;  %v24246_v31 = vld [vmem:[#allocation22 + $0x120] ss:$8 sps:$4 sm:$0xff]   ;;  %17975 = vmatprep.subr.bf16.mxu1 %v24392_v35  ;;  %v24396_v36 = vld [vmem:[#allocation22 + $0x410] ss:$8 sps:$4 sm:$0xff]  }
0x142f   : > { %v16696_v3 = vmul.f32 %v16664_v32, %v16440_v43  ;;  %v24404_v21 = vld [vmem:[#allocation22 + $0x424] ss:$8 sps:$4 sm:$0xff]   ;;  %v24402_v8 = vld [vmem:[#allocation22 + $0x420] ss:$8 sps:$4 sm:$0xff]   ;;  %v24410_v49 = vld [vmem:[#allocation22 + $0x434] ss:$8 sps:$4 sm:$0xff]  }
0x1430   : > { %16764 = vmatprep.subr.bf16.mxu0 %v16712_v42  ;;  %v16698_v20 = vmul.f32 %v16666_v6, %v16442_v2  ;;  %v24408_v1 = vld [vmem:[#allocation22 + $0x430] ss:$8 sps:$4 sm:$0xff]   ;;  %v24416_v40 = vld [vmem:[#allocation22 + $0x444] ss:$8 sps:$4 sm:$0xff]   ;;  %v24414_v26 = vld [vmem:[#allocation22 + $0x440] ss:$8 sps:$4 sm:$0xff]  }
0x1431   : > { %v24422_v54 = vld [vmem:[#allocation22 + $0x454] ss:$8 sps:$4 sm:$0xff]   ;;  %v24420_v50 = vld [vmem:[#allocation22 + $0x450] ss:$8 sps:$4 sm:$0xff]   ;;  %v24428_v12 = vld [vmem:[#allocation22 + $0x464] ss:$8 sps:$4 sm:$0xff]  }
0x1432   : > { %16765 = vmatpush1.bf16.msra.mxu0 %v16711_v62  ;;  %v16714_v10 = vpack.c.bf16 %v16698_v20, %v16696_v3  ;;  %v24267_v62 = vld [vmem:[#allocation22 + $0x190] ss:$8 sps:$4 sm:$0xff]   ;;  %v24426_v16 = vld [vmem:[#allocation22 + $0x460] ss:$8 sps:$4 sm:$0xff]   ;;  %v24434_v45 = vld [vmem:[#allocation22 + $0x474] ss:$8 sps:$4 sm:$0xff]  }
0x1433   : > { %v24432_v11 = vld [vmem:[#allocation22 + $0x470] ss:$8 sps:$4 sm:$0xff]   ;;  %v24440_v33 = vld [vmem:[#allocation22 + $0x484] ss:$8 sps:$4 sm:$0xff]   ;;  %v24438_v32 = vld [vmem:[#allocation22 + $0x480] ss:$8 sps:$4 sm:$0xff]  }
0x1434   : > { %16766 = vmatprep.subr.bf16.mxu0 %v16714_v10  ;;  %v24446_v44 = vld [vmem:[#allocation22 + $0x494] ss:$8 sps:$4 sm:$0xff]   ;;  %v24444_v42 = vld [vmem:[#allocation22 + $0x490] ss:$8 sps:$4 sm:$0xff]   ;;  %v24452_v43 = vld [vmem:[#allocation22 + $0x4a4] ss:$8 sps:$4 sm:$0xff]  }
0x1435   : > { %v24450_v2 = vld [vmem:[#allocation22 + $0x4a0] ss:$8 sps:$4 sm:$0xff]   ;;  %v24458_v6 = vld [vmem:[#allocation22 + $0x4b4] ss:$8 sps:$4 sm:$0xff]   ;;  %v24456_v3 = vld [vmem:[#allocation22 + $0x4b0] ss:$8 sps:$4 sm:$0xff]  }
0x1436   : > { %16767 = vmatpush1.bf16.msra.mxu0 %v16713_v60  ;;  %v24390_v60 = vld [vmem:[#allocation22 + $0x400] ss:$8 sps:$4 sm:$0xff]   ;;  %v24464_v20 = vld [vmem:[#allocation22 + $0x4c4] ss:$8 sps:$4 sm:$0xff]  }
0x1437   : > { %17062 = vmatprep.subr.bf16.mxu0 %v24242_v57  ;;  %17976 = vmatpush1.bf16.msra.mxu1 %v24390_v60  ;;  %v24462_v10 = vld [vmem:[#allocation22 + $0x4c0] ss:$8 sps:$4 sm:$0xff]   ;;  %v24470_v57 = vld [vmem:[#allocation22 + $0x4d4] ss:$8 sps:$4 sm:$0xff]  }
0x1438   : > { %17977 = vmatprep.subr.bf16.mxu1 %v24398_v5  ;;  %v24498_v35 = vld [vmem:[#allocation22 + $0x620] ss:$8 sps:$4 sm:$0xff]   ;;  %v24506_v60 = vld [vmem:[#allocation22 + $0x634] ss:$8 sps:$4 sm:$0xff]  }
0x1439   : > { %16785 = vmatmul.mubr.bf16.vlgmr.msra.gmra.mrb[232].mxu0 %v24238_v55  ;;  %v24468_v55 = vld [vmem:[#allocation22 + $0x4d0] ss:$8 sps:$4 sm:$0xff]   ;;  %v24309_v5 = vld [vmem:[#allocation22 + $0x60] ss:$8 sps:$4 sm:$0xff]  }
0x143a   : > { %16794 = vmatprep.mubr.bf16.mxu0 %v25410_v0  ;;  %17063 = vmatpush1.bf16.msra.mxu0 %v24240_v13  ;;  %v24476_v13 = vld [vmem:[#allocation22 + $0x4e4] ss:$8 sps:$4 sm:$0xff]  }
0x143b   : > { %17064 = vmatprep.subr.bf16.mxu0 %v24245_v56  ;;  %17978 = vmatpush1.bf16.msra.mxu1 %v24396_v36  ;;  %v24474_v56 = vld [vmem:[#allocation22 + $0x4e0] ss:$8 sps:$4 sm:$0xff]   ;;  %v24314_v36 = vld [vmem:[#allocation22 + $0x74] ss:$8 sps:$4 sm:$0xff]  }
0x143c   : > { %17979 = vmatprep.subr.bf16.mxu1 %v24404_v21  ;;  %v24504_v21 = vld [vmem:[#allocation22 + $0x630] ss:$8 sps:$4 sm:$0xff]  }
0x143e   : > { %17065 = vmatpush1.bf16.msra.mxu0 %v24243_v48  ;;  %v24482_v48 = vld [vmem:[#allocation22 + $0x4f4] ss:$8 sps:$4 sm:$0xff]  }
0x143f   : > { %17066 = vmatprep.subr.bf16.mxu0 %v24248_v37  ;;  %17980 = vmatpush1.bf16.msra.mxu1 %v24402_v8  ;;  %v24480_v37 = vld [vmem:[#allocation22 + $0x4f0] ss:$8 sps:$4 sm:$0xff]   ;;  %v24512_v8 = vld [vmem:[#allocation22 + $0x644] ss:$8 sps:$4 sm:$0xff]  }
0x1440   : > { %17981 = vmatprep.subr.bf16.mxu1 %v24410_v49  ;;  %v24312_v49 = vld [vmem:[#allocation22 + $0x70] ss:$8 sps:$4 sm:$0xff]  }
0x1441   : > { %16795 = vmatmul.mubr.bf16.gmra.mrb[236].mxu0 %v24239_v4  ;;  %v24488_v4 = vld [vmem:[#allocation22 + $0x604] ss:$8 sps:$4 sm:$0xff]  }
0x1442   : > { %17067 = vmatpush1.bf16.msra.mxu0 %v24246_v31  ;;  %16804 = vmatprep.mubr.bf16.mxu0 %v25410_v0 }
0x1443   : > { %17068 = vmatprep.subr.bf16.mxu0 %v24251_v47  ;;  %17982 = vmatpush1.bf16.msra.mxu1 %v24408_v1 }
0x1444   : > { %17983 = vmatprep.subr.bf16.mxu1 %v24416_v40  ;;  %v24317_v40 = vld [vmem:[#allocation22 + $0x84] ss:$8 sps:$4 sm:$0xff]  }
0x1446   : > { %17069 = vmatpush1.bf16.msra.mxu0 %v24249_v9 }
0x1447   : > { %17070 = vmatprep.subr.bf16.mxu0 %v24254_v52  ;;  %17984 = vmatpush1.bf16.msra.mxu1 %v24414_v26 }
0x1448   : > { %17985 = vmatprep.subr.bf16.mxu1 %v24422_v54  ;;  %v24510_v54 = vld [vmem:[#allocation22 + $0x640] ss:$8 sps:$4 sm:$0xff]  }
0x1449   : > { %16805 = vmatmul.mubr.bf16.gmra.mrb[240].mxu0 %v24273_v28 }
0x144a   : > { %17071 = vmatpush1.bf16.msra.mxu0 %v24252_v23  ;;  %16814 = vmatprep.mubr.bf16.mxu0 %v25410_v0  ;;  %v24291_v23 = vld [vmem:[#allocation22] ss:$8 sps:$4 sm:$0xff]  }
0x144b   : > { %17072 = vmatprep.subr.bf16.mxu0 %v24257_v38  ;;  %17986 = vmatpush1.bf16.msra.mxu1 %v24420_v50 }
0x144c   : > { %17987 = vmatprep.subr.bf16.mxu1 %v24428_v12  ;;  %v24518_v12 = vld [vmem:[#allocation22 + $0x654] ss:$8 sps:$4 sm:$0xff]  }
0x144e   : > { %17073 = vmatpush1.bf16.msra.mxu0 %v24255_v41  ;;  %v24296_v41 = vld [vmem:[#allocation22 + $0x14] ss:$8 sps:$4 sm:$0xff]  }
0x144f   : > { %17074 = vmatprep.subr.bf16.mxu0 %v24260_v46  ;;  %17988 = vmatpush1.bf16.msra.mxu1 %v24426_v16 }
0x1450   : > { %17989 = vmatprep.subr.bf16.mxu1 %v24434_v45  ;;  %v24315_v45 = vld [vmem:[#allocation22 + $0x80] ss:$8 sps:$4 sm:$0xff]  }
0x1451   : > { %16815 = vmatmul.mubr.bf16.gmra.mrb[244].mxu0 %v24280_v61  ;;  %v24294_v61 = vld [vmem:[#allocation22 + $0x10] ss:$8 sps:$4 sm:$0xff]  }
0x1452   : > { %17075 = vmatpush1.bf16.msra.mxu0 %v24258_v34  ;;  %16824 = vmatprep.mubr.bf16.mxu0 %v25410_v0  ;;  %v24279_v0 = vld [vmem:[#allocation22 + $0x1c4] ss:$8 sps:$4 sm:$0xff]  }
0x1453   : > { %17076 = vmatprep.subr.bf16.mxu0 %v24263_v39  ;;  %17990 = vmatpush1.bf16.msra.mxu1 %v24432_v11  ;;  %v24299_v39 = vld [vmem:[#allocation22 + $0x24] ss:$8 sps:$4 sm:$0xff]  }
0x1454   : > { %17991 = vmatprep.subr.bf16.mxu1 %v24440_v33  ;;  %v24320_v33 = vld [vmem:[#allocation22 + $0x94] ss:$8 sps:$4 sm:$0xff]  }
0x1456   : > { %17077 = vmatpush1.bf16.msra.mxu0 %v24261_v24 }
0x1457   : > { %17078 = vmatprep.subr.bf16.mxu0 %v24266_v15  ;;  %17992 = vmatpush1.bf16.msra.mxu1 %v24438_v32  ;;  %v24516_v32 = vld [vmem:[#allocation22 + $0x650] ss:$8 sps:$4 sm:$0xff]  }
0x1458   : > { %17993 = vmatprep.subr.bf16.mxu1 %v24446_v44  ;;  %v24524_v44 = vld [vmem:[#allocation22 + $0x664] ss:$8 sps:$4 sm:$0xff]  }
0x1459   : > { %16825 = vmatmul.mubr.bf16.gmra.mrb[248].mxu0 %v24287_v18 }
0x145a   : > { %17079 = vmatpush1.bf16.msra.mxu0 %v24264_v17  ;;  %v24297_v17 = vld [vmem:[#allocation22 + $0x20] ss:$8 sps:$4 sm:$0xff]  }
0x145b   : > { %17080 = vmatprep.subr.bf16.mxu0 %v24269_v27  ;;  %17994 = vmatpush1.bf16.msra.mxu1 %v24444_v42  ;;  %v24302_v27 = vld [vmem:[#allocation22 + $0x34] ss:$8 sps:$4 sm:$0xff]   ;;  %v24318_v42 = vld [vmem:[#allocation22 + $0x90] ss:$8 sps:$4 sm:$0xff]  }
0x145c   : > { %17995 = vmatprep.subr.bf16.mxu1 %v24452_v43  ;;  %v24323_v43 = vld [vmem:[#allocation22 + $0xa4] ss:$8 sps:$4 sm:$0xff]  }
0x145e   : > { %17081 = vmatpush1.bf16.msra.mxu0 %v24267_v62  ;;  %v24300_v62 = vld [vmem:[#allocation22 + $0x30] ss:$8 sps:$4 sm:$0xff]  }
0x145f   : > { %17082 = vmatprep.subr.bf16.mxu0 %v24272_v30  ;;  %17996 = vmatpush1.bf16.msra.mxu1 %v24450_v2  ;;  %v24522_v2 = vld [vmem:[#allocation22 + $0x660] ss:$8 sps:$4 sm:$0xff]  }
0x1460   : > { %17997 = vmatprep.subr.bf16.mxu1 %v24458_v6  ;;  %v24530_v6 = vld [vmem:[#allocation22 + $0x674] ss:$8 sps:$4 sm:$0xff]  }
0x1462   : > { %17083 = vmatpush1.bf16.msra.mxu0 %v24270_v7  ;;  %v24305_v7 = vld [vmem:[#allocation22 + $0x44] ss:$8 sps:$4 sm:$0xff]  }
0x1463   : > { %17084 = vmatprep.subr.bf16.mxu0 %v24276_v51  ;;  %17998 = vmatpush1.bf16.msra.mxu1 %v24456_v3  ;;  %v24321_v3 = vld [vmem:[#allocation22 + $0xa0] ss:$8 sps:$4 sm:$0xff]  }
0x1464   : > { %17999 = vmatprep.subr.bf16.mxu1 %v24464_v20  ;;  %v24326_v20 = vld [vmem:[#allocation22 + $0xb4] ss:$8 sps:$4 sm:$0xff]  }
0x1466   : > { %17085 = vmatpush1.bf16.msra.mxu0 %v24274_v53 }
0x1467   : > { %17086 = vmatprep.subr.bf16.mxu0 %v24279_v0  ;;  %18000 = vmatpush1.bf16.msra.mxu1 %v24462_v10  ;;  %v24528_v10 = vld [vmem:[#allocation22 + $0x670] ss:$8 sps:$4 sm:$0xff]  }
0x1468   : > { %18001 = vmatprep.subr.bf16.mxu1 %v24470_v57  ;;  %v24536_v57 = vld [vmem:[#allocation22 + $0x684] ss:$8 sps:$4 sm:$0xff]  }
0x146a   : > { %17087 = vmatpush1.bf16.msra.mxu0 %v24277_v19  ;;  %v24486_v19 = vld [vmem:[#allocation22 + $0x600] ss:$8 sps:$4 sm:$0xff]  }
0x146b   : > { %17088 = vmatprep.subr.bf16.mxu0 %v24283_v25  ;;  %18002 = vmatpush1.bf16.msra.mxu1 %v24468_v55  ;;  %v24494_v25 = vld [vmem:[#allocation22 + $0x614] ss:$8 sps:$4 sm:$0xff]   ;;  %v24324_v55 = vld [vmem:[#allocation22 + $0xb0] ss:$8 sps:$4 sm:$0xff]  }
0x146c   : > { %18003 = vmatprep.subr.bf16.mxu1 %v24476_v13  ;;  %v24329_v13 = vld [vmem:[#allocation22 + $0xc4] ss:$8 sps:$4 sm:$0xff]  }
0x146e   : > { %17089 = vmatpush1.bf16.msra.mxu0 %v24281_v63  ;;  %v24303_v63 = vld [vmem:[#allocation22 + $0x40] ss:$8 sps:$4 sm:$0xff]  }
0x146f   : > { %17090 = vmatprep.subr.bf16.mxu0 %v24286_v22  ;;  %18004 = vmatpush1.bf16.msra.mxu1 %v24474_v56  ;;  %v24308_v22 = vld [vmem:[#allocation22 + $0x54] ss:$8 sps:$4 sm:$0xff]   ;;  %v24534_v56 = vld [vmem:[#allocation22 + $0x680] ss:$8 sps:$4 sm:$0xff]  }
0x1470   : > { %18005 = vmatprep.subr.bf16.mxu1 %v24482_v48  ;;  %v24542_v48 = vld [vmem:[#allocation22 + $0x694] ss:$8 sps:$4 sm:$0xff]  }
0x1472   : > { %17091 = vmatpush1.bf16.msra.mxu0 %v24284_v14  ;;  %v24492_v14 = vld [vmem:[#allocation22 + $0x610] ss:$8 sps:$4 sm:$0xff]  }
0x1473   : > { %17092 = vmatprep.subr.bf16.mxu0 %v24290_v59  ;;  %18006 = vmatpush1.bf16.msra.mxu1 %v24480_v37  ;;  %v24306_v59 = vld [vmem:[#allocation22 + $0x50] ss:$8 sps:$4 sm:$0xff]   ;;  %v24327_v37 = vld [vmem:[#allocation22 + $0xc0] ss:$8 sps:$4 sm:$0xff]  }
0x1474   : > { %18451 = vmatprep.subr.bf16.mxu1 %v24488_v4  ;;  %v24332_v4 = vld [vmem:[#allocation22 + $0xd4] ss:$8 sps:$4 sm:$0xff]  }
0x1476   : > { %17093 = vmatpush1.bf16.msra.mxu0 %v24288_v29  ;;  %v24500_v29 = vld [vmem:[#allocation22 + $0x624] ss:$8 sps:$4 sm:$0xff]  }
0x1477   : > { %17263 = vmatprep.subr.bf16.mxu0 %v24293_v58  ;;  %v24311_v58 = vld [vmem:[#allocation22 + $0x64] ss:$8 sps:$4 sm:$0xff]  }
0x150c   : > { %v28495_v31 = vpop.f32.mrb[232].mxu0 }
0x150d   : > { %v16788_v47 = vpop.f32.mrb[233].mxu0 }
0x150e   : > { %v16790_v9 = vpop.f32.mrb[234].mxu0  ;;  %v16834_v46 = vpack.c.bf16 %v16788_v47, %v16788_v47  ;;  %v24540_v47 = vld [vmem:[#allocation22 + $0x690] ss:$8 sps:$4 sm:$0xff]  }
0x150f   : > { %v16792_v52 = vpop.f32.mrb[235].mxu0  ;;  %v16867_v38 = vpack.c.bf16 %v16790_v9, %v16790_v9  ;;  %v24548_v9 = vld [vmem:[#allocation22 + $0x6a4] ss:$8 sps:$4 sm:$0xff]  }
0x1510   : > { %v16868_v28 = vpack.c.bf16 %v16792_v52, %v16792_v52  ;;  %v24330_v52 = vld [vmem:[#allocation22 + $0xd0] ss:$8 sps:$4 sm:$0xff]  }
0x1512   : > { %17094 = vmatprep.mubr.bf16.mxu0 %v16868_v28  ;;  %v24335_v28 = vld [vmem:[#allocation22 + $0xe4] ss:$8 sps:$4 sm:$0xff]  }
0x1513   : > { %17095 = vmatmul.mubr.bf16.vlgmr.msra.gmra.mrb[252].mxu0 %v16867_v38  ;;  %v24554_v38 = vld [vmem:[#allocation22 + $0x6b4] ss:$8 sps:$4 sm:$0xff]  }
0x1514   : > { %17264 = vmatpush1.bf16.msra.mxu0 %v24291_v23  ;;  %17295 = vmatprep.mubr.bf16.mxu0 %v16834_v46  ;;  %v28497_v34 = vpop.f32.mrb[236].mxu0  ;;  %v24546_v23 = vld [vmem:[#allocation22 + $0x6a0] ss:$8 sps:$4 sm:$0xff]   ;;  %v24338_v46 = vld [vmem:[#allocation22 + $0xf4] ss:$8 sps:$4 sm:$0xff]  }
0x1515   : > { %17265 = vmatprep.subr.bf16.mxu0 %v24296_v41  ;;  %v28499_v24 = vpop.f32.mrb[237].mxu0  ;;  %v24333_v41 = vld [vmem:[#allocation22 + $0xe0] ss:$8 sps:$4 sm:$0xff]  }
0x1516   : > { %v28501_v15 = vpop.f32.mrb[238].mxu0 }
0x1517   : > { %v28503_v18 = vpop.f32.mrb[239].mxu0 }
0x1518   : > { %17266 = vmatpush1.bf16.msra.mxu0 %v24294_v61  ;;  %v24552_v61 = vld [vmem:[#allocation22 + $0x6b0] ss:$8 sps:$4 sm:$0xff]  }
0x1519   : > { %17267 = vmatprep.subr.bf16.mxu0 %v24299_v39  ;;  %v24560_v39 = vld [vmem:[#allocation22 + $0x6c4] ss:$8 sps:$4 sm:$0xff]  }
0x151c   : > { %17268 = vmatpush1.bf16.msra.mxu0 %v24297_v17  ;;  %v16806_v30 = vpop.f32.mrb[240].mxu0  ;;  %v24336_v17 = vld [vmem:[#allocation22 + $0xf0] ss:$8 sps:$4 sm:$0xff]  }
0x151d   : > { %17269 = vmatprep.subr.bf16.mxu0 %v24302_v27  ;;  %v17780_v51 = vpack.c.bf16 %v16806_v30, %v16806_v30  ;;  %v16808_v53 = vpop.f32.mrb[241].mxu0  ;;  %v24341_v27 = vld [vmem:[#allocation22 + $0x204] ss:$8 sps:$4 sm:$0xff]   ;;  %v24566_v30 = vld [vmem:[#allocation22 + $0x6d4] ss:$8 sps:$4 sm:$0xff]  }
0x151e   : > { %v17781_v0 = vpack.c.bf16 %v16808_v53, %v16808_v53  ;;  %v28505_v1 = vpop.f32.mrb[242].mxu0  ;;  %v16833_v53 = vpack.c.bf16 %v28495_v31, %v28495_v31  ;;  %v24350_v31 = vld [vmem:[#allocation22 + $0x234] ss:$8 sps:$4 sm:$0xff]  }
0x151f   : > { %v28507_v26 = vpop.f32.mrb[243].mxu0 }
0x1520   : > { %17270 = vmatpush1.bf16.msra.mxu0 %v24300_v62  ;;  %18007 = vmatprep.mubr.bf16.mxu1 %v17781_v0  ;;  %v24558_v62 = vld [vmem:[#allocation22 + $0x6c0] ss:$8 sps:$4 sm:$0xff]   ;;  %v24344_v0 = vld [vmem:[#allocation22 + $0x214] ss:$8 sps:$4 sm:$0xff]  }
0x1521   : > { %17271 = vmatprep.subr.bf16.mxu0 %v24305_v7  ;;  %18008 = vmatmul.mubr.bf16.vlgmr.msra.gmra.mrb[104].mxu1 %v17780_v51  ;;  %v24339_v7 = vld [vmem:[#allocation22 + $0x200] ss:$8 sps:$4 sm:$0xff]   ;;  %v17305_v51 = vpack.c.bf16 %v28499_v24, %v28499_v24 }
0x1522   : > { %18452 = vmatpush1.bf16.msra.mxu1 %v24486_v19  ;;  %v24564_v19 = vld [vmem:[#allocation22 + $0x6d0] ss:$8 sps:$4 sm:$0xff]   ;;  %v24345_v24 = vld [vmem:[#allocation22 + $0x220] ss:$8 sps:$4 sm:$0xff]  }
0x1523   : > { %18453 = vmatprep.subr.bf16.mxu1 %v24494_v25  ;;  %v24572_v25 = vld [vmem:[#allocation22 + $0x6e4] ss:$8 sps:$4 sm:$0xff]  }
0x1524   : > { %17272 = vmatpush1.bf16.msra.mxu0 %v24303_v63  ;;  %v28509_v50 = vpop.f32.mrb[244].mxu0  ;;  %v24342_v63 = vld [vmem:[#allocation22 + $0x210] ss:$8 sps:$4 sm:$0xff]  }
0x1525   : > { %17273 = vmatprep.subr.bf16.mxu0 %v24308_v22  ;;  %v16818_v16 = vpop.f32.mrb[245].mxu0  ;;  %v24347_v22 = vld [vmem:[#allocation22 + $0x224] ss:$8 sps:$4 sm:$0xff]  }
0x1526   : > { %18454 = vmatpush1.bf16.msra.mxu1 %v24492_v14  ;;  %v18257_v11 = vpack.c.bf16 %v16818_v16, %v16818_v16  ;;  %v24570_v14 = vld [vmem:[#allocation22 + $0x6e0] ss:$8 sps:$4 sm:$0xff]   ;;  %v24359_v16 = vld [vmem:[#allocation22 + $0x264] ss:$8 sps:$4 sm:$0xff]  }
0x1527   : > { %18455 = vmatprep.subr.bf16.mxu1 %v24500_v29  ;;  %v24578_v29 = vld [vmem:[#allocation22 + $0x6f4] ss:$8 sps:$4 sm:$0xff]  }
0x1528   : > { %17274 = vmatpush1.bf16.msra.mxu0 %v24306_v59  ;;  %18483 = vmatprep.mubr.bf16.mxu1 %v18257_v11  ;;  %v24576_v59 = vld [vmem:[#allocation22 + $0x6f0] ss:$8 sps:$4 sm:$0xff]   ;;  %v24357_v11 = vld [vmem:[#allocation22 + $0x260] ss:$8 sps:$4 sm:$0xff]  }
0x1529   : > { %17275 = vmatprep.subr.bf16.mxu0 %v24311_v58  ;;  %v24584_v58 = vld [vmem:[#allocation22 + $0x804] ss:$8 sps:$4 sm:$0xff]  }
0x152a   : > { %18456 = vmatpush1.bf16.msra.mxu1 %v24498_v35  ;;  %v24348_v35 = vld [vmem:[#allocation22 + $0x230] ss:$8 sps:$4 sm:$0xff]  }
0x152b   : > { %18457 = vmatprep.subr.bf16.mxu1 %v24506_v60  ;;  %v24353_v60 = vld [vmem:[#allocation22 + $0x244] ss:$8 sps:$4 sm:$0xff]  }
0x152c   : > { %17276 = vmatpush1.bf16.msra.mxu0 %v24309_v5  ;;  %v18256_v5 = vpack.c.bf16 %v28509_v50, %v28509_v50  ;;  %v24602_v50 = vld [vmem:[#allocation22 + $0x834] ss:$8 sps:$4 sm:$0xff]  }
0x152d   : > { %17277 = vmatprep.subr.bf16.mxu0 %v24314_v36  ;;  %v24582_v36 = vld [vmem:[#allocation22 + $0x800] ss:$8 sps:$4 sm:$0xff]  }
0x152e   : > { %18458 = vmatpush1.bf16.msra.mxu1 %v24504_v21  ;;  %v24590_v21 = vld [vmem:[#allocation22 + $0x814] ss:$8 sps:$4 sm:$0xff]  }
0x152f   : > { %18459 = vmatprep.subr.bf16.mxu1 %v24512_v8  ;;  %v24351_v8 = vld [vmem:[#allocation22 + $0x240] ss:$8 sps:$4 sm:$0xff]  }
0x1530   : > { %17278 = vmatpush1.bf16.msra.mxu0 %v24312_v49  ;;  %v24356_v49 = vld [vmem:[#allocation22 + $0x254] ss:$8 sps:$4 sm:$0xff]  }
0x1531   : > { %17279 = vmatprep.subr.bf16.mxu0 %v24317_v40  ;;  %v24588_v40 = vld [vmem:[#allocation22 + $0x810] ss:$8 sps:$4 sm:$0xff]  }
0x1532   : > { %18460 = vmatpush1.bf16.msra.mxu1 %v24510_v54  ;;  %v24596_v54 = vld [vmem:[#allocation22 + $0x824] ss:$8 sps:$4 sm:$0xff]  }
0x1533   : > { %18461 = vmatprep.subr.bf16.mxu1 %v24518_v12  ;;  %v24354_v12 = vld [vmem:[#allocation22 + $0x250] ss:$8 sps:$4 sm:$0xff]  }
0x1534   : > { %17280 = vmatpush1.bf16.msra.mxu0 %v24315_v45  ;;  %v24594_v45 = vld [vmem:[#allocation22 + $0x820] ss:$8 sps:$4 sm:$0xff]  }
0x1535   : > { %17281 = vmatprep.subr.bf16.mxu0 %v24320_v33  ;;  %v24362_v33 = vld [vmem:[#allocation22 + $0x274] ss:$8 sps:$4 sm:$0xff]  }
0x1536   : > { %18462 = vmatpush1.bf16.msra.mxu1 %v24516_v32  ;;  %v28517_v32 = vpop.f32.mrb[246].mxu0 }
0x1537   : > { %18463 = vmatprep.subr.bf16.mxu1 %v24524_v44  ;;  %v24600_v44 = vld [vmem:[#allocation22 + $0x830] ss:$8 sps:$4 sm:$0xff]  }
0x1538   : > { %17282 = vmatpush1.bf16.msra.mxu0 %v24318_v42  ;;  %v28519_v42 = vpop.f32.mrb[247].mxu0 }
0x1539   : > { %17283 = vmatprep.subr.bf16.mxu0 %v24323_v43  ;;  %v24608_v43 = vld [vmem:[#allocation22 + $0x844] ss:$8 sps:$4 sm:$0xff]  }
0x153a   : > { %18464 = vmatpush1.bf16.msra.mxu1 %v24522_v2  ;;  %v24360_v2 = vld [vmem:[#allocation22 + $0x270] ss:$8 sps:$4 sm:$0xff]  }
0x153b   : > { %18465 = vmatprep.subr.bf16.mxu1 %v24530_v6  ;;  %v24365_v6 = vld [vmem:[#allocation22 + $0x284] ss:$8 sps:$4 sm:$0xff]  }
0x153c   : > { %17284 = vmatpush1.bf16.msra.mxu0 %v24321_v3  ;;  %v28521_v3 = vpop.f32.mrb[248].mxu0 }
0x153d   : > { %17285 = vmatprep.subr.bf16.mxu0 %v24326_v20  ;;  %v24606_v20 = vld [vmem:[#allocation22 + $0x840] ss:$8 sps:$4 sm:$0xff]  }
0x153e   : > { %18466 = vmatpush1.bf16.msra.mxu1 %v24528_v10  ;;  %v16828_v10 = vpop.f32.mrb[249].mxu0 }
0x153f   : > { %18467 = vmatprep.subr.bf16.mxu1 %v24536_v57  ;;  %v24614_v57 = vld [vmem:[#allocation22 + $0x854] ss:$8 sps:$4 sm:$0xff]  }
0x1540   : > { %17286 = vmatpush1.bf16.msra.mxu0 %v24324_v55  ;;  %v18733_v55 = vpack.c.bf16 %v16828_v10, %v16828_v10  ;;  %v24431_v10 = vld [vmem:[#allocation22 + $0x374] ss:$8 sps:$4 sm:$0xff]  }
0x1541   : > { %17287 = vmatprep.subr.bf16.mxu0 %v24329_v13  ;;  %v16830_v13 = vpop.f32.mrb[250].mxu0 }
0x1542   : > { %18468 = vmatpush1.bf16.msra.mxu1 %v24534_v56  ;;  %v24363_v56 = vld [vmem:[#allocation22 + $0x280] ss:$8 sps:$4 sm:$0xff]   ;;  %v24443_v13 = vld [vmem:[#allocation22 + $0x394] ss:$8 sps:$4 sm:$0xff]  }
0x1543   : > { %18469 = vmatprep.subr.bf16.mxu1 %v24542_v48  ;;  %v16831_v48 = vpop.f32.mrb[251].mxu0 }
0x1544   : > { %17288 = vmatpush1.bf16.msra.mxu0 %v24327_v37  ;;  %v24368_v37 = vld [vmem:[#allocation22 + $0x294] ss:$8 sps:$4 sm:$0xff]   ;;  %v24449_v48 = vld [vmem:[#allocation22 + $0x3a4] ss:$8 sps:$4 sm:$0xff]  }
0x1545   : > { %17289 = vmatprep.subr.bf16.mxu0 %v24332_v4  ;;  %v24612_v4 = vld [vmem:[#allocation22 + $0x850] ss:$8 sps:$4 sm:$0xff]  }
0x1546   : > { %18470 = vmatpush1.bf16.msra.mxu1 %v24540_v47  ;;  %v24620_v47 = vld [vmem:[#allocation22 + $0x864] ss:$8 sps:$4 sm:$0xff]  }
0x1547   : > { %18471 = vmatprep.subr.bf16.mxu1 %v24548_v9  ;;  %v24366_v9 = vld [vmem:[#allocation22 + $0x290] ss:$8 sps:$4 sm:$0xff]  }
0x1548   : > { %17290 = vmatpush1.bf16.msra.mxu0 %v24330_v52  ;;  %v24371_v52 = vld [vmem:[#allocation22 + $0x2a4] ss:$8 sps:$4 sm:$0xff]  }
0x1549   : > { %17291 = vmatprep.subr.bf16.mxu0 %v24335_v28  ;;  %v24618_v28 = vld [vmem:[#allocation22 + $0x860] ss:$8 sps:$4 sm:$0xff]  }
0x154a   : > { %18472 = vmatpush1.bf16.msra.mxu1 %v24546_v23  ;;  %v24626_v23 = vld [vmem:[#allocation22 + $0x874] ss:$8 sps:$4 sm:$0xff]  }
0x154b   : > { %18473 = vmatprep.subr.bf16.mxu1 %v24554_v38  ;;  %v24369_v38 = vld [vmem:[#allocation22 + $0x2a0] ss:$8 sps:$4 sm:$0xff]  }
0x154c   : > { %17292 = vmatpush1.bf16.msra.mxu0 %v24333_v41  ;;  %v24374_v41 = vld [vmem:[#allocation22 + $0x2b4] ss:$8 sps:$4 sm:$0xff]  }
0x154d   : > { %17293 = vmatprep.subr.bf16.mxu0 %v24338_v46  ;;  %v24624_v46 = vld [vmem:[#allocation22 + $0x870] ss:$8 sps:$4 sm:$0xff]  }
0x154e   : > { %18474 = vmatpush1.bf16.msra.mxu1 %v24552_v61  ;;  %v24632_v61 = vld [vmem:[#allocation22 + $0x884] ss:$8 sps:$4 sm:$0xff]  }
0x154f   : > { %18475 = vmatprep.subr.bf16.mxu1 %v24560_v39  ;;  %v24372_v39 = vld [vmem:[#allocation22 + $0x2b0] ss:$8 sps:$4 sm:$0xff]  }
0x1550   : > { %17294 = vmatpush1.bf16.msra.mxu0 %v24336_v17  ;;  %v24377_v17 = vld [vmem:[#allocation22 + $0x2c4] ss:$8 sps:$4 sm:$0xff]  }
0x1551   : > { %17499 = vmatprep.subr.bf16.mxu0 %v24341_v27  ;;  %v24630_v27 = vld [vmem:[#allocation22 + $0x880] ss:$8 sps:$4 sm:$0xff]  }
0x1552   : > { %18476 = vmatpush1.bf16.msra.mxu1 %v24558_v62  ;;  %v24638_v62 = vld [vmem:[#allocation22 + $0x894] ss:$8 sps:$4 sm:$0xff]  }
0x1553   : > { %17296 = vmatmul.mubr.bf16.vlgmr.msra.gmra.mrb[0].mxu0 %v16833_v53  ;;  %18477 = vmatprep.subr.bf16.mxu1 %v24566_v30  ;;  %v24375_v30 = vld [vmem:[#allocation22 + $0x2c0] ss:$8 sps:$4 sm:$0xff]   ;;  %v24644_v53 = vld [vmem:[#allocation22 + $0x8a4] ss:$8 sps:$4 sm:$0xff]  }
0x1554   : > { %17500 = vmatpush1.bf16.msra.mxu0 %v24339_v7  ;;  %17531 = vmatprep.mubr.bf16.mxu0 %v17305_v51  ;;  %v24380_v7 = vld [vmem:[#allocation22 + $0x2d4] ss:$8 sps:$4 sm:$0xff]   ;;  %v24636_v51 = vld [vmem:[#allocation22 + $0x890] ss:$8 sps:$4 sm:$0xff]  }
0x1555   : > { %17501 = vmatprep.subr.bf16.mxu0 %v24344_v0  ;;  %v24378_v0 = vld [vmem:[#allocation22 + $0x2d0] ss:$8 sps:$4 sm:$0xff]  }
0x1556   : > { %18478 = vmatpush1.bf16.msra.mxu1 %v24564_v19  ;;  %v24383_v19 = vld [vmem:[#allocation22 + $0x2e4] ss:$8 sps:$4 sm:$0xff]  }
0x1557   : > { %18479 = vmatprep.subr.bf16.mxu1 %v24572_v25  ;;  %v24642_v25 = vld [vmem:[#allocation22 + $0x8a0] ss:$8 sps:$4 sm:$0xff]  }
0x1558   : > { %17502 = vmatpush1.bf16.msra.mxu0 %v24342_v63  ;;  %v24650_v63 = vld [vmem:[#allocation22 + $0x8b4] ss:$8 sps:$4 sm:$0xff]  }
0x1559   : > { %17503 = vmatprep.subr.bf16.mxu0 %v24347_v22  ;;  %v24381_v22 = vld [vmem:[#allocation22 + $0x2e0] ss:$8 sps:$4 sm:$0xff]  }
0x155a   : > { %18480 = vmatpush1.bf16.msra.mxu1 %v24570_v14  ;;  %v24386_v14 = vld [vmem:[#allocation22 + $0x2f4] ss:$8 sps:$4 sm:$0xff]  }
0x155b   : > { %18481 = vmatprep.subr.bf16.mxu1 %v24578_v29  ;;  %v24648_v29 = vld [vmem:[#allocation22 + $0x8b0] ss:$8 sps:$4 sm:$0xff]  }
0x155c   : > { %17504 = vmatpush1.bf16.msra.mxu0 %v24345_v24  ;;  %v24656_v24 = vld [vmem:[#allocation22 + $0x8c4] ss:$8 sps:$4 sm:$0xff]  }
0x155d   : > { %17505 = vmatprep.subr.bf16.mxu0 %v24350_v31  ;;  %v24384_v31 = vld [vmem:[#allocation22 + $0x2f0] ss:$8 sps:$4 sm:$0xff]  }
0x155e   : > { %18482 = vmatpush1.bf16.msra.mxu1 %v24576_v59  ;;  %v24389_v59 = vld [vmem:[#allocation22 + $0x304] ss:$8 sps:$4 sm:$0xff]  }
0x155f   : > { %18927 = vmatprep.subr.bf16.mxu1 %v24584_v58  ;;  %v24654_v58 = vld [vmem:[#allocation22 + $0x8c0] ss:$8 sps:$4 sm:$0xff]  }
0x1560   : > { %17506 = vmatpush1.bf16.msra.mxu0 %v24348_v35  ;;  %v17304_v35 = vpack.c.bf16 %v28497_v34, %v28497_v34  ;;  %v24666_v34 = vld [vmem:[#allocation22 + $0x8e0] ss:$8 sps:$4 sm:$0xff]  }
0x1561   : > { %17507 = vmatprep.subr.bf16.mxu0 %v24353_v60  ;;  %18484 = vmatmul.mubr.bf16.vlgmr.msra.gmra.mrb[108].mxu1 %v18256_v5  ;;  %v24662_v60 = vld [vmem:[#allocation22 + $0x8d4] ss:$8 sps:$4 sm:$0xff]   ;;  %v24387_v5 = vld [vmem:[#allocation22 + $0x300] ss:$8 sps:$4 sm:$0xff]  }
0x1562   : > { %18928 = vmatpush1.bf16.msra.mxu1 %v24582_v36  ;;  %18959 = vmatprep.mubr.bf16.mxu1 %v18733_v55  ;;  %v24395_v36 = vld [vmem:[#allocation22 + $0x314] ss:$8 sps:$4 sm:$0xff]   ;;  %v24437_v55 = vld [vmem:[#allocation22 + $0x384] ss:$8 sps:$4 sm:$0xff]  }
0x1563   : > { %18929 = vmatprep.subr.bf16.mxu1 %v24590_v21  ;;  %v17543_v21 = vpack.c.bf16 %v28503_v18, %v28503_v18  ;;  %v24672_v18 = vld [vmem:[#allocation22 + $0x8f0] ss:$8 sps:$4 sm:$0xff]  }
0x1564   : > { %17508 = vmatpush1.bf16.msra.mxu0 %v24351_v8  ;;  %v24660_v8 = vld [vmem:[#allocation22 + $0x8d0] ss:$8 sps:$4 sm:$0xff]  }
0x1565   : > { %17509 = vmatprep.subr.bf16.mxu0 %v24356_v49  ;;  %v24668_v49 = vld [vmem:[#allocation22 + $0x8e4] ss:$8 sps:$4 sm:$0xff]  }
0x1566   : > { %18930 = vmatpush1.bf16.msra.mxu1 %v24588_v40  ;;  %v24393_v40 = vld [vmem:[#allocation22 + $0x310] ss:$8 sps:$4 sm:$0xff]  }
0x1567   : > { %18931 = vmatprep.subr.bf16.mxu1 %v24596_v54  ;;  %v24401_v54 = vld [vmem:[#allocation22 + $0x324] ss:$8 sps:$4 sm:$0xff]  }
0x1568   : > { %17510 = vmatpush1.bf16.msra.mxu0 %v24354_v12  ;;  %v24674_v12 = vld [vmem:[#allocation22 + $0x8f4] ss:$8 sps:$4 sm:$0xff]  }
0x1569   : > { %17511 = vmatprep.subr.bf16.mxu0 %v24359_v16  ;;  %v24399_v16 = vld [vmem:[#allocation22 + $0x320] ss:$8 sps:$4 sm:$0xff]  }
0x156a   : > { %18932 = vmatpush1.bf16.msra.mxu1 %v24594_v45  ;;  %v24407_v45 = vld [vmem:[#allocation22 + $0x334] ss:$8 sps:$4 sm:$0xff]  }
0x156b   : > { %18933 = vmatprep.subr.bf16.mxu1 %v24602_v50  ;;  %v24405_v50 = vld [vmem:[#allocation22 + $0x330] ss:$8 sps:$4 sm:$0xff]  }
0x156c   : > { %17512 = vmatpush1.bf16.msra.mxu0 %v24357_v11  ;;  %v24413_v11 = vld [vmem:[#allocation22 + $0x344] ss:$8 sps:$4 sm:$0xff]  }
0x156d   : > { %17513 = vmatprep.subr.bf16.mxu0 %v24362_v33  ;;  %v18732_v33 = vpack.c.bf16 %v28521_v3, %v28521_v3  ;;  %v24435_v3 = vld [vmem:[#allocation22 + $0x380] ss:$8 sps:$4 sm:$0xff]  }
0x156e   : > { %18934 = vmatpush1.bf16.msra.mxu1 %v24600_v44  ;;  %v24411_v44 = vld [vmem:[#allocation22 + $0x340] ss:$8 sps:$4 sm:$0xff]  }
0x156f   : > { %18935 = vmatprep.subr.bf16.mxu1 %v24608_v43  ;;  %v24419_v43 = vld [vmem:[#allocation22 + $0x354] ss:$8 sps:$4 sm:$0xff]  }
0x1570   : > { %17514 = vmatpush1.bf16.msra.mxu0 %v24360_v2  ;;  %v24417_v2 = vld [vmem:[#allocation22 + $0x350] ss:$8 sps:$4 sm:$0xff]  }
0x1571   : > { %17515 = vmatprep.subr.bf16.mxu0 %v24365_v6  ;;  %v24425_v6 = vld [vmem:[#allocation22 + $0x364] ss:$8 sps:$4 sm:$0xff]  }
0x1572   : > { %18936 = vmatpush1.bf16.msra.mxu1 %v24606_v20  ;;  %v24423_v20 = vld [vmem:[#allocation22 + $0x360] ss:$8 sps:$4 sm:$0xff]  }
0x1573   : > { %18937 = vmatprep.subr.bf16.mxu1 %v24614_v57  ;;  %v24429_v57 = vld [vmem:[#allocation22 + $0x370] ss:$8 sps:$4 sm:$0xff]  }
0x1574   : > { %17516 = vmatpush1.bf16.msra.mxu0 %v24363_v56  ;;  %v24441_v56 = vld [vmem:[#allocation22 + $0x390] ss:$8 sps:$4 sm:$0xff]  }
0x1575   : > { %17517 = vmatprep.subr.bf16.mxu0 %v24368_v37  ;;  %v24447_v37 = vld [vmem:[#allocation22 + $0x3a0] ss:$8 sps:$4 sm:$0xff]  }
0x1576   : > { %18938 = vmatpush1.bf16.msra.mxu1 %v24612_v4  ;;  %v24455_v4 = vld [vmem:[#allocation22 + $0x3b4] ss:$8 sps:$4 sm:$0xff]  }
0x1577   : > { %18939 = vmatprep.subr.bf16.mxu1 %v24620_v47  ;;  %v24453_v47 = vld [vmem:[#allocation22 + $0x3b0] ss:$8 sps:$4 sm:$0xff]  }
0x1578   : > { %17518 = vmatpush1.bf16.msra.mxu0 %v24366_v9  ;;  %v24461_v9 = vld [vmem:[#allocation22 + $0x3c4] ss:$8 sps:$4 sm:$0xff]  }
0x1579   : > { %17519 = vmatprep.subr.bf16.mxu0 %v24371_v52  ;;  %v24459_v52 = vld [vmem:[#allocation22 + $0x3c0] ss:$8 sps:$4 sm:$0xff]  }
0x157a   : > { %18940 = vmatpush1.bf16.msra.mxu1 %v24618_v28  ;;  %v24467_v28 = vld [vmem:[#allocation22 + $0x3d4] ss:$8 sps:$4 sm:$0xff]  }
0x157b   : > { %18941 = vmatprep.subr.bf16.mxu1 %v24626_v23  ;;  %v24465_v23 = vld [vmem:[#allocation22 + $0x3d0] ss:$8 sps:$4 sm:$0xff]  }
0x157c   : > { %17520 = vmatpush1.bf16.msra.mxu0 %v24369_v38  ;;  %v24473_v38 = vld [vmem:[#allocation22 + $0x3e4] ss:$8 sps:$4 sm:$0xff]  }
0x157d   : > { %17521 = vmatprep.subr.bf16.mxu0 %v24374_v41  ;;  %v24471_v41 = vld [vmem:[#allocation22 + $0x3e0] ss:$8 sps:$4 sm:$0xff]  }
0x157e   : > { %18942 = vmatpush1.bf16.msra.mxu1 %v24624_v46  ;;  %v24479_v46 = vld [vmem:[#allocation22 + $0x3f4] ss:$8 sps:$4 sm:$0xff]  }
0x157f   : > { %18943 = vmatprep.subr.bf16.mxu1 %v24632_v61  ;;  %v24477_v61 = vld [vmem:[#allocation22 + $0x3f0] ss:$8 sps:$4 sm:$0xff]  }
0x1580   : > { %17522 = vmatpush1.bf16.msra.mxu0 %v24372_v39  ;;  %v24485_v39 = vld [vmem:[#allocation22 + $0x504] ss:$8 sps:$4 sm:$0xff]  }
0x1581   : > { %17523 = vmatprep.subr.bf16.mxu0 %v24377_v17  ;;  %v24483_v17 = vld [vmem:[#allocation22 + $0x500] ss:$8 sps:$4 sm:$0xff]  }
0x1582   : > { %18944 = vmatpush1.bf16.msra.mxu1 %v24630_v27  ;;  %v17542_v27 = vpack.c.bf16 %v28501_v15, %v28501_v15  ;;  %v24507_v15 = vld [vmem:[#allocation22 + $0x540] ss:$8 sps:$4 sm:$0xff]  }
0x1583   : > { %18945 = vmatprep.subr.bf16.mxu1 %v24638_v62  ;;  %v24491_v62 = vld [vmem:[#allocation22 + $0x514] ss:$8 sps:$4 sm:$0xff]  }
0x1584   : > { %17524 = vmatpush1.bf16.msra.mxu0 %v24375_v30  ;;  %v18019_v30 = vpack.c.bf16 %v28507_v26, %v28507_v26  ;;  %v24513_v26 = vld [vmem:[#allocation22 + $0x550] ss:$8 sps:$4 sm:$0xff]  }
0x1585   : > { %17525 = vmatprep.subr.bf16.mxu0 %v24380_v7  ;;  %v24489_v7 = vld [vmem:[#allocation22 + $0x510] ss:$8 sps:$4 sm:$0xff]  }
0x1586   : > { %18946 = vmatpush1.bf16.msra.mxu1 %v24636_v51  ;;  %v24497_v51 = vld [vmem:[#allocation22 + $0x524] ss:$8 sps:$4 sm:$0xff]  }
0x1587   : > { %18947 = vmatprep.subr.bf16.mxu1 %v24644_v53  ;;  %v24495_v53 = vld [vmem:[#allocation22 + $0x520] ss:$8 sps:$4 sm:$0xff]  }
0x1588   : > { %17526 = vmatpush1.bf16.msra.mxu0 %v24378_v0  ;;  %v24503_v0 = vld [vmem:[#allocation22 + $0x534] ss:$8 sps:$4 sm:$0xff]  }
0x1589   : > { %17527 = vmatprep.subr.bf16.mxu0 %v24383_v19  ;;  %v24501_v19 = vld [vmem:[#allocation22 + $0x530] ss:$8 sps:$4 sm:$0xff]  }
0x158a   : > { %18948 = vmatpush1.bf16.msra.mxu1 %v24642_v25  ;;  %v24509_v25 = vld [vmem:[#allocation22 + $0x544] ss:$8 sps:$4 sm:$0xff]  }
0x158b   : > { %18949 = vmatprep.subr.bf16.mxu1 %v24650_v63  ;;  %v24515_v63 = vld [vmem:[#allocation22 + $0x554] ss:$8 sps:$4 sm:$0xff]  }
0x158c   : > { %17528 = vmatpush1.bf16.msra.mxu0 %v24381_v22  ;;  %v24521_v22 = vld [vmem:[#allocation22 + $0x564] ss:$8 sps:$4 sm:$0xff]  }
0x158d   : > { %17529 = vmatprep.subr.bf16.mxu0 %v24386_v14 }
0x158e   : > { %18950 = vmatpush1.bf16.msra.mxu1 %v24648_v29 }
0x158f   : > { %18951 = vmatprep.subr.bf16.mxu1 %v24656_v24  ;;  %v24519_v24 = vld [vmem:[#allocation22 + $0x560] ss:$8 sps:$4 sm:$0xff]  }
0x1590   : > { %17530 = vmatpush1.bf16.msra.mxu0 %v24384_v31 }
0x1591   : > { %17737 = vmatprep.subr.bf16.mxu0 %v24389_v59  ;;  %v24527_v59 = vld [vmem:[#allocation22 + $0x574] ss:$8 sps:$4 sm:$0xff]  }
0x1592   : > { %18952 = vmatpush1.bf16.msra.mxu1 %v24654_v58 }
0x1593   : > { %17532 = vmatmul.mubr.bf16.vlgmr.msra.gmra.mrb[4].mxu0 %v17304_v35  ;;  %18953 = vmatprep.subr.bf16.mxu1 %v24662_v60  ;;  %v24525_v35 = vld [vmem:[#allocation22 + $0x570] ss:$8 sps:$4 sm:$0xff]   ;;  %v24533_v60 = vld [vmem:[#allocation22 + $0x584] ss:$8 sps:$4 sm:$0xff]  }
0x1594   : > { %17738 = vmatpush1.bf16.msra.mxu0 %v24387_v5  ;;  %17769 = vmatprep.mubr.bf16.mxu0 %v17543_v21  ;;  %v24531_v5 = vld [vmem:[#allocation22 + $0x580] ss:$8 sps:$4 sm:$0xff]   ;;  %v24537_v21 = vld [vmem:[#allocation22 + $0x590] ss:$8 sps:$4 sm:$0xff]  }
0x1595   : > { %17739 = vmatprep.subr.bf16.mxu0 %v24395_v36  ;;  %v24539_v36 = vld [vmem:[#allocation22 + $0x594] ss:$8 sps:$4 sm:$0xff]  }
0x1596   : > { %18954 = vmatpush1.bf16.msra.mxu1 %v24660_v8  ;;  %v24545_v8 = vld [vmem:[#allocation22 + $0x5a4] ss:$8 sps:$4 sm:$0xff]  }
0x1597   : > { %18955 = vmatprep.subr.bf16.mxu1 %v24668_v49  ;;  %v24543_v49 = vld [vmem:[#allocation22 + $0x5a0] ss:$8 sps:$4 sm:$0xff]  }
0x1598   : > { %17740 = vmatpush1.bf16.msra.mxu0 %v24393_v40  ;;  %v24551_v40 = vld [vmem:[#allocation22 + $0x5b4] ss:$8 sps:$4 sm:$0xff]  }
0x1599   : > { %17741 = vmatprep.subr.bf16.mxu0 %v24401_v54  ;;  %v24549_v54 = vld [vmem:[#allocation22 + $0x5b0] ss:$8 sps:$4 sm:$0xff]  }
0x159a   : > { %18956 = vmatpush1.bf16.msra.mxu1 %v24666_v34  ;;  %v24557_v34 = vld [vmem:[#allocation22 + $0x5c4] ss:$8 sps:$4 sm:$0xff]  }
0x159b   : > { %18957 = vmatprep.subr.bf16.mxu1 %v24674_v12  ;;  %v24555_v12 = vld [vmem:[#allocation22 + $0x5c0] ss:$8 sps:$4 sm:$0xff]  }
0x159c   : > { %17742 = vmatpush1.bf16.msra.mxu0 %v24399_v16  ;;  %v24563_v16 = vld [vmem:[#allocation22 + $0x5d4] ss:$8 sps:$4 sm:$0xff]  }
0x159d   : > { %17743 = vmatprep.subr.bf16.mxu0 %v24407_v45  ;;  %v24561_v45 = vld [vmem:[#allocation22 + $0x5d0] ss:$8 sps:$4 sm:$0xff]  }
0x159e   : > { %18958 = vmatpush1.bf16.msra.mxu1 %v24672_v18  ;;  %v24569_v18 = vld [vmem:[#allocation22 + $0x5e4] ss:$8 sps:$4 sm:$0xff]  }
0x15a0   : > { %17744 = vmatpush1.bf16.msra.mxu0 %v24405_v50  ;;  %v24567_v50 = vld [vmem:[#allocation22 + $0x5e0] ss:$8 sps:$4 sm:$0xff]  }
0x15a1   : > { %17745 = vmatprep.subr.bf16.mxu0 %v24413_v11  ;;  %18960 = vmatmul.mubr.bf16.vlgmr.msra.gmra.mrb[112].mxu1 %v18732_v33  ;;  %v24575_v11 = vld [vmem:[#allocation22 + $0x5f4] ss:$8 sps:$4 sm:$0xff]   ;;  %v24573_v33 = vld [vmem:[#allocation22 + $0x5f0] ss:$8 sps:$4 sm:$0xff]  }
0x15a4   : > { %17746 = vmatpush1.bf16.msra.mxu0 %v24411_v44  ;;  %v24581_v44 = vld [vmem:[#allocation22 + $0x704] ss:$8 sps:$4 sm:$0xff]  }
0x15a5   : > { %17747 = vmatprep.subr.bf16.mxu0 %v24419_v43  ;;  %v24579_v43 = vld [vmem:[#allocation22 + $0x700] ss:$8 sps:$4 sm:$0xff]  }
0x15a8   : > { %17748 = vmatpush1.bf16.msra.mxu0 %v24417_v2  ;;  %v18018_v2 = vpack.c.bf16 %v28505_v1, %v28505_v1  ;;  %v24603_v1 = vld [vmem:[#allocation22 + $0x740] ss:$8 sps:$4 sm:$0xff]  }
0x15a9   : > { %17749 = vmatprep.subr.bf16.mxu0 %v24425_v6  ;;  %v24587_v6 = vld [vmem:[#allocation22 + $0x714] ss:$8 sps:$4 sm:$0xff]  }
0x15ac   : > { %17750 = vmatpush1.bf16.msra.mxu0 %v24423_v20  ;;  %v18495_v20 = vpack.c.bf16 %v28519_v42, %v28519_v42  ;;  %v24609_v42 = vld [vmem:[#allocation22 + $0x750] ss:$8 sps:$4 sm:$0xff]  }
0x15ad   : > { %17751 = vmatprep.subr.bf16.mxu0 %v24431_v10  ;;  %v24585_v10 = vld [vmem:[#allocation22 + $0x710] ss:$8 sps:$4 sm:$0xff]  }
0x15b0   : > { %17752 = vmatpush1.bf16.msra.mxu0 %v24429_v57  ;;  %v24593_v57 = vld [vmem:[#allocation22 + $0x724] ss:$8 sps:$4 sm:$0xff]  }
0x15b1   : > { %17753 = vmatprep.subr.bf16.mxu0 %v24437_v55  ;;  %v24591_v55 = vld [vmem:[#allocation22 + $0x720] ss:$8 sps:$4 sm:$0xff]  }
0x15b4   : > { %17754 = vmatpush1.bf16.msra.mxu0 %v24435_v3  ;;  %v24599_v3 = vld [vmem:[#allocation22 + $0x734] ss:$8 sps:$4 sm:$0xff]  }
0x15b5   : > { %17755 = vmatprep.subr.bf16.mxu0 %v24443_v13  ;;  %v24597_v13 = vld [vmem:[#allocation22 + $0x730] ss:$8 sps:$4 sm:$0xff]  }
0x15b8   : > { %17756 = vmatpush1.bf16.msra.mxu0 %v24441_v56  ;;  %v24605_v56 = vld [vmem:[#allocation22 + $0x744] ss:$8 sps:$4 sm:$0xff]  }
0x15b9   : > { %17757 = vmatprep.subr.bf16.mxu0 %v24449_v48  ;;  %v24611_v48 = vld [vmem:[#allocation22 + $0x754] ss:$8 sps:$4 sm:$0xff]  }
0x15bc   : > { %17758 = vmatpush1.bf16.msra.mxu0 %v24447_v37  ;;  %v24617_v37 = vld [vmem:[#allocation22 + $0x764] ss:$8 sps:$4 sm:$0xff]  }
0x15bd   : > { %17759 = vmatprep.subr.bf16.mxu0 %v24455_v4 }
0x15c0   : > { %17760 = vmatpush1.bf16.msra.mxu0 %v24453_v47 }
0x15c1   : > { %17761 = vmatprep.subr.bf16.mxu0 %v24461_v9 }
0x15c4   : > { %17762 = vmatpush1.bf16.msra.mxu0 %v24459_v52  ;;  %v24615_v52 = vld [vmem:[#allocation22 + $0x760] ss:$8 sps:$4 sm:$0xff]  }
0x15c5   : > { %17763 = vmatprep.subr.bf16.mxu0 %v24467_v28 }
0x15c8   : > { %17764 = vmatpush1.bf16.msra.mxu0 %v24465_v23 }
0x15c9   : > { %17765 = vmatprep.subr.bf16.mxu0 %v24473_v38 }
0x15cc   : > { %17766 = vmatpush1.bf16.msra.mxu0 %v24471_v41  ;;  %v24623_v41 = vld [vmem:[#allocation22 + $0x774] ss:$8 sps:$4 sm:$0xff]  }
0x15cd   : > { %17767 = vmatprep.subr.bf16.mxu0 %v24479_v46 }
0x15d0   : > { %17768 = vmatpush1.bf16.msra.mxu0 %v24477_v61 }
0x15d1   : > { %18213 = vmatprep.subr.bf16.mxu0 %v24485_v39 }
0x15d3   : > { %17770 = vmatmul.mubr.bf16.vlgmr.msra.gmra.mrb[8].mxu0 %v17542_v27  ;;  %v24621_v27 = vld [vmem:[#allocation22 + $0x770] ss:$8 sps:$4 sm:$0xff]  }
0x15d4   : > { %18214 = vmatpush1.bf16.msra.mxu0 %v24483_v17  ;;  %18245 = vmatprep.mubr.bf16.mxu0 %v18019_v30  ;;  %v24627_v30 = vld [vmem:[#allocation22 + $0x780] ss:$8 sps:$4 sm:$0xff]  }
0x15d5   : > { %18215 = vmatprep.subr.bf16.mxu0 %v24491_v62  ;;  %v24629_v62 = vld [vmem:[#allocation22 + $0x784] ss:$8 sps:$4 sm:$0xff]  }
0x15d8   : > { %18216 = vmatpush1.bf16.msra.mxu0 %v24489_v7  ;;  %v24635_v7 = vld [vmem:[#allocation22 + $0x794] ss:$8 sps:$4 sm:$0xff]  }
0x15d9   : > { %18217 = vmatprep.subr.bf16.mxu0 %v24497_v51  ;;  %v24633_v51 = vld [vmem:[#allocation22 + $0x790] ss:$8 sps:$4 sm:$0xff]  }
0x15dc   : > { %18218 = vmatpush1.bf16.msra.mxu0 %v24495_v53  ;;  %v24641_v53 = vld [vmem:[#allocation22 + $0x7a4] ss:$8 sps:$4 sm:$0xff]  }
0x15dd   : > { %18219 = vmatprep.subr.bf16.mxu0 %v24503_v0  ;;  %v24639_v0 = vld [vmem:[#allocation22 + $0x7a0] ss:$8 sps:$4 sm:$0xff]  }
0x15e0   : > { %18220 = vmatpush1.bf16.msra.mxu0 %v24501_v19  ;;  %v24647_v19 = vld [vmem:[#allocation22 + $0x7b4] ss:$8 sps:$4 sm:$0xff]  }
0x15e1   : > { %18221 = vmatprep.subr.bf16.mxu0 %v24509_v25  ;;  %v24645_v25 = vld [vmem:[#allocation22 + $0x7b0] ss:$8 sps:$4 sm:$0xff]  }
0x15e4   : > { %18222 = vmatpush1.bf16.msra.mxu0 %v24507_v15  ;;  %v24653_v15 = vld [vmem:[#allocation22 + $0x7c4] ss:$8 sps:$4 sm:$0xff]  }
0x15e5   : > { %18223 = vmatprep.subr.bf16.mxu0 %v24515_v63 }
0x15e6   : > { %v28533_v14 = vpop.f32.mrb[252].mxu0 }
0x15e7   : > { %v28535_v29 = vpop.f32.mrb[253].mxu0 }
0x15e8   : > { %18224 = vmatpush1.bf16.msra.mxu0 %v24513_v26  ;;  %v17100_v31 = vpop.f32.mrb[254].mxu0 }
0x15e9   : > { %18225 = vmatprep.subr.bf16.mxu0 %v24521_v22  ;;  %v17101_v58 = vpop.f32.mrb[255].mxu0  ;;  %v24657_v31 = vld [vmem:[#allocation22 + $0x7d0] ss:$8 sps:$4 sm:$0xff]  }
0x15ea   : > { %v24663_v58 = vld [vmem:[#allocation22 + $0x7e0] ss:$8 sps:$4 sm:$0xff]  }
0x15ec   : > { %18226 = vmatpush1.bf16.msra.mxu0 %v24519_v24  ;;  %v24659_v24 = vld [vmem:[#allocation22 + $0x7d4] ss:$8 sps:$4 sm:$0xff]  }
0x15ed   : > { %18227 = vmatprep.subr.bf16.mxu0 %v24527_v59  ;;  %v24665_v59 = vld [vmem:[#allocation22 + $0x7e4] ss:$8 sps:$4 sm:$0xff]  }
0x15f0   : > { %18228 = vmatpush1.bf16.msra.mxu0 %v24525_v35  ;;  %v24671_v35 = vld [vmem:[#allocation22 + $0x7f4] ss:$8 sps:$4 sm:$0xff]  }
0x15f1   : > { %18229 = vmatprep.subr.bf16.mxu0 %v24533_v60  ;;  %v24669_v60 = vld [vmem:[#allocation22 + $0x7f0] ss:$8 sps:$4 sm:$0xff]  }
0x15f4   : > { %18230 = vmatpush1.bf16.msra.mxu0 %v24531_v5  ;;  %v28543_v38 = vpop.f32.mrb[104].mxu1  ;;  %v18494_v5 = vpack.c.bf16 %v28517_v32, %v28517_v32 }
0x15f5   : > { %18231 = vmatprep.subr.bf16.mxu0 %v24539_v36  ;;  %v18011_v61 = vpop.f32.mrb[105].mxu1 }
0x15f6   : > { %v18013_v39 = vpop.f32.mrb[106].mxu1 }
0x15f7   : > { %v18014_v17 = vpop.f32.mrb[107].mxu1 }
0x15f8   : > { %18232 = vmatpush1.bf16.msra.mxu0 %v24537_v21 }
0x15f9   : > { %18233 = vmatprep.subr.bf16.mxu0 %v24545_v8 }
0x15fc   : > { %18234 = vmatpush1.bf16.msra.mxu0 %v24543_v49 }
0x15fd   : > { %18235 = vmatprep.subr.bf16.mxu0 %v24551_v40 }
0x1600   : > { %18236 = vmatpush1.bf16.msra.mxu0 %v24549_v54 }
0x1601   : > { %18237 = vmatprep.subr.bf16.mxu0 %v24557_v34 }
0x1604   : > { %18238 = vmatpush1.bf16.msra.mxu0 %v24555_v12 }
0x1605   : > { %18239 = vmatprep.subr.bf16.mxu0 %v24563_v16 }
0x1608   : > { %18240 = vmatpush1.bf16.msra.mxu0 %v24561_v45 }
0x1609   : > { %18241 = vmatprep.subr.bf16.mxu0 %v24569_v18 }
0x160c   : > { %18242 = vmatpush1.bf16.msra.mxu0 %v24567_v50 }
0x160d   : > { %18243 = vmatprep.subr.bf16.mxu0 %v24575_v11 }
0x1610   : > { %18244 = vmatpush1.bf16.msra.mxu0 %v24573_v33 }
0x1611   : > { %18689 = vmatprep.subr.bf16.mxu0 %v24581_v44 }
0x1613   : > { %18246 = vmatmul.mubr.bf16.vlgmr.msra.gmra.mrb[12].mxu0 %v18018_v2 }
0x1614   : > { %18690 = vmatpush1.bf16.msra.mxu0 %v24579_v43  ;;  %18721 = vmatprep.mubr.bf16.mxu0 %v18495_v20 }
0x1615   : > { %18691 = vmatprep.subr.bf16.mxu0 %v24587_v6 }
0x1618   : > { %18692 = vmatpush1.bf16.msra.mxu0 %v24585_v10 }
0x1619   : > { %18693 = vmatprep.subr.bf16.mxu0 %v24593_v57 }
0x161c   : > { %18694 = vmatpush1.bf16.msra.mxu0 %v24591_v55 }
0x161d   : > { %18695 = vmatprep.subr.bf16.mxu0 %v24599_v3 }
0x1620   : > { %18696 = vmatpush1.bf16.msra.mxu0 %v24597_v13 }
0x1621   : > { %18697 = vmatprep.subr.bf16.mxu0 %v24605_v56 }
0x1624   : > { %18698 = vmatpush1.bf16.msra.mxu0 %v24603_v1 }
0x1625   : > { %18699 = vmatprep.subr.bf16.mxu0 %v24611_v48 }
0x1626   : > { %v17297_v4 = vpop.f32.mrb[0].mxu0 }
0x1627   : > { %v17298_v47 = vadd.f32 %v17297_v4, %v28533_v14  ;;  %v17299_v9 = vpop.f32.mrb[1].mxu0  ;;  %v24651_v14 = vld [vmem:[#allocation22 + $0x7c0] ss:$8 sps:$4 sm:$0xff]  }
0x1628   : > { %18700 = vmatpush1.bf16.msra.mxu0 %v24609_v42  ;;  %v17300_v28 = vadd.f32 %v17299_v9, %v28535_v29  ;;  %v17301_v23 = vpop.f32.mrb[2].mxu0 }
0x1629   : > { %18701 = vmatprep.subr.bf16.mxu0 %v24617_v37  ;;  %v17302_v46 = vpop.f32.mrb[3].mxu0 }
0x162c   : > { %18702 = vmatpush1.bf16.msra.mxu0 %v24615_v52  ;;  %v18974_v52 = vpop.permute.xlu0 %18973 }
0x162d   : > { %18703 = vmatprep.subr.bf16.mxu0 %v24623_v41 }
0x1630   : > { %18704 = vmatpush1.bf16.msra.mxu0 %v24621_v27 }
0x1631   : > { %18705 = vmatprep.subr.bf16.mxu0 %v24629_v62 }
0x1634   : > { %18706 = vmatpush1.bf16.msra.mxu0 %v24627_v30  ;;  %v18485_v63 = vpop.f32.mrb[108].mxu1 }
0x1635   : > { %18707 = vmatprep.subr.bf16.mxu0 %v24635_v7  ;;  %v18487_v26 = vpop.f32.mrb[109].mxu1 }
0x1636   : > { %v18489_v22 = vpop.f32.mrb[110].mxu1 }
0x1637   : > { %v18490_v29 = vpop.f32.mrb[111].mxu1 }
0x1638   : > { %18708 = vmatpush1.bf16.msra.mxu0 %v24633_v51 }
0x1639   : > { %18709 = vmatprep.subr.bf16.mxu0 %v24641_v53 }
0x163c   : > { %18710 = vmatpush1.bf16.msra.mxu0 %v24639_v0 }
0x163d   : > { %18711 = vmatprep.subr.bf16.mxu0 %v24647_v19 }
0x1640   : > { %18712 = vmatpush1.bf16.msra.mxu0 %v24645_v25 }
0x1641   : > { %18713 = vmatprep.subr.bf16.mxu0 %v24653_v15 }
0x1644   : > { %18714 = vmatpush1.bf16.msra.mxu0 %v24651_v14 }
0x1645   : > { %18715 = vmatprep.subr.bf16.mxu0 %v24659_v24 }
0x1648   : > { %18716 = vmatpush1.bf16.msra.mxu0 %v24657_v31 }
0x1649   : > { %18717 = vmatprep.subr.bf16.mxu0 %v24665_v59 }
0x164c   : > { %18718 = vmatpush1.bf16.msra.mxu0 %v24663_v58 }
0x164d   : > { %18719 = vmatprep.subr.bf16.mxu0 %v24671_v35 }
0x1650   : > { %18720 = vmatpush1.bf16.msra.mxu0 %v24669_v60 }
0x1653   : > { %18722 = vmatmul.mubr.bf16.vlgmr.msra.gmra.mrb[16].mxu0 %v18494_v5 }
0x1666   : > { %v17533_v36 = vpop.f32.mrb[4].mxu0 }
0x1667   : > { %v17540_v21 = vadd.f32 %v17533_v36, %v17298_v47  ;;  %v17535_v8 = vpop.f32.mrb[5].mxu0 }
0x1668   : > { %v17541_v49 = vadd.f32 %v17535_v8, %v17300_v28  ;;  %v17537_v40 = vpop.f32.mrb[6].mxu0 }
0x1669   : > { %v17538_v54 = vpop.f32.mrb[7].mxu0 }
0x1674   : > { %v18961_v34 = vpop.f32.mrb[112].mxu1 }
0x1675   : > { %v18963_v12 = vpop.f32.mrb[113].mxu1 }
0x1676   : > { %v18965_v16 = vpop.f32.mrb[114].mxu1 }
0x1677   : > { %v18966_v45 = vpop.f32.mrb[115].mxu1 }
0x16a6   : > { %v17771_v18 = vpop.f32.mrb[8].mxu0 }
0x16a7   : > { %v17778_v50 = vadd.f32 %v17771_v18, %v17540_v21  ;;  %v17773_v11 = vpop.f32.mrb[9].mxu0 }
0x16a8   : > { %v17779_v33 = vadd.f32 %v17773_v11, %v17541_v49  ;;  %v17775_v44 = vpop.f32.mrb[10].mxu0 }
0x16a9   : > { %v18016_v43 = vadd.f32 %v28543_v38, %v17778_v50  ;;  %v17776_v2 = vpop.f32.mrb[11].mxu0 }
0x16aa   : > { %v18017_v32 = vadd.f32 %v18011_v61, %v17779_v33 }
0x16e6   : > { %v18247_v6 = vpop.f32.mrb[12].mxu0 }
0x16e7   : > { %v18254_v20 = vadd.f32 %v18247_v6, %v18016_v43  ;;  %v18249_v10 = vpop.f32.mrb[13].mxu0 }
0x16e8   : > { %v18255_v57 = vadd.f32 %v18249_v10, %v18017_v32  ;;  %v18251_v55 = vpop.f32.mrb[14].mxu0 }
0x16e9   : > { %v18492_v3 = vadd.f32 %v18485_v63, %v18254_v20  ;;  %v18252_v13 = vpop.f32.mrb[15].mxu0 }
0x16ea   : > { %v18493_v56 = vadd.f32 %v18487_v26, %v18255_v57 }
0x1726   : > { %v18723_v1 = vpop.f32.mrb[16].mxu0 }
0x1727   : > { %v18730_v48 = vadd.f32 %v18723_v1, %v18492_v3  ;;  %v18725_v42 = vpop.f32.mrb[17].mxu0 }
0x1728   : > { %v18731_v37 = vadd.f32 %v18725_v42, %v18493_v56  ;;  %v18727_v4 = vpop.f32.mrb[18].mxu0 }
0x1729   : > { %v18968_v47 = vadd.f32 %v18961_v34, %v18730_v48  ;;  %v18728_v9 = vpop.f32.mrb[19].mxu0 }
0x172a   : > { %v18969_v28 = vadd.f32 %v18963_v12, %v18731_v37 }
0x172b   : > { %v18976_v23 = vadd.f32 %v18974_v52, %v18968_v47 }
0x172c   : > { %v18977_v38 = vadd.f32 %v18974_v52, %v18969_v28 }
0x172d   : > { %v18980_v41 = vmul.f32 0.044715, %v18976_v23  ;;  %v18978_v19 = vmul.f32 0.5, %v18976_v23 }
0x172e   : > { %v18981_v46 = vmul.f32 0.044715, %v18977_v38  ;;  %v18979_v15 = vmul.f32 0.5, %v18977_v38 }
0x172f   : > { %v18982_v61 = vmul.f32 %v18980_v41, %v18976_v23 }
0x1730   : > { %v18983_v39 = vmul.f32 %v18981_v46, %v18977_v38 }
0x1731   : > { %v18984_v17 = vmul.f32 %v18982_v61, %v18976_v23 }
0x1732   : > { %v18985_v27 = vmul.f32 %v18983_v39, %v18977_v38 }
0x1733   : > { %v18986_v62 = vadd.f32 %v18984_v17, %v18976_v23 }
0x1734   : > { %v18987_v30 = vadd.f32 %v18985_v27, %v18977_v38 }
0x1735   : > { %v18988_v7 = vmul.f32 0.7978846, %v18986_v62 }
0x1736   : > { %v18989_v51 = vmul.f32 0.7978846, %v18987_v30 }
0x1737   : > { %24931 = vtanh.f32 %v18988_v7 }
0x1738   : > { %24933 = vtanh.f32 %v18989_v51 }
0x1741   : > { %v24932_v53 = vpop.eup %24931 }
0x1742   : > { %v24934_v0 = vpop.eup %24933  ;;  %v18992_v25 = vadd.f32 1.0, %v24932_v53 }
0x1743   : > { %v18993_v63 = vadd.f32 1.0, %v24934_v0 }
0x1744   : > { %v18994_v26 = vmul.f32 %v18992_v25, %v18978_v19 }
0x1745   : > { %v18995_v22 = vmul.f32 %v18993_v63, %v18979_v15 }
0x1746   : > { %18996 = vst [vmem:[%s890_s19] sm:$0xff] %v18994_v26 }
0x1747   : > { %18997 = vst [vmem:[%s890_s19 + $0x8] sm:$0xff] %v18995_v22 }
0x1748   : > { %25312 = shalt.err (!%p25309_p11)
}
0x1749   : > { %s25313_s4 = scalar_lea.hbm %s28553_s3, 256  ;;  %s25317_s24 = scalar_lea.hbm %s28707_s7, 512 }
0x174a   : > { %p25314_p13 = scmp.ne.s32.totalorder %s28553_s3, %s25313_s4  ;;  %p25318_p9 = scmp.lt.u32.totalorder %s28553_s3, %s28707_s7 }
0x174b   : > { %p25319_p5 = scmp.lt.u32.totalorder %s25317_s24, %s25313_s4  ;;  %p25321_p0 = scmp.lt.u32.totalorder %s25313_s4, %s28553_s3 }
0x174c   : > { %p25315_p1 = pnand %p25314_p13, %p28708_p2 }
0x174d   : > { %p25320_p10 = por %p25319_p5, %p25318_p9 }
0x174e   : > { %p25316_p6 = pneg %p25315_p1 }
0x174f   : > { %p25322_p3 = por %p25321_p0, %p25320_p10 }
0x1751   : > { %p25323_p4 = pnand %p25322_p3, %p25316_p6 }
0x1753   : > { %25326 = shalt.err (!%p25323_p4)
}
0x1754   : > { %23573 = dma.vmem_to_hbm [thread:$0]  (%p28708_p2), %s28555_s16, 256, %s28553_s3, %s18999_s27  }
0x1755 PF: > { %s28709_s0 = sld [smem:[#allocation35_spill]]  ;;  %s28710_s5 = sld [smem:[#allocation32_spill]] }
0x1756   : > { %s28711_s30 = sld [smem:[#allocation39_spill]] }
0x175b   : > { %p23645_p12 = scmp.ge.s32.totalorder %s28709_s0, 2  ;;  %s19025_s14 = sand.u32 1, %s28710_s5  }
0x175c   : > { %p28712_p7 = scmp.ne.s32.totalorder %s28711_s30, 0  ;;  %s19026_s19 = scalar_lea.sflag [#allocation4], %s19025_s14 }
0x175e   : > { %p23616_p8 = pnand %p23645_p12, %p28712_p7 }
0x1760   : > { %25372 = dma.done.wait (!%p23616_p8), %s19026_s19, 256  }
0x1761   : > { %25374 = vsyncadd (!%p23616_p8), %s19026_s19, 4294967040  ;;  %s28713_s25 = sld [smem:[#allocation36_spill]]  ;;  %s28714_s4 = sld [smem:[#allocation33_spill]] }
0x1762   : > { %s28715_s30 = sld [smem:[#allocation34_spill]]  ;;  %s28716_s24 = sld [smem:[#allocation37_spill]] }
0x1767   : > { %p40_p11 = scmp.ge.s32.totalorder %s28713_s25, 4  }
0x1769   :  { %42 = sbr.rel (!%p40_p11) target bundleno = 26 (0x1a), region = 248 }
0x1770   :  { %19031 = vsyncpa [#allocation3], 1 }
0x1771   :  { %19033 = vsyncpa [#allocation3 + $0x1], 1 }
0x1772   :  { %19034 = vsyncpa [#allocation6], 1 }
0x1773   :  { %19035 = vsyncpa [#allocation9], 1 }
0x1774   :  { %19036 = vsyncpa [#allocation12], 1 }
0x1775   :  { %19037 = vsyncpa [#allocation15], 1 }
0x1776   :  { %19038 = vsyncpa [#allocation18], 1 }
0x1777   :  { %19039 = vsyncpa [#allocation21], 1 }
0x1778   :  { %19040 = vsyncpa [#allocation4], 1 }
0x1779   :  { %19042 = vsyncpa [#allocation4 + $0x1], 1 }

</bundles_post_ra>
